<compile_context>
chip_gen: v5e
topology: v5e:2x2
jax: 0.10.0
libtpu: 0.0.40
codegen_flags: <defaults>
</compile_context>

<pallas_src>
import math

import jax
import jax.numpy as jnp
from jax.experimental import pallas as pl
from jax.experimental.pallas import tpu as pltpu

# ----------------------------- config (scaled) ------------------------------
IN_SIZE = 16                 # input image H=W (real pSp: 256)
OUT_SIZE = 16                # generator output size (real: 256)
STYLE_DIM = 64               # latent width (real: 512)
N_STYLES = int(math.log(OUT_SIZE, 2)) * 2 - 2   # 6 (real: 14)
RGB = 3
ENC_CH = (16, 32, 32, 32)    # conv_in, c1, c2, c3 channel widths
DEC_CH = {4: 32, 8: 32, 16: 16}

_SQRT2 = math.sqrt(2.0)


# ----------------------------- fused Pallas GEMM ----------------------------
def _make_fused_kernel(has_colbias, has_scale, has_rowadd, has_addmat, act):
    """GEMM + fused epilogue.  o = act((A@B) * scale + rowadd + colbias + addmat)."""

    def kernel(*refs):
        idx = 0
        a_ref = refs[idx]; idx += 1
        b_ref = refs[idx]; idx += 1
        colbias_ref = scale_ref = rowadd_ref = addmat_ref = None
        if has_colbias:
            colbias_ref = refs[idx]; idx += 1
        if has_scale:
            scale_ref = refs[idx]; idx += 1
        if has_rowadd:
            rowadd_ref = refs[idx]; idx += 1
        if has_addmat:
            addmat_ref = refs[idx]; idx += 1
        o_ref = refs[idx]

        acc = jnp.dot(a_ref[...], b_ref[...],
                      preferred_element_type=jnp.float32)   # MXU, f32 accumulate
        if has_scale:
            acc = acc * scale_ref[...]                       # demodulation
        if has_rowadd:
            acc = acc + rowadd_ref[...]                      # per-row noise
        if has_colbias:
            acc = acc + colbias_ref[...]                     # per-channel bias
        if has_addmat:
            acc = acc + addmat_ref[...]                      # toRGB skip
        if act == "lrelu":
            acc = jnp.where(acc >= 0.0, acc, 0.2 * acc)
        elif act == "lrelu_sqrt2":                           # FusedLeakyReLU
            acc = jnp.where(acc >= 0.0, acc, 0.2 * acc) * _SQRT2
        o_ref[...] = acc.astype(o_ref.dtype)

    return kernel


def fused_gemm(a, b, colbias=None, scale=None, rowadd=None, addmat=None,
               act="none", out_dtype=jnp.bfloat16):
    """(M, K) @ (K, N) with fused epilogue.  a, b are cast to bf16 (f32 acc)."""
    M, K = a.shape
    K2, N = b.shape
    assert K == K2

    # Tile M into a "parallel" grid axis when it is large (v7x: 2 TensorCores).
    tm = 256 if (M > 256 and M % 256 == 0) else M
    grid = (M // tm,)

    args = [a.astype(jnp.bfloat16), b.astype(jnp.bfloat16)]
    in_specs = [pl.BlockSpec((tm, K), lambda i: (i, 0)),
                pl.BlockSpec((K, N), lambda i: (0, 0))]
    if colbias is not None:
        args.append(colbias.reshape(1, N).astype(jnp.float32))
        in_specs.append(pl.BlockSpec((1, N), lambda i: (0, 0)))
    if scale is not None:
        args.append(scale.astype(jnp.float32))
        in_specs.append(pl.BlockSpec((tm, N), lambda i: (i, 0)))
    if rowadd is not None:
        args.append(rowadd.reshape(M, 1).astype(jnp.float32))
        in_specs.append(pl.BlockSpec((tm, 1), lambda i: (i, 0)))
    if addmat is not None:
        args.append(addmat.astype(jnp.float32))
        in_specs.append(pl.BlockSpec((tm, N), lambda i: (i, 0)))

    kernel = _make_fused_kernel(colbias is not None, scale is not None,
                                rowadd is not None, addmat is not None, act)
    return pl.pallas_call(
        kernel,
        out_shape=jax.ShapeDtypeStruct((M, N), out_dtype),
        grid_spec=pltpu.PrefetchScalarGridSpec(
            num_scalar_prefetch=0,
            grid=grid,
            in_specs=in_specs,
            out_specs=pl.BlockSpec((tm, N), lambda i: (i, 0))),
        compiler_params=pltpu.CompilerParams(
            dimension_semantics=("parallel",),
            vmem_limit_bytes=32 * 1024 * 1024),
    )(*args)


# ----------------------------- NHWC conv plumbing ---------------------------
def _im2col_nhwc(x, k, stride, pad):
    """x: (B, H, W, C) -> patches (B*Ho*Wo, k*k*C); no transposes needed."""
    B, H, W, C = x.shape
    xp = jnp.pad(x, ((0, 0), (pad, pad), (pad, pad), (0, 0)))
    Ho = (H + 2 * pad - k) // stride + 1
    Wo = (W + 2 * pad - k) // stride + 1
    cols = []
    for di in range(k):
        for dj in range(k):
            cols.append(xp[:, di:di + stride * Ho:stride,
                           dj:dj + stride * Wo:stride, :])
    patches = jnp.concatenate(cols, axis=-1)      # (B, Ho, Wo, k*k*C)
    return patches.reshape(B * Ho * Wo, k * k * C), Ho, Wo


def upsample2x_nhwc(x):
    # TODO(synk): StyleGAN2 uses upfirdn2d (blur) upsampling; nearest x2 here.
    return jnp.repeat(jnp.repeat(x, 2, axis=1), 2, axis=2)


def adaptive_avg_pool_nhwc(x, out_hw):
    B, H, W, C = x.shape
    oh, ow = out_hw
    if (H, W) == (oh, ow):
        return x
    assert H % oh == 0 and W % ow == 0
    return x.reshape(B, oh, H // oh, ow, W // ow, C).mean(axis=(2, 4))


# ----------------------------- StyleGAN2 building blocks --------------------
def styled_conv(x, style, noise, p, upsample=False):
    """x: (B,H,W,Cin) bf16; style: (B,Cin) f32; noise: (B,1,Ho,Wo)."""
    B = x.shape[0]
    if upsample:
        x = upsample2x_nhwc(x)
    x_mod = (x.astype(jnp.float32) * style[:, None, None, :]).astype(jnp.bfloat16)
    patches, Ho, Wo = _im2col_nhwc(x_mod, 3, 1, 1)
    # demodulation: rsqrt(sum_c style^2 * sum_{k,k}(scale*W)^2 + eps), f32
    demod = jax.lax.rsqrt(
        jnp.einsum('bc,oc->bo', style * style, p['sw2']) + 1e-8)     # (B, Cout)
    scale = jnp.repeat(demod, Ho * Wo, axis=0)                        # (M, Cout)
    rowadd = noise.reshape(B * Ho * Wo, 1).astype(jnp.float32) * p['noise_weight']
    out = fused_gemm(patches, p['w_mat'], colbias=p['act_bias'],
                     scale=scale, rowadd=rowadd, act="lrelu_sqrt2")
    return out.reshape(B, Ho, Wo, -1)


def to_rgb(x, style, p, skip=None):
    """1x1 modulated conv (no demod) + bias + optional upsampled skip, all fused."""
    B, H, W, Cin = x.shape
    x_mod = (x.astype(jnp.float32) * style[:, None, None, :]).astype(jnp.bfloat16)
    patches = x_mod.reshape(B * H * W, Cin)
    addmat = None
    if skip is not None:
        addmat = upsample2x_nhwc(skip).reshape(B * H * W, RGB)
    out = fused_gemm(patches, p['w_mat'], colbias=p['bias'], addmat=addmat,
                     act="none", out_dtype=jnp.float32)
    return out.reshape(B, H, W, RGB)


# ----------------------------- encoder / decoder forward --------------------
def _enc_conv(x, w_mat, bias, stride):
    patches, Ho, Wo = _im2col_nhwc(x, 3, stride, 1)
    out = fused_gemm(patches, w_mat, colbias=bias, act="lrelu")
    return out.reshape(x.shape[0], Ho, Wo, -1)


def encoder_forward(params, x):
    # TODO(synk): real GradualStyleEncoder uses a 50-layer IR-SE backbone;
    # replaced by a small strided-conv pyramid with the same 3-level structure.
    e = params['encoder']
    x = jnp.transpose(x, (0, 2, 3, 1)).astype(jnp.bfloat16)       # NCHW -> NHWC
    h = _enc_conv(x, e['conv_in_w'], e['conv_in_b'], 1)
    c1 = _enc_conv(h, e['conv1_w'], e['conv1_b'], 2)
    c2 = _enc_conv(c1, e['conv2_w'], e['conv2_b'], 2)
    c3 = _enc_conv(c2, e['conv3_w'], e['conv3_b'], 2)
    # all three style-head groups in ONE block-diagonal GEMM
    pooled = jnp.concatenate([jnp.mean(c3.astype(jnp.float32), axis=(1, 2)),
                              jnp.mean(c2.astype(jnp.float32), axis=(1, 2)),
                              jnp.mean(c1.astype(jnp.float32), axis=(1, 2))],
                             axis=-1)                               # (B, 96)
    codes = fused_gemm(pooled, params['encoder']['heads_w'],
                       colbias=params['encoder']['heads_b'],
                       act="none", out_dtype=jnp.float32)
    return codes.reshape(x.shape[0], N_STYLES, STYLE_DIM)


def _decoder_affine_meta():
    """Static (python) ordering of the decoder's modulation affines."""
    cins = [DEC_CH[4], DEC_CH[4]]        # conv1, to_rgb1
    style_idx = [0, 1]
    in_ch = DEC_CH[4]
    i = 1
    log_size = int(math.log2(OUT_SIZE))
    for res_log in range(3, log_size + 1):
        out_ch = DEC_CH[2 ** res_log]
        cins += [in_ch, out_ch, out_ch]  # conv_up, conv, to_rgb
        style_idx += [i, i + 1, i + 2]
        i += 2
        in_ch = out_ch
    offs, off = [], 0
    for c in cins:
        offs.append(off)
        off += c
    return tuple(style_idx), tuple(cins), tuple(offs)


def decoder_forward(params, latent, noises):
    d = params['decoder']
    B = latent.shape[0]
    style_idx, cins, offs = _decoder_affine_meta()
    L = len(style_idx)
    S = STYLE_DIM

    # --- all modulation affine linears in ONE block-diagonal GEMM -----------
    sel = latent[:, jnp.array(style_idx), :]          # (B, L, S)
    sel = jnp.transpose(sel, (1, 0, 2))               # (L, B, S)
    eye = jnp.eye(L, dtype=sel.dtype)
    a_big = (sel[:, :, None, :] * eye[:, None, :, None]).reshape(L * B, L * S)
    styles_all = fused_gemm(a_big, d['affine_w_big'], colbias=d['affine_b_big'],
                            act="none", out_dtype=jnp.float32)       # (L*B, sumC)

    def get_style(j):
        return styles_all[j * B:(j + 1) * B, offs[j]:offs[j] + cins[j]]

    # --- synthesis -----------------------------------------------------------
    out = jnp.broadcast_to(d['const'], (B,) + d['const'].shape[1:])  # (B,4,4,C)
    out = styled_conv(out, get_style(0), noises[0], d['conv1'])
    skip = to_rgb(out, get_style(1), d['to_rgb1'])
    j, n_idx = 2, 1
    for layer in d['layers']:
        out = styled_conv(out, get_style(j), noises[n_idx],
                          layer['conv_up'], upsample=True)
        out = styled_conv(out, get_style(j + 1), noises[n_idx + 1], layer['conv'])
        skip = to_rgb(out, get_style(j + 2), layer['to_rgb'], skip)
        j += 3
        n_idx += 2
    return skip, latent


def psp_forward(params, x, noises, resize=True, latent_mask=None,
                input_code=False, inject_latent=None, return_latents=False,
                alpha=None):
    if input_code:
        codes = x
    else:
        codes = encoder_forward(params, x)
    if latent_mask is not None:
        for i in latent_mask:
            if inject_latent is not None:
                if alpha is not None:
                    codes = codes.at[:, i].set(
                        alpha * inject_latent[:, i] + (1 - alpha) * codes[:, i])
                else:
                    codes = codes.at[:, i].set(inject_latent[:, i])
            else:
                codes = codes.at[:, i].set(0.0)
    images, result_latent = decoder_forward(params, codes, noises)
    if resize:
        images = adaptive_avg_pool_nhwc(images, (OUT_SIZE, OUT_SIZE))
    images = jnp.transpose(images, (0, 3, 1, 2))      # back to NCHW convention
    if return_latents:
        return images, result_latent
    return images


# ----------------------------- parameter init (PyTorch layout) --------------
def _normal(key, shape, std=0.1):
    return std * jax.random.normal(key, shape, dtype=jnp.float32)


def init_params(key):
    keys = iter(jax.random.split(key, 64))
    nk = lambda: next(keys)

    c0, c1, c2, c3 = ENC_CH
    enc = {
        'conv_in_w': _normal(nk(), (c0, RGB, 3, 3)), 'conv_in_b': jnp.zeros((c0,)),
        'conv1_w': _normal(nk(), (c1, c0, 3, 3)),    'conv1_b': jnp.zeros((c1,)),
        'conv2_w': _normal(nk(), (c2, c1, 3, 3)),    'conv2_b': jnp.zeros((c2,)),
        'conv3_w': _normal(nk(), (c3, c2, 3, 3)),    'conv3_b': jnp.zeros((c3,)),
    }
    n_group = N_STYLES // 3
    for name, ck in (('coarse', c3), ('middle', c2), ('fine', c1)):
        enc[name + '_w'] = _normal(nk(), (ck, n_group * STYLE_DIM))
        enc[name + '_b'] = jnp.zeros((n_group * STYLE_DIM,))

    def mod_conv_params(cin, cout, k):
        return {'affine_w': _normal(nk(), (STYLE_DIM, cin)),
                'affine_b': jnp.ones((cin,)),
                'weight': _normal(nk(), (cout, cin, k, k), std=1.0)}

    def styled_conv_params(cin, cout):
        p = mod_conv_params(cin, cout, 3)
        p['noise_weight'] = jnp.zeros(())
        p['act_bias'] = jnp.zeros((cout,))
        return p

    def to_rgb_params(cin):
        p = mod_conv_params(cin, RGB, 1)
        p['bias'] = jnp.zeros((RGB,))
        return p

    ch4 = DEC_CH[4]
    dec = {'const': _normal(nk(), (1, ch4, 4, 4), std=1.0),
           'conv1': styled_conv_params(ch4, ch4),
           'to_rgb1': to_rgb_params(ch4)}
    layers = []
    in_ch = ch4
    log_size = int(math.log(OUT_SIZE, 2))
    for res_log in range(3, log_size + 1):
        out_ch = DEC_CH[2 ** res_log]
        layers.append({'conv_up': styled_conv_params(in_ch, out_ch),
                       'conv': styled_conv_params(out_ch, out_ch),
                       'to_rgb': to_rgb_params(out_ch)})
        in_ch = out_ch
    dec['layers'] = layers
    return {'encoder': enc, 'decoder': dec}


# ------------------- one-time prep: GEMM-ready (bf16) parameters ------------
def prepare_params(params):
    enc, dec = params['encoder'], params['decoder']

    def conv_w_mat(w, scale=1.0):
        Cout, Cin, kh, kw = w.shape
        # (Cout,Cin,kh,kw) -> (kh*kw*Cin, Cout), matching NHWC im2col ordering.
        return (scale * w).transpose(2, 3, 1, 0).reshape(kh * kw * Cin, Cout) \
                          .astype(jnp.bfloat16)

    fe = {'conv_in_w': conv_w_mat(enc['conv_in_w']), 'conv_in_b': enc['conv_in_b'],
          'conv1_w': conv_w_mat(enc['conv1_w']),     'conv1_b': enc['conv1_b'],
          'conv2_w': conv_w_mat(enc['conv2_w']),     'conv2_b': enc['conv2_b'],
          'conv3_w': conv_w_mat(enc['conv3_w']),     'conv3_b': enc['conv3_b']}

    # block-diagonal style heads: rows [c3|c2|c1] pooled, cols [coarse|middle|fine]
    head_in = (ENC_CH[3], ENC_CH[2], ENC_CH[1])
    head_names = ('coarse', 'middle', 'fine')
    n_group = N_STYLES // 3
    W_big = jnp.zeros((sum(head_in), 3 * n_group * STYLE_DIM), jnp.float32)
    b_big, ro, co = [], 0, 0
    for name, ck in zip(head_names, head_in):
        w = enc[name + '_w']
        W_big = W_big.at[ro:ro + ck, co:co + w.shape[1]].set(w)
        b_big.append(enc[name + '_b'])
        ro += ck
        co += w.shape[1]
    fe['heads_w'] = W_big.astype(jnp.bfloat16)
    fe['heads_b'] = jnp.concatenate(b_big)

    def mod_prep(p, demod):
        w = p['weight']
        Cout, Cin, k, _ = w.shape
        scale = 1.0 / math.sqrt(Cin * k * k)          # equalized-lr scale
        d = {'w_mat': conv_w_mat(w, scale)}
        if demod:
            sw = scale * w
            d['sw2'] = jnp.sum(sw * sw, axis=(2, 3))  # (Cout, Cin) f32
        return d

    def styled_prep(p):
        d = mod_prep(p, True)
        d['noise_weight'] = p['noise_weight']
        d['act_bias'] = p['act_bias']
        return d

    def rgb_prep(p):
        d = mod_prep(p, False)
        d['bias'] = p['bias']
        return d

    # ordered modulation affines -> one block-diagonal GEMM matrix
    mods = [dec['conv1'], dec['to_rgb1']]
    for layer in dec['layers']:
        mods += [layer['conv_up'], layer['conv'], layer['to_rgb']]
    _, cins, offs = _decoder_affine_meta()
    L, sumC = len(mods), sum(cins)
    Wb = jnp.zeros((L * STYLE_DIM, sumC), jnp.float32)
    bb = jnp.zeros((sumC,), jnp.float32)
    for j, m in enumerate(mods):
        off, cin = offs[j], cins[j]
        Wb = Wb.at[j * STYLE_DIM:(j + 1) * STYLE_DIM, off:off + cin].set(m['affine_w'])
        bb = bb.at[off:off + cin].set(m['affine_b'])

    fd = {'const': dec['const'].transpose(0, 2, 3, 1).astype(jnp.bfloat16),
          'conv1': styled_prep(dec['conv1']),
          'to_rgb1': rgb_prep(dec['to_rgb1']),
          'layers': [{'conv_up': styled_prep(l['conv_up']),
                      'conv': styled_prep(l['conv']),
                      'to_rgb': rgb_prep(l['to_rgb'])} for l in dec['layers']],
          'affine_w_big': Wb.astype(jnp.bfloat16),
          'affine_b_big': bb}
    return {'encoder': fe, 'decoder': fd}


def make_noises(key, batch):
    # randomize_noise=True: per-layer Gaussian noise (deterministic key here).
    log_size = int(math.log(OUT_SIZE, 2))
    n_layers = 1 + 2 * (log_size - 2)
    keys = jax.random.split(key, n_layers)
    noises = [jax.random.normal(keys[0], (batch, 1, 4, 4), dtype=jnp.float32)]
    idx = 1
    for res_log in range(3, log_size + 1):
        s = 2 ** res_log
        for _ in range(2):
            noises.append(jax.random.normal(keys[idx], (batch, 1, s, s),
                                            dtype=jnp.float32))
            idx += 1
    return noises


# ----------------------------- main ------------------------------------------
if __name__ == "__main__":
    key = jax.random.PRNGKey(0)
    pkey, xkey, nkey = jax.random.split(key, 3)
    params = init_params(pkey)
    fast_params = prepare_params(params)       # one-time weight reshape/cast

    batch = 2
    x = jax.random.normal(xkey, (batch, RGB, IN_SIZE, IN_SIZE), dtype=jnp.float32)
    noises = make_noises(nkey, batch)

    fwd = jax.jit(lambda p, xx, nn: psp_forward(p, xx, nn, resize=True))
    images = jax.block_until_ready(fwd(fast_params, x, noises))

    assert images.shape == (batch, RGB, OUT_SIZE, OUT_SIZE), images.shape
    assert bool(jnp.all(jnp.isfinite(images)))
    print("KERNEL_OK")
</pallas_src>

<mosaic_0001>
module attributes {stable_mosaic.version = 11 : i64} {
  func.func @kernel(%arg0: i32, %arg1: memref<256x27xbf16, #tpu.memory_space<vmem>>, %arg2: memref<27x16xbf16, #tpu.memory_space<vmem>>, %arg3: memref<1x16xf32, #tpu.memory_space<vmem>>, %arg4: memref<256x16xbf16, #tpu.memory_space<vmem>>) attributes {dimension_semantics = [#tpu.dimension_semantics<parallel>], iteration_bounds = array<i64: 2>, scalar_prefetch = 0 : i64, scratch_operands = 0 : i64, tpu.core_type = #tpu.core_type<tc>, window_params = [{transform_indices = @transform_0, window_bounds = array<i64: 256, 27>}, {pipeline_mode = #tpu.pipeline_mode<synchronous>, transform_indices = @transform_1, window_bounds = array<i64: 27, 16>}, {pipeline_mode = #tpu.pipeline_mode<synchronous>, transform_indices = @transform_2, window_bounds = array<i64: 1, 16>}, {transform_indices = @transform_3, window_bounds = array<i64: 256, 16>}]} {
    %c0 = arith.constant 0 : index
    %c0_0 = arith.constant 0 : index
    %0 = vector.load %arg1[%c0, %c0_0] : memref<256x27xbf16, #tpu.memory_space<vmem>>, vector<256x27xbf16>
    %c0_1 = arith.constant 0 : index
    %c0_2 = arith.constant 0 : index
    %1 = vector.load %arg2[%c0_1, %c0_2] : memref<27x16xbf16, #tpu.memory_space<vmem>>, vector<27x16xbf16>
    %cst = arith.constant dense<0.000000e+00> : vector<256x16xf32>
    %2 = tpu.matmul %0, %1, %cst {dimension_numbers = #tpu.dot_dimension_numbers<[1], [0], [0], [1], [0, 0, 1, 1], [], []>} : vector<256x27xbf16>, vector<27x16xbf16>, vector<256x16xf32> -> vector<256x16xf32>
    %c0_3 = arith.constant 0 : index
    %c0_4 = arith.constant 0 : index
    %3 = vector.load %arg3[%c0_3, %c0_4] : memref<1x16xf32, #tpu.memory_space<vmem>>, vector<1x16xf32>
    %4 = vector.broadcast %3 : vector<1x16xf32> to vector<256x16xf32>
    %5 = arith.addf %2, %4 : vector<256x16xf32>
    %cst_5 = arith.constant 0.000000e+00 : f32
    %6 = vector.broadcast %cst_5 : f32 to vector<256x16xf32>
    %7 = arith.cmpf oge, %5, %6 : vector<256x16xf32>
    %cst_6 = arith.constant 2.000000e-01 : f32
    %8 = vector.broadcast %cst_6 : f32 to vector<256x16xf32>
    %9 = arith.mulf %8, %5 : vector<256x16xf32>
    %10 = arith.select %7, %5, %9 : vector<256x16xi1>, vector<256x16xf32>
    %11 = arith.truncf %10 : vector<256x16xf32> to vector<256x16xbf16>
    %c0_7 = arith.constant 0 : index
    %c0_8 = arith.constant 0 : index
    %12 = vector.load %arg4[%c0_7, %c0_8] : memref<256x16xbf16, #tpu.memory_space<vmem>>, vector<256x16xbf16>
    tpu.vector_store %arg4[%c0_7, %c0_8], %11 {strides = array<i32>} : memref<256x16xbf16, #tpu.memory_space<vmem>>, vector<256x16xbf16>,
    return
  }
  func.func @transform_0(%arg0: i32) -> (i32, i32) {
    %c0_i32 = arith.constant 0 : i32
    %c0_i32_0 = arith.constant 0 : i32
    return %arg0, %c0_i32 : i32, i32
  }
  func.func @transform_1(%arg0: i32) -> (i32, i32) {
    %c0_i32 = arith.constant 0 : i32
    %c0_i32_0 = arith.constant 0 : i32
    %c0_i32_1 = arith.constant 0 : i32
    return %c0_i32, %c0_i32_0 : i32, i32
  }
  func.func @transform_2(%arg0: i32) -> (i32, i32) {
    %c0_i32 = arith.constant 0 : i32
    %c0_i32_0 = arith.constant 0 : i32
    %c0_i32_1 = arith.constant 0 : i32
    return %c0_i32, %c0_i32_0 : i32, i32
  }
  func.func @transform_3(%arg0: i32) -> (i32, i32) {
    %c0_i32 = arith.constant 0 : i32
    %c0_i32_0 = arith.constant 0 : i32
    return %arg0, %c0_i32 : i32, i32
  }
}

module attributes {stable_mosaic.version = 11 : i64} {
  func.func @kernel(%arg0: i32, %arg1: memref<128x144xbf16, #tpu.memory_space<vmem>>, %arg2: memref<144x32xbf16, #tpu.memory_space<vmem>>, %arg3: memref<1x32xf32, #tpu.memory_space<vmem>>, %arg4: memref<128x32xbf16, #tpu.memory_space<vmem>>) attributes {dimension_semantics = [#tpu.dimension_semantics<parallel>], iteration_bounds = array<i64: 1>, scalar_prefetch = 0 : i64, scratch_operands = 0 : i64, tpu.core_type = #tpu.core_type<tc>, window_params = [{transform_indices = @transform_0, window_bounds = array<i64: 128, 144>}, {pipeline_mode = #tpu.pipeline_mode<synchronous>, transform_indices = @transform_1, window_bounds = array<i64: 144, 32>}, {pipeline_mode = #tpu.pipeline_mode<synchronous>, transform_indices = @transform_2, window_bounds = array<i64: 1, 32>}, {transform_indices = @transform_3, window_bounds = array<i64: 128, 32>}]} {
    %c0 = arith.constant 0 : index
    %c0_0 = arith.constant 0 : index
    %0 = vector.load %arg1[%c0, %c0_0] : memref<128x144xbf16, #tpu.memory_space<vmem>>, vector<128x144xbf16>
    %c0_1 = arith.constant 0 : index
    %c0_2 = arith.constant 0 : index
    %1 = vector.load %arg2[%c0_1, %c0_2] : memref<144x32xbf16, #tpu.memory_space<vmem>>, vector<144x32xbf16>
    %cst = arith.constant dense<0.000000e+00> : vector<128x32xf32>
    %2 = tpu.matmul %0, %1, %cst {dimension_numbers = #tpu.dot_dimension_numbers<[1], [0], [0], [1], [0, 0, 1, 1], [], []>} : vector<128x144xbf16>, vector<144x32xbf16>, vector<128x32xf32> -> vector<128x32xf32>
    %c0_3 = arith.constant 0 : index
    %c0_4 = arith.constant 0 : index
    %3 = vector.load %arg3[%c0_3, %c0_4] : memref<1x32xf32, #tpu.memory_space<vmem>>, vector<1x32xf32>
    %4 = vector.broadcast %3 : vector<1x32xf32> to vector<128x32xf32>
    %5 = arith.addf %2, %4 : vector<128x32xf32>
    %cst_5 = arith.constant 0.000000e+00 : f32
    %6 = vector.broadcast %cst_5 : f32 to vector<128x32xf32>
    %7 = arith.cmpf oge, %5, %6 : vector<128x32xf32>
    %cst_6 = arith.constant 2.000000e-01 : f32
    %8 = vector.broadcast %cst_6 : f32 to vector<128x32xf32>
    %9 = arith.mulf %8, %5 : vector<128x32xf32>
    %10 = arith.select %7, %5, %9 : vector<128x32xi1>, vector<128x32xf32>
    %11 = arith.truncf %10 : vector<128x32xf32> to vector<128x32xbf16>
    %c0_7 = arith.constant 0 : index
    %c0_8 = arith.constant 0 : index
    %12 = vector.load %arg4[%c0_7, %c0_8] : memref<128x32xbf16, #tpu.memory_space<vmem>>, vector<128x32xbf16>
    tpu.vector_store %arg4[%c0_7, %c0_8], %11 {strides = array<i32>} : memref<128x32xbf16, #tpu.memory_space<vmem>>, vector<128x32xbf16>,
    return
  }
  func.func @transform_0(%arg0: i32) -> (i32, i32) {
    %c0_i32 = arith.constant 0 : i32
    %c0_i32_0 = arith.constant 0 : i32
    return %arg0, %c0_i32 : i32, i32
  }
  func.func @transform_1(%arg0: i32) -> (i32, i32) {
    %c0_i32 = arith.constant 0 : i32
    %c0_i32_0 = arith.constant 0 : i32
    %c0_i32_1 = arith.constant 0 : i32
    return %c0_i32, %c0_i32_0 : i32, i32
  }
  func.func @transform_2(%arg0: i32) -> (i32, i32) {
    %c0_i32 = arith.constant 0 : i32
    %c0_i32_0 = arith.constant 0 : i32
    %c0_i32_1 = arith.constant 0 : i32
    return %c0_i32, %c0_i32_0 : i32, i32
  }
  func.func @transform_3(%arg0: i32) -> (i32, i32) {
    %c0_i32 = arith.constant 0 : i32
    %c0_i32_0 = arith.constant 0 : i32
    return %arg0, %c0_i32 : i32, i32
  }
}

module attributes {stable_mosaic.version = 11 : i64} {
  func.func @kernel(%arg0: i32, %arg1: memref<32x288xbf16, #tpu.memory_space<vmem>>, %arg2: memref<288x32xbf16, #tpu.memory_space<vmem>>, %arg3: memref<1x32xf32, #tpu.memory_space<vmem>>, %arg4: memref<32x32xbf16, #tpu.memory_space<vmem>>) attributes {dimension_semantics = [#tpu.dimension_semantics<parallel>], iteration_bounds = array<i64: 1>, scalar_prefetch = 0 : i64, scratch_operands = 0 : i64, tpu.core_type = #tpu.core_type<tc>, window_params = [{transform_indices = @transform_0, window_bounds = array<i64: 32, 288>}, {pipeline_mode = #tpu.pipeline_mode<synchronous>, transform_indices = @transform_1, window_bounds = array<i64: 288, 32>}, {pipeline_mode = #tpu.pipeline_mode<synchronous>, transform_indices = @transform_2, window_bounds = array<i64: 1, 32>}, {transform_indices = @transform_3, window_bounds = array<i64: 32, 32>}]} {
    %c0 = arith.constant 0 : index
    %c0_0 = arith.constant 0 : index
    %0 = vector.load %arg1[%c0, %c0_0] : memref<32x288xbf16, #tpu.memory_space<vmem>>, vector<32x288xbf16>
    %c0_1 = arith.constant 0 : index
    %c0_2 = arith.constant 0 : index
    %1 = vector.load %arg2[%c0_1, %c0_2] : memref<288x32xbf16, #tpu.memory_space<vmem>>, vector<288x32xbf16>
    %cst = arith.constant dense<0.000000e+00> : vector<32x32xf32>
    %2 = tpu.matmul %0, %1, %cst {dimension_numbers = #tpu.dot_dimension_numbers<[1], [0], [0], [1], [0, 0, 1, 1], [], []>} : vector<32x288xbf16>, vector<288x32xbf16>, vector<32x32xf32> -> vector<32x32xf32>
    %c0_3 = arith.constant 0 : index
    %c0_4 = arith.constant 0 : index
    %3 = vector.load %arg3[%c0_3, %c0_4] : memref<1x32xf32, #tpu.memory_space<vmem>>, vector<1x32xf32>
    %4 = vector.broadcast %3 : vector<1x32xf32> to vector<32x32xf32>
    %5 = arith.addf %2, %4 : vector<32x32xf32>
    %cst_5 = arith.constant 0.000000e+00 : f32
    %6 = vector.broadcast %cst_5 : f32 to vector<32x32xf32>
    %7 = arith.cmpf oge, %5, %6 : vector<32x32xf32>
    %cst_6 = arith.constant 2.000000e-01 : f32
    %8 = vector.broadcast %cst_6 : f32 to vector<32x32xf32>
    %9 = arith.mulf %8, %5 : vector<32x32xf32>
    %10 = arith.select %7, %5, %9 : vector<32x32xi1>, vector<32x32xf32>
    %11 = arith.truncf %10 : vector<32x32xf32> to vector<32x32xbf16>
    %c0_7 = arith.constant 0 : index
    %c0_8 = arith.constant 0 : index
    %12 = vector.load %arg4[%c0_7, %c0_8] : memref<32x32xbf16, #tpu.memory_space<vmem>>, vector<32x32xbf16>
    tpu.vector_store %arg4[%c0_7, %c0_8], %11 {strides = array<i32>} : memref<32x32xbf16, #tpu.memory_space<vmem>>, vector<32x32xbf16>,
    return
  }
  func.func @transform_0(%arg0: i32) -> (i32, i32) {
    %c0_i32 = arith.constant 0 : i32
    %c0_i32_0 = arith.constant 0 : i32
    return %arg0, %c0_i32 : i32, i32
  }
  func.func @transform_1(%arg0: i32) -> (i32, i32) {
    %c0_i32 = arith.constant 0 : i32
    %c0_i32_0 = arith.constant 0 : i32
    %c0_i32_1 = arith.constant 0 : i32
    return %c0_i32, %c0_i32_0 : i32, i32
  }
  func.func @transform_2(%arg0: i32) -> (i32, i32) {
    %c0_i32 = arith.constant 0 : i32
    %c0_i32_0 = arith.constant 0 : i32
    %c0_i32_1 = arith.constant 0 : i32
    return %c0_i32, %c0_i32_0 : i32, i32
  }
  func.func @transform_3(%arg0: i32) -> (i32, i32) {
    %c0_i32 = arith.constant 0 : i32
    %c0_i32_0 = arith.constant 0 : i32
    return %arg0, %c0_i32 : i32, i32
  }
}

module attributes {stable_mosaic.version = 11 : i64} {
  func.func @kernel(%arg0: i32, %arg1: memref<8x288xbf16, #tpu.memory_space<vmem>>, %arg2: memref<288x32xbf16, #tpu.memory_space<vmem>>, %arg3: memref<1x32xf32, #tpu.memory_space<vmem>>, %arg4: memref<8x32xbf16, #tpu.memory_space<vmem>>) attributes {dimension_semantics = [#tpu.dimension_semantics<parallel>], iteration_bounds = array<i64: 1>, scalar_prefetch = 0 : i64, scratch_operands = 0 : i64, tpu.core_type = #tpu.core_type<tc>, window_params = [{transform_indices = @transform_0, window_bounds = array<i64: 8, 288>}, {pipeline_mode = #tpu.pipeline_mode<synchronous>, transform_indices = @transform_1, window_bounds = array<i64: 288, 32>}, {pipeline_mode = #tpu.pipeline_mode<synchronous>, transform_indices = @transform_2, window_bounds = array<i64: 1, 32>}, {transform_indices = @transform_3, window_bounds = array<i64: 8, 32>}]} {
    %c0 = arith.constant 0 : index
    %c0_0 = arith.constant 0 : index
    %0 = vector.load %arg1[%c0, %c0_0] : memref<8x288xbf16, #tpu.memory_space<vmem>>, vector<8x288xbf16>
    %c0_1 = arith.constant 0 : index
    %c0_2 = arith.constant 0 : index
    %1 = vector.load %arg2[%c0_1, %c0_2] : memref<288x32xbf16, #tpu.memory_space<vmem>>, vector<288x32xbf16>
    %cst = arith.constant dense<0.000000e+00> : vector<8x32xf32>
    %2 = tpu.matmul %0, %1, %cst {dimension_numbers = #tpu.dot_dimension_numbers<[1], [0], [0], [1], [0, 0, 1, 1], [], []>} : vector<8x288xbf16>, vector<288x32xbf16>, vector<8x32xf32> -> vector<8x32xf32>
    %c0_3 = arith.constant 0 : index
    %c0_4 = arith.constant 0 : index
    %3 = vector.load %arg3[%c0_3, %c0_4] : memref<1x32xf32, #tpu.memory_space<vmem>>, vector<1x32xf32>
    %4 = vector.broadcast %3 : vector<1x32xf32> to vector<8x32xf32>
    %5 = arith.addf %2, %4 : vector<8x32xf32>
    %cst_5 = arith.constant 0.000000e+00 : f32
    %6 = vector.broadcast %cst_5 : f32 to vector<8x32xf32>
    %7 = arith.cmpf oge, %5, %6 : vector<8x32xf32>
    %cst_6 = arith.constant 2.000000e-01 : f32
    %8 = vector.broadcast %cst_6 : f32 to vector<8x32xf32>
    %9 = arith.mulf %8, %5 : vector<8x32xf32>
    %10 = arith.select %7, %5, %9 : vector<8x32xi1>, vector<8x32xf32>
    %11 = arith.truncf %10 : vector<8x32xf32> to vector<8x32xbf16>
    %c0_7 = arith.constant 0 : index
    %c0_8 = arith.constant 0 : index
    %12 = vector.load %arg4[%c0_7, %c0_8] : memref<8x32xbf16, #tpu.memory_space<vmem>>, vector<8x32xbf16>
    tpu.vector_store %arg4[%c0_7, %c0_8], %11 {strides = array<i32>} : memref<8x32xbf16, #tpu.memory_space<vmem>>, vector<8x32xbf16>,
    return
  }
  func.func @transform_0(%arg0: i32) -> (i32, i32) {
    %c0_i32 = arith.constant 0 : i32
    %c0_i32_0 = arith.constant 0 : i32
    return %arg0, %c0_i32 : i32, i32
  }
  func.func @transform_1(%arg0: i32) -> (i32, i32) {
    %c0_i32 = arith.constant 0 : i32
    %c0_i32_0 = arith.constant 0 : i32
    %c0_i32_1 = arith.constant 0 : i32
    return %c0_i32, %c0_i32_0 : i32, i32
  }
  func.func @transform_2(%arg0: i32) -> (i32, i32) {
    %c0_i32 = arith.constant 0 : i32
    %c0_i32_0 = arith.constant 0 : i32
    %c0_i32_1 = arith.constant 0 : i32
    return %c0_i32, %c0_i32_0 : i32, i32
  }
  func.func @transform_3(%arg0: i32) -> (i32, i32) {
    %c0_i32 = arith.constant 0 : i32
    %c0_i32_0 = arith.constant 0 : i32
    return %arg0, %c0_i32 : i32, i32
  }
}

module attributes {stable_mosaic.version = 11 : i64} {
  func.func @kernel(%arg0: i32, %arg1: memref<2x96xbf16, #tpu.memory_space<vmem>>, %arg2: memref<96x384xbf16, #tpu.memory_space<vmem>>, %arg3: memref<1x384xf32, #tpu.memory_space<vmem>>, %arg4: memref<2x384xf32, #tpu.memory_space<vmem>>) attributes {dimension_semantics = [#tpu.dimension_semantics<parallel>], iteration_bounds = array<i64: 1>, scalar_prefetch = 0 : i64, scratch_operands = 0 : i64, tpu.core_type = #tpu.core_type<tc>, window_params = [{transform_indices = @transform_0, window_bounds = array<i64: 2, 96>}, {pipeline_mode = #tpu.pipeline_mode<synchronous>, transform_indices = @transform_1, window_bounds = array<i64: 96, 384>}, {pipeline_mode = #tpu.pipeline_mode<synchronous>, transform_indices = @transform_2, window_bounds = array<i64: 1, 384>}, {transform_indices = @transform_3, window_bounds = array<i64: 2, 384>}]} {
    %c0 = arith.constant 0 : index
    %c0_0 = arith.constant 0 : index
    %0 = vector.load %arg1[%c0, %c0_0] : memref<2x96xbf16, #tpu.memory_space<vmem>>, vector<2x96xbf16>
    %c0_1 = arith.constant 0 : index
    %c0_2 = arith.constant 0 : index
    %1 = vector.load %arg2[%c0_1, %c0_2] : memref<96x384xbf16, #tpu.memory_space<vmem>>, vector<96x384xbf16>
    %cst = arith.constant dense<0.000000e+00> : vector<2x384xf32>
    %2 = tpu.matmul %0, %1, %cst {dimension_numbers = #tpu.dot_dimension_numbers<[1], [0], [0], [1], [0, 0, 1, 1], [], []>} : vector<2x96xbf16>, vector<96x384xbf16>, vector<2x384xf32> -> vector<2x384xf32>
    %c0_3 = arith.constant 0 : index
    %c0_4 = arith.constant 0 : index
    %3 = vector.load %arg3[%c0_3, %c0_4] : memref<1x384xf32, #tpu.memory_space<vmem>>, vector<1x384xf32>
    %4 = vector.broadcast %3 : vector<1x384xf32> to vector<2x384xf32>
    %5 = arith.addf %2, %4 : vector<2x384xf32>
    %c0_5 = arith.constant 0 : index
    %c0_6 = arith.constant 0 : index
    %6 = vector.load %arg4[%c0_5, %c0_6] : memref<2x384xf32, #tpu.memory_space<vmem>>, vector<2x384xf32>
    tpu.vector_store %arg4[%c0_5, %c0_6], %5 {strides = array<i32>} : memref<2x384xf32, #tpu.memory_space<vmem>>, vector<2x384xf32>,
    return
  }
  func.func @transform_0(%arg0: i32) -> (i32, i32) {
    %c0_i32 = arith.constant 0 : i32
    %c0_i32_0 = arith.constant 0 : i32
    return %arg0, %c0_i32 : i32, i32
  }
  func.func @transform_1(%arg0: i32) -> (i32, i32) {
    %c0_i32 = arith.constant 0 : i32
    %c0_i32_0 = arith.constant 0 : i32
    %c0_i32_1 = arith.constant 0 : i32
    return %c0_i32, %c0_i32_0 : i32, i32
  }
  func.func @transform_2(%arg0: i32) -> (i32, i32) {
    %c0_i32 = arith.constant 0 : i32
    %c0_i32_0 = arith.constant 0 : i32
    %c0_i32_1 = arith.constant 0 : i32
    return %c0_i32, %c0_i32_0 : i32, i32
  }
  func.func @transform_3(%arg0: i32) -> (i32, i32) {
    %c0_i32 = arith.constant 0 : i32
    %c0_i32_0 = arith.constant 0 : i32
    return %arg0, %c0_i32 : i32, i32
  }
}

module attributes {stable_mosaic.version = 11 : i64} {
  func.func @kernel(%arg0: i32, %arg1: memref<16x512xbf16, #tpu.memory_space<vmem>>, %arg2: memref<512x224xbf16, #tpu.memory_space<vmem>>, %arg3: memref<1x224xf32, #tpu.memory_space<vmem>>, %arg4: memref<16x224xf32, #tpu.memory_space<vmem>>) attributes {dimension_semantics = [#tpu.dimension_semantics<parallel>], iteration_bounds = array<i64: 1>, scalar_prefetch = 0 : i64, scratch_operands = 0 : i64, tpu.core_type = #tpu.core_type<tc>, window_params = [{transform_indices = @transform_0, window_bounds = array<i64: 16, 512>}, {pipeline_mode = #tpu.pipeline_mode<synchronous>, transform_indices = @transform_1, window_bounds = array<i64: 512, 224>}, {pipeline_mode = #tpu.pipeline_mode<synchronous>, transform_indices = @transform_2, window_bounds = array<i64: 1, 224>}, {transform_indices = @transform_3, window_bounds = array<i64: 16, 224>}]} {
    %c0 = arith.constant 0 : index
    %c0_0 = arith.constant 0 : index
    %0 = vector.load %arg1[%c0, %c0_0] : memref<16x512xbf16, #tpu.memory_space<vmem>>, vector<16x512xbf16>
    %c0_1 = arith.constant 0 : index
    %c0_2 = arith.constant 0 : index
    %1 = vector.load %arg2[%c0_1, %c0_2] : memref<512x224xbf16, #tpu.memory_space<vmem>>, vector<512x224xbf16>
    %cst = arith.constant dense<0.000000e+00> : vector<16x224xf32>
    %2 = tpu.matmul %0, %1, %cst {dimension_numbers = #tpu.dot_dimension_numbers<[1], [0], [0], [1], [0, 0, 1, 1], [], []>} : vector<16x512xbf16>, vector<512x224xbf16>, vector<16x224xf32> -> vector<16x224xf32>
    %c0_3 = arith.constant 0 : index
    %c0_4 = arith.constant 0 : index
    %3 = vector.load %arg3[%c0_3, %c0_4] : memref<1x224xf32, #tpu.memory_space<vmem>>, vector<1x224xf32>
    %4 = vector.broadcast %3 : vector<1x224xf32> to vector<16x224xf32>
    %5 = arith.addf %2, %4 : vector<16x224xf32>
    %c0_5 = arith.constant 0 : index
    %c0_6 = arith.constant 0 : index
    %6 = vector.load %arg4[%c0_5, %c0_6] : memref<16x224xf32, #tpu.memory_space<vmem>>, vector<16x224xf32>
    tpu.vector_store %arg4[%c0_5, %c0_6], %5 {strides = array<i32>} : memref<16x224xf32, #tpu.memory_space<vmem>>, vector<16x224xf32>,
    return
  }
  func.func @transform_0(%arg0: i32) -> (i32, i32) {
    %c0_i32 = arith.constant 0 : i32
    %c0_i32_0 = arith.constant 0 : i32
    return %arg0, %c0_i32 : i32, i32
  }
  func.func @transform_1(%arg0: i32) -> (i32, i32) {
    %c0_i32 = arith.constant 0 : i32
    %c0_i32_0 = arith.constant 0 : i32
    %c0_i32_1 = arith.constant 0 : i32
    return %c0_i32, %c0_i32_0 : i32, i32
  }
  func.func @transform_2(%arg0: i32) -> (i32, i32) {
    %c0_i32 = arith.constant 0 : i32
    %c0_i32_0 = arith.constant 0 : i32
    %c0_i32_1 = arith.constant 0 : i32
    return %c0_i32, %c0_i32_0 : i32, i32
  }
  func.func @transform_3(%arg0: i32) -> (i32, i32) {
    %c0_i32 = arith.constant 0 : i32
    %c0_i32_0 = arith.constant 0 : i32
    return %arg0, %c0_i32 : i32, i32
  }
}

module attributes {stable_mosaic.version = 11 : i64} {
  func.func @kernel(%arg0: i32, %arg1: memref<32x288xbf16, #tpu.memory_space<vmem>>, %arg2: memref<288x32xbf16, #tpu.memory_space<vmem>>, %arg3: memref<1x32xf32, #tpu.memory_space<vmem>>, %arg4: memref<32x32xf32, #tpu.memory_space<vmem>>, %arg5: memref<32x1xf32, #tpu.memory_space<vmem>>, %arg6: memref<32x32xbf16, #tpu.memory_space<vmem>>) attributes {dimension_semantics = [#tpu.dimension_semantics<parallel>], iteration_bounds = array<i64: 1>, scalar_prefetch = 0 : i64, scratch_operands = 0 : i64, tpu.core_type = #tpu.core_type<tc>, window_params = [{transform_indices = @transform_0, window_bounds = array<i64: 32, 288>}, {pipeline_mode = #tpu.pipeline_mode<synchronous>, transform_indices = @transform_1, window_bounds = array<i64: 288, 32>}, {pipeline_mode = #tpu.pipeline_mode<synchronous>, transform_indices = @transform_2, window_bounds = array<i64: 1, 32>}, {transform_indices = @transform_3, window_bounds = array<i64: 32, 32>}, {transform_indices = @transform_4, window_bounds = array<i64: 32, 1>}, {transform_indices = @transform_5, window_bounds = array<i64: 32, 32>}]} {
    %c0 = arith.constant 0 : index
    %c0_0 = arith.constant 0 : index
    %0 = vector.load %arg1[%c0, %c0_0] : memref<32x288xbf16, #tpu.memory_space<vmem>>, vector<32x288xbf16>
    %c0_1 = arith.constant 0 : index
    %c0_2 = arith.constant 0 : index
    %1 = vector.load %arg2[%c0_1, %c0_2] : memref<288x32xbf16, #tpu.memory_space<vmem>>, vector<288x32xbf16>
    %cst = arith.constant dense<0.000000e+00> : vector<32x32xf32>
    %2 = tpu.matmul %0, %1, %cst {dimension_numbers = #tpu.dot_dimension_numbers<[1], [0], [0], [1], [0, 0, 1, 1], [], []>} : vector<32x288xbf16>, vector<288x32xbf16>, vector<32x32xf32> -> vector<32x32xf32>
    %c0_3 = arith.constant 0 : index
    %c0_4 = arith.constant 0 : index
    %3 = vector.load %arg4[%c0_3, %c0_4] : memref<32x32xf32, #tpu.memory_space<vmem>>, vector<32x32xf32>
    %4 = arith.mulf %2, %3 : vector<32x32xf32>
    %c0_5 = arith.constant 0 : index
    %c0_6 = arith.constant 0 : index
    %5 = vector.load %arg5[%c0_5, %c0_6] : memref<32x1xf32, #tpu.memory_space<vmem>>, vector<32x1xf32>
    %6 = vector.broadcast %5 : vector<32x1xf32> to vector<32x32xf32>
    %7 = arith.addf %4, %6 : vector<32x32xf32>
    %c0_7 = arith.constant 0 : index
    %c0_8 = arith.constant 0 : index
    %8 = vector.load %arg3[%c0_7, %c0_8] : memref<1x32xf32, #tpu.memory_space<vmem>>, vector<1x32xf32>
    %9 = vector.broadcast %8 : vector<1x32xf32> to vector<32x32xf32>
    %10 = arith.addf %7, %9 : vector<32x32xf32>
    %cst_9 = arith.constant 0.000000e+00 : f32
    %11 = vector.broadcast %cst_9 : f32 to vector<32x32xf32>
    %12 = arith.cmpf oge, %10, %11 : vector<32x32xf32>
    %cst_10 = arith.constant 2.000000e-01 : f32
    %13 = vector.broadcast %cst_10 : f32 to vector<32x32xf32>
    %14 = arith.mulf %13, %10 : vector<32x32xf32>
    %15 = arith.select %12, %10, %14 : vector<32x32xi1>, vector<32x32xf32>
    %cst_11 = arith.constant 1.41421354 : f32
    %16 = vector.broadcast %cst_11 : f32 to vector<32x32xf32>
    %17 = arith.mulf %15, %16 : vector<32x32xf32>
    %18 = arith.truncf %17 : vector<32x32xf32> to vector<32x32xbf16>
    %c0_12 = arith.constant 0 : index
    %c0_13 = arith.constant 0 : index
    %19 = vector.load %arg6[%c0_12, %c0_13] : memref<32x32xbf16, #tpu.memory_space<vmem>>, vector<32x32xbf16>
    tpu.vector_store %arg6[%c0_12, %c0_13], %18 {strides = array<i32>} : memref<32x32xbf16, #tpu.memory_space<vmem>>, vector<32x32xbf16>,
    return
  }
  func.func @transform_0(%arg0: i32) -> (i32, i32) {
    %c0_i32 = arith.constant 0 : i32
    %c0_i32_0 = arith.constant 0 : i32
    return %arg0, %c0_i32 : i32, i32
  }
  func.func @transform_1(%arg0: i32) -> (i32, i32) {
    %c0_i32 = arith.constant 0 : i32
    %c0_i32_0 = arith.constant 0 : i32
    %c0_i32_1 = arith.constant 0 : i32
    return %c0_i32, %c0_i32_0 : i32, i32
  }
  func.func @transform_2(%arg0: i32) -> (i32, i32) {
    %c0_i32 = arith.constant 0 : i32
    %c0_i32_0 = arith.constant 0 : i32
    %c0_i32_1 = arith.constant 0 : i32
    return %c0_i32, %c0_i32_0 : i32, i32
  }
  func.func @transform_3(%arg0: i32) -> (i32, i32) {
    %c0_i32 = arith.constant 0 : i32
    %c0_i32_0 = arith.constant 0 : i32
    return %arg0, %c0_i32 : i32, i32
  }
  func.func @transform_4(%arg0: i32) -> (i32, i32) {
    %c0_i32 = arith.constant 0 : i32
    %c0_i32_0 = arith.constant 0 : i32
    return %arg0, %c0_i32 : i32, i32
  }
  func.func @transform_5(%arg0: i32) -> (i32, i32) {
    %c0_i32 = arith.constant 0 : i32
    %c0_i32_0 = arith.constant 0 : i32
    return %arg0, %c0_i32 : i32, i32
  }
}

module attributes {stable_mosaic.version = 11 : i64} {
  func.func @kernel(%arg0: i32, %arg1: memref<128x288xbf16, #tpu.memory_space<vmem>>, %arg2: memref<288x32xbf16, #tpu.memory_space<vmem>>, %arg3: memref<1x32xf32, #tpu.memory_space<vmem>>, %arg4: memref<128x32xf32, #tpu.memory_space<vmem>>, %arg5: memref<128x1xf32, #tpu.memory_space<vmem>>, %arg6: memref<128x32xbf16, #tpu.memory_space<vmem>>) attributes {dimension_semantics = [#tpu.dimension_semantics<parallel>], iteration_bounds = array<i64: 1>, scalar_prefetch = 0 : i64, scratch_operands = 0 : i64, tpu.core_type = #tpu.core_type<tc>, window_params = [{transform_indices = @transform_0, window_bounds = array<i64: 128, 288>}, {pipeline_mode = #tpu.pipeline_mode<synchronous>, transform_indices = @transform_1, window_bounds = array<i64: 288, 32>}, {pipeline_mode = #tpu.pipeline_mode<synchronous>, transform_indices = @transform_2, window_bounds = array<i64: 1, 32>}, {transform_indices = @transform_3, window_bounds = array<i64: 128, 32>}, {transform_indices = @transform_4, window_bounds = array<i64: 128, 1>}, {transform_indices = @transform_5, window_bounds = array<i64: 128, 32>}]} {
    %c0 = arith.constant 0 : index
    %c0_0 = arith.constant 0 : index
    %0 = vector.load %arg1[%c0, %c0_0] : memref<128x288xbf16, #tpu.memory_space<vmem>>, vector<128x288xbf16>
    %c0_1 = arith.constant 0 : index
    %c0_2 = arith.constant 0 : index
    %1 = vector.load %arg2[%c0_1, %c0_2] : memref<288x32xbf16, #tpu.memory_space<vmem>>, vector<288x32xbf16>
    %cst = arith.constant dense<0.000000e+00> : vector<128x32xf32>
    %2 = tpu.matmul %0, %1, %cst {dimension_numbers = #tpu.dot_dimension_numbers<[1], [0], [0], [1], [0, 0, 1, 1], [], []>} : vector<128x288xbf16>, vector<288x32xbf16>, vector<128x32xf32> -> vector<128x32xf32>
    %c0_3 = arith.constant 0 : index
    %c0_4 = arith.constant 0 : index
    %3 = vector.load %arg4[%c0_3, %c0_4] : memref<128x32xf32, #tpu.memory_space<vmem>>, vector<128x32xf32>
    %4 = arith.mulf %2, %3 : vector<128x32xf32>
    %c0_5 = arith.constant 0 : index
    %c0_6 = arith.constant 0 : index
    %5 = vector.load %arg5[%c0_5, %c0_6] : memref<128x1xf32, #tpu.memory_space<vmem>>, vector<128x1xf32>
    %6 = vector.broadcast %5 : vector<128x1xf32> to vector<128x32xf32>
    %7 = arith.addf %4, %6 : vector<128x32xf32>
    %c0_7 = arith.constant 0 : index
    %c0_8 = arith.constant 0 : index
    %8 = vector.load %arg3[%c0_7, %c0_8] : memref<1x32xf32, #tpu.memory_space<vmem>>, vector<1x32xf32>
    %9 = vector.broadcast %8 : vector<1x32xf32> to vector<128x32xf32>
    %10 = arith.addf %7, %9 : vector<128x32xf32>
    %cst_9 = arith.constant 0.000000e+00 : f32
    %11 = vector.broadcast %cst_9 : f32 to vector<128x32xf32>
    %12 = arith.cmpf oge, %10, %11 : vector<128x32xf32>
    %cst_10 = arith.constant 2.000000e-01 : f32
    %13 = vector.broadcast %cst_10 : f32 to vector<128x32xf32>
    %14 = arith.mulf %13, %10 : vector<128x32xf32>
    %15 = arith.select %12, %10, %14 : vector<128x32xi1>, vector<128x32xf32>
    %cst_11 = arith.constant 1.41421354 : f32
    %16 = vector.broadcast %cst_11 : f32 to vector<128x32xf32>
    %17 = arith.mulf %15, %16 : vector<128x32xf32>
    %18 = arith.truncf %17 : vector<128x32xf32> to vector<128x32xbf16>
    %c0_12 = arith.constant 0 : index
    %c0_13 = arith.constant 0 : index
    %19 = vector.load %arg6[%c0_12, %c0_13] : memref<128x32xbf16, #tpu.memory_space<vmem>>, vector<128x32xbf16>
    tpu.vector_store %arg6[%c0_12, %c0_13], %18 {strides = array<i32>} : memref<128x32xbf16, #tpu.memory_space<vmem>>, vector<128x32xbf16>,
    return
  }
  func.func @transform_0(%arg0: i32) -> (i32, i32) {
    %c0_i32 = arith.constant 0 : i32
    %c0_i32_0 = arith.constant 0 : i32
    return %arg0, %c0_i32 : i32, i32
  }
  func.func @transform_1(%arg0: i32) -> (i32, i32) {
    %c0_i32 = arith.constant 0 : i32
    %c0_i32_0 = arith.constant 0 : i32
    %c0_i32_1 = arith.constant 0 : i32
    return %c0_i32, %c0_i32_0 : i32, i32
  }
  func.func @transform_2(%arg0: i32) -> (i32, i32) {
    %c0_i32 = arith.constant 0 : i32
    %c0_i32_0 = arith.constant 0 : i32
    %c0_i32_1 = arith.constant 0 : i32
    return %c0_i32, %c0_i32_0 : i32, i32
  }
  func.func @transform_3(%arg0: i32) -> (i32, i32) {
    %c0_i32 = arith.constant 0 : i32
    %c0_i32_0 = arith.constant 0 : i32
    return %arg0, %c0_i32 : i32, i32
  }
  func.func @transform_4(%arg0: i32) -> (i32, i32) {
    %c0_i32 = arith.constant 0 : i32
    %c0_i32_0 = arith.constant 0 : i32
    return %arg0, %c0_i32 : i32, i32
  }
  func.func @transform_5(%arg0: i32) -> (i32, i32) {
    %c0_i32 = arith.constant 0 : i32
    %c0_i32_0 = arith.constant 0 : i32
    return %arg0, %c0_i32 : i32, i32
  }
}

module attributes {stable_mosaic.version = 11 : i64} {
  func.func @kernel(%arg0: i32, %arg1: memref<32x32xbf16, #tpu.memory_space<vmem>>, %arg2: memref<32x3xbf16, #tpu.memory_space<vmem>>, %arg3: memref<1x3xf32, #tpu.memory_space<vmem>>, %arg4: memref<32x3xf32, #tpu.memory_space<vmem>>) attributes {dimension_semantics = [#tpu.dimension_semantics<parallel>], iteration_bounds = array<i64: 1>, scalar_prefetch = 0 : i64, scratch_operands = 0 : i64, tpu.core_type = #tpu.core_type<tc>, window_params = [{transform_indices = @transform_0, window_bounds = array<i64: 32, 32>}, {pipeline_mode = #tpu.pipeline_mode<synchronous>, transform_indices = @transform_1, window_bounds = array<i64: 32, 3>}, {pipeline_mode = #tpu.pipeline_mode<synchronous>, transform_indices = @transform_2, window_bounds = array<i64: 1, 3>}, {transform_indices = @transform_3, window_bounds = array<i64: 32, 3>}]} {
    %c0 = arith.constant 0 : index
    %c0_0 = arith.constant 0 : index
    %0 = vector.load %arg1[%c0, %c0_0] : memref<32x32xbf16, #tpu.memory_space<vmem>>, vector<32x32xbf16>
    %c0_1 = arith.constant 0 : index
    %c0_2 = arith.constant 0 : index
    %1 = vector.load %arg2[%c0_1, %c0_2] : memref<32x3xbf16, #tpu.memory_space<vmem>>, vector<32x3xbf16>
    %cst = arith.constant dense<0.000000e+00> : vector<32x3xf32>
    %2 = tpu.matmul %0, %1, %cst {dimension_numbers = #tpu.dot_dimension_numbers<[1], [0], [0], [1], [0, 0, 1, 1], [], []>} : vector<32x32xbf16>, vector<32x3xbf16>, vector<32x3xf32> -> vector<32x3xf32>
    %c0_3 = arith.constant 0 : index
    %c0_4 = arith.constant 0 : index
    %3 = vector.load %arg3[%c0_3, %c0_4] : memref<1x3xf32, #tpu.memory_space<vmem>>, vector<1x3xf32>
    %4 = vector.broadcast %3 : vector<1x3xf32> to vector<32x3xf32>
    %5 = arith.addf %2, %4 : vector<32x3xf32>
    %c0_5 = arith.constant 0 : index
    %c0_6 = arith.constant 0 : index
    %6 = vector.load %arg4[%c0_5, %c0_6] : memref<32x3xf32, #tpu.memory_space<vmem>>, vector<32x3xf32>
    tpu.vector_store %arg4[%c0_5, %c0_6], %5 {strides = array<i32>} : memref<32x3xf32, #tpu.memory_space<vmem>>, vector<32x3xf32>,
    return
  }
  func.func @transform_0(%arg0: i32) -> (i32, i32) {
    %c0_i32 = arith.constant 0 : i32
    %c0_i32_0 = arith.constant 0 : i32
    return %arg0, %c0_i32 : i32, i32
  }
  func.func @transform_1(%arg0: i32) -> (i32, i32) {
    %c0_i32 = arith.constant 0 : i32
    %c0_i32_0 = arith.constant 0 : i32
    %c0_i32_1 = arith.constant 0 : i32
    return %c0_i32, %c0_i32_0 : i32, i32
  }
  func.func @transform_2(%arg0: i32) -> (i32, i32) {
    %c0_i32 = arith.constant 0 : i32
    %c0_i32_0 = arith.constant 0 : i32
    %c0_i32_1 = arith.constant 0 : i32
    return %c0_i32, %c0_i32_0 : i32, i32
  }
  func.func @transform_3(%arg0: i32) -> (i32, i32) {
    %c0_i32 = arith.constant 0 : i32
    %c0_i32_0 = arith.constant 0 : i32
    return %arg0, %c0_i32 : i32, i32
  }
}

module attributes {stable_mosaic.version = 11 : i64} {
  func.func @kernel(%arg0: i32, %arg1: memref<128x32xbf16, #tpu.memory_space<vmem>>, %arg2: memref<32x3xbf16, #tpu.memory_space<vmem>>, %arg3: memref<1x3xf32, #tpu.memory_space<vmem>>, %arg4: memref<128x3xf32, #tpu.memory_space<vmem>>, %arg5: memref<128x3xf32, #tpu.memory_space<vmem>>) attributes {dimension_semantics = [#tpu.dimension_semantics<parallel>], iteration_bounds = array<i64: 1>, scalar_prefetch = 0 : i64, scratch_operands = 0 : i64, tpu.core_type = #tpu.core_type<tc>, window_params = [{transform_indices = @transform_0, window_bounds = array<i64: 128, 32>}, {pipeline_mode = #tpu.pipeline_mode<synchronous>, transform_indices = @transform_1, window_bounds = array<i64: 32, 3>}, {pipeline_mode = #tpu.pipeline_mode<synchronous>, transform_indices = @transform_2, window_bounds = array<i64: 1, 3>}, {transform_indices = @transform_3, window_bounds = array<i64: 128, 3>}, {transform_indices = @transform_4, window_bounds = array<i64: 128, 3>}]} {
    %c0 = arith.constant 0 : index
    %c0_0 = arith.constant 0 : index
    %0 = vector.load %arg1[%c0, %c0_0] : memref<128x32xbf16, #tpu.memory_space<vmem>>, vector<128x32xbf16>
    %c0_1 = arith.constant 0 : index
    %c0_2 = arith.constant 0 : index
    %1 = vector.load %arg2[%c0_1, %c0_2] : memref<32x3xbf16, #tpu.memory_space<vmem>>, vector<32x3xbf16>
    %cst = arith.constant dense<0.000000e+00> : vector<128x3xf32>
    %2 = tpu.matmul %0, %1, %cst {dimension_numbers = #tpu.dot_dimension_numbers<[1], [0], [0], [1], [0, 0, 1, 1], [], []>} : vector<128x32xbf16>, vector<32x3xbf16>, vector<128x3xf32> -> vector<128x3xf32>
    %c0_3 = arith.constant 0 : index
    %c0_4 = arith.constant 0 : index
    %3 = vector.load %arg3[%c0_3, %c0_4] : memref<1x3xf32, #tpu.memory_space<vmem>>, vector<1x3xf32>
    %4 = vector.broadcast %3 : vector<1x3xf32> to vector<128x3xf32>
    %5 = arith.addf %2, %4 : vector<128x3xf32>
    %c0_5 = arith.constant 0 : index
    %c0_6 = arith.constant 0 : index
    %6 = vector.load %arg4[%c0_5, %c0_6] : memref<128x3xf32, #tpu.memory_space<vmem>>, vector<128x3xf32>
    %7 = arith.addf %5, %6 : vector<128x3xf32>
    %c0_7 = arith.constant 0 : index
    %c0_8 = arith.constant 0 : index
    %8 = vector.load %arg5[%c0_7, %c0_8] : memref<128x3xf32, #tpu.memory_space<vmem>>, vector<128x3xf32>
    tpu.vector_store %arg5[%c0_7, %c0_8], %7 {strides = array<i32>} : memref<128x3xf32, #tpu.memory_space<vmem>>, vector<128x3xf32>,
    return
  }
  func.func @transform_0(%arg0: i32) -> (i32, i32) {
    %c0_i32 = arith.constant 0 : i32
    %c0_i32_0 = arith.constant 0 : i32
    return %arg0, %c0_i32 : i32, i32
  }
  func.func @transform_1(%arg0: i32) -> (i32, i32) {
    %c0_i32 = arith.constant 0 : i32
    %c0_i32_0 = arith.constant 0 : i32
    %c0_i32_1 = arith.constant 0 : i32
    return %c0_i32, %c0_i32_0 : i32, i32
  }
  func.func @transform_2(%arg0: i32) -> (i32, i32) {
    %c0_i32 = arith.constant 0 : i32
    %c0_i32_0 = arith.constant 0 : i32
    %c0_i32_1 = arith.constant 0 : i32
    return %c0_i32, %c0_i32_0 : i32, i32
  }
  func.func @transform_3(%arg0: i32) -> (i32, i32) {
    %c0_i32 = arith.constant 0 : i32
    %c0_i32_0 = arith.constant 0 : i32
    return %arg0, %c0_i32 : i32, i32
  }
  func.func @transform_4(%arg0: i32) -> (i32, i32) {
    %c0_i32 = arith.constant 0 : i32
    %c0_i32_0 = arith.constant 0 : i32
    return %arg0, %c0_i32 : i32, i32
  }
}

module attributes {stable_mosaic.version = 11 : i64} {
  func.func @kernel(%arg0: i32, %arg1: memref<256x288xbf16, #tpu.memory_space<vmem>>, %arg2: memref<288x16xbf16, #tpu.memory_space<vmem>>, %arg3: memref<1x16xf32, #tpu.memory_space<vmem>>, %arg4: memref<256x16xf32, #tpu.memory_space<vmem>>, %arg5: memref<256x1xf32, #tpu.memory_space<vmem>>, %arg6: memref<256x16xbf16, #tpu.memory_space<vmem>>) attributes {dimension_semantics = [#tpu.dimension_semantics<parallel>], iteration_bounds = array<i64: 2>, scalar_prefetch = 0 : i64, scratch_operands = 0 : i64, tpu.core_type = #tpu.core_type<tc>, window_params = [{transform_indices = @transform_0, window_bounds = array<i64: 256, 288>}, {pipeline_mode = #tpu.pipeline_mode<synchronous>, transform_indices = @transform_1, window_bounds = array<i64: 288, 16>}, {pipeline_mode = #tpu.pipeline_mode<synchronous>, transform_indices = @transform_2, window_bounds = array<i64: 1, 16>}, {transform_indices = @transform_3, window_bounds = array<i64: 256, 16>}, {transform_indices = @transform_4, window_bounds = array<i64: 256, 1>}, {transform_indices = @transform_5, window_bounds = array<i64: 256, 16>}]} {
    %c0 = arith.constant 0 : index
    %c0_0 = arith.constant 0 : index
    %0 = vector.load %arg1[%c0, %c0_0] : memref<256x288xbf16, #tpu.memory_space<vmem>>, vector<256x288xbf16>
    %c0_1 = arith.constant 0 : index
    %c0_2 = arith.constant 0 : index
    %1 = vector.load %arg2[%c0_1, %c0_2] : memref<288x16xbf16, #tpu.memory_space<vmem>>, vector<288x16xbf16>
    %cst = arith.constant dense<0.000000e+00> : vector<256x16xf32>
    %2 = tpu.matmul %0, %1, %cst {dimension_numbers = #tpu.dot_dimension_numbers<[1], [0], [0], [1], [0, 0, 1, 1], [], []>} : vector<256x288xbf16>, vector<288x16xbf16>, vector<256x16xf32> -> vector<256x16xf32>
    %c0_3 = arith.constant 0 : index
    %c0_4 = arith.constant 0 : index
    %3 = vector.load %arg4[%c0_3, %c0_4] : memref<256x16xf32, #tpu.memory_space<vmem>>, vector<256x16xf32>
    %4 = arith.mulf %2, %3 : vector<256x16xf32>
    %c0_5 = arith.constant 0 : index
    %c0_6 = arith.constant 0 : index
    %5 = vector.load %arg5[%c0_5, %c0_6] : memref<256x1xf32, #tpu.memory_space<vmem>>, vector<256x1xf32>
    %6 = vector.broadcast %5 : vector<256x1xf32> to vector<256x16xf32>
    %7 = arith.addf %4, %6 : vector<256x16xf32>
    %c0_7 = arith.constant 0 : index
    %c0_8 = arith.constant 0 : index
    %8 = vector.load %arg3[%c0_7, %c0_8] : memref<1x16xf32, #tpu.memory_space<vmem>>, vector<1x16xf32>
    %9 = vector.broadcast %8 : vector<1x16xf32> to vector<256x16xf32>
    %10 = arith.addf %7, %9 : vector<256x16xf32>
    %cst_9 = arith.constant 0.000000e+00 : f32
    %11 = vector.broadcast %cst_9 : f32 to vector<256x16xf32>
    %12 = arith.cmpf oge, %10, %11 : vector<256x16xf32>
    %cst_10 = arith.constant 2.000000e-01 : f32
    %13 = vector.broadcast %cst_10 : f32 to vector<256x16xf32>
    %14 = arith.mulf %13, %10 : vector<256x16xf32>
    %15 = arith.select %12, %10, %14 : vector<256x16xi1>, vector<256x16xf32>
    %cst_11 = arith.constant 1.41421354 : f32
    %16 = vector.broadcast %cst_11 : f32 to vector<256x16xf32>
    %17 = arith.mulf %15, %16 : vector<256x16xf32>
    %18 = arith.truncf %17 : vector<256x16xf32> to vector<256x16xbf16>
    %c0_12 = arith.constant 0 : index
    %c0_13 = arith.constant 0 : index
    %19 = vector.load %arg6[%c0_12, %c0_13] : memref<256x16xbf16, #tpu.memory_space<vmem>>, vector<256x16xbf16>
    tpu.vector_store %arg6[%c0_12, %c0_13], %18 {strides = array<i32>} : memref<256x16xbf16, #tpu.memory_space<vmem>>, vector<256x16xbf16>,
    return
  }
  func.func @transform_0(%arg0: i32) -> (i32, i32) {
    %c0_i32 = arith.constant 0 : i32
    %c0_i32_0 = arith.constant 0 : i32
    return %arg0, %c0_i32 : i32, i32
  }
  func.func @transform_1(%arg0: i32) -> (i32, i32) {
    %c0_i32 = arith.constant 0 : i32
    %c0_i32_0 = arith.constant 0 : i32
    %c0_i32_1 = arith.constant 0 : i32
    return %c0_i32, %c0_i32_0 : i32, i32
  }
  func.func @transform_2(%arg0: i32) -> (i32, i32) {
    %c0_i32 = arith.constant 0 : i32
    %c0_i32_0 = arith.constant 0 : i32
    %c0_i32_1 = arith.constant 0 : i32
    return %c0_i32, %c0_i32_0 : i32, i32
  }
  func.func @transform_3(%arg0: i32) -> (i32, i32) {
    %c0_i32 = arith.constant 0 : i32
    %c0_i32_0 = arith.constant 0 : i32
    return %arg0, %c0_i32 : i32, i32
  }
  func.func @transform_4(%arg0: i32) -> (i32, i32) {
    %c0_i32 = arith.constant 0 : i32
    %c0_i32_0 = arith.constant 0 : i32
    return %arg0, %c0_i32 : i32, i32
  }
  func.func @transform_5(%arg0: i32) -> (i32, i32) {
    %c0_i32 = arith.constant 0 : i32
    %c0_i32_0 = arith.constant 0 : i32
    return %arg0, %c0_i32 : i32, i32
  }
}

module attributes {stable_mosaic.version = 11 : i64} {
  func.func @kernel(%arg0: i32, %arg1: memref<256x144xbf16, #tpu.memory_space<vmem>>, %arg2: memref<144x16xbf16, #tpu.memory_space<vmem>>, %arg3: memref<1x16xf32, #tpu.memory_space<vmem>>, %arg4: memref<256x16xf32, #tpu.memory_space<vmem>>, %arg5: memref<256x1xf32, #tpu.memory_space<vmem>>, %arg6: memref<256x16xbf16, #tpu.memory_space<vmem>>) attributes {dimension_semantics = [#tpu.dimension_semantics<parallel>], iteration_bounds = array<i64: 2>, scalar_prefetch = 0 : i64, scratch_operands = 0 : i64, tpu.core_type = #tpu.core_type<tc>, window_params = [{transform_indices = @transform_0, window_bounds = array<i64: 256, 144>}, {pipeline_mode = #tpu.pipeline_mode<synchronous>, transform_indices = @transform_1, window_bounds = array<i64: 144, 16>}, {pipeline_mode = #tpu.pipeline_mode<synchronous>, transform_indices = @transform_2, window_bounds = array<i64: 1, 16>}, {transform_indices = @transform_3, window_bounds = array<i64: 256, 16>}, {transform_indices = @transform_4, window_bounds = array<i64: 256, 1>}, {transform_indices = @transform_5, window_bounds = array<i64: 256, 16>}]} {
    %c0 = arith.constant 0 : index
    %c0_0 = arith.constant 0 : index
    %0 = vector.load %arg1[%c0, %c0_0] : memref<256x144xbf16, #tpu.memory_space<vmem>>, vector<256x144xbf16>
    %c0_1 = arith.constant 0 : index
    %c0_2 = arith.constant 0 : index
    %1 = vector.load %arg2[%c0_1, %c0_2] : memref<144x16xbf16, #tpu.memory_space<vmem>>, vector<144x16xbf16>
    %cst = arith.constant dense<0.000000e+00> : vector<256x16xf32>
    %2 = tpu.matmul %0, %1, %cst {dimension_numbers = #tpu.dot_dimension_numbers<[1], [0], [0], [1], [0, 0, 1, 1], [], []>} : vector<256x144xbf16>, vector<144x16xbf16>, vector<256x16xf32> -> vector<256x16xf32>
    %c0_3 = arith.constant 0 : index
    %c0_4 = arith.constant 0 : index
    %3 = vector.load %arg4[%c0_3, %c0_4] : memref<256x16xf32, #tpu.memory_space<vmem>>, vector<256x16xf32>
    %4 = arith.mulf %2, %3 : vector<256x16xf32>
    %c0_5 = arith.constant 0 : index
    %c0_6 = arith.constant 0 : index
    %5 = vector.load %arg5[%c0_5, %c0_6] : memref<256x1xf32, #tpu.memory_space<vmem>>, vector<256x1xf32>
    %6 = vector.broadcast %5 : vector<256x1xf32> to vector<256x16xf32>
    %7 = arith.addf %4, %6 : vector<256x16xf32>
    %c0_7 = arith.constant 0 : index
    %c0_8 = arith.constant 0 : index
    %8 = vector.load %arg3[%c0_7, %c0_8] : memref<1x16xf32, #tpu.memory_space<vmem>>, vector<1x16xf32>
    %9 = vector.broadcast %8 : vector<1x16xf32> to vector<256x16xf32>
    %10 = arith.addf %7, %9 : vector<256x16xf32>
    %cst_9 = arith.constant 0.000000e+00 : f32
    %11 = vector.broadcast %cst_9 : f32 to vector<256x16xf32>
    %12 = arith.cmpf oge, %10, %11 : vector<256x16xf32>
    %cst_10 = arith.constant 2.000000e-01 : f32
    %13 = vector.broadcast %cst_10 : f32 to vector<256x16xf32>
    %14 = arith.mulf %13, %10 : vector<256x16xf32>
    %15 = arith.select %12, %10, %14 : vector<256x16xi1>, vector<256x16xf32>
    %cst_11 = arith.constant 1.41421354 : f32
    %16 = vector.broadcast %cst_11 : f32 to vector<256x16xf32>
    %17 = arith.mulf %15, %16 : vector<256x16xf32>
    %18 = arith.truncf %17 : vector<256x16xf32> to vector<256x16xbf16>
    %c0_12 = arith.constant 0 : index
    %c0_13 = arith.constant 0 : index
    %19 = vector.load %arg6[%c0_12, %c0_13] : memref<256x16xbf16, #tpu.memory_space<vmem>>, vector<256x16xbf16>
    tpu.vector_store %arg6[%c0_12, %c0_13], %18 {strides = array<i32>} : memref<256x16xbf16, #tpu.memory_space<vmem>>, vector<256x16xbf16>,
    return
  }
  func.func @transform_0(%arg0: i32) -> (i32, i32) {
    %c0_i32 = arith.constant 0 : i32
    %c0_i32_0 = arith.constant 0 : i32
    return %arg0, %c0_i32 : i32, i32
  }
  func.func @transform_1(%arg0: i32) -> (i32, i32) {
    %c0_i32 = arith.constant 0 : i32
    %c0_i32_0 = arith.constant 0 : i32
    %c0_i32_1 = arith.constant 0 : i32
    return %c0_i32, %c0_i32_0 : i32, i32
  }
  func.func @transform_2(%arg0: i32) -> (i32, i32) {
    %c0_i32 = arith.constant 0 : i32
    %c0_i32_0 = arith.constant 0 : i32
    %c0_i32_1 = arith.constant 0 : i32
    return %c0_i32, %c0_i32_0 : i32, i32
  }
  func.func @transform_3(%arg0: i32) -> (i32, i32) {
    %c0_i32 = arith.constant 0 : i32
    %c0_i32_0 = arith.constant 0 : i32
    return %arg0, %c0_i32 : i32, i32
  }
  func.func @transform_4(%arg0: i32) -> (i32, i32) {
    %c0_i32 = arith.constant 0 : i32
    %c0_i32_0 = arith.constant 0 : i32
    return %arg0, %c0_i32 : i32, i32
  }
  func.func @transform_5(%arg0: i32) -> (i32, i32) {
    %c0_i32 = arith.constant 0 : i32
    %c0_i32_0 = arith.constant 0 : i32
    return %arg0, %c0_i32 : i32, i32
  }
}

module attributes {stable_mosaic.version = 11 : i64} {
  func.func @kernel(%arg0: i32, %arg1: memref<256x16xbf16, #tpu.memory_space<vmem>>, %arg2: memref<16x3xbf16, #tpu.memory_space<vmem>>, %arg3: memref<1x3xf32, #tpu.memory_space<vmem>>, %arg4: memref<256x3xf32, #tpu.memory_space<vmem>>, %arg5: memref<256x3xf32, #tpu.memory_space<vmem>>) attributes {dimension_semantics = [#tpu.dimension_semantics<parallel>], iteration_bounds = array<i64: 2>, scalar_prefetch = 0 : i64, scratch_operands = 0 : i64, tpu.core_type = #tpu.core_type<tc>, window_params = [{transform_indices = @transform_0, window_bounds = array<i64: 256, 16>}, {pipeline_mode = #tpu.pipeline_mode<synchronous>, transform_indices = @transform_1, window_bounds = array<i64: 16, 3>}, {pipeline_mode = #tpu.pipeline_mode<synchronous>, transform_indices = @transform_2, window_bounds = array<i64: 1, 3>}, {transform_indices = @transform_3, window_bounds = array<i64: 256, 3>}, {transform_indices = @transform_4, window_bounds = array<i64: 256, 3>}]} {
    %c0 = arith.constant 0 : index
    %c0_0 = arith.constant 0 : index
    %0 = vector.load %arg1[%c0, %c0_0] : memref<256x16xbf16, #tpu.memory_space<vmem>>, vector<256x16xbf16>
    %c0_1 = arith.constant 0 : index
    %c0_2 = arith.constant 0 : index
    %1 = vector.load %arg2[%c0_1, %c0_2] : memref<16x3xbf16, #tpu.memory_space<vmem>>, vector<16x3xbf16>
    %cst = arith.constant dense<0.000000e+00> : vector<256x3xf32>
    %2 = tpu.matmul %0, %1, %cst {dimension_numbers = #tpu.dot_dimension_numbers<[1], [0], [0], [1], [0, 0, 1, 1], [], []>} : vector<256x16xbf16>, vector<16x3xbf16>, vector<256x3xf32> -> vector<256x3xf32>
    %c0_3 = arith.constant 0 : index
    %c0_4 = arith.constant 0 : index
    %3 = vector.load %arg3[%c0_3, %c0_4] : memref<1x3xf32, #tpu.memory_space<vmem>>, vector<1x3xf32>
    %4 = vector.broadcast %3 : vector<1x3xf32> to vector<256x3xf32>
    %5 = arith.addf %2, %4 : vector<256x3xf32>
    %c0_5 = arith.constant 0 : index
    %c0_6 = arith.constant 0 : index
    %6 = vector.load %arg4[%c0_5, %c0_6] : memref<256x3xf32, #tpu.memory_space<vmem>>, vector<256x3xf32>
    %7 = arith.addf %5, %6 : vector<256x3xf32>
    %c0_7 = arith.constant 0 : index
    %c0_8 = arith.constant 0 : index
    %8 = vector.load %arg5[%c0_7, %c0_8] : memref<256x3xf32, #tpu.memory_space<vmem>>, vector<256x3xf32>
    tpu.vector_store %arg5[%c0_7, %c0_8], %7 {strides = array<i32>} : memref<256x3xf32, #tpu.memory_space<vmem>>, vector<256x3xf32>,
    return
  }
  func.func @transform_0(%arg0: i32) -> (i32, i32) {
    %c0_i32 = arith.constant 0 : i32
    %c0_i32_0 = arith.constant 0 : i32
    return %arg0, %c0_i32 : i32, i32
  }
  func.func @transform_1(%arg0: i32) -> (i32, i32) {
    %c0_i32 = arith.constant 0 : i32
    %c0_i32_0 = arith.constant 0 : i32
    %c0_i32_1 = arith.constant 0 : i32
    return %c0_i32, %c0_i32_0 : i32, i32
  }
  func.func @transform_2(%arg0: i32) -> (i32, i32) {
    %c0_i32 = arith.constant 0 : i32
    %c0_i32_0 = arith.constant 0 : i32
    %c0_i32_1 = arith.constant 0 : i32
    return %c0_i32, %c0_i32_0 : i32, i32
  }
  func.func @transform_3(%arg0: i32) -> (i32, i32) {
    %c0_i32 = arith.constant 0 : i32
    %c0_i32_0 = arith.constant 0 : i32
    return %arg0, %c0_i32 : i32, i32
  }
  func.func @transform_4(%arg0: i32) -> (i32, i32) {
    %c0_i32 = arith.constant 0 : i32
    %c0_i32_0 = arith.constant 0 : i32
    return %arg0, %c0_i32 : i32, i32
  }
}

</mosaic_0001>

<bundles_post_ra>
// kernel: _lambda_.14
= control target key start
LH: loop header
LB: loop body
LE: loop exit
PB: predicated region body
PF: predicated region fallthrough
CT: control target
= control target key end

     0   :  { %s830_s12 = smov 0   ;;  %s1000_s0 = inlined_call_operand.vmem [shape: bf16[512,27], index: 0, kind: input, shape index: {}]   ;;  %s1001_s1 = inlined_call_operand.vmem [shape: bf16[27,16], index: 1, kind: input, shape index: {}]   ;;  %s1002_s2 = inlined_call_operand.vmem [shape: f32[1,16], index: 2, kind: input, shape index: {}]   ;;  %s1003_s3 = inlined_call_operand.vmem [shape: bf16[512,16], index: 3, kind: output, shape index: {}]  }
   0x1 LB: > { %s668_s13 = sadd.s32 4294967295, %s807_s12   ;;  %p672_p0 = scmp.ge.s32.totalorder %s807_s12, 1  ;;  %s807_s12 = sphi %s830_s12, %s13_s12  }
   0x2   : > { %p138_p1 = scmp.lt.s32.totalorder %s807_s12, 3 }
   0x4   : > { %p139_p2 = pnand %p672_p0, %p138_p1 }
   0x5   : > { %s673_s18 = sshll.u32 (!%p139_p2), %s668_s13, 5 }
   0x6   : > { %142 = sbr.rel (%p139_p2) target bundleno = 222 (0xde), region = 32  ;;  %p163_p3 = scmp.lt.s32.totalorder (!%p139_p2), %s673_s18, 63 }
   0xb   : > { %v747_v0 = vld [vmem:[%s1001_s1 + $0x8] sm:$0xf]  ;;  %v784_v1 = vld [vmem:[%s1001_s1 + $0x8] sm:$0x30]  ;;  %vm355_vm0 = vcmask 1044480   ;;  %vm356_vm1 = vcmask 1045504  }
   0xc   : > { %v748_v2 = vor.u32 %v784_v1, %v747_v0  ;;  %v809_v3 = vmov 65535   ;;  %s1005_s18 = smov (!%p163_p3, %s673_s18), 63  ;;  %v783_v7 = vld [vmem:[%s1001_s1] sm:$0xff]  ;;  %vm306_vm2 = vcmask 220160   ;;  %vm579_vm5 = vcmask 125952  }
   0xd   : > { %v357_v4 = vsel %vm355_vm0, 4294967295, %v809_v3  ;;  %s674_s21 = sshll.u32 %s1005_s18, 2  ;;  %v892_v24 = vld [vmem:[%s1002_s2] ss:$0 sm:$0xff] }
   0xe   : > { %v358_v5 = vsel %vm356_vm1, %v357_v4, 0  ;;  %s855_s24 = scalar_lea.vmem %s1000_s0, %s674_s21  ;;  %s901_s29 = scalar_lea.vmem %s1003_s3, %s674_s21 }
   0xf   : > { %v360_v6 = vand.u32 %v748_v2, %v358_v5  ;;  %v767_v8 = vld [vmem:[%s855_s24] sm:$0xff]  ;;  %v768_v12 = vld [vmem:[%s855_s24 + $0x8] sm:$0xff]  ;;  %v769_v16 = vld [vmem:[%s855_s24 + $0x10] sm:$0xff] }
  0x10   : > { %v771_v9 = vld [vmem:[%s855_s24 + $0x20] sm:$0xff]  ;;  %v772_v13 = vld [vmem:[%s855_s24 + $0x28] sm:$0xff]  ;;  %v773_v17 = vld [vmem:[%s855_s24 + $0x30] sm:$0xff] }
  0x11   : > { %368 = vmatpush.bf16.msra.mxu0 %v360_v6  ;;  %785 = vmatpush.bf16.msra.mxu1 %v360_v6  ;;  %v775_v10 = vld [vmem:[%s855_s24 + $0x40] sm:$0xff]  ;;  %v776_v14 = vld [vmem:[%s855_s24 + $0x48] sm:$0xff]  ;;  %v777_v18 = vld [vmem:[%s855_s24 + $0x50] sm:$0xff] }
  0x12   : > { %786 = vmatpush.bf16.msra.mxu2 %v360_v6  ;;  %787 = vmatpush.bf16.msra.mxu3 %v360_v6  ;;  %v779_v11 = vld [vmem:[%s855_s24 + $0x60] sm:$0xff]  ;;  %v780_v15 = vld [vmem:[%s855_s24 + $0x68] sm:$0xff]  ;;  %v781_v19 = vld [vmem:[%s855_s24 + $0x70] sm:$0xff] }
  0x13   : > { %v770_v20 = vld [vmem:[%s855_s24 + $0x18] sm:$0xff] }
  0x14   : > { %v774_v21 = vld [vmem:[%s855_s24 + $0x38] sm:$0xff] }
  0x15   : > { %369 = vmatpush.bf16.msra.mxu0 %v783_v7  ;;  %788 = vmatpush.bf16.msra.mxu1 %v783_v7  ;;  %v778_v22 = vld [vmem:[%s855_s24 + $0x58] sm:$0xff] }
  0x16   : > { %789 = vmatpush.bf16.msra.mxu2 %v783_v7  ;;  %790 = vmatpush.bf16.msra.mxu3 %v783_v7  ;;  %v782_v23 = vld [vmem:[%s855_s24 + $0x78] sm:$0xff] }
  0x18   : > { %749 = vmatmul.msk.bf16.vlgmr.msra.gmra.mxu0 %vm306_vm2, %v767_v8  ;;  %753 = vmatmul.msk.bf16.vlgmr.msra.gmra.mxu1 %vm306_vm2, %v771_v9 }
  0x19   : > { %757 = vmatmul.msk.bf16.vlgmr.msra.gmra.mxu2 %vm306_vm2, %v775_v10  ;;  %761 = vmatmul.msk.bf16.vlgmr.msra.gmra.mxu3 %vm306_vm2, %v779_v11 }
  0x28   : > { %750 = vmatmul.msk.bf16.gmra.mxu0 %vm306_vm2, %v768_v12  ;;  %754 = vmatmul.msk.bf16.gmra.mxu1 %vm306_vm2, %v772_v13 }
  0x29   : > { %758 = vmatmul.msk.bf16.gmra.mxu2 %vm306_vm2, %v776_v14  ;;  %762 = vmatmul.msk.bf16.gmra.mxu3 %vm306_vm2, %v780_v15 }
  0x38   : > { %751 = vmatmul.msk.bf16.gmra.mxu0 %vm306_vm2, %v769_v16  ;;  %755 = vmatmul.msk.bf16.gmra.mxu1 %vm306_vm2, %v773_v17 }
  0x39   : > { %759 = vmatmul.msk.bf16.gmra.mxu2 %vm306_vm2, %v777_v18  ;;  %763 = vmatmul.msk.bf16.gmra.mxu3 %vm306_vm2, %v781_v19 }
  0x48   : > { %752 = vmatmul.msk.bf16.gmra.mxu0 %vm306_vm2, %v770_v20  ;;  %756 = vmatmul.msk.bf16.gmra.mxu1 %vm306_vm2, %v774_v21 }
  0x49   : > { %760 = vmatmul.msk.bf16.gmra.mxu2 %vm306_vm2, %v778_v22  ;;  %764 = vmatmul.msk.bf16.gmra.mxu3 %vm306_vm2, %v782_v23 }
  0x95   : > { %v371_v25 = vpop.f32.mrf.mxu0  ;;  %v391_v26 = vpop.f32.mrf.mxu1 }
  0x96   : > { %v372_v27 = vadd.f32 %v892_v24, %v371_v25  ;;  %v392_v28 = vadd.f32 %v892_v24, %v391_v26 }
  0x98   : > { %vm451_vm3 = vcmp.ge.f32.partialorder %v372_v27, 0.0  ;;  %v483_v29 = vmul.f32 0.2, %v372_v27  ;;  %vm459_vm4 = vcmp.ge.f32.partialorder %v392_v28, 0.0  ;;  %v491_v30 = vmul.f32 0.2, %v392_v28 }
  0x9a   : > { %v515_v31 = vsel %vm451_vm3, %v372_v27, %v483_v29  ;;  %v523_v32 = vsel %vm459_vm4, %v392_v28, %v491_v30 }
  0x9b   : > { %v547_v33 = vpack.c.bf16 %v515_v31, %v515_v31  ;;  %v555_v34 = vpack.c.bf16 %v523_v32, %v523_v32 }
  0x9c   : > { %v411_v35 = vpop.f32.mrf.mxu2  ;;  %v431_v36 = vpop.f32.mrf.mxu3 }
  0x9d   : > { %580 = vst.msk [vmem:[%s901_s29] sm:$0xf] %vm579_vm5, %v547_v33  ;;  %v412_v37 = vadd.f32 %v892_v24, %v411_v35  ;;  %v432_v38 = vadd.f32 %v892_v24, %v431_v36  ;;  %v373_v39 = vpop.f32.mrf.mxu0  ;;  %v393_v40 = vpop.f32.mrf.mxu1 }
  0x9e   : > { %588 = vst.msk [vmem:[%s901_s29 + $0x20] sm:$0xf] %vm579_vm5, %v555_v34  ;;  %v374_v41 = vadd.f32 %v892_v24, %v373_v39  ;;  %v394_v42 = vadd.f32 %v892_v24, %v393_v40 }
  0x9f   : > { %vm467_vm6 = vcmp.ge.f32.partialorder %v412_v37, 0.0  ;;  %v499_v43 = vmul.f32 0.2, %v412_v37  ;;  %vm475_vm7 = vcmp.ge.f32.partialorder %v432_v38, 0.0  ;;  %v507_v44 = vmul.f32 0.2, %v432_v38 }
  0xa0   : > { %vm452_vm8 = vcmp.ge.f32.partialorder %v374_v41, 0.0  ;;  %v484_v45 = vmul.f32 0.2, %v374_v41  ;;  %vm460_vm9 = vcmp.ge.f32.partialorder %v394_v42, 0.0  ;;  %v492_v46 = vmul.f32 0.2, %v394_v42 }
  0xa1   : > { %v531_v47 = vsel %vm467_vm6, %v412_v37, %v499_v43  ;;  %v539_v48 = vsel %vm475_vm7, %v432_v38, %v507_v44 }
  0xa2   : > { %v563_v49 = vpack.c.bf16 %v531_v47, %v531_v47  ;;  %v571_v50 = vpack.c.bf16 %v539_v48, %v539_v48  ;;  %v516_v51 = vsel %vm452_vm8, %v374_v41, %v484_v45  ;;  %v524_v52 = vsel %vm460_vm9, %v394_v42, %v492_v46 }
  0xa3   : > { %v548_v53 = vpack.c.bf16 %v516_v51, %v516_v51  ;;  %v556_v54 = vpack.c.bf16 %v524_v52, %v524_v52 }
  0xa4   : > { %596 = vst.msk [vmem:[%s901_s29 + $0x40] sm:$0xf] %vm579_vm5, %v563_v49  ;;  %v413_v55 = vpop.f32.mrf.mxu2  ;;  %v433_v56 = vpop.f32.mrf.mxu3 }
  0xa5   : > { %604 = vst.msk [vmem:[%s901_s29 + $0x60] sm:$0xf] %vm579_vm5, %v571_v50  ;;  %v414_v57 = vadd.f32 %v892_v24, %v413_v55  ;;  %v434_v58 = vadd.f32 %v892_v24, %v433_v56  ;;  %v376_v59 = vpop.f32.mrf.mxu0  ;;  %v396_v60 = vpop.f32.mrf.mxu1 }
  0xa6   : > { %581 = vst.msk [vmem:[%s901_s29 + $0x4] sm:$0xf] %vm579_vm5, %v548_v53  ;;  %v377_v61 = vadd.f32 %v892_v24, %v376_v59  ;;  %v397_v62 = vadd.f32 %v892_v24, %v396_v60 }
  0xa7   : > { %589 = vst.msk [vmem:[%s901_s29 + $0x24] sm:$0xf] %vm579_vm5, %v556_v54  ;;  %vm468_vm10 = vcmp.ge.f32.partialorder %v414_v57, 0.0  ;;  %v500_v63 = vmul.f32 0.2, %v414_v57  ;;  %vm476_vm11 = vcmp.ge.f32.partialorder %v434_v58, 0.0 }
  0xa8   : > { %v508_v0 = vmul.f32 0.2, %v434_v58  ;;  %vm453_vm12 = vcmp.ge.f32.partialorder %v377_v61, 0.0  ;;  %v485_v1 = vmul.f32 0.2, %v377_v61  ;;  %vm461_vm13 = vcmp.ge.f32.partialorder %v397_v62, 0.0 }
  0xa9   : > { %v532_v2 = vsel %vm468_vm10, %v414_v57, %v500_v63  ;;  %v493_v3 = vmul.f32 0.2, %v397_v62 }
  0xaa   : > { %v564_v4 = vpack.c.bf16 %v532_v2, %v532_v2  ;;  %v540_v5 = vsel %vm476_vm11, %v434_v58, %v508_v0  ;;  %v517_v6 = vsel %vm453_vm12, %v377_v61, %v485_v1 }
  0xab   : > { %v572_v7 = vpack.c.bf16 %v540_v5, %v540_v5  ;;  %v549_v8 = vpack.c.bf16 %v517_v6, %v517_v6  ;;  %v525_v9 = vsel %vm461_vm13, %v397_v62, %v493_v3 }
  0xac   : > { %597 = vst.msk [vmem:[%s901_s29 + $0x44] sm:$0xf] %vm579_vm5, %v564_v4  ;;  %v557_v10 = vpack.c.bf16 %v525_v9, %v525_v9  ;;  %v416_v11 = vpop.f32.mrf.mxu2  ;;  %v436_v12 = vpop.f32.mrf.mxu3 }
  0xad   : > { %605 = vst.msk [vmem:[%s901_s29 + $0x64] sm:$0xf] %vm579_vm5, %v572_v7  ;;  %v417_v13 = vadd.f32 %v892_v24, %v416_v11  ;;  %v437_v14 = vadd.f32 %v892_v24, %v436_v12  ;;  %v378_v15 = vpop.f32.mrf.mxu0  ;;  %v398_v16 = vpop.f32.mrf.mxu1 }
  0xae   : > { %582 = vst.msk [vmem:[%s901_s29 + $0x8] sm:$0xf] %vm579_vm5, %v549_v8  ;;  %v379_v17 = vadd.f32 %v892_v24, %v378_v15  ;;  %v399_v18 = vadd.f32 %v892_v24, %v398_v16 }
  0xaf   : > { %590 = vst.msk [vmem:[%s901_s29 + $0x28] sm:$0xf] %vm579_vm5, %v557_v10  ;;  %vm469_vm14 = vcmp.ge.f32.partialorder %v417_v13, 0.0  ;;  %v501_v19 = vmul.f32 0.2, %v417_v13  ;;  %vm477_vm15 = vcmp.ge.f32.partialorder %v437_v14, 0.0 }
  0xb0   : > { %v509_v20 = vmul.f32 0.2, %v437_v14  ;;  %vm454_vm0 = vcmp.ge.f32.partialorder %v379_v17, 0.0  ;;  %v486_v21 = vmul.f32 0.2, %v379_v17  ;;  %vm462_vm1 = vcmp.ge.f32.partialorder %v399_v18, 0.0 }
  0xb1   : > { %v533_v22 = vsel %vm469_vm14, %v417_v13, %v501_v19  ;;  %v494_v23 = vmul.f32 0.2, %v399_v18 }
  0xb2   : > { %v565_v25 = vpack.c.bf16 %v533_v22, %v533_v22  ;;  %v541_v26 = vsel %vm477_vm15, %v437_v14, %v509_v20  ;;  %v518_v27 = vsel %vm454_vm0, %v379_v17, %v486_v21 }
  0xb3   : > { %v573_v28 = vpack.c.bf16 %v541_v26, %v541_v26  ;;  %v550_v29 = vpack.c.bf16 %v518_v27, %v518_v27  ;;  %v526_v30 = vsel %vm462_vm1, %v399_v18, %v494_v23 }
  0xb4   : > { %598 = vst.msk [vmem:[%s901_s29 + $0x48] sm:$0xf] %vm579_vm5, %v565_v25  ;;  %v558_v31 = vpack.c.bf16 %v526_v30, %v526_v30  ;;  %v418_v32 = vpop.f32.mrf.mxu2  ;;  %v438_v33 = vpop.f32.mrf.mxu3 }
  0xb5   : > { %606 = vst.msk [vmem:[%s901_s29 + $0x68] sm:$0xf] %vm579_vm5, %v573_v28  ;;  %v419_v34 = vadd.f32 %v892_v24, %v418_v32  ;;  %v439_v35 = vadd.f32 %v892_v24, %v438_v33  ;;  %v381_v36 = vpop.f32.mrf.mxu0  ;;  %v401_v37 = vpop.f32.mrf.mxu1 }
  0xb6   : > { %583 = vst.msk [vmem:[%s901_s29 + $0xc] sm:$0xf] %vm579_vm5, %v550_v29  ;;  %v382_v38 = vadd.f32 %v892_v24, %v381_v36  ;;  %v402_v39 = vadd.f32 %v892_v24, %v401_v37 }
  0xb7   : > { %591 = vst.msk [vmem:[%s901_s29 + $0x2c] sm:$0xf] %vm579_vm5, %v558_v31  ;;  %vm470_vm2 = vcmp.ge.f32.partialorder %v419_v34, 0.0  ;;  %v502_v40 = vmul.f32 0.2, %v419_v34  ;;  %vm478_vm3 = vcmp.ge.f32.partialorder %v439_v35, 0.0 }
  0xb8   : > { %v510_v41 = vmul.f32 0.2, %v439_v35  ;;  %vm455_vm4 = vcmp.ge.f32.partialorder %v382_v38, 0.0  ;;  %v487_v42 = vmul.f32 0.2, %v382_v38  ;;  %vm463_vm6 = vcmp.ge.f32.partialorder %v402_v39, 0.0 }
  0xb9   : > { %v534_v43 = vsel %vm470_vm2, %v419_v34, %v502_v40  ;;  %v495_v44 = vmul.f32 0.2, %v402_v39 }
  0xba   : > { %v566_v45 = vpack.c.bf16 %v534_v43, %v534_v43  ;;  %v542_v46 = vsel %vm478_vm3, %v439_v35, %v510_v41  ;;  %v519_v47 = vsel %vm455_vm4, %v382_v38, %v487_v42 }
  0xbb   : > { %v574_v48 = vpack.c.bf16 %v542_v46, %v542_v46  ;;  %v551_v49 = vpack.c.bf16 %v519_v47, %v519_v47  ;;  %v527_v50 = vsel %vm463_vm6, %v402_v39, %v495_v44 }
  0xbc   : > { %599 = vst.msk [vmem:[%s901_s29 + $0x4c] sm:$0xf] %vm579_vm5, %v566_v45  ;;  %v559_v51 = vpack.c.bf16 %v527_v50, %v527_v50  ;;  %v421_v52 = vpop.f32.mrf.mxu2  ;;  %v441_v53 = vpop.f32.mrf.mxu3 }
  0xbd   : > { %607 = vst.msk [vmem:[%s901_s29 + $0x6c] sm:$0xf] %vm579_vm5, %v574_v48  ;;  %v422_v54 = vadd.f32 %v892_v24, %v421_v52  ;;  %v442_v55 = vadd.f32 %v892_v24, %v441_v53  ;;  %v383_v56 = vpop.f32.mrf.mxu0  ;;  %v403_v57 = vpop.f32.mrf.mxu1 }
  0xbe   : > { %584 = vst.msk [vmem:[%s901_s29 + $0x10] sm:$0xf] %vm579_vm5, %v551_v49  ;;  %v384_v58 = vadd.f32 %v892_v24, %v383_v56  ;;  %v404_v59 = vadd.f32 %v892_v24, %v403_v57 }
  0xbf   : > { %592 = vst.msk [vmem:[%s901_s29 + $0x30] sm:$0xf] %vm579_vm5, %v559_v51  ;;  %vm471_vm7 = vcmp.ge.f32.partialorder %v422_v54, 0.0  ;;  %v503_v60 = vmul.f32 0.2, %v422_v54  ;;  %vm479_vm8 = vcmp.ge.f32.partialorder %v442_v55, 0.0 }
  0xc0   : > { %v511_v61 = vmul.f32 0.2, %v442_v55  ;;  %vm456_vm9 = vcmp.ge.f32.partialorder %v384_v58, 0.0  ;;  %v488_v62 = vmul.f32 0.2, %v384_v58  ;;  %vm464_vm10 = vcmp.ge.f32.partialorder %v404_v59, 0.0 }
  0xc1   : > { %v535_v63 = vsel %vm471_vm7, %v422_v54, %v503_v60  ;;  %v496_v0 = vmul.f32 0.2, %v404_v59 }
  0xc2   : > { %v567_v1 = vpack.c.bf16 %v535_v63, %v535_v63  ;;  %v543_v2 = vsel %vm479_vm8, %v442_v55, %v511_v61  ;;  %v520_v3 = vsel %vm456_vm9, %v384_v58, %v488_v62 }
  0xc3   : > { %v575_v4 = vpack.c.bf16 %v543_v2, %v543_v2  ;;  %v552_v5 = vpack.c.bf16 %v520_v3, %v520_v3  ;;  %v528_v6 = vsel %vm464_vm10, %v404_v59, %v496_v0 }
  0xc4   : > { %600 = vst.msk [vmem:[%s901_s29 + $0x50] sm:$0xf] %vm579_vm5, %v567_v1  ;;  %v560_v7 = vpack.c.bf16 %v528_v6, %v528_v6  ;;  %v423_v8 = vpop.f32.mrf.mxu2  ;;  %v443_v9 = vpop.f32.mrf.mxu3 }
  0xc5   : > { %608 = vst.msk [vmem:[%s901_s29 + $0x70] sm:$0xf] %vm579_vm5, %v575_v4  ;;  %v424_v10 = vadd.f32 %v892_v24, %v423_v8  ;;  %v444_v11 = vadd.f32 %v892_v24, %v443_v9  ;;  %v386_v12 = vpop.f32.mrf.mxu0  ;;  %v406_v13 = vpop.f32.mrf.mxu1 }
  0xc6   : > { %585 = vst.msk [vmem:[%s901_s29 + $0x14] sm:$0xf] %vm579_vm5, %v552_v5  ;;  %v387_v14 = vadd.f32 %v892_v24, %v386_v12  ;;  %v407_v15 = vadd.f32 %v892_v24, %v406_v13 }
  0xc7   : > { %593 = vst.msk [vmem:[%s901_s29 + $0x34] sm:$0xf] %vm579_vm5, %v560_v7  ;;  %vm472_vm11 = vcmp.ge.f32.partialorder %v424_v10, 0.0  ;;  %v504_v16 = vmul.f32 0.2, %v424_v10  ;;  %vm480_vm12 = vcmp.ge.f32.partialorder %v444_v11, 0.0 }
  0xc8   : > { %v512_v17 = vmul.f32 0.2, %v444_v11  ;;  %vm457_vm13 = vcmp.ge.f32.partialorder %v387_v14, 0.0  ;;  %v489_v18 = vmul.f32 0.2, %v387_v14  ;;  %vm465_vm14 = vcmp.ge.f32.partialorder %v407_v15, 0.0 }
  0xc9   : > { %v536_v19 = vsel %vm472_vm11, %v424_v10, %v504_v16  ;;  %v497_v20 = vmul.f32 0.2, %v407_v15 }
  0xca   : > { %v568_v21 = vpack.c.bf16 %v536_v19, %v536_v19  ;;  %v544_v22 = vsel %vm480_vm12, %v444_v11, %v512_v17  ;;  %v521_v23 = vsel %vm457_vm13, %v387_v14, %v489_v18 }
  0xcb   : > { %v576_v25 = vpack.c.bf16 %v544_v22, %v544_v22  ;;  %v553_v26 = vpack.c.bf16 %v521_v23, %v521_v23  ;;  %v529_v27 = vsel %vm465_vm14, %v407_v15, %v497_v20 }
  0xcc   : > { %601 = vst.msk [vmem:[%s901_s29 + $0x54] sm:$0xf] %vm579_vm5, %v568_v21  ;;  %v561_v28 = vpack.c.bf16 %v529_v27, %v529_v27  ;;  %v426_v29 = vpop.f32.mrf.mxu2  ;;  %v446_v30 = vpop.f32.mrf.mxu3 }
  0xcd   : > { %609 = vst.msk [vmem:[%s901_s29 + $0x74] sm:$0xf] %vm579_vm5, %v576_v25  ;;  %v427_v31 = vadd.f32 %v892_v24, %v426_v29  ;;  %v447_v32 = vadd.f32 %v892_v24, %v446_v30  ;;  %v388_v33 = vpop.f32.mrf.mxu0  ;;  %v408_v34 = vpop.f32.mrf.mxu1 }
  0xce   : > { %586 = vst.msk [vmem:[%s901_s29 + $0x18] sm:$0xf] %vm579_vm5, %v553_v26  ;;  %v389_v35 = vadd.f32 %v892_v24, %v388_v33  ;;  %v409_v36 = vadd.f32 %v892_v24, %v408_v34 }
  0xcf   : > { %594 = vst.msk [vmem:[%s901_s29 + $0x38] sm:$0xf] %vm579_vm5, %v561_v28  ;;  %vm473_vm15 = vcmp.ge.f32.partialorder %v427_v31, 0.0  ;;  %v505_v37 = vmul.f32 0.2, %v427_v31  ;;  %vm481_vm0 = vcmp.ge.f32.partialorder %v447_v32, 0.0 }
  0xd0   : > { %v513_v38 = vmul.f32 0.2, %v447_v32  ;;  %vm458_vm1 = vcmp.ge.f32.partialorder %v389_v35, 0.0  ;;  %v490_v39 = vmul.f32 0.2, %v389_v35  ;;  %vm466_vm2 = vcmp.ge.f32.partialorder %v409_v36, 0.0 }
  0xd1   : > { %v537_v40 = vsel %vm473_vm15, %v427_v31, %v505_v37  ;;  %v498_v41 = vmul.f32 0.2, %v409_v36 }
  0xd2   : > { %v569_v42 = vpack.c.bf16 %v537_v40, %v537_v40  ;;  %v545_v43 = vsel %vm481_vm0, %v447_v32, %v513_v38  ;;  %v522_v44 = vsel %vm458_vm1, %v389_v35, %v490_v39 }
  0xd3   : > { %v577_v45 = vpack.c.bf16 %v545_v43, %v545_v43  ;;  %v554_v46 = vpack.c.bf16 %v522_v44, %v522_v44  ;;  %v530_v47 = vsel %vm466_vm2, %v409_v36, %v498_v41 }
  0xd4   : > { %602 = vst.msk [vmem:[%s901_s29 + $0x58] sm:$0xf] %vm579_vm5, %v569_v42  ;;  %v562_v48 = vpack.c.bf16 %v530_v47, %v530_v47  ;;  %v428_v49 = vpop.f32.mrf.mxu2  ;;  %v448_v50 = vpop.f32.mrf.mxu3 }
  0xd5   : > { %610 = vst.msk [vmem:[%s901_s29 + $0x78] sm:$0xf] %vm579_vm5, %v577_v45  ;;  %v429_v51 = vadd.f32 %v892_v24, %v428_v49  ;;  %v449_v52 = vadd.f32 %v892_v24, %v448_v50 }
  0xd6   : > { %587 = vst.msk [vmem:[%s901_s29 + $0x1c] sm:$0xf] %vm579_vm5, %v554_v46 }
  0xd7   : > { %595 = vst.msk [vmem:[%s901_s29 + $0x3c] sm:$0xf] %vm579_vm5, %v562_v48  ;;  %vm474_vm3 = vcmp.ge.f32.partialorder %v429_v51, 0.0  ;;  %v506_v53 = vmul.f32 0.2, %v429_v51  ;;  %vm482_vm4 = vcmp.ge.f32.partialorder %v449_v52, 0.0 }
  0xd8   : > { %v514_v54 = vmul.f32 0.2, %v449_v52 }
  0xd9   : > { %v538_v55 = vsel %vm474_vm3, %v429_v51, %v506_v53 }
  0xda   : > { %v570_v56 = vpack.c.bf16 %v538_v55, %v538_v55  ;;  %v546_v57 = vsel %vm482_vm4, %v449_v52, %v514_v54 }
  0xdb   : > { %v578_v58 = vpack.c.bf16 %v546_v57, %v546_v57 }
  0xdc   : > { %603 = vst.msk [vmem:[%s901_s29 + $0x5c] sm:$0xf] %vm579_vm5, %v570_v56 }
  0xdd   : > { %611 = vst.msk [vmem:[%s901_s29 + $0x7c] sm:$0xf] %vm579_vm5, %v578_v58 }
  0xde PF: > { %s13_s12 = sadd.s32 1, %s807_s12  }
  0xdf   : > { %p10_p4 = scmp.ge.s32.totalorder %s13_s12, 4  }
  0xe1   :  { %12 = sbr.rel (!%p10_p4) target bundleno = 1 (0x1), region = 62 }

// kernel: _lambda_.15
= control target key start
LH: loop header
LB: loop body
LE: loop exit
PB: predicated region body
PF: predicated region fallthrough
CT: control target
= control target key end

     0   :  { %vm179_vm0 = vcmask 130048   ;;  %vm366_vm2 = vcmask 257024   ;;  %s772_s1 = inlined_call_operand.vmem [shape: bf16[144,32], index: 1, kind: input, shape index: {}]   ;;  %s773_s0 = inlined_call_operand.vmem [shape: bf16[128,144], index: 0, kind: input, shape index: {}]   ;;  %s774_s2 = inlined_call_operand.vmem [shape: f32[1,32], index: 2, kind: input, shape index: {}]   ;;  %s775_s3 = inlined_call_operand.vmem [shape: bf16[128,32], index: 3, kind: output, shape index: {}]  }
   0x1   :  { %v518_v0 = vld [vmem:[%s772_s1 + $0x38] sm:$0xff]  ;;  %v519_v1 = vld [vmem:[%s772_s1 + $0x40] sm:$0xff]  ;;  %v391_v3 = vld [vmem:[%s773_s0 + $0x8] sm:$0xf0] }
   0x2   :  { %v495_v2 = vld [vmem:[%s773_s0 + $0x4] sm:$0xf]  ;;  %204 = vmatpush.bf16.msra.mxu0 %v518_v0  ;;  %520 = vmatpush.bf16.msra.mxu2 %v518_v0  ;;  %v517_v5 = vld [vmem:[%s772_s1 + $0x30] sm:$0xff]  ;;  %v516_v6 = vld [vmem:[%s772_s1 + $0x28] sm:$0xff] }
   0x3   :  { %v394_v4 = vor.u32 %v495_v2, %v391_v3  ;;  %260 = vmatpush.bf16.msra.mxu1 %v519_v1  ;;  %528 = vmatpush.bf16.msra.mxu3 %v519_v1  ;;  %v505_v7 = vld [vmem:[%s773_s0 + $0x54] sm:$0xf]  ;;  %v431_v8 = vld [vmem:[%s773_s0 + $0x58] sm:$0xf0]  ;;  %v515_v10 = vld [vmem:[%s772_s1 + $0x20] sm:$0xff] }
   0x4   :  { %v434_v9 = vor.u32 %v505_v7, %v431_v8  ;;  %v514_v11 = vld [vmem:[%s772_s1 + $0x18] sm:$0xff]  ;;  %v497_v12 = vld [vmem:[%s773_s0 + $0x14] sm:$0xf]  ;;  %v512_v16 = vld [vmem:[%s772_s1 + $0x8] sm:$0xff] }
   0x5   :  { %v399_v13 = vld [vmem:[%s773_s0 + $0x18] sm:$0xf0]  ;;  %v513_v15 = vld [vmem:[%s772_s1 + $0x10] sm:$0xff]  ;;  %v507_v17 = vld [vmem:[%s773_s0 + $0x64] sm:$0xf] }
   0x6   :  { %487 = vmatmul.msk.bf16.vlgmr.msra.gmra.mxu1 %vm179_vm0, %v394_v4  ;;  %205 = vmatpush.bf16.msra.mxu0 %v517_v5  ;;  %v402_v14 = vor.u32 %v497_v12, %v399_v13  ;;  %v439_v18 = vld [vmem:[%s773_s0 + $0x68] sm:$0xf0]  ;;  %v511_v20 = vld [vmem:[%s772_s1] sm:$0xff]  ;;  %v496_v22 = vld [vmem:[%s773_s0 + $0x4] sm:$0xf0] }
   0x7   :  { %521 = vmatpush.bf16.msra.mxu2 %v517_v5  ;;  %492 = vmatmul.msk.bf16.vlgmr.msra.gmra.mxu3 %vm179_vm0, %v434_v9  ;;  %v442_v19 = vor.u32 %v507_v17, %v439_v18  ;;  %v389_v21 = vld [vmem:[%s773_s0] sm:$0xf]  ;;  %v504_v24 = vld [vmem:[%s773_s0 + $0x44] sm:$0xf0]  ;;  %v499_v27 = vld [vmem:[%s773_s0 + $0x24] sm:$0xf] }
   0x8   :  { %v421_v23 = vld [vmem:[%s773_s0 + $0x40] sm:$0xf]  ;;  %v390_v25 = vor.u32 %v496_v22, %v389_v21  ;;  %v407_v28 = vld [vmem:[%s773_s0 + $0x28] sm:$0xf0]  ;;  %v509_v30 = vld [vmem:[%s773_s0 + $0x74] sm:$0xf] }
   0x9   :  { %v422_v26 = vor.u32 %v504_v24, %v421_v23  ;;  %v410_v29 = vor.u32 %v499_v27, %v407_v28  ;;  %v447_v31 = vld [vmem:[%s773_s0 + $0x78] sm:$0xf0]  ;;  %v397_v33 = vld [vmem:[%s773_s0 + $0x10] sm:$0xf]  ;;  %v498_v34 = vld [vmem:[%s773_s0 + $0x14] sm:$0xf0] }
   0xa   :  { %206 = vmatpush.bf16.msra.mxu0 %v516_v6  ;;  %v450_v32 = vor.u32 %v509_v30, %v447_v31  ;;  %v429_v35 = vld [vmem:[%s773_s0 + $0x50] sm:$0xf]  ;;  %v506_v36 = vld [vmem:[%s773_s0 + $0x54] sm:$0xf0]  ;;  %v398_v37 = vor.u32 %v498_v34, %v397_v33  ;;  %v501_v39 = vld [vmem:[%s773_s0 + $0x34] sm:$0xf] }
   0xb   :  { %522 = vmatpush.bf16.msra.mxu2 %v516_v6  ;;  %v430_v38 = vor.u32 %v506_v36, %v429_v35  ;;  %v415_v40 = vld [vmem:[%s773_s0 + $0x38] sm:$0xf0]  ;;  %v405_v42 = vld [vmem:[%s773_s0 + $0x20] sm:$0xf]  ;;  %v500_v43 = vld [vmem:[%s773_s0 + $0x24] sm:$0xf0] }
   0xc   :  { %v418_v41 = vor.u32 %v501_v39, %v415_v40  ;;  %v437_v44 = vld [vmem:[%s773_s0 + $0x60] sm:$0xf]  ;;  %v508_v45 = vld [vmem:[%s773_s0 + $0x64] sm:$0xf0]  ;;  %v406_v46 = vor.u32 %v500_v43, %v405_v42  ;;  %v503_v48 = vld [vmem:[%s773_s0 + $0x44] sm:$0xf] }
   0xd   :  { %v438_v47 = vor.u32 %v508_v45, %v437_v44  ;;  %v423_v49 = vld [vmem:[%s773_s0 + $0x48] sm:$0xf0]  ;;  %v413_v51 = vld [vmem:[%s773_s0 + $0x30] sm:$0xf]  ;;  %v502_v52 = vld [vmem:[%s773_s0 + $0x34] sm:$0xf0] }
   0xe   :  { %207 = vmatpush.bf16.msra.mxu0 %v515_v10  ;;  %v426_v50 = vor.u32 %v503_v48, %v423_v49  ;;  %v445_v53 = vld [vmem:[%s773_s0 + $0x70] sm:$0xf]  ;;  %v510_v54 = vld [vmem:[%s773_s0 + $0x74] sm:$0xf0]  ;;  %v414_v55 = vor.u32 %v502_v52, %v413_v51  ;;  %v684_v61 = vld [vmem:[%s774_s2] ss:$0 sm:$0xff] }
   0xf   :  { %523 = vmatpush.bf16.msra.mxu2 %v515_v10  ;;  %v446_v56 = vor.u32 %v510_v54, %v445_v53 }
  0x12   :  { %208 = vmatpush.bf16.msra.mxu0 %v514_v11 }
  0x13   :  { %524 = vmatpush.bf16.msra.mxu2 %v514_v11 }
  0x16   :  { %488 = vmatmul.msk.bf16.gmra.mxu1 %vm179_vm0, %v402_v14  ;;  %209 = vmatpush.bf16.msra.mxu0 %v513_v15 }
  0x17   :  { %525 = vmatpush.bf16.msra.mxu2 %v513_v15  ;;  %493 = vmatmul.msk.bf16.gmra.mxu3 %vm179_vm0, %v442_v19 }
  0x1a   :  { %210 = vmatpush.bf16.msra.mxu0 %v512_v16 }
  0x1b   :  { %526 = vmatpush.bf16.msra.mxu2 %v512_v16 }
  0x1e   :  { %211 = vmatpush.bf16.msra.mxu0 %v511_v20 }
  0x1f   :  { %527 = vmatpush.bf16.msra.mxu2 %v511_v20 }
  0x21   :  { %212 = vmatmul.bf16.vlgmr.msra.gmra.mxu0 %v390_v25 }
  0x22   :  { %232 = vmatmul.bf16.vlgmr.msra.gmra.mxu2 %v422_v26 }
  0x26   :  { %489 = vmatmul.msk.bf16.gmra.mxu1 %vm179_vm0, %v410_v29 }
  0x27   :  { %494 = vmatmul.msk.bf16.gmra.mxu3 %vm179_vm0, %v450_v32 }
  0x31   :  { %217 = vmatmul.bf16.gmra.mxu0 %v398_v37 }
  0x32   :  { %237 = vmatmul.bf16.gmra.mxu2 %v430_v38 }
  0x36   :  { %490 = vmatmul.msk.bf16.gmra.mxu1 %vm179_vm0, %v418_v41 }
  0x41   :  { %222 = vmatmul.bf16.gmra.mxu0 %v406_v46 }
  0x42   :  { %242 = vmatmul.bf16.gmra.mxu2 %v438_v47 }
  0x46   :  { %491 = vmatmul.msk.bf16.gmra.mxu1 %vm179_vm0, %v426_v50 }
  0x51   :  { %227 = vmatmul.bf16.gmra.mxu0 %v414_v55 }
  0x52   :  { %247 = vmatmul.bf16.gmra.mxu2 %v446_v56 }
  0x83   :  { %v262_v57 = vpop.f32.mrf.mxu1 }
  0x8a   :  { %v287_v13 = vpop.f32.mrf.mxu3 }
  0x8b   :  { %v264_v58 = vpop.f32.mrf.mxu1 }
  0x92   :  { %v289_v26 = vpop.f32.mrf.mxu3 }
  0x93   :  { %v267_v59 = vpop.f32.mrf.mxu1 }
  0x9a   :  { %v292_v42 = vpop.f32.mrf.mxu3 }
  0x9b   :  { %v269_v60 = vpop.f32.mrf.mxu1 }
  0x9e   :  { %v213_v62 = vpop.f32.mrf.mxu0 }
  0x9f   :  { %v214_v63 = vadd.f32 %v684_v61, %v213_v62 }
  0xa1   :  { %v263_v0 = vadd.f32 %v262_v57, %v214_v63 }
  0xa3   :  { %vm302_vm1 = vcmp.ge.f32.partialorder %v263_v0, 0.0  ;;  %v318_v1 = vmul.f32 0.2, %v263_v0  ;;  %v272_v2 = vpop.f32.mrf.mxu1 }
  0xa5   :  { %v334_v3 = vsel %vm302_vm1, %v263_v0, %v318_v1  ;;  %v233_v4 = vpop.f32.mrf.mxu2  ;;  %v294_v1 = vpop.f32.mrf.mxu3 }
  0xa6   :  { %v350_v5 = vpack.c.bf16 %v334_v3, %v334_v3  ;;  %v215_v6 = vpop.f32.mrf.mxu0  ;;  %v234_v43 = vadd.f32 %v684_v61, %v233_v4 }
  0xa7   :  { %v216_v7 = vadd.f32 %v684_v61, %v215_v6 }
  0xa8   :  { %367 = vst.msk [vmem:[%s775_s3] sm:$0xf] %vm366_vm2, %v350_v5 }
  0xa9   :  { %v265_v8 = vadd.f32 %v264_v58, %v216_v7 }
  0xab   :  { %vm303_vm3 = vcmp.ge.f32.partialorder %v265_v8, 0.0  ;;  %v319_v9 = vmul.f32 0.2, %v265_v8  ;;  %v274_v10 = vpop.f32.mrf.mxu1 }
  0xad   :  { %v335_v11 = vsel %vm303_vm3, %v265_v8, %v319_v9  ;;  %v235_v12 = vpop.f32.mrf.mxu2 }
  0xae   :  { %v351_v14 = vpack.c.bf16 %v335_v11, %v335_v11  ;;  %v218_v15 = vpop.f32.mrf.mxu0  ;;  %v236_v62 = vadd.f32 %v684_v61, %v235_v12 }
  0xaf   :  { %v219_v16 = vadd.f32 %v684_v61, %v218_v15 }
  0xb0   :  { %368 = vst.msk [vmem:[%s775_s3 + $0x4] sm:$0xf] %vm366_vm2, %v351_v14 }
  0xb1   :  { %v268_v17 = vadd.f32 %v267_v59, %v219_v16 }
  0xb3   :  { %vm304_vm4 = vcmp.ge.f32.partialorder %v268_v17, 0.0  ;;  %v320_v18 = vmul.f32 0.2, %v268_v17  ;;  %v697_v19 = vpop.f32.mrf.mxu1 }
  0xb5   :  { %v336_v20 = vsel %vm304_vm4, %v268_v17, %v320_v18  ;;  %v238_v21 = vpop.f32.mrf.mxu2 }
  0xb6   :  { %v352_v22 = vpack.c.bf16 %v336_v20, %v336_v20  ;;  %v239_v23 = vadd.f32 %v684_v61, %v238_v21  ;;  %v220_v24 = vpop.f32.mrf.mxu0 }
  0xb7   :  { %v221_v25 = vadd.f32 %v684_v61, %v220_v24 }
  0xb8   :  { %369 = vst.msk [vmem:[%s775_s3 + $0x8] sm:$0xf] %vm366_vm2, %v352_v22  ;;  %v288_v27 = vadd.f32 %v287_v13, %v239_v23  ;;  %v297_v23 = vpop.f32.mrf.mxu3 }
  0xb9   :  { %v270_v28 = vadd.f32 %v269_v60, %v221_v25 }
  0xba   :  { %vm312_vm5 = vcmp.ge.f32.partialorder %v288_v27, 0.0  ;;  %v328_v29 = vmul.f32 0.2, %v288_v27 }
  0xbb   :  { %vm305_vm6 = vcmp.ge.f32.partialorder %v270_v28, 0.0  ;;  %v321_v30 = vmul.f32 0.2, %v270_v28  ;;  %v705_v31 = vpop.f32.mrf.mxu1 }
  0xbc   :  { %v344_v32 = vsel %vm312_vm5, %v288_v27, %v328_v29 }
  0xbd   :  { %v360_v33 = vpack.c.bf16 %v344_v32, %v344_v32  ;;  %v337_v34 = vsel %vm305_vm6, %v270_v28, %v321_v30  ;;  %v240_v35 = vpop.f32.mrf.mxu2 }
  0xbe   :  { %v353_v36 = vpack.c.bf16 %v337_v34, %v337_v34  ;;  %v241_v37 = vadd.f32 %v684_v61, %v240_v35  ;;  %v223_v38 = vpop.f32.mrf.mxu0 }
  0xbf   :  { %377 = vst.msk [vmem:[%s775_s3 + $0x28] sm:$0xf] %vm366_vm2, %v360_v33  ;;  %v224_v39 = vadd.f32 %v684_v61, %v223_v38 }
  0xc0   :  { %370 = vst.msk [vmem:[%s775_s3 + $0xc] sm:$0xf] %vm366_vm2, %v353_v36  ;;  %v290_v40 = vadd.f32 %v289_v26, %v241_v37 }
  0xc1   :  { %v273_v41 = vadd.f32 %v272_v2, %v224_v39  ;;  %v299_v39 = vpop.f32.mrf.mxu3 }
  0xc2   :  { %vm313_vm7 = vcmp.ge.f32.partialorder %v290_v40, 0.0  ;;  %v329_v44 = vmul.f32 0.2, %v290_v40 }
  0xc3   :  { %vm306_vm8 = vcmp.ge.f32.partialorder %v273_v41, 0.0  ;;  %v322_v45 = vmul.f32 0.2, %v273_v41  ;;  %v282_v46 = vpop.f32.mrf.mxu1 }
  0xc4   :  { %v345_v47 = vsel %vm313_vm7, %v290_v40, %v329_v44  ;;  %v283_v48 = vadd.f32 %v282_v46, %v234_v43 }
  0xc5   :  { %v361_v49 = vpack.c.bf16 %v345_v47, %v345_v47  ;;  %v338_v50 = vsel %vm306_vm8, %v273_v41, %v322_v45  ;;  %v243_v51 = vpop.f32.mrf.mxu2 }
  0xc6   :  { %v354_v52 = vpack.c.bf16 %v338_v50, %v338_v50  ;;  %vm310_vm9 = vcmp.ge.f32.partialorder %v283_v48, 0.0  ;;  %v326_v53 = vmul.f32 0.2, %v283_v48  ;;  %v244_v54 = vadd.f32 %v684_v61, %v243_v51  ;;  %v225_v55 = vpop.f32.mrf.mxu0 }
  0xc7   :  { %378 = vst.msk [vmem:[%s775_s3 + $0x2c] sm:$0xf] %vm366_vm2, %v361_v49  ;;  %v226_v56 = vadd.f32 %v684_v61, %v225_v55 }
  0xc8   :  { %371 = vst.msk [vmem:[%s775_s3 + $0x10] sm:$0xf] %vm366_vm2, %v354_v52  ;;  %v342_v57 = vsel %vm310_vm9, %v283_v48, %v326_v53  ;;  %v293_v58 = vadd.f32 %v292_v42, %v244_v54 }
  0xc9   :  { %v358_v59 = vpack.c.bf16 %v342_v57, %v342_v57  ;;  %v275_v60 = vadd.f32 %v274_v10, %v226_v56 }
  0xca   :  { %vm314_vm10 = vcmp.ge.f32.partialorder %v293_v58, 0.0  ;;  %v330_v63 = vmul.f32 0.2, %v293_v58 }
  0xcb   :  { %375 = vst.msk [vmem:[%s775_s3 + $0x20] sm:$0xf] %vm366_vm2, %v358_v59  ;;  %vm307_vm11 = vcmp.ge.f32.partialorder %v275_v60, 0.0  ;;  %v323_v0 = vmul.f32 0.2, %v275_v60  ;;  %v284_v2 = vpop.f32.mrf.mxu1 }
  0xcc   :  { %v346_v3 = vsel %vm314_vm10, %v293_v58, %v330_v63  ;;  %v285_v4 = vadd.f32 %v284_v2, %v236_v62 }
  0xcd   :  { %v362_v5 = vpack.c.bf16 %v346_v3, %v346_v3  ;;  %v339_v6 = vsel %vm307_vm11, %v275_v60, %v323_v0  ;;  %v245_v7 = vpop.f32.mrf.mxu2 }
  0xce   :  { %v355_v8 = vpack.c.bf16 %v339_v6, %v339_v6  ;;  %vm311_vm12 = vcmp.ge.f32.partialorder %v285_v4, 0.0  ;;  %v327_v9 = vmul.f32 0.2, %v285_v4  ;;  %v246_v10 = vadd.f32 %v684_v61, %v245_v7  ;;  %v228_v11 = vpop.f32.mrf.mxu0 }
  0xcf   :  { %379 = vst.msk [vmem:[%s775_s3 + $0x30] sm:$0xf] %vm366_vm2, %v362_v5  ;;  %v229_v12 = vadd.f32 %v684_v61, %v228_v11 }
  0xd0   :  { %372 = vst.msk [vmem:[%s775_s3 + $0x14] sm:$0xf] %vm366_vm2, %v355_v8  ;;  %v343_v13 = vsel %vm311_vm12, %v285_v4, %v327_v9  ;;  %v295_v14 = vadd.f32 %v294_v1, %v246_v10 }
  0xd1   :  { %v359_v15 = vpack.c.bf16 %v343_v13, %v343_v13  ;;  %v278_v16 = vadd.f32 %v697_v19, %v229_v12 }
  0xd2   :  { %vm315_vm13 = vcmp.ge.f32.partialorder %v295_v14, 0.0  ;;  %v331_v17 = vmul.f32 0.2, %v295_v14 }
  0xd3   :  { %376 = vst.msk [vmem:[%s775_s3 + $0x24] sm:$0xf] %vm366_vm2, %v359_v15  ;;  %vm308_vm14 = vcmp.ge.f32.partialorder %v278_v16, 0.0  ;;  %v324_v18 = vmul.f32 0.2, %v278_v16 }
  0xd4   :  { %v347_v20 = vsel %vm315_vm13, %v295_v14, %v331_v17 }
  0xd5   :  { %v363_v21 = vpack.c.bf16 %v347_v20, %v347_v20  ;;  %v340_v22 = vsel %vm308_vm14, %v278_v16, %v324_v18  ;;  %v248_v24 = vpop.f32.mrf.mxu2 }
  0xd6   :  { %v356_v25 = vpack.c.bf16 %v340_v22, %v340_v22  ;;  %v249_v26 = vadd.f32 %v684_v61, %v248_v24  ;;  %v230_v27 = vpop.f32.mrf.mxu0 }
  0xd7   :  { %380 = vst.msk [vmem:[%s775_s3 + $0x34] sm:$0xf] %vm366_vm2, %v363_v21  ;;  %v231_v19 = vadd.f32 %v684_v61, %v230_v27 }
  0xd8   :  { %373 = vst.msk [vmem:[%s775_s3 + $0x18] sm:$0xf] %vm366_vm2, %v356_v25  ;;  %v298_v28 = vadd.f32 %v297_v23, %v249_v26 }
  0xd9   :  { %v280_v29 = vadd.f32 %v705_v31, %v231_v19 }
  0xda   :  { %vm316_vm15 = vcmp.ge.f32.partialorder %v298_v28, 0.0  ;;  %v332_v30 = vmul.f32 0.2, %v298_v28 }
  0xdb   :  { %vm309_vm0 = vcmp.ge.f32.partialorder %v280_v29, 0.0  ;;  %v325_v32 = vmul.f32 0.2, %v280_v29 }
  0xdc   :  { %v348_v33 = vsel %vm316_vm15, %v298_v28, %v332_v30 }
  0xdd   :  { %v364_v34 = vpack.c.bf16 %v348_v33, %v348_v33  ;;  %v341_v35 = vsel %vm309_vm0, %v280_v29, %v325_v32  ;;  %v250_v36 = vpop.f32.mrf.mxu2 }
  0xde   :  { %v357_v37 = vpack.c.bf16 %v341_v35, %v341_v35  ;;  %v251_v38 = vadd.f32 %v684_v61, %v250_v36 }
  0xdf   :  { %381 = vst.msk [vmem:[%s775_s3 + $0x38] sm:$0xf] %vm366_vm2, %v364_v34 }
  0xe0   :  { %374 = vst.msk [vmem:[%s775_s3 + $0x1c] sm:$0xf] %vm366_vm2, %v357_v37  ;;  %v300_v31 = vadd.f32 %v299_v39, %v251_v38 }
  0xe2   :  { %vm317_vm1 = vcmp.ge.f32.partialorder %v300_v31, 0.0  ;;  %v333_v40 = vmul.f32 0.2, %v300_v31 }
  0xe4   :  { %v349_v41 = vsel %vm317_vm1, %v300_v31, %v333_v40 }
  0xe5   :  { %v365_v42 = vpack.c.bf16 %v349_v41, %v349_v41 }
  0xe7   :  { %382 = vst.msk [vmem:[%s775_s3 + $0x3c] sm:$0xf] %vm366_vm2, %v365_v42 }

// kernel: _lambda_.16
= control target key start
LH: loop header
LB: loop body
LE: loop exit
PB: predicated region body
PF: predicated region fallthrough
CT: control target
= control target key end

     0   :  { %vm201_vm0 = vcmask 261120   ;;  %vm281_vm2 = vcmask 257024   ;;  %s552_s1 = inlined_call_operand.vmem [shape: bf16[288,32], index: 1, kind: input, shape index: {}]   ;;  %s553_s0 = inlined_call_operand.vmem [shape: bf16[32,288], index: 0, kind: input, shape index: {}]   ;;  %s554_s2 = inlined_call_operand.vmem [shape: f32[1,32], index: 2, kind: input, shape index: {}]   ;;  %s555_s3 = inlined_call_operand.vmem [shape: bf16[32,32], index: 3, kind: output, shape index: {}]  }
   0x1   :  { %v401_v0 = vld [vmem:[%s552_s1 + $0x38] sm:$0xff]  ;;  %v400_v2 = vld [vmem:[%s552_s1 + $0x30] sm:$0xff]  ;;  %v411_v3 = vld [vmem:[%s552_s1 + $0x88] sm:$0xff] }
   0x2   :  { %v409_v1 = vld [vmem:[%s552_s1 + $0x78] sm:$0xff]  ;;  %208 = vmatpush.bf16.msra.mxu0 %v401_v0  ;;  %412 = vmatpush.bf16.msra.mxu3 %v401_v0  ;;  %v408_v4 = vld [vmem:[%s552_s1 + $0x70] sm:$0xff]  ;;  %v410_v5 = vld [vmem:[%s552_s1 + $0x80] sm:$0xff] }
   0x3   :  { %227 = vmatpush.bf16.msra.mxu1 %v409_v1  ;;  %252 = vmatpush.bf16.msra.mxu2 %v411_v3  ;;  %v300_v6 = vld [vmem:[%s553_s0 + $0x8] sm:$0xf]  ;;  %v390_v7 = vld [vmem:[%s553_s0 + $0x10] sm:$0xf0]  ;;  %v398_v11 = vld [vmem:[%s552_s1 + $0x20] sm:$0xff] }
   0x4   :  { %v399_v8 = vld [vmem:[%s552_s1 + $0x28] sm:$0xff]  ;;  %v301_v10 = vor.u32 %v390_v7, %v300_v6  ;;  %v406_v12 = vld [vmem:[%s552_s1 + $0x60] sm:$0xff]  ;;  %v397_v13 = vld [vmem:[%s552_s1 + $0x18] sm:$0xff] }
   0x5   :  { %v407_v9 = vld [vmem:[%s552_s1 + $0x68] sm:$0xff]  ;;  %v405_v14 = vld [vmem:[%s552_s1 + $0x58] sm:$0xff]  ;;  %v396_v15 = vld [vmem:[%s552_s1 + $0x10] sm:$0xff] }
   0x6   :  { %209 = vmatpush.bf16.msra.mxu0 %v400_v2  ;;  %413 = vmatpush.bf16.msra.mxu3 %v400_v2  ;;  %v404_v16 = vld [vmem:[%s552_s1 + $0x50] sm:$0xff]  ;;  %v312_v17 = vld [vmem:[%s553_s0 + $0x20] sm:$0xf]  ;;  %v393_v18 = vld [vmem:[%s553_s0 + $0x28] sm:$0xf0] }
   0x7   :  { %228 = vmatpush.bf16.msra.mxu1 %v408_v4  ;;  %253 = vmatpush.bf16.msra.mxu2 %v410_v5  ;;  %v395_v19 = vld [vmem:[%s552_s1 + $0x8] sm:$0xff]  ;;  %v313_v21 = vor.u32 %v393_v18, %v312_v17  ;;  %v394_v22 = vld [vmem:[%s552_s1] sm:$0xff]  ;;  %v304_v25 = vld [vmem:[%s553_s0 + $0x18] sm:$0xf] }
   0x8   :  { %v403_v20 = vld [vmem:[%s552_s1 + $0x48] sm:$0xff]  ;;  %v292_v23 = vld [vmem:[%s553_s0] sm:$0xf]  ;;  %v392_v26 = vld [vmem:[%s553_s0 + $0x20] sm:$0xf0] }
   0x9   :  { %v389_v24 = vld [vmem:[%s553_s0 + $0x8] sm:$0xf0]  ;;  %v402_v27 = vld [vmem:[%s552_s1 + $0x40] sm:$0xff]  ;;  %v294_v29 = vld [vmem:[%s553_s0 + $0xc] sm:$0xf0]  ;;  %v305_v31 = vor.u32 %v392_v26, %v304_v25 }
   0xa   :  { %210 = vmatpush.bf16.msra.mxu0 %v399_v8  ;;  %414 = vmatpush.bf16.msra.mxu3 %v399_v8  ;;  %v388_v28 = vld [vmem:[%s553_s0 + $0x4] sm:$0xf]  ;;  %v293_v30 = vor.u32 %v389_v24, %v292_v23  ;;  %v391_v33 = vld [vmem:[%s553_s0 + $0x1c] sm:$0xf]  ;;  %v306_v34 = vld [vmem:[%s553_s0 + $0x24] sm:$0xf0] }
   0xb   :  { %229 = vmatpush.bf16.msra.mxu1 %v407_v9  ;;  %386 = vmatmul.msk.bf16.vlgmr.msra.gmra.mxu2 %vm201_vm0, %v301_v10  ;;  %v297_v32 = vor.u32 %v388_v28, %v294_v29  ;;  %v309_v35 = vor.u32 %v391_v33, %v306_v34  ;;  %v420_v37 = vld [vmem:[%s554_s2] ss:$0 sm:$0xff] }
   0xe   :  { %211 = vmatpush.bf16.msra.mxu0 %v398_v11  ;;  %415 = vmatpush.bf16.msra.mxu3 %v398_v11 }
   0xf   :  { %230 = vmatpush.bf16.msra.mxu1 %v406_v12 }
  0x12   :  { %212 = vmatpush.bf16.msra.mxu0 %v397_v13  ;;  %416 = vmatpush.bf16.msra.mxu3 %v397_v13 }
  0x13   :  { %231 = vmatpush.bf16.msra.mxu1 %v405_v14 }
  0x16   :  { %213 = vmatpush.bf16.msra.mxu0 %v396_v15  ;;  %417 = vmatpush.bf16.msra.mxu3 %v396_v15 }
  0x17   :  { %232 = vmatpush.bf16.msra.mxu1 %v404_v16 }
  0x1a   :  { %214 = vmatpush.bf16.msra.mxu0 %v395_v19  ;;  %418 = vmatpush.bf16.msra.mxu3 %v395_v19 }
  0x1b   :  { %233 = vmatpush.bf16.msra.mxu1 %v403_v20  ;;  %387 = vmatmul.msk.bf16.gmra.mxu2 %vm201_vm0, %v313_v21 }
  0x1e   :  { %215 = vmatpush.bf16.msra.mxu0 %v394_v22  ;;  %419 = vmatpush.bf16.msra.mxu3 %v394_v22 }
  0x1f   :  { %234 = vmatpush.bf16.msra.mxu1 %v402_v27 }
  0x21   :  { %216 = vmatmul.bf16.vlgmr.msra.gmra.mxu0 %v293_v30  ;;  %221 = vmatmul.bf16.vlgmr.msra.gmra.mxu3 %v305_v31 }
  0x22   :  { %235 = vmatmul.bf16.vlgmr.msra.gmra.mxu1 %v297_v32 }
  0x32   :  { %240 = vmatmul.bf16.gmra.mxu1 %v309_v35 }
  0x8e   :  { %v255_v36 = vpop.f32.mrf.mxu2 }
  0x96   :  { %v257_v44 = vpop.f32.mrf.mxu2 }
  0x9e   :  { %v217_v38 = vpop.f32.mrf.mxu0  ;;  %v260_v56 = vpop.f32.mrf.mxu2 }
  0x9f   :  { %v218_v39 = vadd.f32 %v420_v37, %v217_v38  ;;  %v236_v40 = vpop.f32.mrf.mxu1 }
  0xa1   :  { %v237_v41 = vadd.f32 %v236_v40, %v218_v39 }
  0xa3   :  { %v256_v42 = vadd.f32 %v255_v36, %v237_v41 }
  0xa4   :  { %v222_v50 = vpop.f32.mrf.mxu3 }
  0xa5   :  { %vm265_vm1 = vcmp.ge.f32.partialorder %v256_v42, 0.0  ;;  %v269_v43 = vmul.f32 0.2, %v256_v42  ;;  %v223_v53 = vadd.f32 %v420_v37, %v222_v50 }
  0xa6   :  { %v219_v45 = vpop.f32.mrf.mxu0  ;;  %v262_v4 = vpop.f32.mrf.mxu2 }
  0xa7   :  { %v273_v46 = vsel %vm265_vm1, %v256_v42, %v269_v43  ;;  %v220_v47 = vadd.f32 %v420_v37, %v219_v45  ;;  %v238_v48 = vpop.f32.mrf.mxu1 }
  0xa8   :  { %v277_v49 = vpack.c.bf16 %v273_v46, %v273_v46 }
  0xa9   :  { %v239_v51 = vadd.f32 %v238_v48, %v220_v47 }
  0xaa   :  { %282 = vst.msk [vmem:[%s555_s3] sm:$0xf] %vm281_vm2, %v277_v49 }
  0xab   :  { %v258_v52 = vadd.f32 %v257_v44, %v239_v51 }
  0xac   :  { %v224_v61 = vpop.f32.mrf.mxu3 }
  0xad   :  { %vm266_vm3 = vcmp.ge.f32.partialorder %v258_v52, 0.0  ;;  %v270_v54 = vmul.f32 0.2, %v258_v52  ;;  %v225_v63 = vadd.f32 %v420_v37, %v224_v61 }
  0xaf   :  { %v274_v55 = vsel %vm266_vm3, %v258_v52, %v270_v54  ;;  %v241_v57 = vpop.f32.mrf.mxu1 }
  0xb0   :  { %v278_v58 = vpack.c.bf16 %v274_v55, %v274_v55  ;;  %v242_v59 = vadd.f32 %v241_v57, %v223_v53 }
  0xb2   :  { %283 = vst.msk [vmem:[%s555_s3 + $0x4] sm:$0xf] %vm281_vm2, %v278_v58  ;;  %v261_v60 = vadd.f32 %v260_v56, %v242_v59 }
  0xb4   :  { %vm267_vm4 = vcmp.ge.f32.partialorder %v261_v60, 0.0  ;;  %v271_v62 = vmul.f32 0.2, %v261_v60 }
  0xb6   :  { %v275_v0 = vsel %vm267_vm4, %v261_v60, %v271_v62 }
  0xb7   :  { %v279_v1 = vpack.c.bf16 %v275_v0, %v275_v0  ;;  %v243_v2 = vpop.f32.mrf.mxu1 }
  0xb8   :  { %v244_v3 = vadd.f32 %v243_v2, %v225_v63 }
  0xb9   :  { %284 = vst.msk [vmem:[%s555_s3 + $0x8] sm:$0xf] %vm281_vm2, %v279_v1 }
  0xba   :  { %v263_v5 = vadd.f32 %v262_v4, %v244_v3 }
  0xbc   :  { %vm268_vm5 = vcmp.ge.f32.partialorder %v263_v5, 0.0  ;;  %v272_v6 = vmul.f32 0.2, %v263_v5 }
  0xbe   :  { %v276_v7 = vsel %vm268_vm5, %v263_v5, %v272_v6 }
  0xbf   :  { %v280_v8 = vpack.c.bf16 %v276_v7, %v276_v7 }
  0xc1   :  { %285 = vst.msk [vmem:[%s555_s3 + $0xc] sm:$0xf] %vm281_vm2, %v280_v8 }

// kernel: _lambda_.17
= control target key start
LH: loop header
LB: loop body
LE: loop exit
PB: predicated region body
PF: predicated region fallthrough
CT: control target
= control target key end

     0   :  { %vm175_vm0 = vcmask 261120   ;;  %vm222_vm2 = vcmask 257024   ;;  %s406_s1 = inlined_call_operand.vmem [shape: bf16[288,32], index: 1, kind: input, shape index: {}]   ;;  %s407_s0 = inlined_call_operand.vmem [shape: bf16[8,288], index: 0, kind: input, shape index: {}]   ;;  %s408_s2 = inlined_call_operand.vmem [shape: f32[1,32], index: 2, kind: input, shape index: {}]   ;;  %s409_s3 = inlined_call_operand.vmem [shape: bf16[8,32], index: 3, kind: output, shape index: {}]  }
   0x1   :  { %v308_v0 = vld [vmem:[%s406_s1 + $0x38] sm:$0xff]  ;;  %v307_v2 = vld [vmem:[%s406_s1 + $0x30] sm:$0xff]  ;;  %v318_v4 = vld [vmem:[%s406_s1 + $0x88] sm:$0xff] }
   0x2   :  { %v316_v1 = vld [vmem:[%s406_s1 + $0x78] sm:$0xff]  ;;  %179 = vmatpush.bf16.msra.mxu0 %v308_v0  ;;  %v315_v3 = vld [vmem:[%s406_s1 + $0x70] sm:$0xff]  ;;  %211 = vmatpush.bf16.msra.mxu2 %v318_v4  ;;  %v317_v5 = vld [vmem:[%s406_s1 + $0x80] sm:$0xff] }
   0x3   :  { %192 = vmatpush.bf16.msra.mxu1 %v316_v1  ;;  %v16_v6 = vld [vmem:[%s407_s0 + $0x8] sm:$0xf]  ;;  %v305_v11 = vld [vmem:[%s406_s1 + $0x20] sm:$0xff]  ;;  %v304_v13 = vld [vmem:[%s406_s1 + $0x18] sm:$0xff] }
   0x4   :  { %v61_v7 = vunpack.c.l.b16 %v16_v6  ;;  %v306_v8 = vld [vmem:[%s406_s1 + $0x28] sm:$0xff]  ;;  %v313_v12 = vld [vmem:[%s406_s1 + $0x60] sm:$0xff]  ;;  %v312_v14 = vld [vmem:[%s406_s1 + $0x58] sm:$0xff] }
   0x5   :  { %v314_v9 = vld [vmem:[%s406_s1 + $0x68] sm:$0xff]  ;;  %v303_v15 = vld [vmem:[%s406_s1 + $0x10] sm:$0xff]  ;;  %v15_v19 = vld [vmem:[%s407_s0] sm:$0xff] }
   0x6   :  { %180 = vmatpush.bf16.msra.mxu0 %v307_v2  ;;  %v64_v10 = vpack.c.b16 %v61_v7, %v61_v7  ;;  %212 = vmatpush.bf16.msra.mxu2 %v317_v5  ;;  %v311_v16 = vld [vmem:[%s406_s1 + $0x50] sm:$0xff]  ;;  %v302_v17 = vld [vmem:[%s406_s1 + $0x8] sm:$0xff]  ;;  %v59_v20 = vunpack.c.l.b16 %v15_v19  ;;  %v60_v21 = vunpack.c.h.b16 %v15_v19  ;;  %v301_v22 = vld [vmem:[%s406_s1] sm:$0xff] }
   0x7   :  { %193 = vmatpush.bf16.msra.mxu1 %v315_v3  ;;  %v310_v18 = vld [vmem:[%s406_s1 + $0x48] sm:$0xff]  ;;  %v309_v23 = vld [vmem:[%s406_s1 + $0x40] sm:$0xff] }
   0x8   :  { %v62_v24 = vpack.c.b16 %v59_v20, %v59_v20  ;;  %v63_v25 = vpack.c.b16 %v60_v21, %v60_v21  ;;  %v319_v28 = vld [vmem:[%s408_s2] ss:$0 sm:$0xff] }
   0x9   :  { %300 = vmatmul.msk.bf16.vlgmr.msra.gmra.mxu2 %vm175_vm0, %v64_v10 }
   0xa   :  { %181 = vmatpush.bf16.msra.mxu0 %v306_v8 }
   0xb   :  { %194 = vmatpush.bf16.msra.mxu1 %v314_v9 }
   0xe   :  { %182 = vmatpush.bf16.msra.mxu0 %v305_v11 }
   0xf   :  { %195 = vmatpush.bf16.msra.mxu1 %v313_v12 }
  0x12   :  { %183 = vmatpush.bf16.msra.mxu0 %v304_v13 }
  0x13   :  { %196 = vmatpush.bf16.msra.mxu1 %v312_v14 }
  0x16   :  { %184 = vmatpush.bf16.msra.mxu0 %v303_v15 }
  0x17   :  { %197 = vmatpush.bf16.msra.mxu1 %v311_v16 }
  0x1a   :  { %185 = vmatpush.bf16.msra.mxu0 %v302_v17 }
  0x1b   :  { %198 = vmatpush.bf16.msra.mxu1 %v310_v18 }
  0x1e   :  { %186 = vmatpush.bf16.msra.mxu0 %v301_v22 }
  0x1f   :  { %199 = vmatpush.bf16.msra.mxu1 %v309_v23 }
  0x21   :  { %187 = vmatmul.bf16.vlgmr.msra.gmra.mxu0 %v62_v24 }
  0x22   :  { %200 = vmatmul.bf16.vlgmr.msra.gmra.mxu1 %v63_v25 }
  0x8c   :  { %v214_v26 = vpop.f32.mrf.mxu2 }
  0x94   :  { %v216_v27 = vpop.f32.mrf.mxu2 }
  0x9e   :  { %v188_v29 = vpop.f32.mrf.mxu0 }
  0x9f   :  { %v201_v30 = vpop.f32.mrf.mxu1  ;;  %v189_v31 = vadd.f32 %v319_v28, %v188_v29 }
  0xa1   :  { %v202_v32 = vadd.f32 %v201_v30, %v189_v31 }
  0xa3   :  { %v215_v33 = vadd.f32 %v214_v26, %v202_v32 }
  0xa5   :  { %vm218_vm1 = vcmp.ge.f32.partialorder %v215_v33, 0.0  ;;  %v219_v34 = vmul.f32 0.2, %v215_v33 }
  0xa6   :  { %v190_v35 = vpop.f32.mrf.mxu0 }
  0xa7   :  { %v203_v36 = vpop.f32.mrf.mxu1  ;;  %v220_v37 = vsel %vm218_vm1, %v215_v33, %v219_v34 }
  0xa8   :  { %v221_v38 = vpack.c.bf16 %v220_v37, %v220_v37 }
  0xaa   :  { %223 = vst.msk [vmem:[%s409_s3] sm:$0xf] %vm222_vm2, %v221_v38 }

// kernel: _lambda_.18
= control target key start
LH: loop header
LB: loop body
LE: loop exit
PB: predicated region body
PF: predicated region fallthrough
CT: control target
= control target key end

     0   :  { %vm144_vm0 = vcmask 785408   ;;  %vm192_vm1 = vcmask 1041408   ;;  %vm194_vm2 = vcmask 1043456   ;;  %s432_s1 = inlined_call_operand.vmem [shape: bf16[96,384], index: 1, kind: input, shape index: {}]   ;;  %s433_s0 = inlined_call_operand.vmem [shape: bf16[2,96], index: 0, kind: input, shape index: {}]   ;;  %s434_s2 = inlined_call_operand.vmem [shape: f32[1,384], index: 2, kind: input, shape index: {}]   ;;  %s435_s3 = inlined_call_operand.vmem [shape: f32[2,384], index: 3, kind: output, shape index: {}]  }
   0x1   :  { %v264_v0 = vld [vmem:[%s432_s1 + $0x78] sm:$0xf]  ;;  %v293_v1 = vld [vmem:[%s432_s1 + $0x80] sm:$0xf0]  ;;  %v292_v2 = vld [vmem:[%s432_s1 + $0x7c] sm:$0xf] }
   0x2   :  { %v265_v3 = vor.u32 %v293_v1, %v264_v0  ;;  %v266_v4 = vld [vmem:[%s432_s1 + $0x84] sm:$0xf0]  ;;  %v272_v5 = vld [vmem:[%s432_s1 + $0x80] sm:$0xf]  ;;  %v294_v6 = vld [vmem:[%s432_s1 + $0x88] sm:$0xf0] }
   0x3   :  { %v269_v7 = vor.u32 %v292_v2, %v266_v4  ;;  %v273_v8 = vor.u32 %v294_v6, %v272_v5  ;;  %v252_v9 = vld [vmem:[%s432_s1 + $0x60] sm:$0xf]  ;;  %v290_v10 = vld [vmem:[%s432_s1 + $0x68] sm:$0xf0]  ;;  %v289_v11 = vld [vmem:[%s432_s1 + $0x64] sm:$0xf] }
   0x4   :  { %150 = vmatpush.bf16.msra.mxu0 %v265_v3  ;;  %v253_v12 = vor.u32 %v290_v10, %v252_v9  ;;  %v254_v13 = vld [vmem:[%s432_s1 + $0x6c] sm:$0xf0]  ;;  %v260_v14 = vld [vmem:[%s432_s1 + $0x68] sm:$0xf]  ;;  %v291_v15 = vld [vmem:[%s432_s1 + $0x70] sm:$0xf0] }
   0x5   :  { %163 = vmatpush.bf16.msra.mxu1 %v269_v7  ;;  %176 = vmatpush.bf16.msra.mxu2 %v273_v8  ;;  %v257_v16 = vor.u32 %v289_v11, %v254_v13  ;;  %v261_v17 = vor.u32 %v291_v15, %v260_v14  ;;  %v240_v18 = vld [vmem:[%s432_s1 + $0x48] sm:$0xf]  ;;  %v287_v19 = vld [vmem:[%s432_s1 + $0x50] sm:$0xf0]  ;;  %v286_v20 = vld [vmem:[%s432_s1 + $0x4c] sm:$0xf] }
   0x6   :  { %v242_v21 = vld [vmem:[%s432_s1 + $0x54] sm:$0xf0]  ;;  %v248_v22 = vld [vmem:[%s432_s1 + $0x50] sm:$0xf]  ;;  %v288_v23 = vld [vmem:[%s432_s1 + $0x58] sm:$0xf0]  ;;  %v241_v24 = vor.u32 %v287_v19, %v240_v18 }
   0x7   :  { %v245_v25 = vor.u32 %v286_v20, %v242_v21  ;;  %v249_v26 = vor.u32 %v288_v23, %v248_v22  ;;  %v228_v27 = vld [vmem:[%s432_s1 + $0x30] sm:$0xf]  ;;  %v284_v28 = vld [vmem:[%s432_s1 + $0x38] sm:$0xf0]  ;;  %v283_v29 = vld [vmem:[%s432_s1 + $0x34] sm:$0xf] }
   0x8   :  { %151 = vmatpush.bf16.msra.mxu0 %v253_v12  ;;  %v230_v30 = vld [vmem:[%s432_s1 + $0x3c] sm:$0xf0]  ;;  %v236_v31 = vld [vmem:[%s432_s1 + $0x38] sm:$0xf]  ;;  %v285_v32 = vld [vmem:[%s432_s1 + $0x40] sm:$0xf0]  ;;  %v229_v33 = vor.u32 %v284_v28, %v228_v27 }
   0x9   :  { %164 = vmatpush.bf16.msra.mxu1 %v257_v16  ;;  %177 = vmatpush.bf16.msra.mxu2 %v261_v17  ;;  %v233_v34 = vor.u32 %v283_v29, %v230_v30  ;;  %v237_v35 = vor.u32 %v285_v32, %v236_v31  ;;  %v216_v36 = vld [vmem:[%s432_s1 + $0x18] sm:$0xf]  ;;  %v281_v37 = vld [vmem:[%s432_s1 + $0x20] sm:$0xf0]  ;;  %v280_v38 = vld [vmem:[%s432_s1 + $0x1c] sm:$0xf] }
   0xa   :  { %v218_v39 = vld [vmem:[%s432_s1 + $0x24] sm:$0xf0]  ;;  %v224_v40 = vld [vmem:[%s432_s1 + $0x20] sm:$0xf]  ;;  %v282_v41 = vld [vmem:[%s432_s1 + $0x28] sm:$0xf0]  ;;  %v217_v42 = vor.u32 %v281_v37, %v216_v36 }
   0xb   :  { %v221_v43 = vor.u32 %v280_v38, %v218_v39  ;;  %v225_v44 = vor.u32 %v282_v41, %v224_v40  ;;  %v204_v45 = vld [vmem:[%s432_s1] sm:$0xf]  ;;  %v278_v46 = vld [vmem:[%s432_s1 + $0x8] sm:$0xf0]  ;;  %v277_v47 = vld [vmem:[%s432_s1 + $0x4] sm:$0xf] }
   0xc   :  { %152 = vmatpush.bf16.msra.mxu0 %v241_v24  ;;  %v206_v48 = vld [vmem:[%s432_s1 + $0xc] sm:$0xf0]  ;;  %v212_v49 = vld [vmem:[%s432_s1 + $0x8] sm:$0xf]  ;;  %v279_v50 = vld [vmem:[%s432_s1 + $0x10] sm:$0xf0]  ;;  %v205_v51 = vor.u32 %v278_v46, %v204_v45 }
   0xd   :  { %165 = vmatpush.bf16.msra.mxu1 %v245_v25  ;;  %178 = vmatpush.bf16.msra.mxu2 %v249_v26  ;;  %v209_v52 = vor.u32 %v277_v47, %v206_v48  ;;  %v213_v53 = vor.u32 %v279_v50, %v212_v49  ;;  %v15_v54 = vld [vmem:[%s433_s0] sm:$0x1] }
   0xe   :  { %v40_v55 = vld [vmem:[%s434_s2] sm:$0x7] }
   0xf   :  { %v43_v56 = vperm.slane %v40_v55, 1  ;;  %v42_v58 = vperm.slane %v40_v55, 0  ;;  %v44_v61 = vperm.slane %v40_v55, 2 }
  0x10   :  { %153 = vmatpush.bf16.msra.mxu0 %v229_v33 }
  0x11   :  { %166 = vmatpush.bf16.msra.mxu1 %v233_v34  ;;  %179 = vmatpush.bf16.msra.mxu2 %v237_v35 }
  0x14   :  { %154 = vmatpush.bf16.msra.mxu0 %v217_v42 }
  0x15   :  { %167 = vmatpush.bf16.msra.mxu1 %v221_v43  ;;  %180 = vmatpush.bf16.msra.mxu2 %v225_v44 }
  0x18   :  { %155 = vmatpush.bf16.msra.mxu0 %v205_v51 }
  0x19   :  { %168 = vmatpush.bf16.msra.mxu1 %v209_v52  ;;  %181 = vmatpush.bf16.msra.mxu2 %v213_v53 }
  0x1b   :  { %274 = vmatmul.msk.bf16.vlgmr.msra.gmra.mxu0 %vm144_vm0, %v15_v54 }
  0x1c   :  { %275 = vmatmul.msk.bf16.vlgmr.msra.gmra.mxu1 %vm144_vm0, %v15_v54  ;;  %276 = vmatmul.msk.bf16.vlgmr.msra.gmra.mxu2 %vm144_vm0, %v15_v54 }
  0x98   :  { %v157_v57 = vpop.f32.mrf.mxu0 }
  0x99   :  { %v170_v59 = vpop.f32.mrf.mxu1  ;;  %v158_v62 = vadd.f32 %v157_v57, %v42_v58 }
  0x9a   :  { %v171_v60 = vadd.f32 %v170_v59, %v43_v56 }
  0x9c   :  { %v190_v63 = vrot.slane %v171_v60, 6 }
  0x9e   :  { %v193_v3 = vsel %vm192_vm1, %v158_v62, %v190_v63 }
  0x9f   :  { %v183_v0 = vpop.f32.mrf.mxu2 }
  0xa0   :  { %v184_v1 = vadd.f32 %v183_v0, %v44_v61  ;;  %v159_v2 = vpop.f32.mrf.mxu0 }
  0xa1   :  { %v172_v4 = vpop.f32.mrf.mxu1 }
  0xa2   :  { %v191_v5 = vrot.slane %v184_v1, 4 }
  0xa4   :  { %v195_v6 = vsel %vm194_vm2, %v193_v3, %v191_v5 }
  0xa5   :  { %197 = vst [vmem:[%s435_s3] sm:$0x3f] %v195_v6 }
  0xa7   :  { %v185_v7 = vpop.f32.mrf.mxu2 }

// kernel: _lambda_.19
= control target key start
LH: loop header
LB: loop body
LE: loop exit
PB: predicated region body
PF: predicated region fallthrough
CT: control target
= control target key end

     0   :  { %vm541_vm0 = vcmask 785408   ;;  %s1348_s1 = inlined_call_operand.vmem [shape: bf16[512,224], index: 1, kind: input, shape index: {}]   ;;  %s1349_s0 = inlined_call_operand.vmem [shape: bf16[16,512], index: 0, kind: input, shape index: {}]   ;;  %s1350_s2 = inlined_call_operand.vmem [shape: f32[1,224], index: 2, kind: input, shape index: {}]   ;;  %s1351_s3 = inlined_call_operand.vmem [shape: f32[16,224], index: 3, kind: output, shape index: {}]  }
   0x1   :  { %v623_v0 = vld [vmem:[%s1348_s1 + $0x70] sm:$0xf]  ;;  %v840_v1 = vld [vmem:[%s1348_s1 + $0x74] sm:$0xf0]  ;;  %v615_v11 = vld [vmem:[%s1348_s1 + $0x60] sm:$0xf] }
   0x2   :  { %v687_v2 = vld [vmem:[%s1348_s1 + $0xf0] sm:$0xf]  ;;  %v624_v3 = vor.u32 %v840_v1, %v623_v0  ;;  %v856_v4 = vld [vmem:[%s1348_s1 + $0xf4] sm:$0xf0]  ;;  %v838_v13 = vld [vmem:[%s1348_s1 + $0x64] sm:$0xf0] }
   0x3   :  { %v751_v5 = vld [vmem:[%s1348_s1 + $0x170] sm:$0xf]  ;;  %v872_v6 = vld [vmem:[%s1348_s1 + $0x174] sm:$0xf0]  ;;  %v688_v7 = vor.u32 %v856_v4, %v687_v2  ;;  %v679_v14 = vld [vmem:[%s1348_s1 + $0xe0] sm:$0xf]  ;;  %v616_v16 = vor.u32 %v838_v13, %v615_v11 }
   0x4   :  { %v752_v8 = vor.u32 %v872_v6, %v751_v5  ;;  %v815_v9 = vld [vmem:[%s1348_s1 + $0x1f0] sm:$0xf]  ;;  %v888_v10 = vld [vmem:[%s1348_s1 + $0x1f4] sm:$0xf0]  ;;  %428 = vmatpush.bf16.msra.mxu0 %v624_v3  ;;  %v854_v15 = vld [vmem:[%s1348_s1 + $0xe4] sm:$0xf0] }
   0x5   :  { %v816_v12 = vor.u32 %v888_v10, %v815_v9  ;;  %442 = vmatpush.bf16.msra.mxu1 %v688_v7  ;;  %v680_v17 = vor.u32 %v854_v15, %v679_v14  ;;  %v743_v18 = vld [vmem:[%s1348_s1 + $0x160] sm:$0xf]  ;;  %v870_v19 = vld [vmem:[%s1348_s1 + $0x164] sm:$0xf0]  ;;  %v607_v23 = vld [vmem:[%s1348_s1 + $0x50] sm:$0xf] }
   0x6   :  { %456 = vmatpush.bf16.msra.mxu2 %v752_v8  ;;  %v807_v20 = vld [vmem:[%s1348_s1 + $0x1e0] sm:$0xf]  ;;  %v744_v21 = vor.u32 %v870_v19, %v743_v18  ;;  %v886_v22 = vld [vmem:[%s1348_s1 + $0x1e4] sm:$0xf0]  ;;  %v836_v24 = vld [vmem:[%s1348_s1 + $0x54] sm:$0xf0] }
   0x7   :  { %470 = vmatpush.bf16.msra.mxu3 %v816_v12  ;;  %v808_v25 = vor.u32 %v886_v22, %v807_v20  ;;  %v671_v26 = vld [vmem:[%s1348_s1 + $0xd0] sm:$0xf]  ;;  %v852_v27 = vld [vmem:[%s1348_s1 + $0xd4] sm:$0xf0]  ;;  %v608_v29 = vor.u32 %v836_v24, %v607_v23  ;;  %v599_v35 = vld [vmem:[%s1348_s1 + $0x40] sm:$0xf] }
   0x8   :  { %v735_v28 = vld [vmem:[%s1348_s1 + $0x150] sm:$0xf]  ;;  %429 = vmatpush.bf16.msra.mxu0 %v616_v16  ;;  %v868_v30 = vld [vmem:[%s1348_s1 + $0x154] sm:$0xf0]  ;;  %v672_v33 = vor.u32 %v852_v27, %v671_v26  ;;  %v834_v36 = vld [vmem:[%s1348_s1 + $0x44] sm:$0xf0] }
   0x9   :  { %v799_v31 = vld [vmem:[%s1348_s1 + $0x1d0] sm:$0xf]  ;;  %v884_v32 = vld [vmem:[%s1348_s1 + $0x1d4] sm:$0xf0]  ;;  %443 = vmatpush.bf16.msra.mxu1 %v680_v17  ;;  %v736_v34 = vor.u32 %v868_v30, %v735_v28  ;;  %v663_v37 = vld [vmem:[%s1348_s1 + $0xc0] sm:$0xf]  ;;  %v600_v44 = vor.u32 %v834_v36, %v599_v35 }
   0xa   :  { %457 = vmatpush.bf16.msra.mxu2 %v744_v21  ;;  %v800_v38 = vor.u32 %v884_v32, %v799_v31  ;;  %v850_v39 = vld [vmem:[%s1348_s1 + $0xc4] sm:$0xf0]  ;;  %v727_v40 = vld [vmem:[%s1348_s1 + $0x140] sm:$0xf]  ;;  %v591_v47 = vld [vmem:[%s1348_s1 + $0x30] sm:$0xf] }
   0xb   :  { %471 = vmatpush.bf16.msra.mxu3 %v808_v25  ;;  %v866_v41 = vld [vmem:[%s1348_s1 + $0x144] sm:$0xf0]  ;;  %v791_v42 = vld [vmem:[%s1348_s1 + $0x1c0] sm:$0xf]  ;;  %v664_v45 = vor.u32 %v850_v39, %v663_v37  ;;  %v832_v48 = vld [vmem:[%s1348_s1 + $0x34] sm:$0xf0] }
   0xc   :  { %v882_v43 = vld [vmem:[%s1348_s1 + $0x1c4] sm:$0xf0]  ;;  %430 = vmatpush.bf16.msra.mxu0 %v608_v29  ;;  %v728_v46 = vor.u32 %v866_v41, %v727_v40  ;;  %v655_v49 = vld [vmem:[%s1348_s1 + $0xb0] sm:$0xf]  ;;  %v848_v51 = vld [vmem:[%s1348_s1 + $0xb4] sm:$0xf0]  ;;  %v592_v56 = vor.u32 %v832_v48, %v591_v47 }
   0xd   :  { %444 = vmatpush.bf16.msra.mxu1 %v672_v33  ;;  %v792_v50 = vor.u32 %v882_v43, %v791_v42  ;;  %v719_v52 = vld [vmem:[%s1348_s1 + $0x130] sm:$0xf]  ;;  %v864_v53 = vld [vmem:[%s1348_s1 + $0x134] sm:$0xf0]  ;;  %v656_v57 = vor.u32 %v848_v51, %v655_v49  ;;  %v583_v59 = vld [vmem:[%s1348_s1 + $0x20] sm:$0xf] }
   0xe   :  { %458 = vmatpush.bf16.msra.mxu2 %v736_v34  ;;  %v783_v54 = vld [vmem:[%s1348_s1 + $0x1b0] sm:$0xf]  ;;  %v880_v55 = vld [vmem:[%s1348_s1 + $0x1b4] sm:$0xf0]  ;;  %v720_v58 = vor.u32 %v864_v53, %v719_v52  ;;  %v830_v60 = vld [vmem:[%s1348_s1 + $0x24] sm:$0xf0] }
   0xf   :  { %472 = vmatpush.bf16.msra.mxu3 %v800_v38  ;;  %v647_v61 = vld [vmem:[%s1348_s1 + $0xa0] sm:$0xf]  ;;  %v784_v62 = vor.u32 %v880_v55, %v783_v54  ;;  %v846_v63 = vld [vmem:[%s1348_s1 + $0xa4] sm:$0xf0]  ;;  %v584_v4 = vor.u32 %v830_v60, %v583_v59  ;;  %v575_v7 = vld [vmem:[%s1348_s1 + $0x10] sm:$0xf] }
  0x10   :  { %431 = vmatpush.bf16.msra.mxu0 %v600_v44  ;;  %v711_v0 = vld [vmem:[%s1348_s1 + $0x120] sm:$0xf]  ;;  %v862_v1 = vld [vmem:[%s1348_s1 + $0x124] sm:$0xf0]  ;;  %v648_v5 = vor.u32 %v846_v63, %v647_v61  ;;  %v828_v8 = vld [vmem:[%s1348_s1 + $0x14] sm:$0xf0] }
  0x11   :  { %445 = vmatpush.bf16.msra.mxu1 %v664_v45  ;;  %v775_v2 = vld [vmem:[%s1348_s1 + $0x1a0] sm:$0xf]  ;;  %v878_v3 = vld [vmem:[%s1348_s1 + $0x1a4] sm:$0xf0]  ;;  %v712_v6 = vor.u32 %v862_v1, %v711_v0  ;;  %v639_v9 = vld [vmem:[%s1348_s1 + $0x90] sm:$0xf]  ;;  %v576_v17 = vor.u32 %v828_v8, %v575_v7 }
  0x12   :  { %459 = vmatpush.bf16.msra.mxu2 %v728_v46  ;;  %v776_v10 = vor.u32 %v878_v3, %v775_v2  ;;  %v844_v11 = vld [vmem:[%s1348_s1 + $0x94] sm:$0xf0]  ;;  %v703_v12 = vld [vmem:[%s1348_s1 + $0x110] sm:$0xf]  ;;  %v567_v16 = vld [vmem:[%s1348_s1] sm:$0xf] }
  0x13   :  { %473 = vmatpush.bf16.msra.mxu3 %v792_v50  ;;  %v860_v13 = vld [vmem:[%s1348_s1 + $0x114] sm:$0xf0]  ;;  %v767_v14 = vld [vmem:[%s1348_s1 + $0x190] sm:$0xf]  ;;  %v826_v18 = vld [vmem:[%s1348_s1 + $0x4] sm:$0xf0]  ;;  %v640_v21 = vor.u32 %v844_v11, %v639_v9 }
  0x14   :  { %432 = vmatpush.bf16.msra.mxu0 %v592_v56  ;;  %v876_v15 = vld [vmem:[%s1348_s1 + $0x194] sm:$0xf0]  ;;  %v631_v19 = vld [vmem:[%s1348_s1 + $0x80] sm:$0xf]  ;;  %v842_v20 = vld [vmem:[%s1348_s1 + $0x84] sm:$0xf0]  ;;  %v704_v22 = vor.u32 %v860_v13, %v703_v12  ;;  %v568_v33 = vor.u32 %v826_v18, %v567_v16 }
  0x15   :  { %446 = vmatpush.bf16.msra.mxu1 %v656_v57  ;;  %v695_v23 = vld [vmem:[%s1348_s1 + $0x100] sm:$0xf]  ;;  %v858_v24 = vld [vmem:[%s1348_s1 + $0x104] sm:$0xf0]  ;;  %v768_v26 = vor.u32 %v876_v15, %v767_v14  ;;  %v839_v28 = vld [vmem:[%s1348_s1 + $0x74] sm:$0xf]  ;;  %v632_v37 = vor.u32 %v842_v20, %v631_v19 }
  0x16   :  { %460 = vmatpush.bf16.msra.mxu2 %v720_v58  ;;  %v759_v25 = vld [vmem:[%s1348_s1 + $0x180] sm:$0xf]  ;;  %v874_v27 = vld [vmem:[%s1348_s1 + $0x184] sm:$0xf0]  ;;  %v625_v29 = vld [vmem:[%s1348_s1 + $0x78] sm:$0xf0]  ;;  %v696_v38 = vor.u32 %v858_v24, %v695_v23 }
  0x17   :  { %474 = vmatpush.bf16.msra.mxu3 %v784_v62  ;;  %v855_v30 = vld [vmem:[%s1348_s1 + $0xf4] sm:$0xf]  ;;  %v689_v31 = vld [vmem:[%s1348_s1 + $0xf8] sm:$0xf0]  ;;  %v837_v39 = vld [vmem:[%s1348_s1 + $0x64] sm:$0xf]  ;;  %v760_v43 = vor.u32 %v874_v27, %v759_v25  ;;  %v628_v44 = vor.u32 %v839_v28, %v625_v29 }
  0x18   :  { %433 = vmatpush.bf16.msra.mxu0 %v584_v4  ;;  %v871_v32 = vld [vmem:[%s1348_s1 + $0x174] sm:$0xf]  ;;  %v753_v34 = vld [vmem:[%s1348_s1 + $0x178] sm:$0xf0]  ;;  %v617_v40 = vld [vmem:[%s1348_s1 + $0x68] sm:$0xf0]  ;;  %v692_v49 = vor.u32 %v855_v30, %v689_v31 }
  0x19   :  { %447 = vmatpush.bf16.msra.mxu1 %v648_v5  ;;  %v887_v35 = vld [vmem:[%s1348_s1 + $0x1f4] sm:$0xf]  ;;  %v817_v36 = vld [vmem:[%s1348_s1 + $0x1f8] sm:$0xf0]  ;;  %v559_v41 = vld [vmem:[%s1349_s0 + $0x8] sm:$0xf]  ;;  %v756_v50 = vor.u32 %v871_v32, %v753_v34  ;;  %v620_v63 = vor.u32 %v837_v39, %v617_v40 }
  0x1a   :  { %461 = vmatpush.bf16.msra.mxu2 %v712_v6  ;;  %v824_v42 = vld [vmem:[%s1349_s0 + $0x14] sm:$0xf0]  ;;  %v853_v45 = vld [vmem:[%s1348_s1 + $0xe4] sm:$0xf]  ;;  %v681_v46 = vld [vmem:[%s1348_s1 + $0xe8] sm:$0xf0]  ;;  %v820_v54 = vor.u32 %v887_v35, %v817_v36 }
  0x1b   :  { %475 = vmatpush.bf16.msra.mxu3 %v776_v10  ;;  %v869_v47 = vld [vmem:[%s1348_s1 + $0x164] sm:$0xf]  ;;  %v745_v48 = vld [vmem:[%s1348_s1 + $0x168] sm:$0xf0]  ;;  %v551_v51 = vld [vmem:[%s1349_s0] sm:$0xf]  ;;  %v1158_v55 = vor.u32 %v824_v42, %v559_v41  ;;  %v684_v1 = vor.u32 %v853_v45, %v681_v46 }
  0x1c   :  { %434 = vmatpush.bf16.msra.mxu0 %v576_v17  ;;  %v823_v52 = vld [vmem:[%s1349_s0 + $0xc] sm:$0xf0]  ;;  %v822_v53 = vld [vmem:[%s1349_s0 + $0xc] sm:$0xf]  ;;  %v561_v56 = vld [vmem:[%s1349_s0 + $0x18] sm:$0xf0]  ;;  %v748_v2 = vor.u32 %v869_v47, %v745_v48 }
  0x1d   :  { %448 = vmatpush.bf16.msra.mxu1 %v640_v21  ;;  %v821_v57 = vld [vmem:[%s1349_s0 + $0x4] sm:$0xf]  ;;  %v553_v58 = vld [vmem:[%s1349_s0 + $0x10] sm:$0xf0]  ;;  %v809_v60 = vld [vmem:[%s1348_s1 + $0x1e8] sm:$0xf0]  ;;  %v1175_v61 = vor.u32 %v823_v52, %v551_v51  ;;  %v1177_v62 = vor.u32 %v822_v53, %v561_v56 }
  0x1e   :  { %462 = vmatpush.bf16.msra.mxu2 %v704_v22  ;;  %v885_v59 = vld [vmem:[%s1348_s1 + $0x1e4] sm:$0xf]  ;;  %v1179_v0 = vor.u32 %v821_v57, %v553_v58  ;;  %v835_v3 = vld [vmem:[%s1348_s1 + $0x54] sm:$0xf]  ;;  %v609_v4 = vld [vmem:[%s1348_s1 + $0x58] sm:$0xf0] }
  0x1f   :  { %476 = vmatpush.bf16.msra.mxu3 %v768_v26  ;;  %v851_v5 = vld [vmem:[%s1348_s1 + $0xd4] sm:$0xf]  ;;  %v812_v6 = vor.u32 %v885_v59, %v809_v60  ;;  %v673_v7 = vld [vmem:[%s1348_s1 + $0xd8] sm:$0xf0]  ;;  %v612_v12 = vor.u32 %v835_v3, %v609_v4  ;;  %v833_v15 = vld [vmem:[%s1348_s1 + $0x44] sm:$0xf] }
  0x20   :  { %435 = vmatpush.bf16.msra.mxu0 %v568_v33  ;;  %v867_v8 = vld [vmem:[%s1348_s1 + $0x154] sm:$0xf]  ;;  %v737_v9 = vld [vmem:[%s1348_s1 + $0x158] sm:$0xf0]  ;;  %v676_v13 = vor.u32 %v851_v5, %v673_v7  ;;  %v601_v16 = vld [vmem:[%s1348_s1 + $0x48] sm:$0xf0] }
  0x21   :  { %449 = vmatpush.bf16.msra.mxu1 %v632_v37  ;;  %v883_v10 = vld [vmem:[%s1348_s1 + $0x1d4] sm:$0xf]  ;;  %v801_v11 = vld [vmem:[%s1348_s1 + $0x1d8] sm:$0xf0]  ;;  %v740_v14 = vor.u32 %v867_v8, %v737_v9  ;;  %v849_v17 = vld [vmem:[%s1348_s1 + $0xc4] sm:$0xf]  ;;  %v604_v24 = vor.u32 %v833_v15, %v601_v16 }
  0x22   :  { %463 = vmatpush.bf16.msra.mxu2 %v696_v38  ;;  %v804_v18 = vor.u32 %v883_v10, %v801_v11  ;;  %v665_v19 = vld [vmem:[%s1348_s1 + $0xc8] sm:$0xf0]  ;;  %v865_v20 = vld [vmem:[%s1348_s1 + $0x144] sm:$0xf]  ;;  %v831_v27 = vld [vmem:[%s1348_s1 + $0x34] sm:$0xf] }
  0x23   :  { %477 = vmatpush.bf16.msra.mxu3 %v760_v43  ;;  %436 = vmatmul.bf16.vlgmr.msra.gmra.mxu0 %v1175_v61  ;;  %v729_v21 = vld [vmem:[%s1348_s1 + $0x148] sm:$0xf0]  ;;  %v881_v22 = vld [vmem:[%s1348_s1 + $0x1c4] sm:$0xf]  ;;  %v668_v25 = vor.u32 %v849_v17, %v665_v19  ;;  %v593_v28 = vld [vmem:[%s1348_s1 + $0x38] sm:$0xf0] }
  0x24   :  { %484 = vmatpush.bf16.msrb.mxu0 %v628_v44  ;;  %450 = vmatmul.bf16.vlgmr.msra.gmra.mxu1 %v1179_v0  ;;  %v793_v23 = vld [vmem:[%s1348_s1 + $0x1c8] sm:$0xf0]  ;;  %v732_v26 = vor.u32 %v865_v20, %v729_v21  ;;  %v847_v29 = vld [vmem:[%s1348_s1 + $0xb4] sm:$0xf]  ;;  %v657_v31 = vld [vmem:[%s1348_s1 + $0xb8] sm:$0xf0]  ;;  %v596_v36 = vor.u32 %v831_v27, %v593_v28 }
  0x25   :  { %498 = vmatpush.bf16.msrb.mxu1 %v692_v49  ;;  %464 = vmatmul.bf16.vlgmr.msra.gmra.mxu2 %v1158_v55  ;;  %v796_v30 = vor.u32 %v881_v22, %v793_v23  ;;  %v863_v32 = vld [vmem:[%s1348_s1 + $0x134] sm:$0xf]  ;;  %v721_v33 = vld [vmem:[%s1348_s1 + $0x138] sm:$0xf0]  ;;  %v660_v37 = vor.u32 %v847_v29, %v657_v31  ;;  %v829_v39 = vld [vmem:[%s1348_s1 + $0x24] sm:$0xf] }
  0x26   :  { %512 = vmatpush.bf16.msrb.mxu2 %v756_v50  ;;  %478 = vmatmul.bf16.vlgmr.msra.gmra.mxu3 %v1177_v62  ;;  %v879_v34 = vld [vmem:[%s1348_s1 + $0x1b4] sm:$0xf]  ;;  %v785_v35 = vld [vmem:[%s1348_s1 + $0x1b8] sm:$0xf0]  ;;  %v724_v38 = vor.u32 %v863_v32, %v721_v33  ;;  %v585_v40 = vld [vmem:[%s1348_s1 + $0x28] sm:$0xf0] }
  0x27   :  { %526 = vmatpush.bf16.msrb.mxu3 %v820_v54  ;;  %v845_v41 = vld [vmem:[%s1348_s1 + $0xa4] sm:$0xf]  ;;  %v788_v42 = vor.u32 %v879_v34, %v785_v35  ;;  %v649_v43 = vld [vmem:[%s1348_s1 + $0xa8] sm:$0xf0]  ;;  %v588_v48 = vor.u32 %v829_v39, %v585_v40  ;;  %v827_v51 = vld [vmem:[%s1348_s1 + $0x14] sm:$0xf] }
  0x28   :  { %485 = vmatpush.bf16.msrb.mxu0 %v620_v63  ;;  %v861_v44 = vld [vmem:[%s1348_s1 + $0x124] sm:$0xf]  ;;  %v713_v45 = vld [vmem:[%s1348_s1 + $0x128] sm:$0xf0]  ;;  %v652_v49 = vor.u32 %v845_v41, %v649_v43  ;;  %v577_v52 = vld [vmem:[%s1348_s1 + $0x18] sm:$0xf0] }
  0x29   :  { %499 = vmatpush.bf16.msrb.mxu1 %v684_v1  ;;  %v877_v46 = vld [vmem:[%s1348_s1 + $0x1a4] sm:$0xf]  ;;  %v777_v47 = vld [vmem:[%s1348_s1 + $0x1a8] sm:$0xf0]  ;;  %v716_v50 = vor.u32 %v861_v44, %v713_v45  ;;  %v843_v53 = vld [vmem:[%s1348_s1 + $0x94] sm:$0xf]  ;;  %v580_v63 = vor.u32 %v827_v51, %v577_v52 }
  0x2a   :  { %513 = vmatpush.bf16.msrb.mxu2 %v748_v2  ;;  %v780_v54 = vor.u32 %v877_v46, %v777_v47  ;;  %v641_v56 = vld [vmem:[%s1348_s1 + $0x98] sm:$0xf0]  ;;  %v859_v57 = vld [vmem:[%s1348_s1 + $0x114] sm:$0xf]  ;;  %v825_v3 = vld [vmem:[%s1348_s1 + $0x4] sm:$0xf] }
  0x2b   :  { %527 = vmatpush.bf16.msrb.mxu3 %v812_v6  ;;  %v705_v58 = vld [vmem:[%s1348_s1 + $0x118] sm:$0xf0]  ;;  %v875_v59 = vld [vmem:[%s1348_s1 + $0x194] sm:$0xf]  ;;  %v644_v1 = vor.u32 %v843_v53, %v641_v56  ;;  %v569_v4 = vld [vmem:[%s1348_s1 + $0x8] sm:$0xf0] }
  0x2c   :  { %486 = vmatpush.bf16.msrb.mxu0 %v612_v12  ;;  %v769_v60 = vld [vmem:[%s1348_s1 + $0x198] sm:$0xf0]  ;;  %v708_v2 = vor.u32 %v859_v57, %v705_v58  ;;  %v841_v5 = vld [vmem:[%s1348_s1 + $0x84] sm:$0xf]  ;;  %v633_v7 = vld [vmem:[%s1348_s1 + $0x88] sm:$0xf0]  ;;  %v572_v12 = vor.u32 %v825_v3, %v569_v4 }
  0x2d   :  { %500 = vmatpush.bf16.msrb.mxu1 %v676_v13  ;;  %v772_v6 = vor.u32 %v875_v59, %v769_v60  ;;  %v857_v8 = vld [vmem:[%s1348_s1 + $0x104] sm:$0xf]  ;;  %v697_v9 = vld [vmem:[%s1348_s1 + $0x108] sm:$0xf0]  ;;  %v636_v13 = vor.u32 %v841_v5, %v633_v7  ;;  %v82_v16 = vld [vmem:[%s1350_s2] sm:$0x3] }
  0x2e   :  { %514 = vmatpush.bf16.msrb.mxu2 %v740_v14  ;;  %v873_v10 = vld [vmem:[%s1348_s1 + $0x184] sm:$0xf]  ;;  %v761_v11 = vld [vmem:[%s1348_s1 + $0x188] sm:$0xf0]  ;;  %v700_v14 = vor.u32 %v857_v8, %v697_v9  ;;  %v84_v17 = vperm.slane %v82_v16, 0 }
  0x2f   :  { %528 = vmatpush.bf16.msrb.mxu3 %v804_v18  ;;  %v764_v15 = vor.u32 %v873_v10, %v761_v11 }
  0x30   :  { %487 = vmatpush.bf16.msrb.mxu0 %v604_v24 }
  0x31   :  { %501 = vmatpush.bf16.msrb.mxu1 %v668_v25 }
  0x32   :  { %515 = vmatpush.bf16.msrb.mxu2 %v732_v26 }
  0x33   :  { %529 = vmatpush.bf16.msrb.mxu3 %v796_v30  ;;  %v85_v30 = vperm.slane %v82_v16, 1 }
  0x34   :  { %488 = vmatpush.bf16.msrb.mxu0 %v596_v36 }
  0x35   :  { %502 = vmatpush.bf16.msrb.mxu1 %v660_v37 }
  0x36   :  { %516 = vmatpush.bf16.msrb.mxu2 %v724_v38 }
  0x37   :  { %530 = vmatpush.bf16.msrb.mxu3 %v788_v42 }
  0x38   :  { %489 = vmatpush.bf16.msrb.mxu0 %v588_v48 }
  0x39   :  { %503 = vmatpush.bf16.msrb.mxu1 %v652_v49 }
  0x3a   :  { %517 = vmatpush.bf16.msrb.mxu2 %v716_v50 }
  0x3b   :  { %531 = vmatpush.bf16.msrb.mxu3 %v780_v54 }
  0x3c   :  { %490 = vmatpush.bf16.msrb.mxu0 %v580_v63 }
  0x3d   :  { %504 = vmatpush.bf16.msrb.mxu1 %v644_v1 }
  0x3e   :  { %518 = vmatpush.bf16.msrb.mxu2 %v708_v2 }
  0x3f   :  { %532 = vmatpush.bf16.msrb.mxu3 %v772_v6 }
  0x40   :  { %491 = vmatpush.bf16.msrb.mxu0 %v572_v12 }
  0x41   :  { %505 = vmatpush.bf16.msrb.mxu1 %v636_v13 }
  0x42   :  { %519 = vmatpush.bf16.msrb.mxu2 %v700_v14 }
  0x43   :  { %533 = vmatpush.bf16.msrb.mxu3 %v764_v15  ;;  %492 = vmatmul.bf16.vlgmr.msrb.gmra.mxu0 %v1175_v61 }
  0x44   :  { %506 = vmatmul.bf16.vlgmr.msrb.gmra.mxu1 %v1179_v0 }
  0x45   :  { %520 = vmatmul.bf16.vlgmr.msrb.gmra.mxu2 %v1158_v55 }
  0x46   :  { %534 = vmatmul.bf16.vlgmr.msrb.gmra.mxu3 %v1177_v62 }
  0xa0   :  { %v437_v18 = vpop.f32.mrf.mxu0 }
  0xa1   :  { %v438_v19 = vadd.f32 %v437_v18, %v84_v17  ;;  %v451_v20 = vpop.f32.mrf.mxu1 }
  0xa3   :  { %v452_v21 = vadd.f32 %v451_v20, %v438_v19 }
  0xa8   :  { %v465_v22 = vpop.f32.mrf.mxu2  ;;  %v439_v61 = vpop.f32.mrf.mxu0 }
  0xa9   :  { %v466_v23 = vadd.f32 %v465_v22, %v452_v21  ;;  %v479_v24 = vpop.f32.mrf.mxu3  ;;  %v440_v26 = vadd.f32 %v439_v61, %v84_v17  ;;  %v453_v0 = vpop.f32.mrf.mxu1 }
  0xab   :  { %v480_v25 = vadd.f32 %v479_v24, %v466_v23  ;;  %v454_v55 = vadd.f32 %v453_v0, %v440_v26 }
  0xad   :  { %540 = vst [vmem:[%s1351_s3] sm:$0xff] %v480_v25 }
  0xb0   :  { %v467_v62 = vpop.f32.mrf.mxu2 }
  0xb1   :  { %v468_v27 = vadd.f32 %v467_v62, %v454_v55  ;;  %v481_v28 = vpop.f32.mrf.mxu3 }
  0xb3   :  { %v482_v29 = vadd.f32 %v481_v28, %v468_v27 }
  0xb5   :  { %543 = vst [vmem:[%s1351_s3 + $0x10] sm:$0xff] %v482_v29 }
  0xc0   :  { %v493_v31 = vpop.f32.mrf.mxu0 }
  0xc1   :  { %v494_v32 = vadd.f32 %v493_v31, %v85_v30  ;;  %v507_v33 = vpop.f32.mrf.mxu1 }
  0xc3   :  { %v508_v34 = vadd.f32 %v507_v33, %v494_v32 }
  0xc8   :  { %v521_v35 = vpop.f32.mrf.mxu2  ;;  %v495_v38 = vpop.f32.mrf.mxu0 }
  0xc9   :  { %v522_v36 = vadd.f32 %v521_v35, %v508_v34  ;;  %v535_v37 = vpop.f32.mrf.mxu3  ;;  %v496_v40 = vadd.f32 %v495_v38, %v85_v30  ;;  %v509_v41 = vpop.f32.mrf.mxu1 }
  0xcb   :  { %v536_v39 = vadd.f32 %v535_v37, %v522_v36  ;;  %v510_v42 = vadd.f32 %v509_v41, %v496_v40 }
  0xcd   :  { %542 = vst.msk [vmem:[%s1351_s3 + $0x8] sm:$0xff] %vm541_vm0, %v536_v39 }
  0xd0   :  { %v523_v43 = vpop.f32.mrf.mxu2 }
  0xd1   :  { %v524_v44 = vadd.f32 %v523_v43, %v510_v42  ;;  %v537_v45 = vpop.f32.mrf.mxu3 }
  0xd3   :  { %v538_v46 = vadd.f32 %v537_v45, %v524_v44 }
  0xd5   :  { %544 = vst.msk [vmem:[%s1351_s3 + $0x18] sm:$0xff] %vm541_vm0, %v538_v46 }

// kernel: _lambda_.20
= control target key start
LH: loop header
LB: loop body
LE: loop exit
PB: predicated region body
PF: predicated region fallthrough
CT: control target
= control target key end

     0   :  { %v474_v5 = vmov 0   ;;  %vm203_vm0 = vcmask 261120   ;;  %vm331_vm2 = vcmask 257024   ;;  %s640_s1 = inlined_call_operand.vmem [shape: bf16[288,32], index: 1, kind: input, shape index: {}]   ;;  %s641_s0 = inlined_call_operand.vmem [shape: bf16[32,288], index: 0, kind: input, shape index: {}]   ;;  %s642_s4 = inlined_call_operand.vmem [shape: f32[32,1], index: 4, kind: input, shape index: {}]   ;;  %s643_s2 = inlined_call_operand.vmem [shape: f32[1,32], index: 2, kind: input, shape index: {}]   ;;  %s644_s3 = inlined_call_operand.vmem [shape: f32[32,32], index: 3, kind: input, shape index: {}]   ;;  %s645_s5 = inlined_call_operand.vmem [shape: bf16[32,32], index: 5, kind: output, shape index: {}]  }
   0x1   :  { %v451_v0 = vld [vmem:[%s640_s1 + $0x38] sm:$0xff]  ;;  %v450_v2 = vld [vmem:[%s640_s1 + $0x30] sm:$0xff]  ;;  %v461_v4 = vld [vmem:[%s640_s1 + $0x88] sm:$0xff]  ;;  %471 = vset.pattern.permute.xlu0 %v474_v5  ;;  %472 = vset.pattern.permute.xlu1 %v474_v5 }
   0x2   :  { %v459_v1 = vld [vmem:[%s640_s1 + $0x78] sm:$0xff]  ;;  %210 = vmatpush.bf16.msra.mxu0 %v451_v0  ;;  %v458_v3 = vld [vmem:[%s640_s1 + $0x70] sm:$0xff]  ;;  %462 = vmatpush.bf16.msra.mxu3 %v451_v0  ;;  %v460_v6 = vld [vmem:[%s640_s1 + $0x80] sm:$0xff] }
   0x3   :  { %229 = vmatpush.bf16.msra.mxu1 %v459_v1  ;;  %254 = vmatpush.bf16.msra.mxu2 %v461_v4  ;;  %v350_v7 = vld [vmem:[%s641_s0 + $0x8] sm:$0xf]  ;;  %v440_v8 = vld [vmem:[%s641_s0 + $0x10] sm:$0xf0]  ;;  %v448_v12 = vld [vmem:[%s640_s1 + $0x20] sm:$0xff] }
   0x4   :  { %v449_v9 = vld [vmem:[%s640_s1 + $0x28] sm:$0xff]  ;;  %v351_v11 = vor.u32 %v440_v8, %v350_v7  ;;  %v456_v13 = vld [vmem:[%s640_s1 + $0x60] sm:$0xff]  ;;  %v447_v14 = vld [vmem:[%s640_s1 + $0x18] sm:$0xff] }
   0x5   :  { %v457_v10 = vld [vmem:[%s640_s1 + $0x68] sm:$0xff]  ;;  %v455_v15 = vld [vmem:[%s640_s1 + $0x58] sm:$0xff]  ;;  %v275_v16 = vld [vmem:[%s642_s4] sm:$0xff] }
   0x6   :  { %211 = vmatpush.bf16.msra.mxu0 %v450_v2  ;;  %463 = vmatpush.bf16.msra.mxu3 %v450_v2  ;;  %v277_v17 = vld [vmem:[%s642_s4 + $0x10] sm:$0xff]  ;;  %v362_v20 = vld [vmem:[%s641_s0 + $0x20] sm:$0xf]  ;;  %v443_v21 = vld [vmem:[%s641_s0 + $0x28] sm:$0xf0] }
   0x7   :  { %230 = vmatpush.bf16.msra.mxu1 %v458_v3  ;;  %255 = vmatpush.bf16.msra.mxu2 %v460_v6  ;;  %v446_v18 = vld [vmem:[%s640_s1 + $0x10] sm:$0xff]  ;;  %v445_v22 = vld [vmem:[%s640_s1 + $0x8] sm:$0xff]  ;;  %v363_v24 = vor.u32 %v443_v21, %v362_v20  ;;  %v444_v25 = vld [vmem:[%s640_s1] sm:$0xff] }
   0x8   :  { %v454_v19 = vld [vmem:[%s640_s1 + $0x50] sm:$0xff]  ;;  %281 = vperm.xlu0 %471, %v275_v16   ;;  %291 = vperm.xlu1 %472, %v277_v17   ;;  %v453_v23 = vld [vmem:[%s640_s1 + $0x48] sm:$0xff]  ;;  %v452_v26 = vld [vmem:[%s640_s1 + $0x40] sm:$0xff] }
   0x9   :  { %v342_v27 = vld [vmem:[%s641_s0] sm:$0xf]  ;;  %v276_v28 = vld [vmem:[%s642_s4 + $0x8] sm:$0xff]  ;;  %v278_v29 = vld [vmem:[%s642_s4 + $0x18] sm:$0xff] }
   0xa   :  { %212 = vmatpush.bf16.msra.mxu0 %v449_v9  ;;  %464 = vmatpush.bf16.msra.mxu3 %v449_v9  ;;  %v439_v30 = vld [vmem:[%s641_s0 + $0x8] sm:$0xf0]  ;;  %v438_v31 = vld [vmem:[%s641_s0 + $0x4] sm:$0xf]  ;;  %v344_v32 = vld [vmem:[%s641_s0 + $0xc] sm:$0xf0] }
   0xb   :  { %231 = vmatpush.bf16.msra.mxu1 %v457_v10  ;;  %436 = vmatmul.msk.bf16.vlgmr.msra.gmra.mxu2 %vm203_vm0, %v351_v11  ;;  %v354_v33 = vld [vmem:[%s641_s0 + $0x18] sm:$0xf]  ;;  %v442_v34 = vld [vmem:[%s641_s0 + $0x20] sm:$0xf0]  ;;  %v343_v35 = vor.u32 %v439_v30, %v342_v27  ;;  %v347_v36 = vor.u32 %v438_v31, %v344_v32  ;;  %v441_v38 = vld [vmem:[%s641_s0 + $0x1c] sm:$0xf] }
   0xc   :  { %v355_v37 = vor.u32 %v442_v34, %v354_v33  ;;  %v356_v39 = vld [vmem:[%s641_s0 + $0x24] sm:$0xf0]  ;;  %v267_v46 = vld [vmem:[%s644_s3] sm:$0xff]  ;;  %v269_v6 = vld [vmem:[%s644_s3 + $0x10] sm:$0xff] }
   0xd   :  { %v359_v40 = vor.u32 %v441_v38, %v356_v39  ;;  %v473_v49 = vld [vmem:[%s643_s2] ss:$0 sm:$0xff]  ;;  %v268_v56 = vld [vmem:[%s644_s3 + $0x8] sm:$0xff]  ;;  %v270_v20 = vld [vmem:[%s644_s3 + $0x18] sm:$0xff] }
   0xe   :  { %213 = vmatpush.bf16.msra.mxu0 %v448_v12  ;;  %465 = vmatpush.bf16.msra.mxu3 %v448_v12 }
   0xf   :  { %232 = vmatpush.bf16.msra.mxu1 %v456_v13 }
  0x10   :  { %286 = vperm.xlu0 %471, %v276_v28   ;;  %296 = vperm.xlu1 %472, %v278_v29  }
  0x12   :  { %214 = vmatpush.bf16.msra.mxu0 %v447_v14  ;;  %466 = vmatpush.bf16.msra.mxu3 %v447_v14 }
  0x13   :  { %233 = vmatpush.bf16.msra.mxu1 %v455_v15 }
  0x16   :  { %215 = vmatpush.bf16.msra.mxu0 %v446_v18  ;;  %467 = vmatpush.bf16.msra.mxu3 %v446_v18 }
  0x17   :  { %234 = vmatpush.bf16.msra.mxu1 %v454_v19 }
  0x1a   :  { %216 = vmatpush.bf16.msra.mxu0 %v445_v22  ;;  %468 = vmatpush.bf16.msra.mxu3 %v445_v22 }
  0x1b   :  { %235 = vmatpush.bf16.msra.mxu1 %v453_v23  ;;  %437 = vmatmul.msk.bf16.gmra.mxu2 %vm203_vm0, %v363_v24 }
  0x1e   :  { %217 = vmatpush.bf16.msra.mxu0 %v444_v25  ;;  %469 = vmatpush.bf16.msra.mxu3 %v444_v25 }
  0x1f   :  { %236 = vmatpush.bf16.msra.mxu1 %v452_v26 }
  0x21   :  { %218 = vmatmul.bf16.vlgmr.msra.gmra.mxu0 %v343_v35  ;;  %223 = vmatmul.bf16.vlgmr.msra.gmra.mxu3 %v355_v37 }
  0x22   :  { %237 = vmatmul.bf16.vlgmr.msra.gmra.mxu1 %v347_v36 }
  0x32   :  { %242 = vmatmul.bf16.gmra.mxu1 %v359_v40 }
  0x7a   :  { %v282_v45 = vpop.permute.xlu0 %281  ;;  %v292_v9 = vpop.permute.xlu1 %291 }
  0x82   :  { %v287_v59 = vpop.permute.xlu0 %286  ;;  %v297_v26 = vpop.permute.xlu1 %296 }
  0x8e   :  { %v257_v41 = vpop.f32.mrf.mxu2 }
  0x96   :  { %v259_v50 = vpop.f32.mrf.mxu2 }
  0x9e   :  { %v219_v42 = vpop.f32.mrf.mxu0  ;;  %v262_v2 = vpop.f32.mrf.mxu2 }
  0x9f   :  { %v238_v43 = vpop.f32.mrf.mxu1 }
  0xa0   :  { %v239_v44 = vadd.f32 %v238_v43, %v219_v42 }
  0xa2   :  { %v258_v47 = vadd.f32 %v257_v41, %v239_v44 }
  0xa4   :  { %v271_v48 = vmul.f32 %v267_v46, %v258_v47  ;;  %v224_v63 = vpop.f32.mrf.mxu3 }
  0xa6   :  { %v299_v51 = vadd.f32 %v282_v45, %v271_v48  ;;  %v221_v52 = vpop.f32.mrf.mxu0  ;;  %v264_v19 = vpop.f32.mrf.mxu2 }
  0xa7   :  { %v240_v53 = vpop.f32.mrf.mxu1 }
  0xa8   :  { %v307_v54 = vadd.f32 %v473_v49, %v299_v51  ;;  %v241_v55 = vadd.f32 %v240_v53, %v221_v52 }
  0xaa   :  { %vm311_vm1 = vcmp.ge.f32.partialorder %v307_v54, 0.0  ;;  %v315_v57 = vmul.f32 0.2, %v307_v54  ;;  %v260_v58 = vadd.f32 %v259_v50, %v241_v55 }
  0xac   :  { %v319_v60 = vsel %vm311_vm1, %v307_v54, %v315_v57  ;;  %v272_v61 = vmul.f32 %v268_v56, %v260_v58  ;;  %v226_v15 = vpop.f32.mrf.mxu3 }
  0xad   :  { %v323_v62 = vmul.f32 1.4142135, %v319_v60 }
  0xae   :  { %v300_v0 = vadd.f32 %v287_v59, %v272_v61 }
  0xaf   :  { %v327_v1 = vpack.c.bf16 %v323_v62, %v323_v62  ;;  %v243_v3 = vpop.f32.mrf.mxu1 }
  0xb0   :  { %v308_v4 = vadd.f32 %v473_v49, %v300_v0  ;;  %v244_v5 = vadd.f32 %v243_v3, %v224_v63 }
  0xb1   :  { %332 = vst.msk [vmem:[%s645_s5] sm:$0xf] %vm331_vm2, %v327_v1 }
  0xb2   :  { %vm312_vm3 = vcmp.ge.f32.partialorder %v308_v4, 0.0  ;;  %v316_v7 = vmul.f32 0.2, %v308_v4  ;;  %v263_v8 = vadd.f32 %v262_v2, %v244_v5 }
  0xb4   :  { %v320_v10 = vsel %vm312_vm3, %v308_v4, %v316_v7  ;;  %v273_v11 = vmul.f32 %v269_v6, %v263_v8 }
  0xb5   :  { %v324_v12 = vmul.f32 1.4142135, %v320_v10 }
  0xb6   :  { %v301_v13 = vadd.f32 %v292_v9, %v273_v11 }
  0xb7   :  { %v328_v14 = vpack.c.bf16 %v324_v12, %v324_v12  ;;  %v245_v16 = vpop.f32.mrf.mxu1 }
  0xb8   :  { %v309_v17 = vadd.f32 %v473_v49, %v301_v13  ;;  %v246_v18 = vadd.f32 %v245_v16, %v226_v15 }
  0xb9   :  { %333 = vst.msk [vmem:[%s645_s5 + $0x4] sm:$0xf] %vm331_vm2, %v328_v14 }
  0xba   :  { %vm313_vm4 = vcmp.ge.f32.partialorder %v309_v17, 0.0  ;;  %v317_v21 = vmul.f32 0.2, %v309_v17  ;;  %v265_v22 = vadd.f32 %v264_v19, %v246_v18 }
  0xbc   :  { %v321_v23 = vsel %vm313_vm4, %v309_v17, %v317_v21  ;;  %v274_v24 = vmul.f32 %v270_v20, %v265_v22 }
  0xbd   :  { %v325_v25 = vmul.f32 1.4142135, %v321_v23 }
  0xbe   :  { %v302_v27 = vadd.f32 %v297_v26, %v274_v24 }
  0xbf   :  { %v329_v28 = vpack.c.bf16 %v325_v25, %v325_v25 }
  0xc0   :  { %v310_v29 = vadd.f32 %v473_v49, %v302_v27 }
  0xc1   :  { %334 = vst.msk [vmem:[%s645_s5 + $0x8] sm:$0xf] %vm331_vm2, %v329_v28 }
  0xc2   :  { %vm314_vm5 = vcmp.ge.f32.partialorder %v310_v29, 0.0  ;;  %v318_v30 = vmul.f32 0.2, %v310_v29 }
  0xc4   :  { %v322_v31 = vsel %vm314_vm5, %v310_v29, %v318_v30 }
  0xc5   :  { %v326_v32 = vmul.f32 1.4142135, %v322_v31 }
  0xc7   :  { %v330_v33 = vpack.c.bf16 %v326_v32, %v326_v32 }
  0xc9   :  { %335 = vst.msk [vmem:[%s645_s5 + $0xc] sm:$0xf] %vm331_vm2, %v330_v33 }

// kernel: _lambda_.21
= control target key start
LH: loop header
LB: loop body
LE: loop exit
PB: predicated region body
PF: predicated region fallthrough
CT: control target
= control target key end

     0   :  { %vm49_vm0 = vcmask 261120   ;;  %vm75_vm1 = vcmask 23552   ;;  %s156_s1 = inlined_call_operand.vmem [shape: bf16[32,3], index: 1, kind: input, shape index: {}]   ;;  %s157_s2 = inlined_call_operand.vmem [shape: f32[1,3], index: 2, kind: input, shape index: {}]   ;;  %s158_s0 = inlined_call_operand.vmem [shape: bf16[32,32], index: 0, kind: input, shape index: {}]   ;;  %s159_s3 = inlined_call_operand.vmem [shape: f32[32,3], index: 3, kind: output, shape index: {}]  }
   0x1   :  { %v105_v0 = vld [vmem:[%s156_s1 + $0x8] sm:$0xff]  ;;  %v104_v1 = vld [vmem:[%s156_s1] sm:$0xff] }
   0x2   :  { %62 = vmatpush.bf16.msra.mxu0 %v105_v0  ;;  %106 = vmatpush.bf16.msra.mxu1 %v105_v0  ;;  %v102_v2 = vld [vmem:[%s158_s0] sm:$0xff]  ;;  %v103_v3 = vld [vmem:[%s158_s0 + $0x8] sm:$0xff] }
   0x3   :  { %v108_v4 = vld [vmem:[%s157_s2] ss:$0 sm:$0xff] }
   0x6   :  { %63 = vmatpush.bf16.msra.mxu0 %v104_v1  ;;  %107 = vmatpush.bf16.msra.mxu1 %v104_v1 }
   0x9   :  { %100 = vmatmul.msk.bf16.vlgmr.msra.gmra.mxu0 %vm49_vm0, %v102_v2  ;;  %101 = vmatmul.msk.bf16.vlgmr.msra.gmra.mxu1 %vm49_vm0, %v103_v3 }
  0x86   :  { %v65_v5 = vpop.f32.mrf.mxu0  ;;  %v70_v6 = vpop.f32.mrf.mxu1 }
  0x87   :  { %v66_v7 = vadd.f32 %v108_v4, %v65_v5  ;;  %v71_v8 = vadd.f32 %v108_v4, %v70_v6 }
  0x89   :  { %76 = vst.msk [vmem:[%s159_s3] sm:$0xff] %vm75_vm1, %v66_v7 }
  0x8a   :  { %78 = vst.msk [vmem:[%s159_s3 + $0x10] sm:$0xff] %vm75_vm1, %v71_v8 }
  0x8e   :  { %v67_v9 = vpop.f32.mrf.mxu0  ;;  %v72_v10 = vpop.f32.mrf.mxu1 }
  0x8f   :  { %v68_v11 = vadd.f32 %v108_v4, %v67_v9  ;;  %v73_v12 = vadd.f32 %v108_v4, %v72_v10 }
  0x91   :  { %77 = vst.msk [vmem:[%s159_s3 + $0x8] sm:$0xff] %vm75_vm1, %v68_v11 }
  0x92   :  { %79 = vst.msk [vmem:[%s159_s3 + $0x18] sm:$0xff] %vm75_vm1, %v73_v12 }

// kernel: _lambda_.22
= control target key start
LH: loop header
LB: loop body
LE: loop exit
PB: predicated region body
PF: predicated region fallthrough
CT: control target
= control target key end

     0   :  { %vm317_vm0 = vcmask 261120   ;;  %v993_v13 = vmov 0   ;;  %vm733_vm2 = vcmask 257024   ;;  %s1446_s1 = inlined_call_operand.vmem [shape: bf16[288,32], index: 1, kind: input, shape index: {}]   ;;  %s1447_s0 = inlined_call_operand.vmem [shape: bf16[128,288], index: 0, kind: input, shape index: {}]   ;;  %s1448_s4 = inlined_call_operand.vmem [shape: f32[128,1], index: 4, kind: input, shape index: {}]   ;;  %s1449_s2 = inlined_call_operand.vmem [shape: f32[1,32], index: 2, kind: input, shape index: {}]   ;;  %s1450_s3 = inlined_call_operand.vmem [shape: f32[128,32], index: 3, kind: input, shape index: {}]   ;;  %s1451_s5 = inlined_call_operand.vmem [shape: bf16[128,32], index: 5, kind: output, shape index: {}]  }
   0x1   :  { %v961_v0 = vld [vmem:[%s1446_s1 + $0x38] sm:$0xff]  ;;  %v971_v2 = vld [vmem:[%s1446_s1 + $0x88] sm:$0xff]  ;;  %v960_v3 = vld [vmem:[%s1446_s1 + $0x30] sm:$0xff]  ;;  %989 = vset.pattern.permute.xlu0 %v993_v13  ;;  %990 = vset.pattern.permute.xlu1 %v993_v13 }
   0x2   :  { %v1030_v1 = vld [vmem:[%s1446_s1 + $0x78] sm:$0xff]  ;;  %342 = vmatpush.bf16.msra.mxu0 %v961_v0  ;;  %972 = vmatpush.bf16.msra.mxu3 %v961_v0  ;;  %v1041_v4 = vld [vmem:[%s1446_s1 + $0x70] sm:$0xff]  ;;  %v970_v5 = vld [vmem:[%s1446_s1 + $0x80] sm:$0xff] }
   0x3   :  { %391 = vmatpush.bf16.msra.mxu1 %v1030_v1  ;;  %446 = vmatpush.bf16.msra.mxu2 %v971_v2  ;;  %v764_v6 = vld [vmem:[%s1447_s0 + $0x8] sm:$0xf]  ;;  %v932_v7 = vld [vmem:[%s1447_s0 + $0x10] sm:$0xf0]  ;;  %v958_v11 = vld [vmem:[%s1446_s1 + $0x20] sm:$0xff] }
   0x4   :  { %v765_v8 = vor.u32 %v932_v7, %v764_v6  ;;  %v959_v9 = vld [vmem:[%s1446_s1 + $0x28] sm:$0xff]  ;;  %v1070_v12 = vld [vmem:[%s1446_s1 + $0x60] sm:$0xff]  ;;  %v957_v14 = vld [vmem:[%s1446_s1 + $0x18] sm:$0xff]  ;;  %991 = vset.pattern.permute.xlu2 %v993_v13 }
   0x5   :  { %v1060_v10 = vld [vmem:[%s1446_s1 + $0x68] sm:$0xff]  ;;  %v965_v15 = vld [vmem:[%s1446_s1 + $0x58] sm:$0xff]  ;;  %v956_v16 = vld [vmem:[%s1446_s1 + $0x10] sm:$0xff] }
   0x6   :  { %343 = vmatpush.bf16.msra.mxu0 %v960_v3  ;;  %973 = vmatpush.bf16.msra.mxu3 %v960_v3  ;;  %v521_v17 = vld [vmem:[%s1448_s4] sm:$0xff]  ;;  %v964_v18 = vld [vmem:[%s1446_s1 + $0x50] sm:$0xff]  ;;  %v935_v20 = vld [vmem:[%s1447_s0 + $0x28] sm:$0xf0] }
   0x7   :  { %392 = vmatpush.bf16.msra.mxu1 %v1041_v4  ;;  %447 = vmatpush.bf16.msra.mxu2 %v970_v5  ;;  %v776_v19 = vld [vmem:[%s1447_s0 + $0x20] sm:$0xf]  ;;  %v955_v22 = vld [vmem:[%s1446_s1 + $0x8] sm:$0xff]  ;;  %v828_v28 = vld [vmem:[%s1447_s0 + $0x90] sm:$0xf] }
   0x8   :  { %539 = vperm.xlu0 %989, %v521_v17   ;;  %v777_v21 = vor.u32 %v935_v20, %v776_v19  ;;  %v963_v23 = vld [vmem:[%s1446_s1 + $0x48] sm:$0xff]  ;;  %v954_v24 = vld [vmem:[%s1446_s1] sm:$0xff]  ;;  %v949_v30 = vld [vmem:[%s1447_s0 + $0x98] sm:$0xf0] }
   0x9   :  { %v1106_v25 = vld [vmem:[%s1446_s1 + $0x40] sm:$0xff]  ;;  %v931_v27 = vld [vmem:[%s1447_s0 + $0x8] sm:$0xf0]  ;;  %v758_v32 = vld [vmem:[%s1447_s0 + $0xc] sm:$0xf0]  ;;  %v829_v34 = vor.u32 %v949_v30, %v828_v28 }
   0xa   :  { %922 = vmatmul.msk.bf16.vlgmr.msra.gmra.mxu2 %vm317_vm0, %v765_v8  ;;  %344 = vmatpush.bf16.msra.mxu0 %v959_v9  ;;  %v756_v26 = vld [vmem:[%s1447_s0] sm:$0xf]  ;;  %v522_v29 = vld [vmem:[%s1448_s4 + $0x8] sm:$0xff]  ;;  %v930_v31 = vld [vmem:[%s1447_s0 + $0x4] sm:$0xf] }
   0xb   :  { %974 = vmatpush.bf16.msra.mxu3 %v959_v9  ;;  %393 = vmatpush.bf16.msra.mxu1 %v1060_v10  ;;  %v757_v33 = vor.u32 %v931_v27, %v756_v26  ;;  %v761_v35 = vor.u32 %v930_v31, %v758_v32  ;;  %v523_v36 = vld [vmem:[%s1448_s4 + $0x10] sm:$0xff]  ;;  %v788_v37 = vld [vmem:[%s1447_s0 + $0x38] sm:$0xf]  ;;  %v938_v38 = vld [vmem:[%s1447_s0 + $0x40] sm:$0xf0] }
   0xc   :  { %549 = vperm.xlu1 %990, %v523_v36   ;;  %v789_v39 = vor.u32 %v938_v38, %v788_v37  ;;  %v768_v40 = vld [vmem:[%s1447_s0 + $0x18] sm:$0xf]  ;;  %v934_v41 = vld [vmem:[%s1447_s0 + $0x20] sm:$0xf0]  ;;  %v840_v42 = vld [vmem:[%s1447_s0 + $0xa8] sm:$0xf] }
   0xd   :  { %v524_v43 = vld [vmem:[%s1448_s4 + $0x18] sm:$0xff]  ;;  %v952_v44 = vld [vmem:[%s1447_s0 + $0xb0] sm:$0xf0]  ;;  %v770_v46 = vld [vmem:[%s1447_s0 + $0x24] sm:$0xf0]  ;;  %v769_v47 = vor.u32 %v934_v41, %v768_v40 }
   0xe   :  { %345 = vmatpush.bf16.msra.mxu0 %v958_v11  ;;  %v933_v45 = vld [vmem:[%s1447_s0 + $0x1c] sm:$0xf]  ;;  %v841_v48 = vor.u32 %v952_v44, %v840_v42  ;;  %v527_v50 = vld [vmem:[%s1448_s4 + $0x30] sm:$0xff]  ;;  %v530_v57 = vld [vmem:[%s1448_s4 + $0x48] sm:$0xff] }
   0xf   :  { %975 = vmatpush.bf16.msra.mxu3 %v958_v11  ;;  %394 = vmatpush.bf16.msra.mxu1 %v1070_v12  ;;  %v773_v49 = vor.u32 %v933_v45, %v770_v46  ;;  %v800_v51 = vld [vmem:[%s1447_s0 + $0x50] sm:$0xf]  ;;  %v941_v52 = vld [vmem:[%s1447_s0 + $0x58] sm:$0xf0]  ;;  %v936_v56 = vld [vmem:[%s1447_s0 + $0x34] sm:$0xf] }
  0x10   :  { %544 = vperm.xlu0 %989, %v522_v29   ;;  %v801_v53 = vor.u32 %v941_v52, %v800_v51  ;;  %v780_v54 = vld [vmem:[%s1447_s0 + $0x30] sm:$0xf]  ;;  %v937_v55 = vld [vmem:[%s1447_s0 + $0x38] sm:$0xf0]  ;;  %v782_v58 = vld [vmem:[%s1447_s0 + $0x3c] sm:$0xf0] }
  0x11   :  { %v948_v59 = vld [vmem:[%s1447_s0 + $0x94] sm:$0xf]  ;;  %v830_v60 = vld [vmem:[%s1447_s0 + $0x9c] sm:$0xf0]  ;;  %v781_v61 = vor.u32 %v937_v55, %v780_v54  ;;  %v785_v62 = vor.u32 %v936_v56, %v782_v58  ;;  %v528_v0 = vld [vmem:[%s1448_s4 + $0x38] sm:$0xff] }
  0x12   :  { %346 = vmatpush.bf16.msra.mxu0 %v957_v14  ;;  %v833_v63 = vor.u32 %v948_v59, %v830_v60  ;;  %v812_v2 = vld [vmem:[%s1447_s0 + $0x68] sm:$0xf]  ;;  %v944_v3 = vld [vmem:[%s1447_s0 + $0x70] sm:$0xf0]  ;;  %v939_v7 = vld [vmem:[%s1447_s0 + $0x4c] sm:$0xf] }
  0x13   :  { %976 = vmatpush.bf16.msra.mxu3 %v957_v14  ;;  %395 = vmatpush.bf16.msra.mxu1 %v965_v15  ;;  %v792_v5 = vld [vmem:[%s1447_s0 + $0x48] sm:$0xf]  ;;  %v940_v6 = vld [vmem:[%s1447_s0 + $0x50] sm:$0xf0]  ;;  %v525_v8 = vld [vmem:[%s1448_s4 + $0x20] sm:$0xff] }
  0x14   :  { %554 = vperm.xlu1 %990, %v524_v43   ;;  %v531_v9 = vld [vmem:[%s1448_s4 + $0x50] sm:$0xff]  ;;  %v794_v11 = vld [vmem:[%s1447_s0 + $0x54] sm:$0xf0]  ;;  %559 = vperm.xlu2 %991, %v525_v8   ;;  %v793_v14 = vor.u32 %v940_v6, %v792_v5  ;;  %v526_v17 = vld [vmem:[%s1448_s4 + $0x28] sm:$0xff] }
  0x15   :  { %v842_v13 = vld [vmem:[%s1447_s0 + $0xb4] sm:$0xf0]  ;;  %v824_v19 = vld [vmem:[%s1447_s0 + $0x80] sm:$0xf]  ;;  %v947_v20 = vld [vmem:[%s1447_s0 + $0x88] sm:$0xf0] }
  0x16   :  { %347 = vmatpush.bf16.msra.mxu0 %v956_v16  ;;  %v806_v26 = vld [vmem:[%s1447_s0 + $0x6c] sm:$0xf0]  ;;  %v532_v29 = vld [vmem:[%s1448_s4 + $0x58] sm:$0xff]  ;;  %v950_v31 = vld [vmem:[%s1447_s0 + $0xa0] sm:$0xf0] }
  0x17   :  { %977 = vmatpush.bf16.msra.mxu3 %v956_v16  ;;  %396 = vmatpush.bf16.msra.mxu1 %v964_v18  ;;  %v836_v30 = vld [vmem:[%s1447_s0 + $0x98] sm:$0xf]  ;;  %v818_v36 = vld [vmem:[%s1447_s0 + $0x84] sm:$0xf0]  ;;  %v535_v38 = vld [vmem:[%s1448_s4 + $0x70] sm:$0xff] }
  0x18   :  { %569 = vperm.xlu0 %989, %v527_v50   ;;  %v837_v32 = vor.u32 %v950_v31, %v836_v30  ;;  %v848_v40 = vld [vmem:[%s1447_s0 + $0xb0] sm:$0xf]  ;;  %v953_v41 = vld [vmem:[%s1447_s0 + $0xb8] sm:$0xf0]  ;;  %v489_v50 = vld [vmem:[%s1450_s3] sm:$0xff] }
  0x19   :  { %v849_v42 = vor.u32 %v953_v41, %v848_v40  ;;  %v490_v60 = vld [vmem:[%s1450_s3 + $0x8] sm:$0xff]  ;;  %v493_v40 = vld [vmem:[%s1450_s3 + $0x20] sm:$0xff] }
  0x1a   :  { %923 = vmatmul.msk.bf16.gmra.mxu2 %vm317_vm0, %v777_v21  ;;  %348 = vmatpush.bf16.msra.mxu0 %v955_v22  ;;  %v825_v21 = vor.u32 %v947_v20, %v824_v19 }
  0x1b   :  { %978 = vmatpush.bf16.msra.mxu3 %v955_v22  ;;  %397 = vmatpush.bf16.msra.mxu1 %v963_v23  ;;  %v804_v22 = vld [vmem:[%s1447_s0 + $0x60] sm:$0xf] }
  0x1c   :  { %574 = vperm.xlu1 %990, %v528_v0   ;;  %564 = vperm.xlu2 %991, %v526_v17  }
  0x1e   :  { %349 = vmatpush.bf16.msra.mxu0 %v954_v24 }
  0x1f   :  { %979 = vmatpush.bf16.msra.mxu3 %v954_v24  ;;  %398 = vmatpush.bf16.msra.mxu1 %v1106_v25  ;;  %v529_v24 = vld [vmem:[%s1448_s4 + $0x40] sm:$0xff] }
  0x20   :  { %584 = vperm.xlu0 %989, %v530_v57  }
  0x21   :  { %350 = vmatmul.bf16.vlgmr.msra.gmra.mxu0 %v757_v33  ;;  %v816_v33 = vld [vmem:[%s1447_s0 + $0x78] sm:$0xf] }
  0x22   :  { %380 = vmatmul.bf16.vlgmr.msra.gmra.mxu3 %v829_v34  ;;  %399 = vmatmul.bf16.vlgmr.msra.gmra.mxu1 %v761_v35  ;;  %v946_v34 = vld [vmem:[%s1447_s0 + $0x80] sm:$0xf0]  ;;  %v945_v35 = vld [vmem:[%s1447_s0 + $0x7c] sm:$0xf] }
  0x23   :  { %980 = vmatpush.bf16.msrb.mxu3 %v1030_v1  ;;  %v533_v1 = vld [vmem:[%s1448_s4 + $0x60] sm:$0xff]  ;;  %v817_v37 = vor.u32 %v946_v34, %v816_v33 }
  0x24   :  { %589 = vperm.xlu1 %990, %v531_v9   ;;  %579 = vperm.xlu2 %991, %v529_v24   ;;  %v492_v24 = vld [vmem:[%s1450_s3 + $0x18] sm:$0xff] }
  0x27   :  { %981 = vmatpush.bf16.msrb.mxu3 %v1041_v4  ;;  %v813_v4 = vor.u32 %v944_v3, %v812_v2 }
  0x28   :  { %599 = vperm.xlu0 %989, %v533_v1  }
  0x2a   :  { %924 = vmatmul.msk.bf16.gmra.mxu2 %vm317_vm0, %v789_v39  ;;  %v821_v39 = vor.u32 %v945_v35, %v818_v36 }
  0x2b   :  { %982 = vmatpush.bf16.msrb.mxu3 %v1060_v10  ;;  %v536_v10 = vld [vmem:[%s1448_s4 + $0x78] sm:$0xff] }
  0x2c   :  { %594 = vperm.xlu2 %991, %v532_v29  }
  0x2f   :  { %983 = vmatpush.bf16.msrb.mxu3 %v1070_v12  ;;  %v951_v12 = vld [vmem:[%s1447_s0 + $0xac] sm:$0xf] }
  0x30   :  { %614 = vperm.xlu0 %989, %v536_v10   ;;  %v845_v16 = vor.u32 %v951_v12, %v842_v13 }
  0x31   :  { %355 = vmatmul.bf16.gmra.mxu0 %v769_v47 }
  0x32   :  { %385 = vmatmul.bf16.gmra.mxu3 %v841_v48  ;;  %404 = vmatmul.bf16.gmra.mxu1 %v773_v49 }
  0x33   :  { %984 = vmatpush.bf16.msrb.mxu3 %v965_v15  ;;  %v797_v15 = vor.u32 %v939_v7, %v794_v11  ;;  %v491_v11 = vld [vmem:[%s1450_s3 + $0x10] sm:$0xff] }
  0x34   :  { %609 = vperm.xlu2 %991, %v535_v38  }
  0x37   :  { %985 = vmatpush.bf16.msrb.mxu3 %v964_v18  ;;  %v534_v18 = vld [vmem:[%s1448_s4 + $0x68] sm:$0xff] }
  0x38   :  { %604 = vperm.xlu1 %990, %v534_v18  }
  0x3a   :  { %925 = vmatmul.msk.bf16.gmra.mxu2 %vm317_vm0, %v801_v53  ;;  %v1304_v53 = vld [vmem:[%s1449_s2] ss:$0 sm:$0xff] }
  0x3b   :  { %986 = vmatpush.bf16.msrb.mxu3 %v963_v23  ;;  %v943_v23 = vld [vmem:[%s1447_s0 + $0x68] sm:$0xf0] }
  0x3c   :  { %v805_v27 = vor.u32 %v943_v23, %v804_v22 }
  0x3f   :  { %987 = vmatpush.bf16.msrb.mxu3 %v1106_v25  ;;  %v942_v25 = vld [vmem:[%s1447_s0 + $0x64] sm:$0xf] }
  0x40   :  { %v809_v28 = vor.u32 %v942_v25, %v806_v26 }
  0x41   :  { %360 = vmatmul.bf16.gmra.mxu0 %v781_v61 }
  0x42   :  { %409 = vmatmul.bf16.gmra.mxu1 %v785_v62  ;;  %429 = vmatmul.bf16.vlgmr.msrb.gmra.mxu3 %v833_v63 }
  0x4a   :  { %926 = vmatmul.msk.bf16.gmra.mxu2 %vm317_vm0, %v813_v4 }
  0x51   :  { %365 = vmatmul.bf16.gmra.mxu0 %v793_v14 }
  0x52   :  { %414 = vmatmul.bf16.gmra.mxu1 %v797_v15  ;;  %434 = vmatmul.bf16.gmra.mxu3 %v845_v16 }
  0x5a   :  { %927 = vmatmul.msk.bf16.gmra.mxu2 %vm317_vm0, %v825_v21 }
  0x61   :  { %370 = vmatmul.bf16.gmra.mxu0 %v805_v27 }
  0x62   :  { %419 = vmatmul.bf16.gmra.mxu1 %v809_v28 }
  0x6a   :  { %928 = vmatmul.msk.bf16.gmra.mxu2 %vm317_vm0, %v837_v32 }
  0x71   :  { %375 = vmatmul.bf16.gmra.mxu0 %v817_v37 }
  0x72   :  { %424 = vmatmul.bf16.gmra.mxu1 %v821_v39  ;;  %v560_v39 = vpop.permute.xlu2 %559 }
  0x7a   :  { %929 = vmatmul.msk.bf16.gmra.mxu2 %vm317_vm0, %v849_v42  ;;  %v540_v49 = vpop.permute.xlu0 %539 }
  0x7e   :  { %v550_v10 = vpop.permute.xlu1 %549 }
  0x82   :  { %v545_v63 = vpop.permute.xlu0 %544 }
  0x86   :  { %v555_v28 = vpop.permute.xlu1 %554 }
  0x8d   :  { %v449_v43 = vpop.f32.mrf.mxu2 }
  0x95   :  { %v451_v44 = vpop.f32.mrf.mxu2 }
  0x9d   :  { %v454_v45 = vpop.f32.mrf.mxu2 }
  0x9e   :  { %v351_v46 = vpop.f32.mrf.mxu0 }
  0x9f   :  { %v400_v47 = vpop.f32.mrf.mxu1 }
  0xa0   :  { %v401_v48 = vadd.f32 %v400_v47, %v351_v46 }
  0xa2   :  { %v450_v51 = vadd.f32 %v449_v43, %v401_v48 }
  0xa4   :  { %v505_v52 = vmul.f32 %v489_v50, %v450_v51 }
  0xa5   :  { %v456_v54 = vpop.f32.mrf.mxu2  ;;  %v1326_v27 = vpop.f32.mrf.mxu3 }
  0xa6   :  { %v617_v55 = vadd.f32 %v540_v49, %v505_v52  ;;  %v353_v56 = vpop.f32.mrf.mxu0 }
  0xa7   :  { %v402_v57 = vpop.f32.mrf.mxu1 }
  0xa8   :  { %v637_v58 = vadd.f32 %v1304_v53, %v617_v55  ;;  %v403_v59 = vadd.f32 %v402_v57, %v353_v56  ;;  %v494_v55 = vld [vmem:[%s1450_s3 + $0x28] sm:$0xff] }
  0xaa   :  { %vm653_vm1 = vcmp.ge.f32.partialorder %v637_v58, 0.0  ;;  %v669_v61 = vmul.f32 0.2, %v637_v58  ;;  %v452_v62 = vadd.f32 %v451_v44, %v403_v59 }
  0xac   :  { %v685_v0 = vsel %vm653_vm1, %v637_v58, %v669_v61  ;;  %v506_v1 = vmul.f32 %v490_v60, %v452_v62  ;;  %v565_v58 = vpop.permute.xlu2 %564 }
  0xad   :  { %v701_v2 = vmul.f32 1.4142135, %v685_v0  ;;  %v459_v3 = vpop.f32.mrf.mxu2 }
  0xae   :  { %v618_v4 = vadd.f32 %v545_v63, %v506_v1  ;;  %v356_v5 = vpop.f32.mrf.mxu0 }
  0xaf   :  { %v717_v6 = vpack.c.bf16 %v701_v2, %v701_v2  ;;  %v405_v7 = vpop.f32.mrf.mxu1 }
  0xb0   :  { %v638_v8 = vadd.f32 %v1304_v53, %v618_v4  ;;  %v406_v9 = vadd.f32 %v405_v7, %v356_v5 }
  0xb1   :  { %734 = vst.msk [vmem:[%s1451_s5] sm:$0xf] %vm733_vm2, %v717_v6  ;;  %v495_v6 = vld [vmem:[%s1450_s3 + $0x30] sm:$0xff] }
  0xb2   :  { %vm654_vm3 = vcmp.ge.f32.partialorder %v638_v8, 0.0  ;;  %v670_v12 = vmul.f32 0.2, %v638_v8  ;;  %v455_v13 = vadd.f32 %v454_v45, %v406_v9  ;;  %v1336_v45 = vpop.f32.mrf.mxu3 }
  0xb4   :  { %v686_v14 = vsel %vm654_vm3, %v638_v8, %v670_v12  ;;  %v507_v15 = vmul.f32 %v491_v11, %v455_v13  ;;  %v570_v11 = vpop.permute.xlu0 %569 }
  0xb5   :  { %v702_v16 = vmul.f32 1.4142135, %v686_v14  ;;  %v461_v17 = vpop.f32.mrf.mxu2 }
  0xb6   :  { %v619_v18 = vadd.f32 %v550_v10, %v507_v15  ;;  %v358_v19 = vpop.f32.mrf.mxu0 }
  0xb7   :  { %v718_v20 = vpack.c.bf16 %v702_v16, %v702_v16  ;;  %v407_v21 = vpop.f32.mrf.mxu1 }
  0xb8   :  { %v639_v22 = vadd.f32 %v1304_v53, %v619_v18  ;;  %v408_v23 = vadd.f32 %v407_v21, %v358_v19  ;;  %v496_v21 = vld [vmem:[%s1450_s3 + $0x38] sm:$0xff] }
  0xb9   :  { %735 = vst.msk [vmem:[%s1451_s5 + $0x4] sm:$0xf] %vm733_vm2, %v718_v20 }
  0xba   :  { %vm655_vm4 = vcmp.ge.f32.partialorder %v639_v22, 0.0  ;;  %v671_v25 = vmul.f32 0.2, %v639_v22  ;;  %v457_v26 = vadd.f32 %v456_v54, %v408_v23  ;;  %v1346_v1 = vpop.f32.mrf.mxu3 }
  0xbc   :  { %v687_v29 = vsel %vm655_vm4, %v639_v22, %v671_v25  ;;  %v508_v30 = vmul.f32 %v492_v24, %v457_v26 }
  0xbd   :  { %v703_v31 = vmul.f32 1.4142135, %v687_v29  ;;  %v464_v32 = vpop.f32.mrf.mxu2 }
  0xbe   :  { %v620_v33 = vadd.f32 %v555_v28, %v508_v30  ;;  %v361_v34 = vpop.f32.mrf.mxu0  ;;  %v575_v28 = vpop.permute.xlu1 %574 }
  0xbf   :  { %v719_v35 = vpack.c.bf16 %v703_v31, %v703_v31  ;;  %v410_v36 = vpop.f32.mrf.mxu1 }
  0xc0   :  { %v640_v37 = vadd.f32 %v1304_v53, %v620_v33  ;;  %v411_v38 = vadd.f32 %v410_v36, %v361_v34  ;;  %v497_v36 = vld [vmem:[%s1450_s3 + $0x40] sm:$0xff] }
  0xc1   :  { %736 = vst.msk [vmem:[%s1451_s5 + $0x8] sm:$0xf] %vm733_vm2, %v719_v35 }
  0xc2   :  { %vm656_vm5 = vcmp.ge.f32.partialorder %v640_v37, 0.0  ;;  %v672_v41 = vmul.f32 0.2, %v640_v37  ;;  %v460_v42 = vadd.f32 %v459_v3, %v411_v38  ;;  %v1357_v20 = vpop.f32.mrf.mxu3 }
  0xc4   :  { %v688_v43 = vsel %vm656_vm5, %v640_v37, %v672_v41  ;;  %v509_v44 = vmul.f32 %v493_v40, %v460_v42  ;;  %v580_v42 = vpop.permute.xlu2 %579 }
  0xc5   :  { %v704_v46 = vmul.f32 1.4142135, %v688_v43  ;;  %v466_v47 = vpop.f32.mrf.mxu2 }
  0xc6   :  { %v621_v48 = vadd.f32 %v560_v39, %v509_v44  ;;  %v363_v49 = vpop.f32.mrf.mxu0 }
  0xc7   :  { %v720_v50 = vpack.c.bf16 %v704_v46, %v704_v46  ;;  %v412_v51 = vpop.f32.mrf.mxu1 }
  0xc8   :  { %v641_v52 = vadd.f32 %v1304_v53, %v621_v48  ;;  %v413_v54 = vadd.f32 %v412_v51, %v363_v49  ;;  %v585_v48 = vpop.permute.xlu0 %584 }
  0xc9   :  { %737 = vst.msk [vmem:[%s1451_s5 + $0xc] sm:$0xf] %vm733_vm2, %v720_v50 }
  0xca   :  { %vm657_vm6 = vcmp.ge.f32.partialorder %v641_v52, 0.0  ;;  %v673_v56 = vmul.f32 0.2, %v641_v52  ;;  %v462_v57 = vadd.f32 %v461_v17, %v413_v54  ;;  %v430_v39 = vpop.f32.mrf.mxu3  ;;  %v498_v54 = vld [vmem:[%s1450_s3 + $0x48] sm:$0xff] }
  0xcc   :  { %v689_v59 = vsel %vm657_vm6, %v641_v52, %v673_v56  ;;  %v510_v60 = vmul.f32 %v494_v55, %v462_v57  ;;  %v431_v57 = vadd.f32 %v430_v39, %v1326_v27 }
  0xcd   :  { %v705_v61 = vmul.f32 1.4142135, %v689_v59  ;;  %v469_v62 = vpop.f32.mrf.mxu2 }
  0xce   :  { %v622_v63 = vadd.f32 %v565_v58, %v510_v60  ;;  %v366_v0 = vpop.f32.mrf.mxu0 }
  0xcf   :  { %v721_v2 = vpack.c.bf16 %v705_v61, %v705_v61  ;;  %v415_v3 = vpop.f32.mrf.mxu1 }
  0xd0   :  { %v642_v4 = vadd.f32 %v1304_v53, %v622_v63  ;;  %v416_v5 = vadd.f32 %v415_v3, %v366_v0  ;;  %v501_v63 = vld [vmem:[%s1450_s3 + $0x60] sm:$0xff]  ;;  %v600_v27 = vpop.permute.xlu0 %599 }
  0xd1   :  { %738 = vst.msk [vmem:[%s1451_s5 + $0x10] sm:$0xf] %vm733_vm2, %v721_v2 }
  0xd2   :  { %vm658_vm7 = vcmp.ge.f32.partialorder %v642_v4, 0.0  ;;  %v674_v7 = vmul.f32 0.2, %v642_v4  ;;  %v465_v8 = vadd.f32 %v464_v32, %v416_v5  ;;  %v432_v60 = vpop.f32.mrf.mxu3  ;;  %v590_v5 = vpop.permute.xlu1 %589 }
  0xd4   :  { %v690_v9 = vsel %vm658_vm7, %v642_v4, %v674_v7  ;;  %v511_v10 = vmul.f32 %v495_v6, %v465_v8 }
  0xd5   :  { %v706_v12 = vmul.f32 1.4142135, %v690_v9  ;;  %v471_v13 = vpop.f32.mrf.mxu2 }
  0xd6   :  { %v623_v14 = vadd.f32 %v570_v11, %v511_v10  ;;  %v368_v15 = vpop.f32.mrf.mxu0  ;;  %v499_v10 = vld [vmem:[%s1450_s3 + $0x50] sm:$0xff] }
  0xd7   :  { %v722_v16 = vpack.c.bf16 %v706_v12, %v706_v12  ;;  %v417_v17 = vpop.f32.mrf.mxu1 }
  0xd8   :  { %v643_v18 = vadd.f32 %v1304_v53, %v623_v14  ;;  %v418_v19 = vadd.f32 %v417_v17, %v368_v15  ;;  %v433_v14 = vadd.f32 %v432_v60, %v1336_v45 }
  0xd9   :  { %739 = vst.msk [vmem:[%s1451_s5 + $0x14] sm:$0xf] %vm733_vm2, %v722_v16 }
  0xda   :  { %vm659_vm8 = vcmp.ge.f32.partialorder %v643_v18, 0.0  ;;  %v675_v22 = vmul.f32 0.2, %v643_v18  ;;  %v467_v23 = vadd.f32 %v466_v47, %v418_v19 }
  0xdc   :  { %v691_v24 = vsel %vm659_vm8, %v643_v18, %v675_v22  ;;  %v512_v25 = vmul.f32 %v496_v21, %v467_v23  ;;  %v502_v21 = vld [vmem:[%s1450_s3 + $0x68] sm:$0xff]  ;;  %v595_v22 = vpop.permute.xlu2 %594 }
  0xdd   :  { %v707_v26 = vmul.f32 1.4142135, %v691_v24  ;;  %v474_v29 = vpop.f32.mrf.mxu2 }
  0xde   :  { %v624_v30 = vadd.f32 %v575_v28, %v512_v25  ;;  %v371_v31 = vpop.f32.mrf.mxu0  ;;  %v435_v28 = vpop.f32.mrf.mxu3 }
  0xdf   :  { %v723_v32 = vpack.c.bf16 %v707_v26, %v707_v26  ;;  %v420_v33 = vpop.f32.mrf.mxu1 }
  0xe0   :  { %v644_v34 = vadd.f32 %v1304_v53, %v624_v30  ;;  %v421_v35 = vadd.f32 %v420_v33, %v371_v31 }
  0xe1   :  { %740 = vst.msk [vmem:[%s1451_s5 + $0x18] sm:$0xf] %vm733_vm2, %v723_v32 }
  0xe2   :  { %vm660_vm9 = vcmp.ge.f32.partialorder %v644_v34, 0.0  ;;  %v676_v37 = vmul.f32 0.2, %v644_v34  ;;  %v470_v38 = vadd.f32 %v469_v62, %v421_v35 }
  0xe4   :  { %v692_v40 = vsel %vm660_vm9, %v644_v34, %v676_v37  ;;  %v513_v41 = vmul.f32 %v497_v36, %v470_v38  ;;  %v605_v34 = vpop.permute.xlu1 %604  ;;  %v500_v36 = vld [vmem:[%s1450_s3 + $0x58] sm:$0xff] }
  0xe5   :  { %v708_v43 = vmul.f32 1.4142135, %v692_v40  ;;  %v1374_v44 = vpop.f32.mrf.mxu2 }
  0xe6   :  { %v625_v46 = vadd.f32 %v580_v42, %v513_v41  ;;  %v373_v47 = vpop.f32.mrf.mxu0  ;;  %v436_v41 = vadd.f32 %v435_v28, %v1346_v1 }
  0xe7   :  { %v724_v49 = vpack.c.bf16 %v708_v43, %v708_v43  ;;  %v422_v50 = vpop.f32.mrf.mxu1 }
  0xe8   :  { %v645_v51 = vadd.f32 %v1304_v53, %v625_v46  ;;  %v423_v52 = vadd.f32 %v422_v50, %v373_v47 }
  0xe9   :  { %741 = vst.msk [vmem:[%s1451_s5 + $0x1c] sm:$0xf] %vm733_vm2, %v724_v49  ;;  %v503_v49 = vld [vmem:[%s1450_s3 + $0x70] sm:$0xff] }
  0xea   :  { %vm661_vm10 = vcmp.ge.f32.partialorder %v645_v51, 0.0  ;;  %v677_v55 = vmul.f32 0.2, %v645_v51  ;;  %v472_v56 = vadd.f32 %v471_v13, %v423_v52 }
  0xec   :  { %v693_v58 = vsel %vm661_vm10, %v645_v51, %v677_v55  ;;  %v514_v59 = vmul.f32 %v498_v54, %v472_v56  ;;  %v437_v56 = vpop.f32.mrf.mxu3 }
  0xed   :  { %v709_v61 = vmul.f32 1.4142135, %v693_v58  ;;  %v479_v62 = vpop.f32.mrf.mxu2 }
  0xee   :  { %v626_v0 = vadd.f32 %v585_v48, %v514_v59  ;;  %v480_v2 = vadd.f32 %v479_v62, %v431_v57  ;;  %v376_v3 = vpop.f32.mrf.mxu0  ;;  %v610_v57 = vpop.permute.xlu2 %609  ;;  %v438_v62 = vadd.f32 %v437_v56, %v1357_v20 }
  0xef   :  { %v725_v4 = vpack.c.bf16 %v709_v61, %v709_v61  ;;  %v425_v6 = vpop.f32.mrf.mxu1 }
  0xf0   :  { %v646_v7 = vadd.f32 %v1304_v53, %v626_v0  ;;  %v517_v8 = vmul.f32 %v501_v63, %v480_v2  ;;  %v426_v9 = vadd.f32 %v425_v6, %v376_v3 }
  0xf1   :  { %742 = vst.msk [vmem:[%s1451_s5 + $0x20] sm:$0xf] %vm733_vm2, %v725_v4  ;;  %v504_v4 = vld [vmem:[%s1450_s3 + $0x78] sm:$0xff] }
  0xf2   :  { %vm662_vm11 = vcmp.ge.f32.partialorder %v646_v7, 0.0  ;;  %v678_v11 = vmul.f32 0.2, %v646_v7  ;;  %v629_v12 = vadd.f32 %v600_v27, %v517_v8  ;;  %v475_v13 = vadd.f32 %v474_v29, %v426_v9  ;;  %v615_v9 = vpop.permute.xlu0 %614 }
  0xf4   :  { %v694_v15 = vsel %vm662_vm11, %v646_v7, %v678_v11  ;;  %v649_v16 = vadd.f32 %v1304_v53, %v629_v12  ;;  %v515_v17 = vmul.f32 %v499_v10, %v475_v13 }
  0xf5   :  { %v710_v18 = vmul.f32 1.4142135, %v694_v15  ;;  %v481_v19 = vpop.f32.mrf.mxu2 }
  0xf6   :  { %vm665_vm12 = vcmp.ge.f32.partialorder %v649_v16, 0.0  ;;  %v681_v23 = vmul.f32 0.2, %v649_v16  ;;  %v627_v24 = vadd.f32 %v590_v5, %v515_v17  ;;  %v482_v25 = vadd.f32 %v481_v19, %v433_v14  ;;  %v378_v26 = vpop.f32.mrf.mxu0 }
  0xf7   :  { %v726_v29 = vpack.c.bf16 %v710_v18, %v710_v18  ;;  %v427_v30 = vpop.f32.mrf.mxu1 }
  0xf8   :  { %v697_v45 = vsel %vm665_vm12, %v649_v16, %v681_v23  ;;  %v647_v31 = vadd.f32 %v1304_v53, %v627_v24  ;;  %v518_v32 = vmul.f32 %v502_v21, %v482_v25  ;;  %v428_v33 = vadd.f32 %v427_v30, %v378_v26 }
  0xf9   :  { %743 = vst.msk [vmem:[%s1451_s5 + $0x24] sm:$0xf] %vm733_vm2, %v726_v29  ;;  %v713_v35 = vmul.f32 1.4142135, %v697_v45 }
  0xfa   :  { %vm663_vm13 = vcmp.ge.f32.partialorder %v647_v31, 0.0  ;;  %v679_v37 = vmul.f32 0.2, %v647_v31  ;;  %v630_v38 = vadd.f32 %v605_v34, %v518_v32  ;;  %v477_v39 = vadd.f32 %v1374_v44, %v428_v33 }
  0xfb   :  { %v729_v40 = vpack.c.bf16 %v713_v35, %v713_v35 }
  0xfc   :  { %v695_v42 = vsel %vm663_vm13, %v647_v31, %v679_v37  ;;  %v650_v43 = vadd.f32 %v1304_v53, %v630_v38  ;;  %v516_v46 = vmul.f32 %v500_v36, %v477_v39 }
  0xfd   :  { %746 = vst.msk [vmem:[%s1451_s5 + $0x30] sm:$0xf] %vm733_vm2, %v729_v40  ;;  %v711_v47 = vmul.f32 1.4142135, %v695_v42  ;;  %v484_v48 = vpop.f32.mrf.mxu2 }
  0xfe   :  { %vm666_vm14 = vcmp.ge.f32.partialorder %v650_v43, 0.0  ;;  %v682_v44 = vmul.f32 0.2, %v650_v43  ;;  %v628_v50 = vadd.f32 %v595_v22, %v516_v46  ;;  %v485_v51 = vadd.f32 %v484_v48, %v436_v41 }
  0xff   :  { %v727_v1 = vpack.c.bf16 %v711_v47, %v711_v47 }
 0x100   :  { %v698_v52 = vsel %vm666_vm14, %v650_v43, %v682_v44  ;;  %v648_v54 = vadd.f32 %v1304_v53, %v628_v50  ;;  %v519_v55 = vmul.f32 %v503_v49, %v485_v51 }
 0x101   :  { %744 = vst.msk [vmem:[%s1451_s5 + $0x28] sm:$0xf] %vm733_vm2, %v727_v1  ;;  %v714_v58 = vmul.f32 1.4142135, %v698_v52 }
 0x102   :  { %vm664_vm15 = vcmp.ge.f32.partialorder %v648_v54, 0.0  ;;  %v680_v59 = vmul.f32 0.2, %v648_v54  ;;  %v631_v60 = vadd.f32 %v610_v57, %v519_v55 }
 0x103   :  { %v730_v61 = vpack.c.bf16 %v714_v58, %v714_v58 }
 0x104   :  { %v696_v63 = vsel %vm664_vm15, %v648_v54, %v680_v59  ;;  %v651_v0 = vadd.f32 %v1304_v53, %v631_v60 }
 0x105   :  { %747 = vst.msk [vmem:[%s1451_s5 + $0x34] sm:$0xf] %vm733_vm2, %v730_v61  ;;  %v712_v2 = vmul.f32 1.4142135, %v696_v63  ;;  %v486_v3 = vpop.f32.mrf.mxu2 }
 0x106   :  { %vm667_vm0 = vcmp.ge.f32.partialorder %v651_v0, 0.0  ;;  %v683_v5 = vmul.f32 0.2, %v651_v0  ;;  %v487_v6 = vadd.f32 %v486_v3, %v438_v62 }
 0x107   :  { %v728_v7 = vpack.c.bf16 %v712_v2, %v712_v2 }
 0x108   :  { %v699_v8 = vsel %vm667_vm0, %v651_v0, %v683_v5  ;;  %v520_v20 = vmul.f32 %v504_v4, %v487_v6 }
 0x109   :  { %745 = vst.msk [vmem:[%s1451_s5 + $0x2c] sm:$0xf] %vm733_vm2, %v728_v7  ;;  %v715_v27 = vmul.f32 1.4142135, %v699_v8 }
 0x10a   :  { %v632_v10 = vadd.f32 %v615_v9, %v520_v20 }
 0x10b   :  { %v731_v11 = vpack.c.bf16 %v715_v27, %v715_v27 }
 0x10c   :  { %v652_v12 = vadd.f32 %v1304_v53, %v632_v10 }
 0x10d   :  { %748 = vst.msk [vmem:[%s1451_s5 + $0x38] sm:$0xf] %vm733_vm2, %v731_v11 }
 0x10e   :  { %vm668_vm1 = vcmp.ge.f32.partialorder %v652_v12, 0.0  ;;  %v684_v13 = vmul.f32 0.2, %v652_v12 }
 0x110   :  { %v700_v14 = vsel %vm668_vm1, %v652_v12, %v684_v13 }
 0x111   :  { %v716_v15 = vmul.f32 1.4142135, %v700_v14 }
 0x113   :  { %v732_v16 = vpack.c.bf16 %v716_v15, %v716_v15 }
 0x115   :  { %749 = vst.msk [vmem:[%s1451_s5 + $0x3c] sm:$0xf] %vm733_vm2, %v732_v16 }

// kernel: _lambda_.24
= control target key start
LH: loop header
LB: loop body
LE: loop exit
PB: predicated region body
PF: predicated region fallthrough
CT: control target
= control target key end

     0   :  { %vm94_vm0 = vcmask 261120   ;;  %vm200_vm1 = vcmask 23552   ;;  %s482_s1 = inlined_call_operand.vmem [shape: bf16[32,3], index: 1, kind: input, shape index: {}]   ;;  %s483_s0 = inlined_call_operand.vmem [shape: bf16[128,32], index: 0, kind: input, shape index: {}]   ;;  %s484_s2 = inlined_call_operand.vmem [shape: f32[1,3], index: 2, kind: input, shape index: {}]   ;;  %s485_s3 = inlined_call_operand.vmem [shape: f32[128,3], index: 3, kind: input, shape index: {}]   ;;  %s486_s4 = inlined_call_operand.vmem [shape: f32[128,3], index: 4, kind: output, shape index: {}]  }
   0x1   :  { %v278_v0 = vld [vmem:[%s482_s1 + $0x8] sm:$0xff]  ;;  %v277_v1 = vld [vmem:[%s482_s1] sm:$0xff]  ;;  %v271_v3 = vld [vmem:[%s483_s0 + $0x10] sm:$0xff] }
   0x2   :  { %125 = vmatpush.bf16.msra.mxu0 %v278_v0  ;;  %279 = vmatpush.bf16.msra.mxu1 %v278_v0  ;;  %v269_v2 = vld [vmem:[%s483_s0] sm:$0xff]  ;;  %v275_v5 = vld [vmem:[%s483_s0 + $0x30] sm:$0xff]  ;;  %v270_v6 = vld [vmem:[%s483_s0 + $0x8] sm:$0xff] }
   0x3   :  { %280 = vmatpush.bf16.msra.mxu2 %v278_v0  ;;  %281 = vmatpush.bf16.msra.mxu3 %v278_v0  ;;  %v273_v4 = vld [vmem:[%s483_s0 + $0x20] sm:$0xff]  ;;  %v272_v7 = vld [vmem:[%s483_s0 + $0x18] sm:$0xff]  ;;  %v274_v8 = vld [vmem:[%s483_s0 + $0x28] sm:$0xff] }
   0x4   :  { %v276_v9 = vld [vmem:[%s483_s0 + $0x38] sm:$0xff]  ;;  %v352_v10 = vld [vmem:[%s484_s2] ss:$0 sm:$0xff]  ;;  %v169_v26 = vld [vmem:[%s485_s3 + $0x8] sm:$0xff] }
   0x5   :  { %v168_v12 = vld [vmem:[%s485_s3] sm:$0xff]  ;;  %v173_v28 = vld [vmem:[%s485_s3 + $0x28] sm:$0xff]  ;;  %v170_v42 = vld [vmem:[%s485_s3 + $0x10] sm:$0xff] }
   0x6   :  { %126 = vmatpush.bf16.msra.mxu0 %v277_v1  ;;  %282 = vmatpush.bf16.msra.mxu1 %v277_v1  ;;  %v172_v14 = vld [vmem:[%s485_s3 + $0x20] sm:$0xff]  ;;  %v177_v36 = vld [vmem:[%s485_s3 + $0x48] sm:$0xff]  ;;  %v174_v44 = vld [vmem:[%s485_s3 + $0x30] sm:$0xff] }
   0x7   :  { %283 = vmatpush.bf16.msra.mxu2 %v277_v1  ;;  %284 = vmatpush.bf16.msra.mxu3 %v277_v1  ;;  %v176_v20 = vld [vmem:[%s485_s3 + $0x40] sm:$0xff]  ;;  %v181_v38 = vld [vmem:[%s485_s3 + $0x68] sm:$0xff]  ;;  %v178_v52 = vld [vmem:[%s485_s3 + $0x50] sm:$0xff] }
   0x8   :  { %v180_v22 = vld [vmem:[%s485_s3 + $0x60] sm:$0xff]  ;;  %v182_v54 = vld [vmem:[%s485_s3 + $0x70] sm:$0xff]  ;;  %v171_v58 = vld [vmem:[%s485_s3 + $0x18] sm:$0xff] }
   0x9   :  { %261 = vmatmul.msk.bf16.vlgmr.msra.gmra.mxu0 %vm94_vm0, %v269_v2  ;;  %263 = vmatmul.msk.bf16.vlgmr.msra.gmra.mxu1 %vm94_vm0, %v271_v3  ;;  %v175_v60 = vld [vmem:[%s485_s3 + $0x38] sm:$0xff] }
   0xa   :  { %265 = vmatmul.msk.bf16.vlgmr.msra.gmra.mxu2 %vm94_vm0, %v273_v4  ;;  %267 = vmatmul.msk.bf16.vlgmr.msra.gmra.mxu3 %vm94_vm0, %v275_v5  ;;  %v179_v4 = vld [vmem:[%s485_s3 + $0x58] sm:$0xff] }
  0x19   :  { %262 = vmatmul.msk.bf16.gmra.mxu0 %vm94_vm0, %v270_v6  ;;  %264 = vmatmul.msk.bf16.gmra.mxu1 %vm94_vm0, %v272_v7  ;;  %v183_v6 = vld [vmem:[%s485_s3 + $0x78] sm:$0xff] }
  0x1a   :  { %266 = vmatmul.msk.bf16.gmra.mxu2 %vm94_vm0, %v274_v8  ;;  %268 = vmatmul.msk.bf16.gmra.mxu3 %vm94_vm0, %v276_v9 }
  0x86   :  { %v128_v11 = vpop.f32.mrf.mxu0  ;;  %v138_v13 = vpop.f32.mrf.mxu1 }
  0x87   :  { %v129_v15 = vadd.f32 %v352_v10, %v128_v11  ;;  %v139_v16 = vadd.f32 %v352_v10, %v138_v13 }
  0x89   :  { %v184_v17 = vadd.f32 %v168_v12, %v129_v15  ;;  %v188_v18 = vadd.f32 %v172_v14, %v139_v16 }
  0x8b   :  { %201 = vst.msk [vmem:[%s486_s4] sm:$0xff] %vm200_vm1, %v184_v17 }
  0x8c   :  { %205 = vst.msk [vmem:[%s486_s4 + $0x20] sm:$0xff] %vm200_vm1, %v188_v18 }
  0x8d   :  { %v148_v19 = vpop.f32.mrf.mxu2  ;;  %v158_v21 = vpop.f32.mrf.mxu3 }
  0x8e   :  { %v149_v23 = vadd.f32 %v352_v10, %v148_v19  ;;  %v159_v24 = vadd.f32 %v352_v10, %v158_v21  ;;  %v130_v25 = vpop.f32.mrf.mxu0  ;;  %v140_v27 = vpop.f32.mrf.mxu1 }
  0x8f   :  { %v131_v29 = vadd.f32 %v352_v10, %v130_v25  ;;  %v141_v30 = vadd.f32 %v352_v10, %v140_v27 }
  0x90   :  { %v192_v31 = vadd.f32 %v176_v20, %v149_v23  ;;  %v196_v32 = vadd.f32 %v180_v22, %v159_v24 }
  0x91   :  { %v185_v33 = vadd.f32 %v169_v26, %v131_v29  ;;  %v189_v34 = vadd.f32 %v173_v28, %v141_v30 }
  0x92   :  { %209 = vst.msk [vmem:[%s486_s4 + $0x40] sm:$0xff] %vm200_vm1, %v192_v31 }
  0x93   :  { %213 = vst.msk [vmem:[%s486_s4 + $0x60] sm:$0xff] %vm200_vm1, %v196_v32 }
  0x94   :  { %202 = vst.msk [vmem:[%s486_s4 + $0x8] sm:$0xff] %vm200_vm1, %v185_v33 }
  0x95   :  { %206 = vst.msk [vmem:[%s486_s4 + $0x28] sm:$0xff] %vm200_vm1, %v189_v34  ;;  %v150_v35 = vpop.f32.mrf.mxu2  ;;  %v160_v37 = vpop.f32.mrf.mxu3 }
  0x96   :  { %v151_v39 = vadd.f32 %v352_v10, %v150_v35  ;;  %v161_v40 = vadd.f32 %v352_v10, %v160_v37  ;;  %v133_v41 = vpop.f32.mrf.mxu0  ;;  %v143_v43 = vpop.f32.mrf.mxu1 }
  0x97   :  { %v134_v45 = vadd.f32 %v352_v10, %v133_v41  ;;  %v144_v46 = vadd.f32 %v352_v10, %v143_v43 }
  0x98   :  { %v193_v47 = vadd.f32 %v177_v36, %v151_v39  ;;  %v197_v48 = vadd.f32 %v181_v38, %v161_v40 }
  0x99   :  { %v186_v49 = vadd.f32 %v170_v42, %v134_v45  ;;  %v190_v50 = vadd.f32 %v174_v44, %v144_v46 }
  0x9a   :  { %210 = vst.msk [vmem:[%s486_s4 + $0x48] sm:$0xff] %vm200_vm1, %v193_v47 }
  0x9b   :  { %214 = vst.msk [vmem:[%s486_s4 + $0x68] sm:$0xff] %vm200_vm1, %v197_v48 }
  0x9c   :  { %203 = vst.msk [vmem:[%s486_s4 + $0x10] sm:$0xff] %vm200_vm1, %v186_v49 }
  0x9d   :  { %207 = vst.msk [vmem:[%s486_s4 + $0x30] sm:$0xff] %vm200_vm1, %v190_v50  ;;  %v153_v51 = vpop.f32.mrf.mxu2  ;;  %v163_v53 = vpop.f32.mrf.mxu3 }
  0x9e   :  { %v154_v55 = vadd.f32 %v352_v10, %v153_v51  ;;  %v164_v56 = vadd.f32 %v352_v10, %v163_v53  ;;  %v135_v57 = vpop.f32.mrf.mxu0  ;;  %v145_v59 = vpop.f32.mrf.mxu1 }
  0x9f   :  { %v136_v61 = vadd.f32 %v352_v10, %v135_v57  ;;  %v146_v62 = vadd.f32 %v352_v10, %v145_v59 }
  0xa0   :  { %v194_v63 = vadd.f32 %v178_v52, %v154_v55  ;;  %v198_v0 = vadd.f32 %v182_v54, %v164_v56 }
  0xa1   :  { %v187_v1 = vadd.f32 %v171_v58, %v136_v61  ;;  %v191_v2 = vadd.f32 %v175_v60, %v146_v62 }
  0xa2   :  { %211 = vst.msk [vmem:[%s486_s4 + $0x50] sm:$0xff] %vm200_vm1, %v194_v63 }
  0xa3   :  { %215 = vst.msk [vmem:[%s486_s4 + $0x70] sm:$0xff] %vm200_vm1, %v198_v0 }
  0xa4   :  { %204 = vst.msk [vmem:[%s486_s4 + $0x18] sm:$0xff] %vm200_vm1, %v187_v1 }
  0xa5   :  { %208 = vst.msk [vmem:[%s486_s4 + $0x38] sm:$0xff] %vm200_vm1, %v191_v2  ;;  %v155_v3 = vpop.f32.mrf.mxu2  ;;  %v165_v5 = vpop.f32.mrf.mxu3 }
  0xa6   :  { %v156_v7 = vadd.f32 %v352_v10, %v155_v3  ;;  %v166_v8 = vadd.f32 %v352_v10, %v165_v5 }
  0xa8   :  { %v195_v9 = vadd.f32 %v179_v4, %v156_v7  ;;  %v199_v11 = vadd.f32 %v183_v6, %v166_v8 }
  0xaa   :  { %212 = vst.msk [vmem:[%s486_s4 + $0x58] sm:$0xff] %vm200_vm1, %v195_v9 }
  0xab   :  { %216 = vst.msk [vmem:[%s486_s4 + $0x78] sm:$0xff] %vm200_vm1, %v199_v11 }

// kernel: _lambda_.25
= control target key start
LH: loop header
LB: loop body
LE: loop exit
PB: predicated region body
PF: predicated region fallthrough
CT: control target
= control target key end

     0   :  { %s2070_s18 = smov 0   ;;  %s2567_s0 = inlined_call_operand.vmem [shape: bf16[512,288], index: 0, kind: input, shape index: {}]   ;;  %s2568_s1 = inlined_call_operand.vmem [shape: bf16[288,16], index: 1, kind: input, shape index: {}]   ;;  %s2569_s2 = inlined_call_operand.vmem [shape: f32[1,16], index: 2, kind: input, shape index: {}]   ;;  %s2570_s3 = inlined_call_operand.vmem [shape: f32[512,16], index: 3, kind: input, shape index: {}]   ;;  %s2571_s4 = inlined_call_operand.vmem [shape: f32[512,1], index: 4, kind: input, shape index: {}]   ;;  %s2572_s5 = inlined_call_operand.vmem [shape: bf16[512,16], index: 5, kind: output, shape index: {}]  }
   0x1 LB: > { %s1637_s19 = sadd.s32 4294967295, %s2037_s18   ;;  %p1641_p0 = scmp.ge.s32.totalorder %s2037_s18, 1  ;;  %s2037_s18 = sphi %s2070_s18, %s15_s18  }
   0x2   : > { %p211_p1 = scmp.lt.s32.totalorder %s2037_s18, 3 }
   0x4   : > { %p212_p2 = pnand %p1641_p0, %p211_p1 }
   0x5   : > { %s1642_s26 = sshll.u32 (!%p212_p2), %s1637_s19, 5 }
   0x6   : > { %215 = sbr.rel (%p212_p2) target bundleno = 385 (0x181), region = 40  ;;  %p251_p3 = scmp.lt.s32.totalorder (!%p212_p2), %s1642_s26, 63 }
   0xb   : > { %v1987_v0 = vld [vmem:[%s2568_s1 + $0x38] sm:$0xff]  ;;  %v2089_v2 = vld [vmem:[%s2568_s1 + $0x88] sm:$0xff]  ;;  %v1986_v3 = vld [vmem:[%s2568_s1 + $0x30] sm:$0xff]  ;;  %s2574_s26 = smov (!%p251_p3, %s1642_s26), 63  ;;  %vm724_vm0 = vcmask 261120   ;;  %v2039_v13 = vmov 0  }
   0xc   : > { %v2084_v1 = vld [vmem:[%s2568_s1 + $0x78] sm:$0xff]  ;;  %773 = vmatpush.bf16.msra.mxu0 %v1987_v0  ;;  %1998 = vmatpush.bf16.msra.mxu3 %v1987_v0  ;;  %v2099_v4 = vld [vmem:[%s2568_s1 + $0x70] sm:$0xff]  ;;  %v2104_v5 = vld [vmem:[%s2568_s1 + $0x80] sm:$0xff]  ;;  %s2016_s8 = smul.u32 12, %s2574_s26  ;;  %s1645_s21 = sshll.u32 %s2574_s26, 3  ;;  %vm1524_vm2 = vcmask 125952  }
   0xd   : > { %862 = vmatpush.bf16.msra.mxu1 %v2084_v1  ;;  %957 = vmatpush.bf16.msra.mxu2 %v2089_v2  ;;  %v1985_v6 = vld [vmem:[%s2568_s1 + $0x28] sm:$0xff]  ;;  %v1984_v11 = vld [vmem:[%s2568_s1 + $0x20] sm:$0xff]  ;;  %v1983_v14 = vld [vmem:[%s2568_s1 + $0x18] sm:$0xff]  ;;  %s2149_s29 = scalar_lea.vmem %s2571_s4, %s1645_s21  ;;  %s2291_s22 = scalar_lea.vmem %s2570_s3, %s1645_s21 }
   0xe   : > { %v2117_v7 = vld [vmem:[%s2568_s1 + $0x68] sm:$0xff]  ;;  %s2122_s15 = scalar_lea.vmem %s2567_s0, %s2016_s8  ;;  %v2134_v12 = vld [vmem:[%s2568_s1 + $0x60] sm:$0xff]  ;;  %2026 = vset.pattern.permute.xlu0 %v2039_v13  ;;  %2027 = vset.pattern.permute.xlu1 %v2039_v13  ;;  %v1991_v15 = vld [vmem:[%s2568_s1 + $0x58] sm:$0xff]  ;;  %s1649_s24 = sshll.u32 %s2574_s26, 2 }
   0xf   : > { %v1660_v8 = vld [vmem:[%s2122_s15 + $0x8] sm:$0xf]  ;;  %v1934_v9 = vld [vmem:[%s2122_s15 + $0x10] sm:$0xf0]  ;;  %2028 = vset.pattern.permute.xlu2 %v2039_v13  ;;  %v1104_v17 = vld [vmem:[%s2149_s29] sm:$0xff]  ;;  %s2325_s28 = scalar_lea.vmem %s2572_s5, %s1649_s24 }
  0x10   : > { %774 = vmatpush.bf16.msra.mxu0 %v1986_v3  ;;  %1999 = vmatpush.bf16.msra.mxu3 %v1986_v3  ;;  %v1661_v10 = vor.u32 %v1934_v9, %v1660_v8  ;;  %v1982_v16 = vld [vmem:[%s2568_s1 + $0x10] sm:$0xff]  ;;  %v1672_v19 = vld [vmem:[%s2122_s15 + $0x20] sm:$0xf]  ;;  %v1937_v20 = vld [vmem:[%s2122_s15 + $0x28] sm:$0xf0] }
  0x11   : > { %863 = vmatpush.bf16.msra.mxu1 %v2099_v4  ;;  %958 = vmatpush.bf16.msra.mxu2 %v2104_v5  ;;  %v1990_v18 = vld [vmem:[%s2568_s1 + $0x50] sm:$0xff]  ;;  %v1981_v21 = vld [vmem:[%s2568_s1 + $0x8] sm:$0xff]  ;;  %v1673_v23 = vor.u32 %v1937_v20, %v1672_v19  ;;  %v1980_v24 = vld [vmem:[%s2568_s1] sm:$0xff] }
  0x12   : > { %1138 = vperm.xlu0 %2026, %v1104_v17   ;;  %v1989_v22 = vld [vmem:[%s2568_s1 + $0x48] sm:$0xff]  ;;  %v1652_v25 = vld [vmem:[%s2122_s15] sm:$0xf]  ;;  %v1932_v31 = vld [vmem:[%s2122_s15 + $0x4] sm:$0xf] }
  0x13   : > { %v1105_v26 = vld [vmem:[%s2149_s29 + $0x8] sm:$0xff]  ;;  %v1796_v28 = vld [vmem:[%s2122_s15 + $0x120] sm:$0xf]  ;;  %v1654_v32 = vld [vmem:[%s2122_s15 + $0xc] sm:$0xf0] }
  0x14   : > { %775 = vmatpush.bf16.msra.mxu0 %v1985_v6  ;;  %2000 = vmatpush.bf16.msra.mxu3 %v1985_v6  ;;  %v1933_v27 = vld [vmem:[%s2122_s15 + $0x8] sm:$0xf0]  ;;  %v1988_v30 = vld [vmem:[%s2568_s1 + $0x40] sm:$0xff]  ;;  %v1657_v35 = vor.u32 %v1932_v31, %v1654_v32  ;;  %v1106_v36 = vld [vmem:[%s2149_s29 + $0x10] sm:$0xff] }
  0x15   : > { %864 = vmatpush.bf16.msra.mxu1 %v2117_v7  ;;  %1914 = vmatmul.msk.bf16.vlgmr.msra.gmra.mxu2 %vm724_vm0, %v1661_v10  ;;  %v1969_v29 = vld [vmem:[%s2122_s15 + $0x128] sm:$0xf0]  ;;  %v1653_v33 = vor.u32 %v1933_v27, %v1652_v25  ;;  %v1684_v37 = vld [vmem:[%s2122_s15 + $0x38] sm:$0xf]  ;;  %v1940_v38 = vld [vmem:[%s2122_s15 + $0x40] sm:$0xf0] }
  0x16   : > { %v1797_v34 = vor.u32 %v1969_v29, %v1796_v28  ;;  %1148 = vperm.xlu1 %2027, %v1106_v36   ;;  %v1685_v39 = vor.u32 %v1940_v38, %v1684_v37  ;;  %v1107_v40 = vld [vmem:[%s2149_s29 + $0x18] sm:$0xff]  ;;  %v1936_v42 = vld [vmem:[%s2122_s15 + $0x20] sm:$0xf0]  ;;  %v1666_v46 = vld [vmem:[%s2122_s15 + $0x24] sm:$0xf0] }
  0x17   : > { %v1664_v41 = vld [vmem:[%s2122_s15 + $0x18] sm:$0xf]  ;;  %v1972_v44 = vld [vmem:[%s2122_s15 + $0x140] sm:$0xf0]  ;;  %v1935_v45 = vld [vmem:[%s2122_s15 + $0x1c] sm:$0xf] }
  0x18   : > { %776 = vmatpush.bf16.msra.mxu0 %v1984_v11  ;;  %2001 = vmatpush.bf16.msra.mxu3 %v1984_v11  ;;  %v1808_v43 = vld [vmem:[%s2122_s15 + $0x138] sm:$0xf]  ;;  %v1665_v47 = vor.u32 %v1936_v42, %v1664_v41  ;;  %v1669_v49 = vor.u32 %v1935_v45, %v1666_v46  ;;  %v1696_v50 = vld [vmem:[%s2122_s15 + $0x50] sm:$0xf]  ;;  %v1943_v51 = vld [vmem:[%s2122_s15 + $0x58] sm:$0xf0] }
  0x19   : > { %865 = vmatpush.bf16.msra.mxu1 %v2134_v12  ;;  %v1809_v48 = vor.u32 %v1972_v44, %v1808_v43  ;;  %v1697_v52 = vor.u32 %v1943_v51, %v1696_v50  ;;  %v1676_v53 = vld [vmem:[%s2122_s15 + $0x30] sm:$0xf]  ;;  %v1939_v54 = vld [vmem:[%s2122_s15 + $0x38] sm:$0xf0]  ;;  %v1938_v57 = vld [vmem:[%s2122_s15 + $0x34] sm:$0xf] }
  0x1a   : > { %1143 = vperm.xlu0 %2026, %v1105_v26   ;;  %v1820_v55 = vld [vmem:[%s2122_s15 + $0x150] sm:$0xf]  ;;  %v1975_v56 = vld [vmem:[%s2122_s15 + $0x158] sm:$0xf0]  ;;  %v1678_v58 = vld [vmem:[%s2122_s15 + $0x3c] sm:$0xf0]  ;;  %v1677_v59 = vor.u32 %v1939_v54, %v1676_v53 }
  0x1b   : > { %v1821_v60 = vor.u32 %v1975_v56, %v1820_v55  ;;  %v1681_v61 = vor.u32 %v1938_v57, %v1678_v58  ;;  %v1110_v62 = vld [vmem:[%s2149_s29 + $0x30] sm:$0xff]  ;;  %v1111_v63 = vld [vmem:[%s2149_s29 + $0x38] sm:$0xff]  ;;  %v1108_v0 = vld [vmem:[%s2149_s29 + $0x20] sm:$0xff] }
  0x1c   : > { %777 = vmatpush.bf16.msra.mxu0 %v1983_v14  ;;  %2002 = vmatpush.bf16.msra.mxu3 %v1983_v14  ;;  %v1942_v6 = vld [vmem:[%s2122_s15 + $0x50] sm:$0xf0]  ;;  %v1941_v9 = vld [vmem:[%s2122_s15 + $0x4c] sm:$0xf]  ;;  %v1690_v10 = vld [vmem:[%s2122_s15 + $0x54] sm:$0xf0] }
  0x1d   : > { %866 = vmatpush.bf16.msra.mxu1 %v1991_v15  ;;  %1158 = vperm.xlu2 %2028, %v1108_v0   ;;  %v1978_v8 = vld [vmem:[%s2122_s15 + $0x170] sm:$0xf0]  ;;  %v1113_v11 = vld [vmem:[%s2149_s29 + $0x48] sm:$0xff]  ;;  %v1693_v14 = vor.u32 %v1941_v9, %v1690_v10  ;;  %v1116_v17 = vld [vmem:[%s2149_s29 + $0x60] sm:$0xff] }
  0x1e   : > { %1153 = vperm.xlu1 %2027, %v1107_v40   ;;  %v1949_v19 = vld [vmem:[%s2122_s15 + $0x88] sm:$0xf0]  ;;  %v1798_v25 = vld [vmem:[%s2122_s15 + $0x12c] sm:$0xf0]  ;;  %v1120_v27 = vld [vmem:[%s2149_s29 + $0x80] sm:$0xff] }
  0x1f   : > { %v1702_v26 = vld [vmem:[%s2122_s15 + $0x6c] sm:$0xf0]  ;;  %v1119_v28 = vld [vmem:[%s2149_s29 + $0x78] sm:$0xff]  ;;  %v1952_v36 = vld [vmem:[%s2122_s15 + $0xa0] sm:$0xf0] }
  0x20   : > { %778 = vmatpush.bf16.msra.mxu0 %v1982_v16  ;;  %2003 = vmatpush.bf16.msra.mxu3 %v1982_v16  ;;  %v1117_v16 = vld [vmem:[%s2149_s29 + $0x68] sm:$0xff]  ;;  %v1123_v32 = vld [vmem:[%s2149_s29 + $0x98] sm:$0xff]  ;;  %v1128_v53 = vld [vmem:[%s2149_s29 + $0xc0] sm:$0xff] }
  0x21   : > { %867 = vmatpush.bf16.msra.mxu1 %v1990_v18  ;;  %v1712_v38 = vld [vmem:[%s2122_s15 + $0x78] sm:$0xf]  ;;  %v1971_v40 = vld [vmem:[%s2122_s15 + $0x13c] sm:$0xf]  ;;  %v1810_v41 = vld [vmem:[%s2122_s15 + $0x144] sm:$0xf0] }
  0x22   : > { %1168 = vperm.xlu0 %2026, %v1110_v62   ;;  %v1947_v42 = vld [vmem:[%s2122_s15 + $0x7c] sm:$0xf]  ;;  %v1714_v43 = vld [vmem:[%s2122_s15 + $0x84] sm:$0xf0]  ;;  %v1813_v45 = vor.u32 %v1971_v40, %v1810_v41  ;;  %v1724_v55 = vld [vmem:[%s2122_s15 + $0x90] sm:$0xf] }
  0x23   : > { %v1717_v46 = vor.u32 %v1947_v42, %v1714_v43  ;;  %v1955_v50 = vld [vmem:[%s2122_s15 + $0xb8] sm:$0xf0]  ;;  %v1974_v57 = vld [vmem:[%s2122_s15 + $0x154] sm:$0xf]  ;;  %v1822_v58 = vld [vmem:[%s2122_s15 + $0x15c] sm:$0xf0] }
  0x24   : > { %779 = vmatpush.bf16.msra.mxu0 %v1981_v21  ;;  %2004 = vmatpush.bf16.msra.mxu3 %v1981_v21  ;;  %v1700_v21 = vld [vmem:[%s2122_s15 + $0x60] sm:$0xf]  ;;  %v1115_v51 = vld [vmem:[%s2149_s29 + $0x58] sm:$0xff]  ;;  %v1825_v62 = vor.u32 %v1974_v57, %v1822_v58  ;;  %v1118_v0 = vld [vmem:[%s2149_s29 + $0x70] sm:$0xff] }
  0x25   : > { %868 = vmatpush.bf16.msra.mxu1 %v1989_v22  ;;  %1915 = vmatmul.msk.bf16.gmra.mxu2 %vm724_vm0, %v1673_v23  ;;  %v1944_v23 = vld [vmem:[%s2122_s15 + $0x64] sm:$0xf]  ;;  %v1951_v56 = vld [vmem:[%s2122_s15 + $0x98] sm:$0xf0]  ;;  %v1736_v9 = vld [vmem:[%s2122_s15 + $0xa8] sm:$0xf] }
  0x26   : > { %1173 = vperm.xlu1 %2027, %v1111_v63   ;;  %v1705_v31 = vor.u32 %v1944_v23, %v1702_v26  ;;  %v1134_v10 = vld [vmem:[%s2149_s29 + $0xf0] sm:$0xff]  ;;  %v1957_v26 = vld [vmem:[%s2122_s15 + $0xc8] sm:$0xf0]  ;;  %v1040_v40 = vld [vmem:[%s2291_s22] sm:$0xff] }
  0x27   : > { %v2301_v42 = vld [vmem:[%s2569_s2] ss:$0 sm:$0xff]  ;;  %v1960_v57 = vld [vmem:[%s2122_s15 + $0xe0] sm:$0xf0]  ;;  %v1840_v58 = vld [vmem:[%s2122_s15 + $0x170] sm:$0xf] }
  0x28   : > { %780 = vmatpush.bf16.msra.mxu0 %v1980_v24  ;;  %2005 = vmatpush.bf16.msra.mxu3 %v1980_v24  ;;  %v1968_v24 = vld [vmem:[%s2122_s15 + $0x124] sm:$0xf] }
  0x29   : > { %869 = vmatpush.bf16.msra.mxu1 %v1988_v30 }
  0x2a   : > { %1183 = vperm.xlu0 %2026, %v1113_v11   ;;  %v1977_v11 = vld [vmem:[%s2122_s15 + $0x16c] sm:$0xf] }
  0x2b   : > { %781 = vmatmul.bf16.vlgmr.msra.gmra.mxu0 %v1653_v33  ;;  %841 = vmatmul.bf16.vlgmr.msra.gmra.mxu3 %v1797_v34  ;;  %v1122_v33 = vld [vmem:[%s2149_s29 + $0x90] sm:$0xff]  ;;  %v1112_v34 = vld [vmem:[%s2149_s29 + $0x40] sm:$0xff] }
  0x2c   : > { %2006 = vmatpush.bf16.msrb.mxu3 %v2084_v1  ;;  %870 = vmatmul.bf16.vlgmr.msra.gmra.mxu1 %v1657_v35  ;;  %v1708_v1 = vld [vmem:[%s2122_s15 + $0x68] sm:$0xf]  ;;  %v1732_v35 = vld [vmem:[%s2122_s15 + $0x98] sm:$0xf] }
  0x2d   : > { %v1733_v37 = vor.u32 %v1952_v36, %v1732_v35 }
  0x30   : > { %2007 = vmatpush.bf16.msrb.mxu3 %v2099_v4  ;;  %v1688_v4 = vld [vmem:[%s2122_s15 + $0x48] sm:$0xf] }
  0x32   : > { %1198 = vperm.xlu0 %2026, %v1116_v17  }
  0x34   : > { %2008 = vmatpush.bf16.msrb.mxu3 %v2117_v7  ;;  %v1832_v7 = vld [vmem:[%s2122_s15 + $0x168] sm:$0xf] }
  0x35   : > { %1916 = vmatmul.msk.bf16.gmra.mxu2 %vm724_vm0, %v1685_v39  ;;  %v1833_v13 = vor.u32 %v1978_v8, %v1832_v7  ;;  %v1948_v39 = vld [vmem:[%s2122_s15 + $0x80] sm:$0xf0]  ;;  %v1121_v7 = vld [vmem:[%s2149_s29 + $0x88] sm:$0xff]  ;;  %v1135_v8 = vld [vmem:[%s2149_s29 + $0xf8] sm:$0xff] }
  0x36   : > { %v1713_v44 = vor.u32 %v1948_v39, %v1712_v38  ;;  %v1130_v38 = vld [vmem:[%s2149_s29 + $0xd0] sm:$0xff] }
  0x38   : > { %2009 = vmatpush.bf16.msrb.mxu3 %v2134_v12  ;;  %v1689_v12 = vor.u32 %v1942_v6, %v1688_v4  ;;  %v1958_v4 = vld [vmem:[%s2122_s15 + $0xd0] sm:$0xf0] }
  0x3a   : > { %1213 = vperm.xlu0 %2026, %v1119_v28   ;;  %v1976_v28 = vld [vmem:[%s2122_s15 + $0x160] sm:$0xf0] }
  0x3b   : > { %786 = vmatmul.bf16.gmra.mxu0 %v1665_v47  ;;  %846 = vmatmul.bf16.gmra.mxu3 %v1809_v48  ;;  %v1126_v47 = vld [vmem:[%s2149_s29 + $0xb0] sm:$0xff]  ;;  %v1125_v48 = vld [vmem:[%s2149_s29 + $0xa8] sm:$0xff] }
  0x3c   : > { %2010 = vmatpush.bf16.msrb.mxu3 %v1991_v15  ;;  %875 = vmatmul.bf16.gmra.mxu1 %v1669_v49  ;;  %v1109_v15 = vld [vmem:[%s2149_s29 + $0x28] sm:$0xff]  ;;  %v1744_v49 = vld [vmem:[%s2122_s15 + $0xb0] sm:$0xf] }
  0x3d   : > { %1163 = vperm.xlu2 %2028, %v1109_v15   ;;  %v1745_v54 = vor.u32 %v1955_v50, %v1744_v49 }
  0x40   : > { %2011 = vmatpush.bf16.msrb.mxu3 %v1990_v18  ;;  %v1720_v18 = vld [vmem:[%s2122_s15 + $0x80] sm:$0xf] }
  0x41   : > { %v1721_v20 = vor.u32 %v1949_v19, %v1720_v18  ;;  %v1124_v19 = vld [vmem:[%s2149_s29 + $0xa0] sm:$0xff] }
  0x42   : > { %1228 = vperm.xlu0 %2026, %v1122_v33  }
  0x44   : > { %2012 = vmatpush.bf16.msrb.mxu3 %v1989_v22  ;;  %v1945_v22 = vld [vmem:[%s2122_s15 + $0x68] sm:$0xf0] }
  0x45   : > { %1917 = vmatmul.msk.bf16.gmra.mxu2 %vm724_vm0, %v1697_v52  ;;  %v1701_v29 = vor.u32 %v1945_v22, %v1700_v21  ;;  %1178 = vperm.xlu2 %2028, %v1112_v34   ;;  %v1129_v52 = vld [vmem:[%s2149_s29 + $0xc8] sm:$0xff] }
  0x46   : > { %v1961_v21 = vld [vmem:[%s2122_s15 + $0xe8] sm:$0xf0] }
  0x48   : > { %2013 = vmatpush.bf16.msrb.mxu3 %v1988_v30  ;;  %v1801_v30 = vor.u32 %v1968_v24, %v1798_v25  ;;  %v1127_v24 = vld [vmem:[%s2149_s29 + $0xb8] sm:$0xff]  ;;  %v1748_v25 = vld [vmem:[%s2122_s15 + $0xc0] sm:$0xf] }
  0x4a   : > { %1243 = vperm.xlu0 %2026, %v1125_v48  }
  0x4b   : > { %791 = vmatmul.bf16.gmra.mxu0 %v1677_v59  ;;  %851 = vmatmul.bf16.gmra.mxu3 %v1821_v60  ;;  %v1950_v59 = vld [vmem:[%s2122_s15 + $0x94] sm:$0xf]  ;;  %v1726_v60 = vld [vmem:[%s2122_s15 + $0x9c] sm:$0xf0] }
  0x4c   : > { %2014 = vmatpush.bf16.msra.mxu3 %v2089_v2  ;;  %880 = vmatmul.bf16.gmra.mxu1 %v1681_v61  ;;  %v1946_v2 = vld [vmem:[%s2122_s15 + $0x70] sm:$0xf0]  ;;  %v1725_v61 = vor.u32 %v1951_v56, %v1724_v55  ;;  %v1729_v63 = vor.u32 %v1950_v59, %v1726_v60  ;;  %v1133_v55 = vld [vmem:[%s2149_s29 + $0xe8] sm:$0xff]  ;;  %v1760_v56 = vld [vmem:[%s2122_s15 + $0xd8] sm:$0xf] }
  0x4d   : > { %v1709_v3 = vor.u32 %v1946_v2, %v1708_v1  ;;  %1193 = vperm.xlu2 %2028, %v1115_v51   ;;  %v1132_v1 = vld [vmem:[%s2149_s29 + $0xe0] sm:$0xff]  ;;  %v1131_v2 = vld [vmem:[%s2149_s29 + $0xd8] sm:$0xff] }
  0x50   : > { %2015 = vmatpush.bf16.msra.mxu3 %v2104_v5  ;;  %v1114_v5 = vld [vmem:[%s2149_s29 + $0x50] sm:$0xff] }
  0x51   : > { %1188 = vperm.xlu1 %2027, %v1114_v5   ;;  %v1954_v5 = vld [vmem:[%s2122_s15 + $0xb0] sm:$0xf0] }
  0x52   : > { %1258 = vperm.xlu0 %2026, %v1128_v53   ;;  %v1737_v15 = vor.u32 %v1954_v5, %v1736_v9 }
  0x55   : > { %1918 = vmatmul.msk.bf16.gmra.mxu2 %vm724_vm0, %v1709_v3  ;;  %1208 = vperm.xlu2 %2028, %v1118_v0   ;;  %v1756_v3 = vld [vmem:[%s2122_s15 + $0xc8] sm:$0xf] }
  0x56   : > { %v1757_v6 = vor.u32 %v1958_v4, %v1756_v3  ;;  %v1762_v0 = vld [vmem:[%s2122_s15 + $0xe4] sm:$0xf0] }
  0x59   : > { %1203 = vperm.xlu1 %2027, %v1117_v16  }
  0x5a   : > { %1273 = vperm.xlu0 %2026, %v1131_v2  }
  0x5b   : > { %796 = vmatmul.bf16.gmra.mxu0 %v1689_v12  ;;  %856 = vmatmul.bf16.gmra.mxu3 %v1833_v13  ;;  %v1834_v12 = vld [vmem:[%s2122_s15 + $0x174] sm:$0xf0]  ;;  %v1953_v13 = vld [vmem:[%s2122_s15 + $0xac] sm:$0xf] }
  0x5c   : > { %885 = vmatmul.bf16.gmra.mxu1 %v1693_v14  ;;  %v1738_v14 = vld [vmem:[%s2122_s15 + $0xb4] sm:$0xf0]  ;;  %v1837_v16 = vor.u32 %v1977_v11, %v1834_v12 }
  0x5d   : > { %1223 = vperm.xlu2 %2028, %v1121_v7   ;;  %v1741_v18 = vor.u32 %v1953_v13, %v1738_v14 }
  0x61   : > { %1218 = vperm.xlu1 %2027, %v1120_v27   ;;  %v1828_v27 = vld [vmem:[%s2122_s15 + $0x158] sm:$0xf] }
  0x62   : > { %1288 = vperm.xlu0 %2026, %v1134_v10  }
  0x65   : > { %1919 = vmatmul.msk.bf16.gmra.mxu2 %vm724_vm0, %v1721_v20  ;;  %1238 = vperm.xlu2 %2028, %v1124_v19   ;;  %v1768_v20 = vld [vmem:[%s2122_s15 + $0xe0] sm:$0xf] }
  0x66   : > { %v1769_v23 = vor.u32 %v1961_v21, %v1768_v20 }
  0x69   : > { %1233 = vperm.xlu1 %2027, %v1123_v32   ;;  %v1829_v32 = vor.u32 %v1976_v28, %v1828_v27 }
  0x6b   : > { %801 = vmatmul.bf16.gmra.mxu0 %v1701_v29  ;;  %930 = vmatmul.bf16.vlgmr.msrb.gmra.mxu3 %v1801_v30  ;;  %v1956_v29 = vld [vmem:[%s2122_s15 + $0xc4] sm:$0xf]  ;;  %v1750_v30 = vld [vmem:[%s2122_s15 + $0xcc] sm:$0xf0] }
  0x6c   : > { %890 = vmatmul.bf16.gmra.mxu1 %v1705_v31  ;;  %v1749_v31 = vor.u32 %v1957_v26, %v1748_v25  ;;  %v1753_v35 = vor.u32 %v1956_v29, %v1750_v30 }
  0x6d   : > { %1253 = vperm.xlu2 %2028, %v1127_v24  }
  0x71   : > { %1248 = vperm.xlu1 %2027, %v1126_v47  }
  0x75   : > { %1920 = vmatmul.msk.bf16.gmra.mxu2 %vm724_vm0, %v1733_v37  ;;  %1268 = vperm.xlu2 %2028, %v1130_v38  }
  0x79   : > { %1263 = vperm.xlu1 %2027, %v1129_v52  }
  0x7b   : > { %806 = vmatmul.bf16.gmra.mxu0 %v1713_v44  ;;  %935 = vmatmul.bf16.gmra.mxu3 %v1813_v45  ;;  %v1780_v45 = vld [vmem:[%s2122_s15 + $0xf8] sm:$0xf] }
  0x7c   : > { %895 = vmatmul.bf16.gmra.mxu1 %v1717_v46  ;;  %v1964_v46 = vld [vmem:[%s2122_s15 + $0x100] sm:$0xf0] }
  0x7d   : > { %v1781_v51 = vor.u32 %v1964_v46, %v1780_v45  ;;  %1283 = vperm.xlu2 %2028, %v1133_v55  }
  0x81   : > { %1278 = vperm.xlu1 %2027, %v1132_v1  }
  0x84   : > { %v1139_v39 = vpop.permute.xlu0 %1138 }
  0x85   : > { %1921 = vmatmul.msk.bf16.gmra.mxu2 %vm724_vm0, %v1745_v54  ;;  %v1041_v54 = vld [vmem:[%s2291_s22 + $0x8] sm:$0xff] }
  0x89   : > { %1293 = vperm.xlu1 %2027, %v1135_v8  }
  0x8b   : > { %811 = vmatmul.bf16.gmra.mxu0 %v1725_v61  ;;  %940 = vmatmul.bf16.gmra.mxu3 %v1825_v62  ;;  %v1979_v61 = vld [vmem:[%s2122_s15 + $0x178] sm:$0xf0] }
  0x8c   : > { %900 = vmatmul.bf16.gmra.mxu1 %v1729_v63  ;;  %v1144_v62 = vpop.permute.xlu0 %1143  ;;  %v1959_v63 = vld [vmem:[%s2122_s15 + $0xdc] sm:$0xf]  ;;  %v1841_v7 = vor.u32 %v1979_v61, %v1840_v58 }
  0x8d   : > { %v1765_v5 = vor.u32 %v1959_v63, %v1762_v0  ;;  %v1804_v63 = vld [vmem:[%s2122_s15 + $0x128] sm:$0xf]  ;;  %v1970_v0 = vld [vmem:[%s2122_s15 + $0x130] sm:$0xf0] }
  0x95   : > { %1922 = vmatmul.msk.bf16.gmra.mxu2 %vm724_vm0, %v1757_v6  ;;  %v1761_v6 = vor.u32 %v1960_v57, %v1760_v56  ;;  %v1159_v56 = vpop.permute.xlu2 %1158  ;;  %v1044_v57 = vld [vmem:[%s2291_s22 + $0x20] sm:$0xff] }
  0x98   : > { %v960_v17 = vpop.f32.mrf.mxu2 }
  0x9b   : > { %816 = vmatmul.bf16.gmra.mxu0 %v1737_v15  ;;  %945 = vmatmul.bf16.gmra.mxu3 %v1837_v16  ;;  %v1149_v15 = vpop.permute.xlu1 %1148  ;;  %v1042_v16 = vld [vmem:[%s2291_s22 + $0x10] sm:$0xff] }
  0x9c   : > { %905 = vmatmul.bf16.gmra.mxu1 %v1741_v18 }
  0xa0   : > { %v962_v22 = vpop.f32.mrf.mxu2 }
  0xa3   : > { %v1154_v38 = vpop.permute.xlu1 %1153 }
  0xa5   : > { %1923 = vmatmul.msk.bf16.gmra.mxu2 %vm724_vm0, %v1769_v23  ;;  %v1967_v23 = vld [vmem:[%s2122_s15 + $0x118] sm:$0xf0] }
  0xa8   : > { %v2293_v33 = vpop.f32.mrf.mxu2  ;;  %v782_v34 = vpop.f32.mrf.mxu0 }
  0xa9   : > { %v871_v36 = vpop.f32.mrf.mxu1 }
  0xaa   : > { %v872_v37 = vadd.f32 %v871_v36, %v782_v34  ;;  %v1772_v34 = vld [vmem:[%s2122_s15 + $0xf0] sm:$0xf] }
  0xab   : > { %821 = vmatmul.bf16.gmra.mxu0 %v1749_v31  ;;  %1928 = vmatmul.msk.bf16.vlgmr.msra.gmra.mxu3 %vm724_vm0, %v1829_v32 }
  0xac   : > { %v961_v41 = vadd.f32 %v960_v17, %v872_v37  ;;  %910 = vmatmul.bf16.gmra.mxu1 %v1753_v35  ;;  %v1963_v37 = vld [vmem:[%s2122_s15 + $0xf8] sm:$0xf0] }
  0xae   : > { %v1072_v43 = vmul.f32 %v1040_v40, %v961_v41  ;;  %v2303_v44 = vpop.f32.mrf.mxu3  ;;  %v1774_v40 = vld [vmem:[%s2122_s15 + $0xfc] sm:$0xf0] }
  0xb0   : > { %v1296_v47 = vadd.f32 %v1139_v39, %v1072_v43  ;;  %v2307_v48 = vpop.f32.mrf.mxu2  ;;  %v784_v49 = vpop.f32.mrf.mxu0  ;;  %v1962_v39 = vld [vmem:[%s2122_s15 + $0xf4] sm:$0xf] }
  0xb1   : > { %v873_v50 = vpop.f32.mrf.mxu1 }
  0xb2   : > { %v1332_v52 = vadd.f32 %v2301_v42, %v1296_v47  ;;  %v874_v53 = vadd.f32 %v873_v50, %v784_v49  ;;  %v1773_v47 = vor.u32 %v1963_v37, %v1772_v34 }
  0xb4   : > { %vm1364_vm1 = vcmp.ge.f32.partialorder %v1332_v52, 0.0  ;;  %v1396_v59 = vmul.f32 0.2, %v1332_v52  ;;  %v963_v60 = vadd.f32 %v962_v22, %v874_v53  ;;  %v1792_v22 = vld [vmem:[%s2122_s15 + $0x110] sm:$0xf] }
  0xb5   : > { %1924 = vmatmul.msk.bf16.gmra.mxu2 %vm724_vm0, %v1781_v51  ;;  %v1793_v30 = vor.u32 %v1967_v23, %v1792_v22 }
  0xb6   : > { %v1428_v1 = vsel %vm1364_vm1, %v1332_v52, %v1396_v59  ;;  %v1073_v2 = vmul.f32 %v1041_v54, %v963_v60  ;;  %v2320_v3 = vpop.f32.mrf.mxu3  ;;  %v1777_v52 = vor.u32 %v1962_v39, %v1774_v40  ;;  %v1816_v40 = vld [vmem:[%s2122_s15 + $0x140] sm:$0xf] }
  0xb7   : > { %v1460_v4 = vmul.f32 1.4142135, %v1428_v1 }
  0xb8   : > { %v1297_v8 = vadd.f32 %v1144_v62, %v1073_v2  ;;  %v970_v9 = vpop.f32.mrf.mxu2  ;;  %v787_v10 = vpop.f32.mrf.mxu0 }
  0xb9   : > { %v1492_v11 = vpack.c.bf16 %v1460_v4, %v1460_v4  ;;  %v876_v12 = vpop.f32.mrf.mxu1 }
  0xba   : > { %v1333_v13 = vadd.f32 %v2301_v42, %v1297_v8  ;;  %v877_v14 = vadd.f32 %v876_v12, %v787_v10  ;;  %v1784_v12 = vld [vmem:[%s2122_s15 + $0x108] sm:$0xf] }
  0xbb   : > { %1525 = vst.msk [vmem:[%s2325_s28] sm:$0xf] %vm1524_vm2, %v1492_v11  ;;  %826 = vmatmul.bf16.gmra.mxu0 %v1761_v6  ;;  %1929 = vmatmul.msk.bf16.gmra.mxu3 %vm724_vm0, %v1841_v7  ;;  %v1045_v11 = vld [vmem:[%s2291_s22 + $0x28] sm:$0xff] }
  0xbc   : > { %vm1365_vm3 = vcmp.ge.f32.partialorder %v1333_v13, 0.0  ;;  %v1397_v17 = vmul.f32 0.2, %v1333_v13  ;;  %v966_v18 = vadd.f32 %v2293_v33, %v877_v14  ;;  %915 = vmatmul.bf16.gmra.mxu1 %v1765_v5  ;;  %v1043_v33 = vld [vmem:[%s2291_s22 + $0x18] sm:$0xff] }
  0xbe   : > { %v1429_v19 = vsel %vm1365_vm3, %v1333_v13, %v1397_v17  ;;  %v1074_v20 = vmul.f32 %v1042_v16, %v966_v18  ;;  %v2333_v21 = vpop.f32.mrf.mxu3  ;;  %v1164_v16 = vpop.permute.xlu2 %1163  ;;  %v1965_v17 = vld [vmem:[%s2122_s15 + $0x10c] sm:$0xf]  ;;  %v1786_v18 = vld [vmem:[%s2122_s15 + $0x114] sm:$0xf0] }
  0xbf   : > { %v1461_v24 = vmul.f32 1.4142135, %v1429_v19 }
  0xc0   : > { %v1298_v25 = vadd.f32 %v1149_v15, %v1074_v20  ;;  %v972_v26 = vpop.f32.mrf.mxu2  ;;  %v789_v27 = vpop.f32.mrf.mxu0  ;;  %v1966_v15 = vld [vmem:[%s2122_s15 + $0x110] sm:$0xf0] }
  0xc1   : > { %v1493_v28 = vpack.c.bf16 %v1461_v24, %v1461_v24  ;;  %v878_v29 = vpop.f32.mrf.mxu1  ;;  %v1785_v24 = vor.u32 %v1966_v15, %v1784_v12 }
  0xc2   : > { %v1334_v31 = vadd.f32 %v2301_v42, %v1298_v25  ;;  %v879_v32 = vadd.f32 %v878_v29, %v789_v27  ;;  %v1789_v29 = vor.u32 %v1965_v17, %v1786_v18 }
  0xc3   : > { %1526 = vst.msk [vmem:[%s2325_s28 + $0x4] sm:$0xf] %vm1524_vm2, %v1493_v28 }
  0xc4   : > { %vm1366_vm4 = vcmp.ge.f32.partialorder %v1334_v31, 0.0  ;;  %v1398_v35 = vmul.f32 0.2, %v1334_v31  ;;  %v968_v36 = vadd.f32 %v2307_v48, %v879_v32 }
  0xc5   : > { %1925 = vmatmul.msk.bf16.gmra.mxu2 %vm724_vm0, %v1793_v30 }
  0xc6   : > { %v1430_v41 = vsel %vm1366_vm4, %v1334_v31, %v1398_v35  ;;  %v1075_v43 = vmul.f32 %v1043_v33, %v968_v36  ;;  %v2347_v45 = vpop.f32.mrf.mxu3  ;;  %v1046_v33 = vld [vmem:[%s2291_s22 + $0x30] sm:$0xff]  ;;  %v1169_v36 = vpop.permute.xlu0 %1168 }
  0xc7   : > { %v1462_v46 = vmul.f32 1.4142135, %v1430_v41  ;;  %v1973_v41 = vld [vmem:[%s2122_s15 + $0x148] sm:$0xf0] }
  0xc8   : > { %v1299_v49 = vadd.f32 %v1154_v38, %v1075_v43  ;;  %v975_v50 = vpop.f32.mrf.mxu2  ;;  %v792_v51 = vpop.f32.mrf.mxu0 }
  0xc9   : > { %v1494_v48 = vpack.c.bf16 %v1462_v46, %v1462_v46  ;;  %v881_v53 = vpop.f32.mrf.mxu1 }
  0xca   : > { %v1335_v54 = vadd.f32 %v2301_v42, %v1299_v49  ;;  %v882_v55 = vadd.f32 %v881_v53, %v792_v51 }
  0xcb   : > { %1527 = vst.msk [vmem:[%s2325_s28 + $0x8] sm:$0xf] %vm1524_vm2, %v1494_v48  ;;  %831 = vmatmul.bf16.gmra.mxu0 %v1773_v47  ;;  %v1817_v48 = vor.u32 %v1973_v41, %v1816_v40 }
  0xcc   : > { %vm1367_vm5 = vcmp.ge.f32.partialorder %v1335_v54, 0.0  ;;  %v1399_v58 = vmul.f32 0.2, %v1335_v54  ;;  %v971_v59 = vadd.f32 %v970_v9, %v882_v55  ;;  %920 = vmatmul.bf16.gmra.mxu1 %v1777_v52  ;;  %v1805_v9 = vor.u32 %v1970_v0, %v1804_v63 }
  0xce   : > { %v1431_v60 = vsel %vm1367_vm5, %v1335_v54, %v1399_v58  ;;  %v1076_v61 = vmul.f32 %v1044_v57, %v971_v59  ;;  %v2353_v62 = vpop.f32.mrf.mxu3  ;;  %v1047_v54 = vld [vmem:[%s2291_s22 + $0x38] sm:$0xff] }
  0xcf   : > { %v1463_v1 = vmul.f32 1.4142135, %v1431_v60 }
  0xd0   : > { %v1300_v2 = vadd.f32 %v1159_v56, %v1076_v61  ;;  %v977_v4 = vpop.f32.mrf.mxu2  ;;  %v794_v6 = vpop.f32.mrf.mxu0 }
  0xd1   : > { %v1495_v7 = vpack.c.bf16 %v1463_v1, %v1463_v1  ;;  %v883_v8 = vpop.f32.mrf.mxu1  ;;  %v1174_v61 = vpop.permute.xlu1 %1173 }
  0xd2   : > { %v1336_v10 = vadd.f32 %v2301_v42, %v1300_v2  ;;  %v884_v5 = vadd.f32 %v883_v8, %v794_v6 }
  0xd3   : > { %1528 = vst.msk [vmem:[%s2325_s28 + $0xc] sm:$0xf] %vm1524_vm2, %v1495_v7 }
  0xd4   : > { %vm1368_vm6 = vcmp.ge.f32.partialorder %v1336_v10, 0.0  ;;  %v1400_v13 = vmul.f32 0.2, %v1336_v10  ;;  %v973_v14 = vadd.f32 %v972_v26, %v884_v5  ;;  %v1179_v5 = vpop.permute.xlu2 %1178 }
  0xd5   : > { %1926 = vmatmul.msk.bf16.gmra.mxu2 %vm724_vm0, %v1805_v9  ;;  %v1048_v9 = vld [vmem:[%s2291_s22 + $0x40] sm:$0xff] }
  0xd6   : > { %v1432_v19 = vsel %vm1368_vm6, %v1336_v10, %v1400_v13  ;;  %v1077_v20 = vmul.f32 %v1045_v11, %v973_v14  ;;  %v2366_v22 = vpop.f32.mrf.mxu3 }
  0xd7   : > { %v1464_v23 = vmul.f32 1.4142135, %v1432_v19 }
  0xd8   : > { %v1301_v25 = vadd.f32 %v1164_v16, %v1077_v20  ;;  %v980_v27 = vpop.f32.mrf.mxu2  ;;  %v797_v28 = vpop.f32.mrf.mxu0 }
  0xd9   : > { %v1496_v26 = vpack.c.bf16 %v1464_v23, %v1464_v23  ;;  %v886_v30 = vpop.f32.mrf.mxu1 }
  0xda   : > { %v1337_v31 = vadd.f32 %v2301_v42, %v1301_v25  ;;  %v887_v32 = vadd.f32 %v886_v30, %v797_v28  ;;  %v1049_v25 = vld [vmem:[%s2291_s22 + $0x48] sm:$0xff] }
  0xdb   : > { %1529 = vst.msk [vmem:[%s2325_s28 + $0x10] sm:$0xf] %vm1524_vm2, %v1496_v26  ;;  %836 = vmatmul.bf16.gmra.mxu0 %v1785_v24 }
  0xdc   : > { %vm1369_vm7 = vcmp.ge.f32.partialorder %v1337_v31, 0.0  ;;  %v1401_v34 = vmul.f32 0.2, %v1337_v31  ;;  %v976_v35 = vadd.f32 %v975_v50, %v887_v32  ;;  %925 = vmatmul.bf16.gmra.mxu1 %v1789_v29  ;;  %v1189_v29 = vpop.permute.xlu1 %1188 }
  0xde   : > { %v1433_v37 = vsel %vm1369_vm7, %v1337_v31, %v1401_v34  ;;  %v1078_v38 = vmul.f32 %v1046_v33, %v976_v35  ;;  %v2372_v39 = vpop.f32.mrf.mxu3  ;;  %v1184_v31 = vpop.permute.xlu0 %1183 }
  0xdf   : > { %v1465_v43 = vmul.f32 1.4142135, %v1433_v37 }
  0xe0   : > { %v1302_v46 = vadd.f32 %v1169_v36, %v1078_v38  ;;  %v982_v47 = vpop.f32.mrf.mxu2  ;;  %v799_v49 = vpop.f32.mrf.mxu0 }
  0xe1   : > { %v1497_v51 = vpack.c.bf16 %v1465_v43, %v1465_v43  ;;  %v888_v52 = vpop.f32.mrf.mxu1  ;;  %v1050_v43 = vld [vmem:[%s2291_s22 + $0x50] sm:$0xff] }
  0xe2   : > { %v1338_v53 = vadd.f32 %v2301_v42, %v1302_v46  ;;  %v889_v50 = vadd.f32 %v888_v52, %v799_v49  ;;  %v1194_v49 = vpop.permute.xlu2 %1193 }
  0xe3   : > { %1530 = vst.msk [vmem:[%s2325_s28 + $0x14] sm:$0xf] %vm1524_vm2, %v1497_v51 }
  0xe4   : > { %vm1370_vm8 = vcmp.ge.f32.partialorder %v1338_v53, 0.0  ;;  %v1402_v55 = vmul.f32 0.2, %v1338_v53  ;;  %v978_v56 = vadd.f32 %v977_v4, %v889_v50 }
  0xe5   : > { %1927 = vmatmul.msk.bf16.gmra.mxu2 %vm724_vm0, %v1817_v48 }
  0xe6   : > { %v1434_v57 = vsel %vm1370_vm8, %v1338_v53, %v1402_v55  ;;  %v1079_v58 = vmul.f32 %v1047_v54, %v978_v56  ;;  %v2381_v59 = vpop.f32.mrf.mxu3  ;;  %v1204_v53 = vpop.permute.xlu1 %1203 }
  0xe7   : > { %v1466_v60 = vmul.f32 1.4142135, %v1434_v57 }
  0xe8   : > { %v1303_v63 = vadd.f32 %v1174_v61, %v1079_v58  ;;  %v985_v0 = vpop.f32.mrf.mxu2  ;;  %v802_v1 = vpop.f32.mrf.mxu0 }
  0xe9   : > { %v1498_v2 = vpack.c.bf16 %v1466_v60, %v1466_v60  ;;  %v891_v6 = vpop.f32.mrf.mxu1 }
  0xea   : > { %v1339_v7 = vadd.f32 %v2301_v42, %v1303_v63  ;;  %v892_v8 = vadd.f32 %v891_v6, %v802_v1  ;;  %v1051_v63 = vld [vmem:[%s2291_s22 + $0x58] sm:$0xff] }
  0xeb   : > { %1531 = vst.msk [vmem:[%s2325_s28 + $0x18] sm:$0xf] %vm1524_vm2, %v1498_v2  ;;  %v1199_v2 = vpop.permute.xlu0 %1198 }
  0xec   : > { %vm1371_vm9 = vcmp.ge.f32.partialorder %v1339_v7, 0.0  ;;  %v1403_v4 = vmul.f32 0.2, %v1339_v7  ;;  %v981_v10 = vadd.f32 %v980_v27, %v892_v8 }
  0xee   : > { %v1435_v11 = vsel %vm1371_vm9, %v1339_v7, %v1403_v4  ;;  %v1080_v12 = vmul.f32 %v1048_v9, %v981_v10  ;;  %v931_v13 = vpop.f32.mrf.mxu3  ;;  %v1209_v9 = vpop.permute.xlu2 %1208 }
  0xef   : > { %v1467_v14 = vmul.f32 1.4142135, %v1435_v11  ;;  %v2388_v15 = vadd.f32 %v931_v13, %v2303_v44  ;;  %v2411_v13 = vpop.permute.xlu1 %1218 }
  0xf0   : > { %v1304_v16 = vadd.f32 %v1179_v5, %v1080_v12  ;;  %v987_v17 = vpop.f32.mrf.mxu2  ;;  %v804_v18 = vpop.f32.mrf.mxu0 }
  0xf1   : > { %v1499_v19 = vpack.c.bf16 %v1467_v14, %v1467_v14  ;;  %v893_v20 = vpop.f32.mrf.mxu1 }
  0xf2   : > { %v1340_v23 = vadd.f32 %v2301_v42, %v1304_v16  ;;  %v894_v24 = vadd.f32 %v893_v20, %v804_v18  ;;  %v1052_v18 = vld [vmem:[%s2291_s22 + $0x60] sm:$0xff] }
  0xf3   : > { %1532 = vst.msk [vmem:[%s2325_s28 + $0x1c] sm:$0xf] %vm1524_vm2, %v1499_v19 }
  0xf4   : > { %vm1372_vm10 = vcmp.ge.f32.partialorder %v1340_v23, 0.0  ;;  %v1404_v27 = vmul.f32 0.2, %v1340_v23  ;;  %v983_v28 = vadd.f32 %v982_v47, %v894_v24 }
  0xf6   : > { %v1436_v26 = vsel %vm1372_vm10, %v1340_v23, %v1404_v27  ;;  %v1081_v44 = vmul.f32 %v1049_v25, %v983_v28  ;;  %v933_v30 = vpop.f32.mrf.mxu3  ;;  %v1214_v25 = vpop.permute.xlu0 %1213 }
  0xf7   : > { %v1468_v32 = vmul.f32 1.4142135, %v1436_v26  ;;  %v2395_v33 = vadd.f32 %v933_v30, %v2320_v3  ;;  %v2419_v30 = vpop.permute.xlu2 %1223 }
  0xf8   : > { %v1305_v34 = vadd.f32 %v1184_v31, %v1081_v44  ;;  %v990_v35 = vpop.f32.mrf.mxu2  ;;  %v807_v36 = vpop.f32.mrf.mxu0 }
  0xf9   : > { %v1500_v37 = vpack.c.bf16 %v1468_v32, %v1468_v32  ;;  %v896_v38 = vpop.f32.mrf.mxu1 }
  0xfa   : > { %v1341_v40 = vadd.f32 %v2301_v42, %v1305_v34  ;;  %v897_v41 = vadd.f32 %v896_v38, %v807_v36  ;;  %v1053_v36 = vld [vmem:[%s2291_s22 + $0x68] sm:$0xff] }
  0xfb   : > { %1533 = vst.msk [vmem:[%s2325_s28 + $0x20] sm:$0xf] %vm1524_vm2, %v1500_v37 }
  0xfc   : > { %vm1373_vm11 = vcmp.ge.f32.partialorder %v1341_v40, 0.0  ;;  %v1405_v46 = vmul.f32 0.2, %v1341_v40  ;;  %v986_v47 = vadd.f32 %v985_v0, %v897_v41 }
  0xfe   : > { %v1437_v51 = vsel %vm1373_vm11, %v1341_v40, %v1405_v46  ;;  %v1082_v3 = vmul.f32 %v1050_v43, %v986_v47  ;;  %v936_v52 = vpop.f32.mrf.mxu3 }
  0xff   : > { %v1469_v48 = vmul.f32 1.4142135, %v1437_v51  ;;  %v2402_v50 = vadd.f32 %v936_v52, %v2333_v21 }
 0x100   : > { %v1306_v54 = vadd.f32 %v1189_v29, %v1082_v3  ;;  %v992_v55 = vpop.f32.mrf.mxu2  ;;  %v809_v56 = vpop.f32.mrf.mxu0 }
 0x101   : > { %v1501_v57 = vpack.c.bf16 %v1469_v48, %v1469_v48  ;;  %v898_v58 = vpop.f32.mrf.mxu1  ;;  %v2429_v3 = vpop.permute.xlu0 %1228 }
 0x102   : > { %v1342_v60 = vadd.f32 %v2301_v42, %v1306_v54  ;;  %v899_v61 = vadd.f32 %v898_v58, %v809_v56 }
 0x103   : > { %1534 = vst.msk [vmem:[%s2325_s28 + $0x24] sm:$0xf] %vm1524_vm2, %v1501_v57  ;;  %v2434_v57 = vpop.permute.xlu2 %1238 }
 0x104   : > { %vm1374_vm12 = vcmp.ge.f32.partialorder %v1342_v60, 0.0  ;;  %v1406_v0 = vmul.f32 0.2, %v1342_v60  ;;  %v988_v1 = vadd.f32 %v987_v17, %v899_v61 }
 0x106   : > { %v1438_v6 = vsel %vm1374_vm12, %v1342_v60, %v1406_v0  ;;  %v1083_v21 = vmul.f32 %v1051_v63, %v988_v1  ;;  %v938_v7 = vpop.f32.mrf.mxu3 }
 0x107   : > { %v1470_v8 = vmul.f32 1.4142135, %v1438_v6  ;;  %v2409_v4 = vadd.f32 %v938_v7, %v2347_v45 }
 0x108   : > { %v1307_v10 = vadd.f32 %v1194_v49, %v1083_v21  ;;  %v995_v5 = vpop.f32.mrf.mxu2  ;;  %v812_v11 = vpop.f32.mrf.mxu0 }
 0x109   : > { %v1502_v12 = vpack.c.bf16 %v1470_v8, %v1470_v8  ;;  %v901_v14 = vpop.f32.mrf.mxu1 }
 0x10a   : > { %v1343_v16 = vadd.f32 %v2301_v42, %v1307_v10  ;;  %v902_v17 = vadd.f32 %v901_v14, %v812_v11 }
 0x10b   : > { %1535 = vst.msk [vmem:[%s2325_s28 + $0x28] sm:$0xf] %vm1524_vm2, %v1502_v12  ;;  %v2442_v12 = vpop.permute.xlu0 %1243 }
 0x10c   : > { %vm1375_vm13 = vcmp.ge.f32.partialorder %v1343_v16, 0.0  ;;  %v1407_v19 = vmul.f32 0.2, %v1343_v16  ;;  %v991_v20 = vadd.f32 %v990_v35, %v902_v17  ;;  %v2424_v35 = vpop.permute.xlu1 %1233  ;;  %v2447_v17 = vpop.permute.xlu2 %1253 }
 0x10e   : > { %v1439_v45 = vsel %vm1375_vm13, %v1343_v16, %v1407_v19  ;;  %v1084_v23 = vmul.f32 %v1052_v18, %v991_v20  ;;  %v2417_v24 = vpop.f32.mrf.mxu3 }
 0x10f   : > { %v1471_v27 = vmul.f32 1.4142135, %v1439_v45 }
 0x110   : > { %v1308_v28 = vadd.f32 %v1199_v2, %v1084_v23  ;;  %v997_v29 = vpop.f32.mrf.mxu2  ;;  %v814_v26 = vpop.f32.mrf.mxu0 }
 0x111   : > { %v1503_v44 = vpack.c.bf16 %v1471_v27, %v1471_v27  ;;  %v903_v31 = vpop.f32.mrf.mxu1 }
 0x112   : > { %v1344_v32 = vadd.f32 %v2301_v42, %v1308_v28  ;;  %v904_v34 = vadd.f32 %v903_v31, %v814_v26 }
 0x113   : > { %1536 = vst.msk [vmem:[%s2325_s28 + $0x2c] sm:$0xf] %vm1524_vm2, %v1503_v44 }
 0x114   : > { %vm1376_vm14 = vcmp.ge.f32.partialorder %v1344_v32, 0.0  ;;  %v1408_v37 = vmul.f32 0.2, %v1344_v32  ;;  %v993_v38 = vadd.f32 %v992_v55, %v904_v34  ;;  %v1054_v55 = vld [vmem:[%s2291_s22 + $0x70] sm:$0xff] }
 0x116   : > { %v1440_v40 = vsel %vm1376_vm14, %v1344_v32, %v1408_v37  ;;  %v1085_v41 = vmul.f32 %v1053_v36, %v993_v38  ;;  %v2427_v43 = vpop.f32.mrf.mxu3  ;;  %v942_v37 = vadd.f32 %v2417_v24, %v2353_v62  ;;  %v2461_v38 = vpop.permute.xlu0 %1258 }
 0x117   : > { %v1472_v46 = vmul.f32 1.4142135, %v1440_v40 }
 0x118   : > { %v1309_v47 = vadd.f32 %v1204_v53, %v1085_v41  ;;  %v1000_v49 = vpop.f32.mrf.mxu2  ;;  %v817_v51 = vpop.f32.mrf.mxu0 }
 0x119   : > { %v1504_v52 = vpack.c.bf16 %v1472_v46, %v1472_v46  ;;  %v906_v48 = vpop.f32.mrf.mxu1  ;;  %v2437_v53 = vpop.permute.xlu1 %1248  ;;  %v1068_v46 = vld [vmem:[%s2291_s22 + $0xe0] sm:$0xff] }
 0x11a   : > { %v1345_v54 = vadd.f32 %v2301_v42, %v1309_v47  ;;  %v907_v56 = vadd.f32 %v906_v48, %v817_v51  ;;  %v2464_v51 = vpop.permute.xlu2 %1268 }
 0x11b   : > { %1537 = vst.msk [vmem:[%s2325_s28 + $0x30] sm:$0xf] %vm1524_vm2, %v1504_v52 }
 0x11c   : > { %vm1377_vm15 = vcmp.ge.f32.partialorder %v1345_v54, 0.0  ;;  %v1409_v58 = vmul.f32 0.2, %v1345_v54  ;;  %v996_v60 = vadd.f32 %v995_v5, %v907_v56  ;;  %v1055_v5 = vld [vmem:[%s2291_s22 + $0x78] sm:$0xff] }
 0x11e   : > { %v1441_v61 = vsel %vm1377_vm15, %v1345_v54, %v1409_v58  ;;  %v1086_v63 = vmul.f32 %v1054_v55, %v996_v60  ;;  %v2439_v0 = vpop.f32.mrf.mxu3 }
 0x11f   : > { %v1473_v1 = vmul.f32 1.4142135, %v1441_v61 }
 0x120   : > { %v1310_v2 = vadd.f32 %v1209_v9, %v1086_v63  ;;  %v1002_v6 = vpop.f32.mrf.mxu2  ;;  %v819_v21 = vpop.f32.mrf.mxu0  ;;  %v1057_v63 = vld [vmem:[%s2291_s22 + $0x88] sm:$0xff] }
 0x121   : > { %v1505_v7 = vpack.c.bf16 %v1473_v1, %v1473_v1  ;;  %v908_v8 = vpop.f32.mrf.mxu1  ;;  %v2451_v20 = vpop.permute.xlu1 %1263 }
 0x122   : > { %v1346_v10 = vadd.f32 %v2301_v42, %v1310_v2  ;;  %v909_v11 = vadd.f32 %v908_v8, %v819_v21 }
 0x123   : > { %1538 = vst.msk [vmem:[%s2325_s28 + $0x34] sm:$0xf] %vm1524_vm2, %v1505_v7 }
 0x124   : > { %vm1378_vm0 = vcmp.ge.f32.partialorder %v1346_v10, 0.0  ;;  %v1410_v14 = vmul.f32 0.2, %v1346_v10  ;;  %v998_v16 = vadd.f32 %v997_v29, %v909_v11  ;;  %v1056_v29 = vld [vmem:[%s2291_s22 + $0x80] sm:$0xff]  ;;  %v1069_v11 = vld [vmem:[%s2291_s22 + $0xe8] sm:$0xff] }
 0x126   : > { %v1442_v9 = vsel %vm1378_vm0, %v1346_v10, %v1410_v14  ;;  %v1087_v18 = vmul.f32 %v1055_v5, %v998_v16  ;;  %v2449_v19 = vpop.f32.mrf.mxu3  ;;  %v2477_v5 = vpop.permute.xlu0 %1273 }
 0x127   : > { %v1474_v45 = vmul.f32 1.4142135, %v1442_v9 }
 0x128   : > { %v1311_v23 = vadd.f32 %v1214_v25, %v1087_v18  ;;  %v2453_v27 = vpop.f32.mrf.mxu2  ;;  %v822_v28 = vpop.f32.mrf.mxu0 }
 0x129   : > { %v1506_v26 = vpack.c.bf16 %v1474_v45, %v1474_v45  ;;  %v911_v44 = vpop.f32.mrf.mxu1  ;;  %v1279_v24 = vpop.permute.xlu1 %1278 }
 0x12a   : > { %v1347_v31 = vadd.f32 %v2301_v42, %v1311_v23  ;;  %v912_v32 = vadd.f32 %v911_v44, %v822_v28 }
 0x12b   : > { %1539 = vst.msk [vmem:[%s2325_s28 + $0x38] sm:$0xf] %vm1524_vm2, %v1506_v26  ;;  %v1284_v26 = vpop.permute.xlu2 %1283 }
 0x12c   : > { %vm1379_vm1 = vcmp.ge.f32.partialorder %v1347_v31, 0.0  ;;  %v1411_v34 = vmul.f32 0.2, %v1347_v31  ;;  %v1001_v36 = vadd.f32 %v1000_v49, %v912_v32 }
 0x12e   : > { %v1443_v25 = vsel %vm1379_vm1, %v1347_v31, %v1411_v34  ;;  %v1088_v40 = vmul.f32 %v1056_v29, %v1001_v36  ;;  %v1030_v41 = vpop.f32.mrf.mxu3  ;;  %v1058_v34 = vld [vmem:[%s2291_s22 + $0x90] sm:$0xff] }
 0x12f   : > { %v1475_v47 = vmul.f32 1.4142135, %v1443_v25  ;;  %v1031_v52 = vadd.f32 %v1030_v41, %v942_v37  ;;  %v947_v25 = vadd.f32 %v2439_v0, %v2372_v39 }
 0x130   : > { %v1312_v48 = vadd.f32 %v2411_v13, %v1088_v40  ;;  %v2467_v54 = vpop.f32.mrf.mxu2  ;;  %v824_v49 = vpop.f32.mrf.mxu0  ;;  %v944_v13 = vadd.f32 %v2427_v43, %v2366_v22 }
 0x131   : > { %v1507_v56 = vpack.c.bf16 %v1475_v47, %v1475_v47  ;;  %v1100_v55 = vmul.f32 %v1068_v46, %v1031_v52  ;;  %v913_v62 = vpop.f32.mrf.mxu1  ;;  %v1070_v52 = vld [vmem:[%s2291_s22 + $0xf0] sm:$0xff] }
 0x132   : > { %v1348_v58 = vadd.f32 %v2301_v42, %v1312_v48  ;;  %v914_v60 = vadd.f32 %v913_v62, %v824_v49 }
 0x133   : > { %1540 = vst.msk [vmem:[%s2325_s28 + $0x3c] sm:$0xf] %vm1524_vm2, %v1507_v56  ;;  %v1324_v61 = vadd.f32 %v1279_v24, %v1100_v55 }
 0x134   : > { %vm1380_vm3 = vcmp.ge.f32.partialorder %v1348_v58, 0.0  ;;  %v1412_v1 = vmul.f32 0.2, %v1348_v58  ;;  %v1003_v2 = vadd.f32 %v1002_v6, %v914_v60  ;;  %v1289_v60 = vpop.permute.xlu0 %1288 }
 0x135   : > { %v1360_v21 = vadd.f32 %v2301_v42, %v1324_v61 }
 0x136   : > { %v1444_v7 = vsel %vm1380_vm3, %v1348_v58, %v1412_v1  ;;  %v1089_v8 = vmul.f32 %v1057_v63, %v1003_v2  ;;  %v1032_v10 = vpop.f32.mrf.mxu3 }
 0x137   : > { %v1476_v14 = vmul.f32 1.4142135, %v1444_v7  ;;  %vm1392_vm4 = vcmp.ge.f32.partialorder %v1360_v21, 0.0  ;;  %v1424_v16 = vmul.f32 0.2, %v1360_v21  ;;  %v1033_v9 = vadd.f32 %v1032_v10, %v944_v13  ;;  %v1059_v13 = vld [vmem:[%s2291_s22 + $0x98] sm:$0xff] }
 0x138   : > { %v1313_v18 = vadd.f32 %v2419_v30, %v1089_v8  ;;  %v2480_v6 = vpop.f32.mrf.mxu2  ;;  %v827_v45 = vpop.f32.mrf.mxu0  ;;  %v949_v8 = vadd.f32 %v2449_v19, %v2381_v59 }
 0x139   : > { %v1508_v22 = vpack.c.bf16 %v1476_v14, %v1476_v14  ;;  %v1456_v43 = vsel %vm1392_vm4, %v1360_v21, %v1424_v16  ;;  %v1101_v23 = vmul.f32 %v1069_v11, %v1033_v9  ;;  %v916_v28 = vpop.f32.mrf.mxu1  ;;  %v1071_v9 = vld [vmem:[%s2291_s22 + $0xf8] sm:$0xff] }
 0x13a   : > { %v1488_v44 = vmul.f32 1.4142135, %v1456_v43  ;;  %v1349_v31 = vadd.f32 %v2301_v42, %v1313_v18  ;;  %v917_v32 = vadd.f32 %v916_v28, %v827_v45 }
 0x13b   : > { %1541 = vst.msk [vmem:[%s2325_s28 + $0x40] sm:$0xf] %vm1524_vm2, %v1508_v22  ;;  %v1325_v29 = vadd.f32 %v1284_v26, %v1101_v23 }
 0x13c   : > { %v1520_v36 = vpack.c.bf16 %v1488_v44, %v1488_v44  ;;  %vm1381_vm5 = vcmp.ge.f32.partialorder %v1349_v31, 0.0  ;;  %v1413_v30 = vmul.f32 0.2, %v1349_v31  ;;  %v1006_v37 = vadd.f32 %v2453_v27, %v917_v32  ;;  %v1294_v44 = vpop.permute.xlu1 %1293 }
 0x13d   : > { %v1361_v40 = vadd.f32 %v2301_v42, %v1325_v29 }
 0x13e   : > { %1553 = vst.msk [vmem:[%s2325_s28 + $0x70] sm:$0xf] %vm1524_vm2, %v1520_v36  ;;  %v1445_v41 = vsel %vm1381_vm5, %v1349_v31, %v1413_v30  ;;  %v1090_v46 = vmul.f32 %v1058_v34, %v1006_v37  ;;  %v1035_v47 = vpop.f32.mrf.mxu3  ;;  %v1060_v36 = vld [vmem:[%s2291_s22 + $0xa0] sm:$0xff] }
 0x13f   : > { %v1477_v48 = vmul.f32 1.4142135, %v1445_v41  ;;  %vm1393_vm6 = vcmp.ge.f32.partialorder %v1361_v40, 0.0  ;;  %v1425_v49 = vmul.f32 0.2, %v1361_v40  ;;  %v1036_v56 = vadd.f32 %v1035_v47, %v947_v25 }
 0x140   : > { %v1314_v55 = vadd.f32 %v2429_v3, %v1090_v46  ;;  %v2494_v27 = vpop.f32.mrf.mxu2  ;;  %v829_v62 = vpop.f32.mrf.mxu0 }
 0x141   : > { %v1509_v39 = vpack.c.bf16 %v1477_v48, %v1477_v48  ;;  %v1457_v0 = vsel %vm1393_vm6, %v1361_v40, %v1425_v49  ;;  %v1102_v24 = vmul.f32 %v1070_v52, %v1036_v56  ;;  %v918_v58 = vpop.f32.mrf.mxu1 }
 0x142   : > { %v1489_v61 = vmul.f32 1.4142135, %v1457_v0  ;;  %v1350_v63 = vadd.f32 %v2301_v42, %v1314_v55  ;;  %v919_v1 = vadd.f32 %v918_v58, %v829_v62 }
 0x143   : > { %1542 = vst.msk [vmem:[%s2325_s28 + $0x44] sm:$0xf] %vm1524_vm2, %v1509_v39  ;;  %v1326_v2 = vadd.f32 %v1289_v60, %v1102_v24  ;;  %v1061_v24 = vld [vmem:[%s2291_s22 + $0xa8] sm:$0xff] }
 0x144   : > { %v1521_v21 = vpack.c.bf16 %v1489_v61, %v1489_v61  ;;  %vm1382_vm7 = vcmp.ge.f32.partialorder %v1350_v63, 0.0  ;;  %v1414_v3 = vmul.f32 0.2, %v1350_v63  ;;  %v1008_v7 = vadd.f32 %v2467_v54, %v919_v1 }
 0x145   : > { %v1362_v10 = vadd.f32 %v2301_v42, %v1326_v2 }
 0x146   : > { %1554 = vst.msk [vmem:[%s2325_s28 + $0x74] sm:$0xf] %vm1524_vm2, %v1521_v21  ;;  %v1446_v11 = vsel %vm1382_vm7, %v1350_v63, %v1414_v3  ;;  %v1091_v14 = vmul.f32 %v1059_v13, %v1008_v7  ;;  %v1037_v16 = vpop.f32.mrf.mxu3  ;;  %v1064_v21 = vld [vmem:[%s2291_s22 + $0xc0] sm:$0xff] }
 0x147   : > { %v1478_v18 = vmul.f32 1.4142135, %v1446_v11  ;;  %vm1394_vm8 = vcmp.ge.f32.partialorder %v1362_v10, 0.0  ;;  %v1426_v45 = vmul.f32 0.2, %v1362_v10  ;;  %v1038_v22 = vadd.f32 %v1037_v16, %v949_v8  ;;  %v1062_v16 = vld [vmem:[%s2291_s22 + $0xb0] sm:$0xff] }
 0x148   : > { %v1315_v43 = vadd.f32 %v2424_v35, %v1091_v14  ;;  %v1015_v54 = vpop.f32.mrf.mxu2  ;;  %v832_v23 = vpop.f32.mrf.mxu0 }
 0x149   : > { %v1510_v28 = vpack.c.bf16 %v1478_v18, %v1478_v18  ;;  %v1458_v59 = vsel %vm1394_vm8, %v1362_v10, %v1426_v45  ;;  %v1103_v19 = vmul.f32 %v1071_v9, %v1038_v22  ;;  %v921_v26 = vpop.f32.mrf.mxu1 }
 0x14a   : > { %v1490_v31 = vmul.f32 1.4142135, %v1458_v59  ;;  %v1351_v32 = vadd.f32 %v2301_v42, %v1315_v43  ;;  %v922_v29 = vadd.f32 %v921_v26, %v832_v23  ;;  %v1065_v59 = vld [vmem:[%s2291_s22 + $0xc8] sm:$0xff] }
 0x14b   : > { %1543 = vst.msk [vmem:[%s2325_s28 + $0x48] sm:$0xf] %vm1524_vm2, %v1510_v28  ;;  %v1327_v34 = vadd.f32 %v1294_v44, %v1103_v19 }
 0x14c   : > { %v1522_v30 = vpack.c.bf16 %v1490_v31, %v1490_v31  ;;  %vm1383_vm9 = vcmp.ge.f32.partialorder %v1351_v32, 0.0  ;;  %v1415_v37 = vmul.f32 0.2, %v1351_v32  ;;  %v1011_v35 = vadd.f32 %v2480_v6, %v922_v29 }
 0x14d   : > { %v1363_v25 = vadd.f32 %v2301_v42, %v1327_v34 }
 0x14e   : > { %1555 = vst.msk [vmem:[%s2325_s28 + $0x78] sm:$0xf] %vm1524_vm2, %v1522_v30  ;;  %v1447_v40 = vsel %vm1383_vm9, %v1351_v32, %v1415_v37  ;;  %v1092_v41 = vmul.f32 %v1060_v36, %v1011_v35  ;;  %v1063_v36 = vld [vmem:[%s2291_s22 + $0xb8] sm:$0xff] }
 0x14f   : > { %v1479_v46 = vmul.f32 1.4142135, %v1447_v40  ;;  %vm1395_vm10 = vcmp.ge.f32.partialorder %v1363_v25, 0.0  ;;  %v1427_v47 = vmul.f32 0.2, %v1363_v25 }
 0x150   : > { %v1316_v52 = vadd.f32 %v2434_v57, %v1092_v41  ;;  %v1017_v48 = vpop.f32.mrf.mxu2  ;;  %v834_v49 = vpop.f32.mrf.mxu0 }
 0x151   : > { %v1511_v56 = vpack.c.bf16 %v1479_v46, %v1479_v46  ;;  %v1459_v55 = vsel %vm1395_vm10, %v1363_v25, %v1427_v47  ;;  %v923_v62 = vpop.f32.mrf.mxu1 }
 0x152   : > { %v1491_v6 = vmul.f32 1.4142135, %v1459_v55  ;;  %v1352_v39 = vadd.f32 %v2301_v42, %v1316_v52  ;;  %v924_v0 = vadd.f32 %v923_v62, %v834_v49  ;;  %v1066_v49 = vld [vmem:[%s2291_s22 + $0xd0] sm:$0xff] }
 0x153   : > { %1544 = vst.msk [vmem:[%s2325_s28 + $0x4c] sm:$0xf] %vm1524_vm2, %v1511_v56 }
 0x154   : > { %v1523_v58 = vpack.c.bf16 %v1491_v6, %v1491_v6  ;;  %vm1384_vm11 = vcmp.ge.f32.partialorder %v1352_v39, 0.0  ;;  %v1416_v60 = vmul.f32 0.2, %v1352_v39  ;;  %v1013_v61 = vadd.f32 %v2494_v27, %v924_v0 }
 0x156   : > { %1556 = vst.msk [vmem:[%s2325_s28 + $0x7c] sm:$0xf] %vm1524_vm2, %v1523_v58  ;;  %v1448_v57 = vsel %vm1384_vm11, %v1352_v39, %v1416_v60  ;;  %v1093_v63 = vmul.f32 %v1061_v24, %v1013_v61 }
 0x157   : > { %v1480_v1 = vmul.f32 1.4142135, %v1448_v57  ;;  %v1067_v57 = vld [vmem:[%s2291_s22 + $0xd8] sm:$0xff] }
 0x158   : > { %v1317_v2 = vadd.f32 %v2442_v12, %v1093_v63  ;;  %v1020_v13 = vpop.f32.mrf.mxu2  ;;  %v837_v3 = vpop.f32.mrf.mxu0 }
 0x159   : > { %v1512_v7 = vpack.c.bf16 %v1480_v1, %v1480_v1  ;;  %v1021_v8 = vadd.f32 %v1020_v13, %v2388_v15  ;;  %v926_v10 = vpop.f32.mrf.mxu1 }
 0x15a   : > { %v1353_v11 = vadd.f32 %v2301_v42, %v1317_v2  ;;  %v927_v14 = vadd.f32 %v926_v10, %v837_v3 }
 0x15b   : > { %1545 = vst.msk [vmem:[%s2325_s28 + $0x50] sm:$0xf] %vm1524_vm2, %v1512_v7  ;;  %v1096_v27 = vmul.f32 %v1064_v21, %v1021_v8 }
 0x15c   : > { %vm1385_vm12 = vcmp.ge.f32.partialorder %v1353_v11, 0.0  ;;  %v1417_v9 = vmul.f32 0.2, %v1353_v11  ;;  %v1016_v18 = vadd.f32 %v1015_v54, %v927_v14 }
 0x15d   : > { %v1320_v12 = vadd.f32 %v2461_v38, %v1096_v27 }
 0x15e   : > { %v1449_v45 = vsel %vm1385_vm12, %v1353_v11, %v1417_v9  ;;  %v1094_v22 = vmul.f32 %v1062_v16, %v1016_v18 }
 0x15f   : > { %v1481_v43 = vmul.f32 1.4142135, %v1449_v45  ;;  %v1356_v15 = vadd.f32 %v2301_v42, %v1320_v12 }
 0x160   : > { %v1318_v23 = vadd.f32 %v2437_v53, %v1094_v22  ;;  %v1022_v28 = vpop.f32.mrf.mxu2  ;;  %v839_v19 = vpop.f32.mrf.mxu0 }
 0x161   : > { %v1513_v26 = vpack.c.bf16 %v1481_v43, %v1481_v43  ;;  %vm1388_vm13 = vcmp.ge.f32.partialorder %v1356_v15, 0.0  ;;  %v1420_v44 = vmul.f32 0.2, %v1356_v15  ;;  %v1023_v31 = vadd.f32 %v1022_v28, %v2395_v33  ;;  %v928_v54 = vpop.f32.mrf.mxu1 }
 0x162   : > { %v1354_v38 = vadd.f32 %v2301_v42, %v1318_v23  ;;  %v929_v32 = vadd.f32 %v928_v54, %v839_v19 }
 0x163   : > { %1546 = vst.msk [vmem:[%s2325_s28 + $0x54] sm:$0xf] %vm1524_vm2, %v1513_v26  ;;  %v1452_v29 = vsel %vm1388_vm13, %v1356_v15, %v1420_v44  ;;  %v1097_v34 = vmul.f32 %v1065_v59, %v1023_v31 }
 0x164   : > { %v1484_v53 = vmul.f32 1.4142135, %v1452_v29  ;;  %vm1386_vm14 = vcmp.ge.f32.partialorder %v1354_v38, 0.0  ;;  %v1418_v30 = vmul.f32 0.2, %v1354_v38  ;;  %v1018_v37 = vadd.f32 %v1017_v48, %v929_v32 }
 0x165   : > { %v1321_v35 = vadd.f32 %v2451_v20, %v1097_v34  ;;  %v2030_v20 = vld [vmem:[%s2569_s2] ss:$0 sm:$0xff] }
 0x166   : > { %v1516_v25 = vpack.c.bf16 %v1484_v53, %v1484_v53  ;;  %v1450_v33 = vsel %vm1386_vm14, %v1354_v38, %v1418_v30  ;;  %v1095_v40 = vmul.f32 %v1063_v36, %v1018_v37 }
 0x167   : > { %v1482_v41 = vmul.f32 1.4142135, %v1450_v33  ;;  %v1357_v46 = vadd.f32 %v2301_v42, %v1321_v35 }
 0x168   : > { %1549 = vst.msk [vmem:[%s2325_s28 + $0x60] sm:$0xf] %vm1524_vm2, %v1516_v25  ;;  %v1319_v47 = vadd.f32 %v2447_v17, %v1095_v40  ;;  %v1025_v52 = vpop.f32.mrf.mxu2 }
 0x169   : > { %v1514_v56 = vpack.c.bf16 %v1482_v41, %v1482_v41  ;;  %vm1389_vm15 = vcmp.ge.f32.partialorder %v1357_v46, 0.0  ;;  %v1421_v55 = vmul.f32 0.2, %v1357_v46  ;;  %v1026_v48 = vadd.f32 %v1025_v52, %v2402_v50 }
 0x16a   : > { %v1355_v62 = vadd.f32 %v2030_v20, %v1319_v47 }
 0x16b   : > { %1547 = vst.msk [vmem:[%s2325_s28 + $0x58] sm:$0xf] %vm1524_vm2, %v1514_v56  ;;  %v1453_v42 = vsel %vm1389_vm15, %v1357_v46, %v1421_v55  ;;  %v1098_v6 = vmul.f32 %v1066_v49, %v1026_v48 }
 0x16c   : > { %v1485_v17 = vmul.f32 1.4142135, %v1453_v42  ;;  %vm1387_vm0 = vcmp.ge.f32.partialorder %v1355_v62, 0.0  ;;  %v1419_v39 = vmul.f32 0.2, %v1355_v62 }
 0x16d   : > { %v1322_v0 = vadd.f32 %v2464_v51, %v1098_v6 }
 0x16e   : > { %v1517_v24 = vpack.c.bf16 %v1485_v17, %v1485_v17  ;;  %v1451_v58 = vsel %vm1387_vm0, %v1355_v62, %v1419_v39 }
 0x16f   : > { %v1483_v60 = vmul.f32 1.4142135, %v1451_v58  ;;  %v1358_v50 = vadd.f32 %v2030_v20, %v1322_v0 }
 0x170   : > { %1550 = vst.msk [vmem:[%s2325_s28 + $0x64] sm:$0xf] %vm1524_vm2, %v1517_v24  ;;  %v1027_v61 = vpop.f32.mrf.mxu2 }
 0x171   : > { %v1515_v63 = vpack.c.bf16 %v1483_v60, %v1483_v60  ;;  %vm1390_vm1 = vcmp.ge.f32.partialorder %v1358_v50, 0.0  ;;  %v1422_v1 = vmul.f32 0.2, %v1358_v50  ;;  %v1028_v2 = vadd.f32 %v1027_v61, %v2409_v4 }
 0x173   : > { %1548 = vst.msk [vmem:[%s2325_s28 + $0x5c] sm:$0xf] %vm1524_vm2, %v1515_v63  ;;  %v1454_v13 = vsel %vm1390_vm1, %v1358_v50, %v1422_v1  ;;  %v1099_v21 = vmul.f32 %v1067_v57, %v1028_v2 }
 0x174   : > { %v1486_v51 = vmul.f32 1.4142135, %v1454_v13 }
 0x175   : > { %v1323_v3 = vadd.f32 %v2477_v5, %v1099_v21 }
 0x176   : > { %v1518_v7 = vpack.c.bf16 %v1486_v51, %v1486_v51 }
 0x177   : > { %v1359_v8 = vadd.f32 %v2030_v20, %v1323_v3 }
 0x178   : > { %1551 = vst.msk [vmem:[%s2325_s28 + $0x68] sm:$0xf] %vm1524_vm2, %v1518_v7 }
 0x179   : > { %vm1391_vm3 = vcmp.ge.f32.partialorder %v1359_v8, 0.0  ;;  %v1423_v10 = vmul.f32 0.2, %v1359_v8 }
 0x17b   : > { %v1455_v11 = vsel %vm1391_vm3, %v1359_v8, %v1423_v10 }
 0x17c   : > { %v1487_v14 = vmul.f32 1.4142135, %v1455_v11 }
 0x17e   : > { %v1519_v27 = vpack.c.bf16 %v1487_v14, %v1487_v14 }
 0x180   : > { %1552 = vst.msk [vmem:[%s2325_s28 + $0x6c] sm:$0xf] %vm1524_vm2, %v1519_v27 }
 0x181 PF: > { %s15_s18 = sadd.s32 1, %s2037_s18  }
 0x182   : > { %p12_p4 = scmp.ge.s32.totalorder %s15_s18, 4  }
 0x184   :  { %14 = sbr.rel (!%p12_p4) target bundleno = 1 (0x1), region = 76 }

// kernel: _lambda_.26
= control target key start
LH: loop header
LB: loop body
LE: loop exit
PB: predicated region body
PF: predicated region fallthrough
CT: control target
= control target key end

     0   :  { %s1647_s18 = smov 0   ;;  %s2052_s0 = inlined_call_operand.vmem [shape: bf16[512,144], index: 0, kind: input, shape index: {}]   ;;  %s2053_s1 = inlined_call_operand.vmem [shape: bf16[144,16], index: 1, kind: input, shape index: {}]   ;;  %s2054_s2 = inlined_call_operand.vmem [shape: f32[1,16], index: 2, kind: input, shape index: {}]   ;;  %s2055_s3 = inlined_call_operand.vmem [shape: f32[512,16], index: 3, kind: input, shape index: {}]   ;;  %s2056_s4 = inlined_call_operand.vmem [shape: f32[512,1], index: 4, kind: input, shape index: {}]   ;;  %s2057_s5 = inlined_call_operand.vmem [shape: bf16[512,16], index: 5, kind: output, shape index: {}]  }
   0x1 LB: > { %s1348_s19 = sadd.s32 4294967295, %s1614_s18   ;;  %p1352_p0 = scmp.ge.s32.totalorder %s1614_s18, 1  ;;  %s1614_s18 = sphi %s1647_s18, %s15_s18  }
   0x2   : > { %p211_p1 = scmp.lt.s32.totalorder %s1614_s18, 3 }
   0x4   : > { %p212_p2 = pnand %p1352_p0, %p211_p1 }
   0x5   : > { %s1353_s24 = sshll.u32 (!%p212_p2), %s1348_s19, 5 }
   0x6   : > { %215 = sbr.rel (%p212_p2) target bundleno = 313 (0x139), region = 40  ;;  %p251_p3 = scmp.lt.s32.totalorder (!%p212_p2), %s1353_s24, 63 }
   0xb   : > { %v1584_v0 = vld [vmem:[%s2053_s1 + $0x38] sm:$0xff]  ;;  %v1585_v1 = vld [vmem:[%s2053_s1 + $0x40] sm:$0xff]  ;;  %v1616_v2 = vmov 0   ;;  %v1583_v3 = vld [vmem:[%s2053_s1 + $0x30] sm:$0xff]  ;;  %s2059_s24 = smov (!%p251_p3, %s1353_s24), 63  ;;  %vm524_vm0 = vcmask 130048  }
   0xc   : > { %1605 = vset.pattern.permute.xlu1 %v1616_v2  ;;  %1604 = vset.pattern.permute.xlu0 %v1616_v2  ;;  %s1667_s27 = sshll.u32 %s2059_s24, 3  ;;  %v1582_v4 = vld [vmem:[%s2053_s1 + $0x28] sm:$0xff]  ;;  %v1581_v10 = vld [vmem:[%s2053_s1 + $0x20] sm:$0xff]  ;;  %v1580_v14 = vld [vmem:[%s2053_s1 + $0x18] sm:$0xff]  ;;  %vm1235_vm2 = vcmask 125952  }
   0xd   : > { %573 = vmatpush.bf16.msra.mxu0 %v1584_v0  ;;  %1586 = vmatpush.bf16.msra.mxu2 %v1584_v0  ;;  %s1673_s30 = scalar_lea.vmem %s2052_s0, %s1667_s27  ;;  %s1682_s10 = scalar_lea.vmem %s2056_s4, %s1667_s27  ;;  %v1579_v17 = vld [vmem:[%s2053_s1 + $0x10] sm:$0xff]  ;;  %v1578_v23 = vld [vmem:[%s2053_s1 + $0x8] sm:$0xff]  ;;  %v1577_v25 = vld [vmem:[%s2053_s1] sm:$0xff] }
   0xe   : > { %669 = vmatpush.bf16.msra.mxu1 %v1585_v1  ;;  %1594 = vmatpush.bf16.msra.mxu3 %v1585_v1  ;;  %v1545_v5 = vld [vmem:[%s1673_s30 + $0x4] sm:$0xf]  ;;  %v1366_v6 = vld [vmem:[%s1673_s30 + $0x8] sm:$0xf0]  ;;  %v817_v7 = vld [vmem:[%s1682_s10 + $0x10] sm:$0xff]  ;;  %s1829_s25 = scalar_lea.vmem %s2055_s3, %s1667_s27  ;;  %s1361_s27 = sshll.u32 %s2059_s24, 2 }
   0xf   : > { %1606 = vset.pattern.permute.xlu2 %v1616_v2  ;;  %v1369_v8 = vor.u32 %v1545_v5, %v1366_v6  ;;  %859 = vperm.xlu1 %1605, %v817_v7   ;;  %v815_v9 = vld [vmem:[%s1682_s10] sm:$0xff]  ;;  %v818_v11 = vld [vmem:[%s1682_s10 + $0x18] sm:$0xff]  ;;  %v1563_v12 = vld [vmem:[%s1673_s30 + $0x94] sm:$0xf]  ;;  %s1851_s6 = scalar_lea.vmem %s2057_s5, %s1361_s27 }
  0x10   : > { %849 = vperm.xlu0 %1604, %v815_v9   ;;  %v1438_v13 = vld [vmem:[%s1673_s30 + $0x98] sm:$0xf0]  ;;  %v816_v15 = vld [vmem:[%s1682_s10 + $0x8] sm:$0xff]  ;;  %v819_v18 = vld [vmem:[%s1682_s10 + $0x20] sm:$0xff] }
  0x11   : > { %574 = vmatpush.bf16.msra.mxu0 %v1583_v3  ;;  %1587 = vmatpush.bf16.msra.mxu2 %v1583_v3  ;;  %v1441_v16 = vor.u32 %v1563_v12, %v1438_v13  ;;  %v1547_v19 = vld [vmem:[%s1673_s30 + $0x14] sm:$0xf]  ;;  %v1374_v20 = vld [vmem:[%s1673_s30 + $0x18] sm:$0xf0]  ;;  %v1565_v26 = vld [vmem:[%s1673_s30 + $0xa4] sm:$0xf] }
  0x12   : > { %1526 = vmatmul.msk.bf16.vlgmr.msra.gmra.mxu1 %vm524_vm0, %v1369_v8  ;;  %869 = vperm.xlu2 %1606, %v819_v18   ;;  %v822_v21 = vld [vmem:[%s1682_s10 + $0x38] sm:$0xff]  ;;  %v1377_v22 = vor.u32 %v1547_v19, %v1374_v20  ;;  %v821_v24 = vld [vmem:[%s1682_s10 + $0x30] sm:$0xff]  ;;  %v1446_v27 = vld [vmem:[%s1673_s30 + $0xa8] sm:$0xf0] }
  0x13   : > { %1535 = vmatmul.msk.bf16.vlgmr.msra.gmra.mxu3 %vm524_vm0, %v1441_v16  ;;  %v1364_v28 = vld [vmem:[%s1673_s30] sm:$0xf]  ;;  %v1546_v29 = vld [vmem:[%s1673_s30 + $0x4] sm:$0xf0]  ;;  %v1449_v33 = vor.u32 %v1565_v26, %v1446_v27  ;;  %v825_v35 = vld [vmem:[%s1682_s10 + $0x50] sm:$0xff] }
  0x14   : > { %v820_v30 = vld [vmem:[%s1682_s10 + $0x28] sm:$0xff]  ;;  %v1428_v31 = vld [vmem:[%s1673_s30 + $0x80] sm:$0xf]  ;;  %v1365_v34 = vor.u32 %v1546_v29, %v1364_v28  ;;  %v1549_v39 = vld [vmem:[%s1673_s30 + $0x24] sm:$0xf] }
  0x15   : > { %575 = vmatpush.bf16.msra.mxu0 %v1582_v4  ;;  %1588 = vmatpush.bf16.msra.mxu2 %v1582_v4  ;;  %v1562_v32 = vld [vmem:[%s1673_s30 + $0x84] sm:$0xf0]  ;;  %v823_v38 = vld [vmem:[%s1682_s10 + $0x40] sm:$0xff]  ;;  %v1382_v40 = vld [vmem:[%s1673_s30 + $0x28] sm:$0xf0] }
  0x16   : > { %v1429_v36 = vor.u32 %v1562_v32, %v1428_v31  ;;  %v824_v37 = vld [vmem:[%s1682_s10 + $0x48] sm:$0xff]  ;;  %v1385_v42 = vor.u32 %v1549_v39, %v1382_v40  ;;  %v827_v43 = vld [vmem:[%s1682_s10 + $0x60] sm:$0xff]  ;;  %v1567_v44 = vld [vmem:[%s1673_s30 + $0xb4] sm:$0xf] }
  0x17   : > { %864 = vperm.xlu1 %1605, %v818_v11   ;;  %v828_v41 = vld [vmem:[%s1682_s10 + $0x68] sm:$0xff]  ;;  %v1454_v45 = vld [vmem:[%s1673_s30 + $0xb8] sm:$0xf0]  ;;  %v1372_v46 = vld [vmem:[%s1673_s30 + $0x10] sm:$0xf] }
  0x18   : > { %854 = vperm.xlu0 %1604, %v816_v15   ;;  %v1548_v47 = vld [vmem:[%s1673_s30 + $0x14] sm:$0xf0]  ;;  %v1436_v49 = vld [vmem:[%s1673_s30 + $0x90] sm:$0xf]  ;;  %v1457_v51 = vor.u32 %v1567_v44, %v1454_v45  ;;  %v831_v53 = vld [vmem:[%s1682_s10 + $0x80] sm:$0xff] }
  0x19   : > { %576 = vmatpush.bf16.msra.mxu0 %v1581_v10  ;;  %1589 = vmatpush.bf16.msra.mxu2 %v1581_v10  ;;  %v826_v48 = vld [vmem:[%s1682_s10 + $0x58] sm:$0xff]  ;;  %v1373_v52 = vor.u32 %v1548_v47, %v1372_v46  ;;  %v829_v56 = vld [vmem:[%s1682_s10 + $0x70] sm:$0xff]  ;;  %v1569_v62 = vld [vmem:[%s1673_s30 + $0xc4] sm:$0xf] }
  0x1a   : > { %874 = vperm.xlu2 %1606, %v820_v30   ;;  %v1564_v50 = vld [vmem:[%s1673_s30 + $0x94] sm:$0xf0]  ;;  %v1551_v57 = vld [vmem:[%s1673_s30 + $0x34] sm:$0xf]  ;;  %v1390_v58 = vld [vmem:[%s1673_s30 + $0x38] sm:$0xf0] }
  0x1b   : > { %v1437_v54 = vor.u32 %v1564_v50, %v1436_v49  ;;  %v830_v55 = vld [vmem:[%s1682_s10 + $0x78] sm:$0xff]  ;;  %v1393_v60 = vor.u32 %v1551_v57, %v1390_v58  ;;  %v833_v61 = vld [vmem:[%s1682_s10 + $0x90] sm:$0xff]  ;;  %v1462_v63 = vld [vmem:[%s1673_s30 + $0xc8] sm:$0xf0] }
  0x1c   : > { %v834_v59 = vld [vmem:[%s1682_s10 + $0x98] sm:$0xff]  ;;  %v1380_v0 = vld [vmem:[%s1673_s30 + $0x20] sm:$0xf]  ;;  %v1550_v1 = vld [vmem:[%s1673_s30 + $0x24] sm:$0xf0]  ;;  %v1465_v5 = vor.u32 %v1569_v62, %v1462_v63 }
  0x1d   : > { %577 = vmatpush.bf16.msra.mxu0 %v1580_v14  ;;  %1590 = vmatpush.bf16.msra.mxu2 %v1580_v14  ;;  %v832_v2 = vld [vmem:[%s1682_s10 + $0x88] sm:$0xff]  ;;  %v1444_v3 = vld [vmem:[%s1673_s30 + $0xa0] sm:$0xf]  ;;  %v1381_v6 = vor.u32 %v1550_v1, %v1380_v0  ;;  %v837_v7 = vld [vmem:[%s1682_s10 + $0xb0] sm:$0xff] }
  0x1e   : > { %v1566_v4 = vld [vmem:[%s1673_s30 + $0xa4] sm:$0xf0]  ;;  %v835_v10 = vld [vmem:[%s1682_s10 + $0xa0] sm:$0xff]  ;;  %v1398_v12 = vld [vmem:[%s1673_s30 + $0x48] sm:$0xf0] }
  0x1f   : > { %884 = vperm.xlu1 %1605, %v822_v21   ;;  %v1445_v8 = vor.u32 %v1566_v4, %v1444_v3  ;;  %v836_v9 = vld [vmem:[%s1682_s10 + $0xa8] sm:$0xff]  ;;  %v1553_v11 = vld [vmem:[%s1673_s30 + $0x44] sm:$0xf]  ;;  %v1571_v16 = vld [vmem:[%s1673_s30 + $0xd4] sm:$0xf] }
  0x20   : > { %879 = vperm.xlu0 %1604, %v821_v24   ;;  %v840_v13 = vld [vmem:[%s1682_s10 + $0xc8] sm:$0xff]  ;;  %v1401_v14 = vor.u32 %v1553_v11, %v1398_v12  ;;  %v839_v15 = vld [vmem:[%s1682_s10 + $0xc0] sm:$0xff]  ;;  %v1388_v18 = vld [vmem:[%s1673_s30 + $0x30] sm:$0xf] }
  0x21   : > { %578 = vmatpush.bf16.msra.mxu0 %v1579_v17  ;;  %1591 = vmatpush.bf16.msra.mxu2 %v1579_v17  ;;  %v1470_v17 = vld [vmem:[%s1673_s30 + $0xd8] sm:$0xf0]  ;;  %v1552_v19 = vld [vmem:[%s1673_s30 + $0x34] sm:$0xf0]  ;;  %v1452_v21 = vld [vmem:[%s1673_s30 + $0xb0] sm:$0xf] }
  0x22   : > { %1527 = vmatmul.msk.bf16.gmra.mxu1 %vm524_vm0, %v1377_v22  ;;  %889 = vperm.xlu2 %1606, %v823_v38   ;;  %v838_v20 = vld [vmem:[%s1682_s10 + $0xb8] sm:$0xff]  ;;  %v1389_v24 = vor.u32 %v1552_v19, %v1388_v18  ;;  %v841_v28 = vld [vmem:[%s1682_s10 + $0xd0] sm:$0xff]  ;;  %v844_v38 = vld [vmem:[%s1682_s10 + $0xe8] sm:$0xff] }
  0x23   : > { %1536 = vmatmul.msk.bf16.gmra.mxu3 %vm524_vm0, %v1449_v33  ;;  %v1568_v22 = vld [vmem:[%s1673_s30 + $0xb4] sm:$0xf0]  ;;  %v1555_v29 = vld [vmem:[%s1673_s30 + $0x54] sm:$0xf]  ;;  %v1406_v30 = vld [vmem:[%s1673_s30 + $0x58] sm:$0xf0] }
  0x24   : > { %v1453_v26 = vor.u32 %v1568_v22, %v1452_v21  ;;  %v842_v27 = vld [vmem:[%s1682_s10 + $0xd8] sm:$0xff]  ;;  %v1409_v32 = vor.u32 %v1555_v29, %v1406_v30  ;;  %v845_v33 = vld [vmem:[%s1682_s10 + $0xf0] sm:$0xff]  ;;  %v1460_v39 = vld [vmem:[%s1673_s30 + $0xc0] sm:$0xf] }
  0x25   : > { %579 = vmatpush.bf16.msra.mxu0 %v1578_v23  ;;  %1592 = vmatpush.bf16.msra.mxu2 %v1578_v23  ;;  %v1473_v23 = vor.u32 %v1571_v16, %v1470_v17  ;;  %v846_v31 = vld [vmem:[%s1682_s10 + $0xf8] sm:$0xff]  ;;  %v1570_v40 = vld [vmem:[%s1673_s30 + $0xc4] sm:$0xf0]  ;;  %v1557_v44 = vld [vmem:[%s1673_s30 + $0x64] sm:$0xf] }
  0x26   : > { %v1414_v45 = vld [vmem:[%s1673_s30 + $0x68] sm:$0xf0]  ;;  %v1575_v47 = vld [vmem:[%s1673_s30 + $0xf4] sm:$0xf]  ;;  %v1404_v49 = vld [vmem:[%s1673_s30 + $0x50] sm:$0xf] }
  0x27   : > { %899 = vperm.xlu1 %1605, %v825_v35   ;;  %v1478_v35 = vld [vmem:[%s1673_s30 + $0xe8] sm:$0xf0]  ;;  %v1417_v46 = vor.u32 %v1557_v44, %v1414_v45  ;;  %v1556_v50 = vld [vmem:[%s1673_s30 + $0x54] sm:$0xf0]  ;;  %v1422_v57 = vld [vmem:[%s1673_s30 + $0x78] sm:$0xf0] }
  0x28   : > { %894 = vperm.xlu0 %1604, %v824_v37   ;;  %v1554_v37 = vld [vmem:[%s1673_s30 + $0x44] sm:$0xf0]  ;;  %v1430_v3 = vld [vmem:[%s1673_s30 + $0x88] sm:$0xf0]  ;;  %v1576_v11 = vld [vmem:[%s1673_s30 + $0xf4] sm:$0xf0] }
  0x29   : > { %580 = vmatpush.bf16.msra.mxu0 %v1577_v25  ;;  %1593 = vmatpush.bf16.msra.mxu2 %v1577_v25  ;;  %v843_v25 = vld [vmem:[%s1682_s10 + $0xe0] sm:$0xff]  ;;  %v1574_v62 = vld [vmem:[%s1673_s30 + $0xe4] sm:$0xf0] }
  0x2a   : > { %904 = vperm.xlu2 %1606, %v826_v48   ;;  %v1486_v48 = vld [vmem:[%s1673_s30 + $0xf8] sm:$0xf0] }
  0x2c   : > { %581 = vmatmul.bf16.vlgmr.msra.gmra.mxu0 %v1365_v34  ;;  %621 = vmatmul.bf16.vlgmr.msra.gmra.mxu2 %v1429_v36  ;;  %v1573_v34 = vld [vmem:[%s1673_s30 + $0xe4] sm:$0xf]  ;;  %v1396_v36 = vld [vmem:[%s1673_s30 + $0x40] sm:$0xf] }
  0x2f   : > { %914 = vperm.xlu1 %1605, %v828_v41   ;;  %v1481_v41 = vor.u32 %v1573_v34, %v1478_v35 }
  0x30   : > { %909 = vperm.xlu0 %1604, %v827_v43   ;;  %v1461_v43 = vor.u32 %v1570_v40, %v1460_v39 }
  0x32   : > { %1528 = vmatmul.msk.bf16.gmra.mxu1 %vm524_vm0, %v1385_v42  ;;  %919 = vperm.xlu2 %1606, %v829_v56   ;;  %v1397_v42 = vor.u32 %v1554_v37, %v1396_v36  ;;  %v1559_v56 = vld [vmem:[%s1673_s30 + $0x74] sm:$0xf]  ;;  %v752_v36 = vld [vmem:[%s1829_s25 + $0x8] sm:$0xff] }
  0x33   : > { %1537 = vmatmul.msk.bf16.gmra.mxu3 %vm524_vm0, %v1457_v51  ;;  %v1468_v51 = vld [vmem:[%s1673_s30 + $0xd0] sm:$0xf]  ;;  %v1425_v58 = vor.u32 %v1559_v56, %v1422_v57 }
  0x37   : > { %929 = vperm.xlu1 %1605, %v831_v53   ;;  %v1489_v53 = vor.u32 %v1575_v47, %v1486_v48 }
  0x38   : > { %924 = vperm.xlu0 %1604, %v830_v55  }
  0x3a   : > { %934 = vperm.xlu2 %1606, %v832_v2   ;;  %v1561_v2 = vld [vmem:[%s1673_s30 + $0x84] sm:$0xf] }
  0x3c   : > { %586 = vmatmul.bf16.gmra.mxu0 %v1373_v52  ;;  %626 = vmatmul.bf16.gmra.mxu2 %v1437_v54  ;;  %v1572_v52 = vld [vmem:[%s1673_s30 + $0xd4] sm:$0xf0]  ;;  %v1405_v54 = vor.u32 %v1556_v50, %v1404_v49 }
  0x3d   : > { %v1469_v55 = vor.u32 %v1572_v52, %v1468_v51  ;;  %v753_v51 = vld [vmem:[%s1829_s25 + $0x10] sm:$0xff] }
  0x3f   : > { %944 = vperm.xlu1 %1605, %v834_v59   ;;  %v1412_v59 = vld [vmem:[%s1673_s30 + $0x60] sm:$0xf] }
  0x40   : > { %939 = vperm.xlu0 %1604, %v833_v61   ;;  %v1476_v61 = vld [vmem:[%s1673_s30 + $0xe0] sm:$0xf] }
  0x41   : > { %v1477_v1 = vor.u32 %v1574_v62, %v1476_v61 }
  0x42   : > { %1529 = vmatmul.msk.bf16.gmra.mxu1 %vm524_vm0, %v1393_v60  ;;  %949 = vperm.xlu2 %1606, %v835_v10   ;;  %v1558_v60 = vld [vmem:[%s1673_s30 + $0x64] sm:$0xf0]  ;;  %v1484_v10 = vld [vmem:[%s1673_s30 + $0xf0] sm:$0xf] }
  0x43   : > { %1538 = vmatmul.msk.bf16.gmra.mxu3 %vm524_vm0, %v1465_v5  ;;  %v1413_v0 = vor.u32 %v1558_v60, %v1412_v59  ;;  %v1433_v5 = vor.u32 %v1561_v2, %v1430_v3 }
  0x47   : > { %959 = vperm.xlu1 %1605, %v837_v7  }
  0x48   : > { %954 = vperm.xlu0 %1604, %v836_v9   ;;  %v1560_v9 = vld [vmem:[%s1673_s30 + $0x74] sm:$0xf0] }
  0x4a   : > { %964 = vperm.xlu2 %1606, %v838_v20  }
  0x4c   : > { %591 = vmatmul.bf16.gmra.mxu0 %v1381_v6  ;;  %631 = vmatmul.bf16.gmra.mxu2 %v1445_v8  ;;  %v1420_v8 = vld [vmem:[%s1673_s30 + $0x70] sm:$0xf] }
  0x4f   : > { %974 = vperm.xlu1 %1605, %v840_v13   ;;  %v1421_v13 = vor.u32 %v1560_v9, %v1420_v8 }
  0x50   : > { %969 = vperm.xlu0 %1604, %v839_v15  }
  0x52   : > { %1530 = vmatmul.msk.bf16.gmra.mxu1 %vm524_vm0, %v1401_v14  ;;  %979 = vperm.xlu2 %1606, %v841_v28   ;;  %v1485_v14 = vor.u32 %v1576_v11, %v1484_v10  ;;  %v1835_v28 = vld [vmem:[%s2054_s2] ss:$0 sm:$0xff] }
  0x53   : > { %1539 = vmatmul.msk.bf16.gmra.mxu3 %vm524_vm0, %v1473_v23 }
  0x57   : > { %989 = vperm.xlu1 %1605, %v843_v25  }
  0x58   : > { %984 = vperm.xlu0 %1604, %v842_v27  }
  0x5a   : > { %994 = vperm.xlu2 %1606, %v844_v38  }
  0x5c   : > { %596 = vmatmul.bf16.gmra.mxu0 %v1389_v24  ;;  %636 = vmatmul.bf16.gmra.mxu2 %v1453_v26  ;;  %v751_v24 = vld [vmem:[%s1829_s25] sm:$0xff] }
  0x5f   : > { %1004 = vperm.xlu1 %1605, %v846_v31  }
  0x60   : > { %999 = vperm.xlu0 %1604, %v845_v33  }
  0x62   : > { %1531 = vmatmul.msk.bf16.gmra.mxu1 %vm524_vm0, %v1409_v32 }
  0x63   : > { %1540 = vmatmul.msk.bf16.gmra.mxu3 %vm524_vm0, %v1481_v41 }
  0x6c   : > { %601 = vmatmul.bf16.gmra.mxu0 %v1397_v42  ;;  %641 = vmatmul.bf16.gmra.mxu2 %v1461_v43  ;;  %v1813_v12 = vpop.permute.xlu2 %869 }
  0x72   : > { %1532 = vmatmul.msk.bf16.gmra.mxu1 %vm524_vm0, %v1417_v46 }
  0x73   : > { %1541 = vmatmul.msk.bf16.gmra.mxu3 %vm524_vm0, %v1489_v53 }
  0x74   : > { %v1819_v19 = vpop.permute.xlu2 %874 }
  0x7c   : > { %606 = vmatmul.bf16.gmra.mxu0 %v1405_v54  ;;  %646 = vmatmul.bf16.gmra.mxu2 %v1469_v55  ;;  %v1837_v29 = vpop.permute.xlu2 %889 }
  0x81   : > { %v1806_v4 = vpop.permute.xlu1 %859 }
  0x82   : > { %1533 = vmatmul.msk.bf16.gmra.mxu1 %vm524_vm0, %v1425_v58  ;;  %v850_v63 = vpop.permute.xlu0 %849 }
  0x84   : > { %v1853_v45 = vpop.permute.xlu2 %904 }
  0x89   : > { %v1815_v15 = vpop.permute.xlu1 %864 }
  0x8a   : > { %v855_v7 = vpop.permute.xlu0 %854 }
  0x8c   : > { %611 = vmatmul.bf16.gmra.mxu0 %v1413_v0  ;;  %651 = vmatmul.bf16.gmra.mxu2 %v1477_v1  ;;  %v769_v1 = vld [vmem:[%s1829_s25 + $0x90] sm:$0xff] }
  0x8f   : > { %v671_v6 = vpop.f32.mrf.mxu1 }
  0x91   : > { %v1821_v20 = vpop.permute.xlu1 %884 }
  0x92   : > { %1534 = vmatmul.msk.bf16.gmra.mxu1 %vm524_vm0, %v1433_v5  ;;  %v1817_v17 = vpop.permute.xlu0 %879  ;;  %v754_v5 = vld [vmem:[%s1829_s25 + $0x18] sm:$0xff] }
  0x96   : > { %v716_v22 = vpop.f32.mrf.mxu3 }
  0x97   : > { %v673_v16 = vpop.f32.mrf.mxu1 }
  0x99   : > { %v1839_v30 = vpop.permute.xlu1 %899 }
  0x9a   : > { %v1823_v21 = vpop.permute.xlu0 %894 }
  0x9c   : > { %616 = vmatmul.bf16.gmra.mxu0 %v1421_v13  ;;  %656 = vmatmul.bf16.gmra.mxu2 %v1485_v14 }
  0x9e   : > { %v718_v37 = vpop.f32.mrf.mxu3 }
  0x9f   : > { %v676_v18 = vpop.f32.mrf.mxu1 }
  0xa1   : > { %v1855_v47 = vpop.permute.xlu1 %914 }
  0xa2   : > { %v1842_v33 = vpop.permute.xlu0 %909 }
  0xa6   : > { %v1867_v56 = vpop.f32.mrf.mxu3 }
  0xa7   : > { %v678_v26 = vpop.f32.mrf.mxu1 }
  0xa9   : > { %v582_v23 = vpop.f32.mrf.mxu0 }
  0xaa   : > { %v672_v25 = vadd.f32 %v671_v6, %v582_v23  ;;  %v1863_v53 = vpop.permute.xlu0 %924  ;;  %v1877_v6 = vpop.permute.xlu1 %929 }
  0xac   : > { %v783_v27 = vmul.f32 %v751_v24, %v672_v25 }
  0xae   : > { %v1007_v31 = vadd.f32 %v850_v63, %v783_v27  ;;  %v1871_v63 = vpop.permute.xlu2 %919 }
  0xaf   : > { %v1844_v34 = vpop.f32.mrf.mxu2  ;;  %v681_v40 = vpop.f32.mrf.mxu1 }
  0xb0   : > { %v1043_v32 = vadd.f32 %v1835_v28, %v1007_v31 }
  0xb1   : > { %v584_v35 = vpop.f32.mrf.mxu0 }
  0xb2   : > { %vm1075_vm1 = vcmp.ge.f32.partialorder %v1043_v32, 0.0  ;;  %v1107_v38 = vmul.f32 0.2, %v1043_v32  ;;  %v674_v39 = vadd.f32 %v673_v16, %v584_v35  ;;  %v940_v11 = vpop.permute.xlu0 %939 }
  0xb4   : > { %v1139_v41 = vsel %vm1075_vm1, %v1043_v32, %v1107_v38  ;;  %v784_v42 = vmul.f32 %v752_v36, %v674_v39  ;;  %v755_v36 = vld [vmem:[%s1829_s25 + $0x20] sm:$0xff] }
  0xb5   : > { %v1171_v43 = vmul.f32 1.4142135, %v1139_v41 }
  0xb6   : > { %v1008_v44 = vadd.f32 %v855_v7, %v784_v42  ;;  %v1890_v39 = vpop.permute.xlu2 %934 }
  0xb7   : > { %v1203_v46 = vpack.c.bf16 %v1171_v43, %v1171_v43  ;;  %v1858_v49 = vpop.f32.mrf.mxu2  ;;  %v1865_v55 = vpop.f32.mrf.mxu1 }
  0xb8   : > { %v1044_v48 = vadd.f32 %v1835_v28, %v1008_v44  ;;  %v945_v44 = vpop.permute.xlu1 %944 }
  0xb9   : > { %1236 = vst.msk [vmem:[%s1851_s6] sm:$0xf] %vm1235_vm2, %v1203_v46  ;;  %v587_v50 = vpop.f32.mrf.mxu0 }
  0xba   : > { %vm1076_vm3 = vcmp.ge.f32.partialorder %v1044_v48, 0.0  ;;  %v1108_v52 = vmul.f32 0.2, %v1044_v48  ;;  %v677_v54 = vadd.f32 %v676_v18, %v587_v50  ;;  %v1881_v18 = vpop.f32.mrf.mxu3 }
  0xbc   : > { %v1140_v57 = vsel %vm1076_vm3, %v1044_v48, %v1108_v52  ;;  %v785_v58 = vmul.f32 %v753_v51, %v677_v54 }
  0xbd   : > { %v1172_v59 = vmul.f32 1.4142135, %v1140_v57 }
  0xbe   : > { %v1009_v60 = vadd.f32 %v1806_v4, %v785_v58 }
  0xbf   : > { %v1204_v61 = vpack.c.bf16 %v1172_v59, %v1172_v59  ;;  %v627_v0 = vpop.f32.mrf.mxu2  ;;  %v1879_v4 = vpop.f32.mrf.mxu1 }
  0xc0   : > { %v1045_v62 = vadd.f32 %v1835_v28, %v1009_v60  ;;  %v717_v2 = vadd.f32 %v716_v22, %v627_v0 }
  0xc1   : > { %1237 = vst.msk [vmem:[%s1851_s6 + $0x4] sm:$0xf] %vm1235_vm2, %v1204_v61  ;;  %v589_v3 = vpop.f32.mrf.mxu0  ;;  %v771_v61 = vld [vmem:[%s1829_s25 + $0xa0] sm:$0xff] }
  0xc2   : > { %vm1077_vm4 = vcmp.ge.f32.partialorder %v1045_v62, 0.0  ;;  %v1109_v7 = vmul.f32 0.2, %v1045_v62  ;;  %v679_v8 = vadd.f32 %v678_v26, %v589_v3  ;;  %v801_v9 = vmul.f32 %v769_v1, %v717_v2  ;;  %v770_v26 = vld [vmem:[%s1829_s25 + $0x98] sm:$0xff]  ;;  %v756_v2 = vld [vmem:[%s1829_s25 + $0x28] sm:$0xff] }
  0xc4   : > { %v1141_v10 = vsel %vm1077_vm4, %v1045_v62, %v1109_v7  ;;  %v786_v13 = vmul.f32 %v754_v5, %v679_v8  ;;  %v1025_v16 = vadd.f32 %v940_v11, %v801_v9  ;;  %v950_v11 = vpop.permute.xlu2 %949 }
  0xc5   : > { %v1173_v14 = vmul.f32 1.4142135, %v1141_v10 }
  0xc6   : > { %v1010_v22 = vadd.f32 %v1815_v15, %v786_v13  ;;  %v1061_v24 = vadd.f32 %v1835_v28, %v1025_v16 }
  0xc7   : > { %v1205_v23 = vpack.c.bf16 %v1173_v14, %v1173_v14  ;;  %v629_v27 = vpop.f32.mrf.mxu2  ;;  %v1892_v41 = vpop.f32.mrf.mxu1 }
  0xc8   : > { %v1046_v25 = vadd.f32 %v1835_v28, %v1010_v22  ;;  %vm1093_vm5 = vcmp.ge.f32.partialorder %v1061_v24, 0.0  ;;  %v1125_v31 = vmul.f32 0.2, %v1061_v24  ;;  %v719_v32 = vadd.f32 %v718_v37, %v629_v27  ;;  %v772_v27 = vld [vmem:[%s1829_s25 + $0xa8] sm:$0xff] }
  0xc9   : > { %1238 = vst.msk [vmem:[%s1851_s6 + $0x8] sm:$0xf] %vm1235_vm2, %v1205_v23  ;;  %v592_v35 = vpop.f32.mrf.mxu0 }
  0xca   : > { %vm1078_vm6 = vcmp.ge.f32.partialorder %v1046_v25, 0.0  ;;  %v1110_v38 = vmul.f32 0.2, %v1046_v25  ;;  %v682_v15 = vadd.f32 %v681_v40, %v592_v35  ;;  %v1157_v42 = vsel %vm1093_vm5, %v1061_v24, %v1125_v31  ;;  %v726_v40 = vpop.f32.mrf.mxu3  ;;  %v757_v35 = vld [vmem:[%s1829_s25 + $0x30] sm:$0xff] }
  0xcb   : > { %v802_v43 = vmul.f32 %v770_v26, %v719_v32  ;;  %v1189_v46 = vmul.f32 1.4142135, %v1157_v42 }
  0xcc   : > { %v1142_v48 = vsel %vm1078_vm6, %v1046_v25, %v1110_v38  ;;  %v787_v50 = vmul.f32 %v755_v36, %v682_v15 }
  0xcd   : > { %v1174_v51 = vmul.f32 1.4142135, %v1142_v48  ;;  %v1026_v37 = vadd.f32 %v945_v44, %v802_v43  ;;  %v1221_v52 = vpack.c.bf16 %v1189_v46, %v1189_v46  ;;  %v955_v44 = vpop.permute.xlu0 %954 }
  0xce   : > { %v1011_v54 = vadd.f32 %v1813_v12, %v787_v50 }
  0xcf   : > { %v1206_v57 = vpack.c.bf16 %v1174_v51, %v1174_v51  ;;  %v1062_v58 = vadd.f32 %v1835_v28, %v1026_v37  ;;  %1254 = vst.msk [vmem:[%s1851_s6 + $0x48] sm:$0xf] %vm1235_vm2, %v1221_v52  ;;  %v632_v60 = vpop.f32.mrf.mxu2  ;;  %v1905_v5 = vpop.f32.mrf.mxu1 }
  0xd0   : > { %v1047_v59 = vadd.f32 %v1835_v28, %v1011_v54  ;;  %v722_v0 = vadd.f32 %v1867_v56, %v632_v60 }
  0xd1   : > { %1239 = vst.msk [vmem:[%s1851_s6 + $0xc] sm:$0xf] %vm1235_vm2, %v1206_v57  ;;  %vm1094_vm7 = vcmp.ge.f32.partialorder %v1062_v58, 0.0  ;;  %v1126_v62 = vmul.f32 0.2, %v1062_v58  ;;  %v594_v1 = vpop.f32.mrf.mxu0 }
  0xd2   : > { %vm1079_vm8 = vcmp.ge.f32.partialorder %v1047_v59, 0.0  ;;  %v1111_v12 = vmul.f32 0.2, %v1047_v59  ;;  %v684_v3 = vadd.f32 %v1865_v55, %v594_v1  ;;  %v803_v8 = vmul.f32 %v771_v61, %v722_v0  ;;  %v728_v36 = vpop.f32.mrf.mxu3  ;;  %v758_v0 = vld [vmem:[%s1829_s25 + $0x38] sm:$0xff] }
  0xd3   : > { %v1158_v7 = vsel %vm1094_vm7, %v1062_v58, %v1126_v62 }
  0xd4   : > { %v1190_v9 = vmul.f32 1.4142135, %v1158_v7  ;;  %v1143_v10 = vsel %vm1079_vm8, %v1047_v59, %v1111_v12  ;;  %v788_v13 = vmul.f32 %v756_v2, %v684_v3  ;;  %v1027_v56 = vadd.f32 %v950_v11, %v803_v8  ;;  %v773_v59 = vld [vmem:[%s1829_s25 + $0xb0] sm:$0xff]  ;;  %v960_v8 = vpop.permute.xlu1 %959 }
  0xd5   : > { %v1175_v14 = vmul.f32 1.4142135, %v1143_v10 }
  0xd6   : > { %v1222_v16 = vpack.c.bf16 %v1190_v9, %v1190_v9  ;;  %v1012_v22 = vadd.f32 %v1819_v19, %v788_v13  ;;  %v1063_v24 = vadd.f32 %v1835_v28, %v1027_v56 }
  0xd7   : > { %v1207_v23 = vpack.c.bf16 %v1175_v14, %v1175_v14  ;;  %v634_v25 = vpop.f32.mrf.mxu2  ;;  %v1918_v15 = vpop.f32.mrf.mxu1 }
  0xd8   : > { %1255 = vst.msk [vmem:[%s1851_s6 + $0x4c] sm:$0xf] %vm1235_vm2, %v1222_v16  ;;  %v1048_v55 = vadd.f32 %v1835_v28, %v1012_v22  ;;  %vm1095_vm9 = vcmp.ge.f32.partialorder %v1063_v24, 0.0  ;;  %v1127_v26 = vmul.f32 0.2, %v1063_v24  ;;  %v724_v31 = vadd.f32 %v1881_v18, %v634_v25 }
  0xd9   : > { %1240 = vst.msk [vmem:[%s1851_s6 + $0x10] sm:$0xf] %vm1235_vm2, %v1207_v23  ;;  %v597_v32 = vpop.f32.mrf.mxu0 }
  0xda   : > { %vm1080_vm10 = vcmp.ge.f32.partialorder %v1048_v55, 0.0  ;;  %v1112_v19 = vmul.f32 0.2, %v1048_v55  ;;  %v687_v38 = vadd.f32 %v1879_v4, %v597_v32  ;;  %v1159_v42 = vsel %vm1095_vm9, %v1063_v24, %v1127_v26  ;;  %v731_v7 = vpop.f32.mrf.mxu3  ;;  %v774_v24 = vld [vmem:[%s1829_s25 + $0xb8] sm:$0xff]  ;;  %v759_v26 = vld [vmem:[%s1829_s25 + $0x40] sm:$0xff] }
  0xdb   : > { %v804_v43 = vmul.f32 %v772_v27, %v724_v31  ;;  %v1191_v46 = vmul.f32 1.4142135, %v1159_v42 }
  0xdc   : > { %v1144_v48 = vsel %vm1080_vm10, %v1048_v55, %v1112_v19  ;;  %v789_v50 = vmul.f32 %v757_v35, %v687_v38  ;;  %v965_v38 = vpop.permute.xlu2 %964 }
  0xdd   : > { %v1176_v18 = vmul.f32 1.4142135, %v1144_v48  ;;  %v1028_v51 = vadd.f32 %v955_v44, %v804_v43  ;;  %v1223_v37 = vpack.c.bf16 %v1191_v46, %v1191_v46 }
  0xde   : > { %v1013_v52 = vadd.f32 %v1817_v17, %v789_v50 }
  0xdf   : > { %v1208_v54 = vpack.c.bf16 %v1176_v18, %v1176_v18  ;;  %v1064_v57 = vadd.f32 %v1835_v28, %v1028_v51  ;;  %1256 = vst.msk [vmem:[%s1851_s6 + $0x50] sm:$0xf] %vm1235_vm2, %v1223_v37  ;;  %v637_v58 = vpop.f32.mrf.mxu2  ;;  %v1930_v2 = vpop.f32.mrf.mxu1 }
  0xe0   : > { %v1049_v4 = vadd.f32 %v1835_v28, %v1013_v52  ;;  %v727_v61 = vadd.f32 %v726_v40, %v637_v58 }
  0xe1   : > { %1241 = vst.msk [vmem:[%s1851_s6 + $0x14] sm:$0xf] %vm1235_vm2, %v1208_v54  ;;  %vm1096_vm11 = vcmp.ge.f32.partialorder %v1064_v57, 0.0  ;;  %v1128_v60 = vmul.f32 0.2, %v1064_v57  ;;  %v599_v62 = vpop.f32.mrf.mxu0  ;;  %v775_v54 = vld [vmem:[%s1829_s25 + $0xc0] sm:$0xff] }
  0xe2   : > { %vm1081_vm12 = vcmp.ge.f32.partialorder %v1049_v4, 0.0  ;;  %v1113_v1 = vmul.f32 0.2, %v1049_v4  ;;  %v689_v17 = vadd.f32 %v1892_v41, %v599_v62  ;;  %v805_v3 = vmul.f32 %v773_v59, %v727_v61  ;;  %v733_v48 = vpop.f32.mrf.mxu3  ;;  %v760_v59 = vld [vmem:[%s1829_s25 + $0x48] sm:$0xff] }
  0xe3   : > { %v1160_v12 = vsel %vm1096_vm11, %v1064_v57, %v1128_v60 }
  0xe4   : > { %v1192_v9 = vmul.f32 1.4142135, %v1160_v12  ;;  %v1145_v10 = vsel %vm1081_vm12, %v1049_v4, %v1113_v1  ;;  %v790_v11 = vmul.f32 %v758_v0, %v689_v17  ;;  %v1029_v13 = vadd.f32 %v960_v8, %v805_v3  ;;  %v970_v1 = vpop.permute.xlu0 %969 }
  0xe5   : > { %v1177_v40 = vmul.f32 1.4142135, %v1145_v10 }
  0xe6   : > { %v1224_v14 = vpack.c.bf16 %v1192_v9, %v1192_v9  ;;  %v1014_v56 = vadd.f32 %v1821_v20, %v790_v11  ;;  %v1065_v41 = vadd.f32 %v1835_v28, %v1029_v13 }
  0xe7   : > { %v1209_v16 = vpack.c.bf16 %v1177_v40, %v1177_v40  ;;  %v639_v23 = vpop.f32.mrf.mxu2  ;;  %v1942_v32 = vpop.f32.mrf.mxu1 }
  0xe8   : > { %1257 = vst.msk [vmem:[%s1851_s6 + $0x54] sm:$0xf] %vm1235_vm2, %v1224_v14  ;;  %v1050_v22 = vadd.f32 %v1835_v28, %v1014_v56  ;;  %vm1097_vm13 = vcmp.ge.f32.partialorder %v1065_v41, 0.0  ;;  %v1129_v55 = vmul.f32 0.2, %v1065_v41  ;;  %v729_v25 = vadd.f32 %v728_v36, %v639_v23  ;;  %v776_v56 = vld [vmem:[%s1829_s25 + $0xc8] sm:$0xff] }
  0xe9   : > { %1242 = vst.msk [vmem:[%s1851_s6 + $0x18] sm:$0xf] %vm1235_vm2, %v1209_v16  ;;  %v602_v27 = vpop.f32.mrf.mxu0  ;;  %v761_v23 = vld [vmem:[%s1829_s25 + $0x50] sm:$0xff] }
  0xea   : > { %vm1082_vm14 = vcmp.ge.f32.partialorder %v1050_v22, 0.0  ;;  %v1114_v31 = vmul.f32 0.2, %v1050_v22  ;;  %v692_v20 = vadd.f32 %v1905_v5, %v602_v27  ;;  %v1161_v35 = vsel %vm1097_vm13, %v1065_v41, %v1129_v55 }
  0xeb   : > { %v806_v19 = vmul.f32 %v774_v24, %v729_v25  ;;  %v1193_v42 = vmul.f32 1.4142135, %v1161_v35 }
  0xec   : > { %v1146_v43 = vsel %vm1082_vm14, %v1050_v22, %v1114_v31  ;;  %v791_v44 = vmul.f32 %v759_v26, %v692_v20  ;;  %v975_v26 = vpop.permute.xlu1 %974 }
  0xed   : > { %v1178_v46 = vmul.f32 1.4142135, %v1146_v43  ;;  %v1030_v36 = vadd.f32 %v965_v38, %v806_v19  ;;  %v1225_v50 = vpack.c.bf16 %v1193_v42, %v1193_v42 }
  0xee   : > { %v1015_v18 = vadd.f32 %v1837_v29, %v791_v44 }
  0xef   : > { %v1210_v51 = vpack.c.bf16 %v1178_v46, %v1178_v46  ;;  %v1066_v5 = vadd.f32 %v1835_v28, %v1030_v36  ;;  %1258 = vst.msk [vmem:[%s1851_s6 + $0x58] sm:$0xf] %vm1235_vm2, %v1225_v50  ;;  %v642_v52 = vpop.f32.mrf.mxu2  ;;  %v1954_v61 = vpop.f32.mrf.mxu1 }
  0xf0   : > { %v1051_v37 = vadd.f32 %v1835_v28, %v1015_v18  ;;  %v732_v4 = vadd.f32 %v731_v7, %v642_v52 }
  0xf1   : > { %1243 = vst.msk [vmem:[%s1851_s6 + $0x1c] sm:$0xf] %vm1235_vm2, %v1210_v51  ;;  %vm1098_vm15 = vcmp.ge.f32.partialorder %v1066_v5, 0.0  ;;  %v1130_v57 = vmul.f32 0.2, %v1066_v5  ;;  %v604_v58 = vpop.f32.mrf.mxu0 }
  0xf2   : > { %vm1083_vm0 = vcmp.ge.f32.partialorder %v1051_v37, 0.0  ;;  %v1115_v60 = vmul.f32 0.2, %v1051_v37  ;;  %v694_v29 = vadd.f32 %v1918_v15, %v604_v58  ;;  %v807_v0 = vmul.f32 %v775_v54, %v732_v4  ;;  %v736_v15 = vpop.f32.mrf.mxu3  ;;  %v980_v58 = vpop.permute.xlu2 %979 }
  0xf3   : > { %v1162_v62 = vsel %vm1098_vm15, %v1066_v5, %v1130_v57 }
  0xf4   : > { %v1194_v17 = vmul.f32 1.4142135, %v1162_v62  ;;  %v1147_v12 = vsel %vm1083_vm0, %v1051_v37, %v1115_v60  ;;  %v792_v3 = vmul.f32 %v760_v59, %v694_v29  ;;  %v1031_v7 = vadd.f32 %v970_v1, %v807_v0  ;;  %v762_v37 = vld [vmem:[%s1829_s25 + $0x58] sm:$0xff] }
  0xf5   : > { %v1179_v8 = vmul.f32 1.4142135, %v1147_v12 }
  0xf6   : > { %v1226_v9 = vpack.c.bf16 %v1194_v17, %v1194_v17  ;;  %v1016_v10 = vadd.f32 %v1823_v21, %v792_v3  ;;  %v1067_v40 = vadd.f32 %v1835_v28, %v1031_v7  ;;  %v778_v7 = vld [vmem:[%s1829_s25 + $0xd8] sm:$0xff] }
  0xf7   : > { %v1211_v11 = vpack.c.bf16 %v1179_v8, %v1179_v8  ;;  %v644_v14 = vpop.f32.mrf.mxu2  ;;  %v1966_v55 = vpop.f32.mrf.mxu1 }
  0xf8   : > { %1259 = vst.msk [vmem:[%s1851_s6 + $0x5c] sm:$0xf] %vm1235_vm2, %v1226_v9  ;;  %v1052_v13 = vadd.f32 %v1835_v28, %v1016_v10  ;;  %vm1099_vm1 = vcmp.ge.f32.partialorder %v1067_v40, 0.0  ;;  %v1131_v16 = vmul.f32 0.2, %v1067_v40  ;;  %v734_v41 = vadd.f32 %v733_v48, %v644_v14  ;;  %v777_v48 = vld [vmem:[%s1829_s25 + $0xd0] sm:$0xff] }
  0xf9   : > { %1244 = vst.msk [vmem:[%s1851_s6 + $0x20] sm:$0xf] %vm1235_vm2, %v1211_v11  ;;  %v607_v22 = vpop.f32.mrf.mxu0 }
  0xfa   : > { %vm1084_vm3 = vcmp.ge.f32.partialorder %v1052_v13, 0.0  ;;  %v1116_v21 = vmul.f32 0.2, %v1052_v13  ;;  %v697_v24 = vadd.f32 %v1930_v2, %v607_v22  ;;  %v1163_v25 = vsel %vm1099_vm1, %v1067_v40, %v1131_v16  ;;  %v738_v51 = vpop.f32.mrf.mxu3  ;;  %v763_v40 = vld [vmem:[%s1829_s25 + $0x60] sm:$0xff] }
  0xfb   : > { %v808_v27 = vmul.f32 %v776_v56, %v734_v41  ;;  %v1195_v31 = vmul.f32 1.4142135, %v1163_v25  ;;  %v985_v41 = vpop.permute.xlu0 %984 }
  0xfc   : > { %v1148_v20 = vsel %vm1084_vm3, %v1052_v13, %v1116_v21  ;;  %v793_v35 = vmul.f32 %v761_v23, %v697_v24 }
  0xfd   : > { %v1180_v19 = vmul.f32 1.4142135, %v1148_v20  ;;  %v1032_v38 = vadd.f32 %v975_v26, %v808_v27  ;;  %v1227_v42 = vpack.c.bf16 %v1195_v31, %v1195_v31 }
  0xfe   : > { %v1017_v43 = vadd.f32 %v1839_v30, %v793_v35 }
  0xff   : > { %v1212_v44 = vpack.c.bf16 %v1180_v19, %v1180_v19  ;;  %v1068_v46 = vadd.f32 %v1835_v28, %v1032_v38  ;;  %1260 = vst.msk [vmem:[%s1851_s6 + $0x60] sm:$0xf] %vm1235_vm2, %v1227_v42  ;;  %v647_v36 = vpop.f32.mrf.mxu2  ;;  %v1978_v54 = vpop.f32.mrf.mxu1  ;;  %v779_v19 = vld [vmem:[%s1829_s25 + $0xe0] sm:$0xff] }
 0x100   : > { %v1053_v2 = vadd.f32 %v1835_v28, %v1017_v43  ;;  %v737_v18 = vadd.f32 %v736_v15, %v647_v36  ;;  %v767_v36 = vld [vmem:[%s1829_s25 + $0x80] sm:$0xff] }
 0x101   : > { %1245 = vst.msk [vmem:[%s1851_s6 + $0x24] sm:$0xf] %vm1235_vm2, %v1212_v44  ;;  %vm1100_vm4 = vcmp.ge.f32.partialorder %v1068_v46, 0.0  ;;  %v1132_v50 = vmul.f32 0.2, %v1068_v46  ;;  %v609_v5 = vpop.f32.mrf.mxu0  ;;  %v764_v44 = vld [vmem:[%s1829_s25 + $0x68] sm:$0xff] }
 0x102   : > { %vm1085_vm5 = vcmp.ge.f32.partialorder %v1053_v2, 0.0  ;;  %v1117_v30 = vmul.f32 0.2, %v1053_v2  ;;  %v699_v52 = vadd.f32 %v1942_v32, %v609_v5  ;;  %v809_v4 = vmul.f32 %v777_v48, %v737_v18  ;;  %v741_v16 = vpop.f32.mrf.mxu3 }
 0x103   : > { %v1164_v57 = vsel %vm1100_vm4, %v1068_v46, %v1132_v50 }
 0x104   : > { %v1196_v59 = vmul.f32 1.4142135, %v1164_v57  ;;  %v1149_v60 = vsel %vm1085_vm5, %v1053_v2, %v1117_v30  ;;  %v794_v29 = vmul.f32 %v762_v37, %v699_v52  ;;  %v1033_v0 = vadd.f32 %v980_v58, %v809_v4 }
 0x105   : > { %v1181_v62 = vmul.f32 1.4142135, %v1149_v60 }
 0x106   : > { %v1228_v1 = vpack.c.bf16 %v1196_v59, %v1196_v59  ;;  %v1018_v17 = vadd.f32 %v1853_v45, %v794_v29  ;;  %v1069_v3 = vadd.f32 %v1835_v28, %v1033_v0 }
 0x107   : > { %v1213_v12 = vpack.c.bf16 %v1181_v62, %v1181_v62  ;;  %v649_v8 = vpop.f32.mrf.mxu2  ;;  %v1990_v13 = vpop.f32.mrf.mxu1 }
 0x108   : > { %1261 = vst.msk [vmem:[%s1851_s6 + $0x64] sm:$0xf] %vm1235_vm2, %v1228_v1  ;;  %v1054_v32 = vadd.f32 %v1835_v28, %v1018_v17  ;;  %vm1101_vm6 = vcmp.ge.f32.partialorder %v1069_v3, 0.0  ;;  %v1133_v9 = vmul.f32 0.2, %v1069_v3  ;;  %v739_v10 = vadd.f32 %v738_v51, %v649_v8  ;;  %v990_v51 = vpop.permute.xlu1 %989  ;;  %v780_v1 = vld [vmem:[%s1829_s25 + $0xe8] sm:$0xff] }
 0x109   : > { %1246 = vst.msk [vmem:[%s1851_s6 + $0x28] sm:$0xf] %vm1235_vm2, %v1213_v12  ;;  %v612_v11 = vpop.f32.mrf.mxu0 }
 0x10a   : > { %vm1086_vm7 = vcmp.ge.f32.partialorder %v1054_v32, 0.0  ;;  %v1118_v15 = vmul.f32 0.2, %v1054_v32  ;;  %v702_v45 = vadd.f32 %v1954_v61, %v612_v11  ;;  %v1165_v14 = vsel %vm1101_vm6, %v1069_v3, %v1133_v9  ;;  %v743_v4 = vpop.f32.mrf.mxu3 }
 0x10b   : > { %v810_v56 = vmul.f32 %v778_v7, %v739_v10  ;;  %v1197_v22 = vmul.f32 1.4142135, %v1165_v14 }
 0x10c   : > { %v1150_v23 = vsel %vm1086_vm7, %v1054_v32, %v1118_v15  ;;  %v795_v21 = vmul.f32 %v763_v40, %v702_v45  ;;  %v765_v32 = vld [vmem:[%s1829_s25 + $0x70] sm:$0xff]  ;;  %v768_v40 = vld [vmem:[%s1829_s25 + $0x88] sm:$0xff]  ;;  %v995_v15 = vpop.permute.xlu2 %994 }
 0x10d   : > { %v1182_v24 = vmul.f32 1.4142135, %v1150_v23  ;;  %v1034_v25 = vadd.f32 %v985_v41, %v810_v56  ;;  %v1229_v27 = vpack.c.bf16 %v1197_v22, %v1197_v22 }
 0x10e   : > { %v1019_v26 = vadd.f32 %v1842_v33, %v795_v21 }
 0x10f   : > { %v1214_v31 = vpack.c.bf16 %v1182_v24, %v1182_v24  ;;  %v1070_v61 = vadd.f32 %v1835_v28, %v1034_v25  ;;  %1262 = vst.msk [vmem:[%s1851_s6 + $0x68] sm:$0xf] %vm1235_vm2, %v1229_v27  ;;  %v652_v35 = vpop.f32.mrf.mxu2  ;;  %v711_v2 = vpop.f32.mrf.mxu1 }
 0x110   : > { %v1055_v20 = vadd.f32 %v1835_v28, %v1019_v26  ;;  %v742_v42 = vadd.f32 %v741_v16, %v652_v35  ;;  %v712_v18 = vadd.f32 %v711_v2, %v1844_v34 }
 0x111   : > { %1247 = vst.msk [vmem:[%s1851_s6 + $0x2c] sm:$0xf] %vm1235_vm2, %v1214_v31  ;;  %vm1102_vm8 = vcmp.ge.f32.partialorder %v1070_v61, 0.0  ;;  %v1134_v38 = vmul.f32 0.2, %v1070_v61  ;;  %v614_v43 = vpop.f32.mrf.mxu0 }
 0x112   : > { %vm1087_vm9 = vcmp.ge.f32.partialorder %v1055_v20, 0.0  ;;  %v1119_v46 = vmul.f32 0.2, %v1055_v20  ;;  %v704_v33 = vadd.f32 %v1966_v55, %v614_v43  ;;  %v811_v50 = vmul.f32 %v779_v19, %v742_v42  ;;  %v746_v31 = vpop.f32.mrf.mxu3  ;;  %v781_v19 = vld [vmem:[%s1829_s25 + $0xf0] sm:$0xff] }
 0x113   : > { %v1166_v48 = vsel %vm1102_vm8, %v1070_v61, %v1134_v38  ;;  %v799_v58 = vmul.f32 %v767_v36, %v712_v18  ;;  %v1000_v36 = vpop.permute.xlu0 %999 }
 0x114   : > { %v1198_v5 = vmul.f32 1.4142135, %v1166_v48  ;;  %v1151_v37 = vsel %vm1087_vm9, %v1055_v20, %v1119_v46  ;;  %v796_v30 = vmul.f32 %v764_v44, %v704_v33  ;;  %v1035_v57 = vadd.f32 %v990_v51, %v811_v50  ;;  %v766_v33 = vld [vmem:[%s1829_s25 + $0x78] sm:$0xff] }
 0x115   : > { %v1183_v52 = vmul.f32 1.4142135, %v1151_v37  ;;  %v1023_v62 = vadd.f32 %v1877_v6, %v799_v58 }
 0x116   : > { %v1230_v59 = vpack.c.bf16 %v1198_v5, %v1198_v5  ;;  %v1020_v55 = vadd.f32 %v1855_v47, %v796_v30  ;;  %v1071_v29 = vadd.f32 %v1835_v28, %v1035_v57 }
 0x117   : > { %v1215_v60 = vpack.c.bf16 %v1183_v52, %v1183_v52  ;;  %v654_v0 = vpop.f32.mrf.mxu2  ;;  %v1059_v12 = vadd.f32 %v1835_v28, %v1023_v62  ;;  %v713_v7 = vpop.f32.mrf.mxu1 }
 0x118   : > { %1263 = vst.msk [vmem:[%s1851_s6 + $0x6c] sm:$0xf] %vm1235_vm2, %v1230_v59  ;;  %v1056_v34 = vadd.f32 %v1835_v28, %v1020_v55  ;;  %vm1103_vm10 = vcmp.ge.f32.partialorder %v1071_v29, 0.0  ;;  %v1135_v17 = vmul.f32 0.2, %v1071_v29  ;;  %v744_v3 = vadd.f32 %v743_v4, %v654_v0 }
 0x119   : > { %1248 = vst.msk [vmem:[%s1851_s6 + $0x30] sm:$0xf] %vm1235_vm2, %v1215_v60  ;;  %v617_v47 = vpop.f32.mrf.mxu0  ;;  %vm1091_vm12 = vcmp.ge.f32.partialorder %v1059_v12, 0.0  ;;  %v1123_v10 = vmul.f32 0.2, %v1059_v12  ;;  %v714_v16 = vadd.f32 %v713_v7, %v1858_v49 }
 0x11a   : > { %vm1088_vm11 = vcmp.ge.f32.partialorder %v1056_v34, 0.0  ;;  %v1120_v8 = vmul.f32 0.2, %v1056_v34  ;;  %v707_v6 = vadd.f32 %v1978_v54, %v617_v47  ;;  %v1167_v9 = vsel %vm1103_vm10, %v1071_v29, %v1135_v17  ;;  %v748_v29 = vpop.f32.mrf.mxu3 }
 0x11b   : > { %v812_v11 = vmul.f32 %v780_v1, %v744_v3  ;;  %v1199_v45 = vmul.f32 1.4142135, %v1167_v9  ;;  %v1155_v22 = vsel %vm1091_vm12, %v1059_v12, %v1123_v10  ;;  %v800_v25 = vmul.f32 %v768_v40, %v714_v16  ;;  %v1005_v3 = vpop.permute.xlu1 %1004 }
 0x11c   : > { %v1152_v14 = vsel %vm1088_vm11, %v1056_v34, %v1120_v8  ;;  %v797_v56 = vmul.f32 %v765_v32, %v707_v6  ;;  %v1187_v54 = vmul.f32 1.4142135, %v1155_v22  ;;  %v782_v34 = vld [vmem:[%s1829_s25 + $0xf8] sm:$0xff] }
 0x11d   : > { %v1184_v41 = vmul.f32 1.4142135, %v1152_v14  ;;  %v1036_v23 = vadd.f32 %v995_v15, %v812_v11  ;;  %v1231_v21 = vpack.c.bf16 %v1199_v45, %v1199_v45  ;;  %v1024_v20 = vadd.f32 %v1890_v39, %v800_v25 }
 0x11e   : > { %v1021_v24 = vadd.f32 %v1871_v63, %v797_v56  ;;  %v1219_v61 = vpack.c.bf16 %v1187_v54, %v1187_v54 }
 0x11f   : > { %v1216_v27 = vpack.c.bf16 %v1184_v41, %v1184_v41  ;;  %v1072_v26 = vadd.f32 %v1835_v28, %v1036_v23  ;;  %1264 = vst.msk [vmem:[%s1851_s6 + $0x70] sm:$0xf] %vm1235_vm2, %v1231_v21  ;;  %v657_v35 = vpop.f32.mrf.mxu2  ;;  %v1060_v44 = vadd.f32 %v1835_v28, %v1024_v20 }
 0x120   : > { %v1057_v49 = vadd.f32 %v1835_v28, %v1021_v24  ;;  %v747_v38 = vadd.f32 %v746_v31, %v657_v35  ;;  %1252 = vst.msk [vmem:[%s1851_s6 + $0x40] sm:$0xf] %vm1235_vm2, %v1219_v61 }
 0x121   : > { %1249 = vst.msk [vmem:[%s1851_s6 + $0x34] sm:$0xf] %vm1235_vm2, %v1216_v27  ;;  %vm1104_vm13 = vcmp.ge.f32.partialorder %v1072_v26, 0.0  ;;  %v1136_v63 = vmul.f32 0.2, %v1072_v26  ;;  %v619_v42 = vpop.f32.mrf.mxu0  ;;  %vm1092_vm15 = vcmp.ge.f32.partialorder %v1060_v44, 0.0 }
 0x122   : > { %vm1089_vm14 = vcmp.ge.f32.partialorder %v1057_v49, 0.0  ;;  %v1121_v43 = vmul.f32 0.2, %v1057_v49  ;;  %v709_v46 = vadd.f32 %v1990_v13, %v619_v42  ;;  %v813_v39 = vmul.f32 %v781_v19, %v747_v38 }
 0x123   : > { %v1168_v2 = vsel %vm1104_vm13, %v1072_v26, %v1136_v63  ;;  %v1124_v18 = vmul.f32 0.2, %v1060_v44 }
 0x124   : > { %v1200_v48 = vmul.f32 1.4142135, %v1168_v2  ;;  %v1153_v50 = vsel %vm1089_vm14, %v1057_v49, %v1121_v43  ;;  %v1037_v5 = vadd.f32 %v1000_v36, %v813_v39  ;;  %v798_v37 = vmul.f32 %v766_v33, %v709_v46 }
 0x125   : > { %v1185_v51 = vmul.f32 1.4142135, %v1153_v50  ;;  %v1156_v52 = vsel %vm1092_vm15, %v1060_v44, %v1124_v18 }
 0x126   : > { %v1232_v30 = vpack.c.bf16 %v1200_v48, %v1200_v48  ;;  %v1188_v4 = vmul.f32 1.4142135, %v1156_v52  ;;  %v1073_v13 = vadd.f32 %v1835_v28, %v1037_v5  ;;  %v1022_v58 = vadd.f32 %v1863_v53, %v798_v37 }
 0x127   : > { %v1217_v57 = vpack.c.bf16 %v1185_v51, %v1185_v51  ;;  %v659_v59 = vpop.f32.mrf.mxu2 }
 0x128   : > { %1265 = vst.msk [vmem:[%s1851_s6 + $0x74] sm:$0xf] %vm1235_vm2, %v1232_v30  ;;  %v1220_v55 = vpack.c.bf16 %v1188_v4, %v1188_v4  ;;  %vm1105_vm0 = vcmp.ge.f32.partialorder %v1073_v13, 0.0  ;;  %v1137_v60 = vmul.f32 0.2, %v1073_v13  ;;  %v1058_v62 = vadd.f32 %v1835_v28, %v1022_v58 }
 0x129   : > { %1250 = vst.msk [vmem:[%s1851_s6 + $0x38] sm:$0xf] %vm1235_vm2, %v1217_v57  ;;  %v749_v0 = vadd.f32 %v748_v29, %v659_v59 }
 0x12a   : > { %1253 = vst.msk [vmem:[%s1851_s6 + $0x44] sm:$0xf] %vm1235_vm2, %v1220_v55  ;;  %v1169_v1 = vsel %vm1105_vm0, %v1073_v13, %v1137_v60  ;;  %vm1090_vm1 = vcmp.ge.f32.partialorder %v1058_v62, 0.0  ;;  %v1122_v53 = vmul.f32 0.2, %v1058_v62 }
 0x12b   : > { %v1201_v17 = vmul.f32 1.4142135, %v1169_v1  ;;  %v814_v12 = vmul.f32 %v782_v34, %v749_v0 }
 0x12c   : > { %v1154_v47 = vsel %vm1090_vm1, %v1058_v62, %v1122_v53 }
 0x12d   : > { %v1233_v32 = vpack.c.bf16 %v1201_v17, %v1201_v17  ;;  %v1186_v8 = vmul.f32 1.4142135, %v1154_v47  ;;  %v1038_v6 = vadd.f32 %v1005_v3, %v814_v12 }
 0x12f   : > { %1266 = vst.msk [vmem:[%s1851_s6 + $0x78] sm:$0xf] %vm1235_vm2, %v1233_v32  ;;  %v1218_v7 = vpack.c.bf16 %v1186_v8, %v1186_v8  ;;  %v1074_v9 = vadd.f32 %v1835_v28, %v1038_v6 }
 0x131   : > { %1251 = vst.msk [vmem:[%s1851_s6 + $0x3c] sm:$0xf] %vm1235_vm2, %v1218_v7  ;;  %vm1106_vm3 = vcmp.ge.f32.partialorder %v1074_v9, 0.0  ;;  %v1138_v10 = vmul.f32 0.2, %v1074_v9 }
 0x133   : > { %v1170_v11 = vsel %vm1106_vm3, %v1074_v9, %v1138_v10 }
 0x134   : > { %v1202_v40 = vmul.f32 1.4142135, %v1170_v11 }
 0x136   : > { %v1234_v15 = vpack.c.bf16 %v1202_v40, %v1202_v40 }
 0x138   : > { %1267 = vst.msk [vmem:[%s1851_s6 + $0x7c] sm:$0xf] %vm1235_vm2, %v1234_v15 }
 0x139 PF: > { %s15_s18 = sadd.s32 1, %s1614_s18  }
 0x13a   : > { %p12_p4 = scmp.ge.s32.totalorder %s15_s18, 4  }
 0x13c   :  { %14 = sbr.rel (!%p12_p4) target bundleno = 1 (0x1), region = 76 }

// kernel: _lambda_.27
= control target key start
LH: loop header
LB: loop body
LE: loop exit
PB: predicated region body
PF: predicated region fallthrough
CT: control target
= control target key end

     0   :  { %s810_s15 = smov 0   ;;  %s990_s0 = inlined_call_operand.vmem [shape: bf16[512,16], index: 0, kind: input, shape index: {}]   ;;  %s991_s1 = inlined_call_operand.vmem [shape: bf16[16,3], index: 1, kind: input, shape index: {}]   ;;  %s992_s2 = inlined_call_operand.vmem [shape: f32[1,3], index: 2, kind: input, shape index: {}]   ;;  %s993_s3 = inlined_call_operand.vmem [shape: f32[512,3], index: 3, kind: input, shape index: {}]   ;;  %s994_s4 = inlined_call_operand.vmem [shape: f32[512,3], index: 4, kind: output, shape index: {}]  }
   0x1 LB: > { %s651_s16 = sadd.s32 4294967295, %s783_s15   ;;  %p655_p0 = scmp.ge.s32.totalorder %s783_s15, 1  ;;  %s783_s15 = sphi %s810_s15, %s14_s15  }
   0x2   : > { %p174_p1 = scmp.lt.s32.totalorder %s783_s15, 3 }
   0x4   : > { %p175_p2 = pnand %p655_p0, %p174_p1 }
   0x5   : > { %s656_s19 = sshll.u32 (!%p175_p2), %s651_s16, 5 }
   0x6   : > { %178 = sbr.rel (%p175_p2) target bundleno = 211 (0xd3), region = 36  ;;  %p206_p3 = scmp.lt.s32.totalorder (!%p175_p2), %s656_s19, 63 }
   0xb   : > { %v764_v0 = vld [vmem:[%s991_s1] sm:$0xff]  ;;  %s996_s19 = smov (!%p206_p3, %s656_s19), 63  ;;  %vm348_vm0 = vcmask 130048   ;;  %vm550_vm1 = vcmask 23552  }
   0xc   : > { %404 = vmatpush.bf16.msra.mxu0 %v764_v0  ;;  %765 = vmatpush.bf16.msra.mxu1 %v764_v0  ;;  %s657_s20 = sshll.u32 %s996_s19, 2  ;;  %s659_s24 = sshll.u32 %s996_s19, 3  ;;  %v852_v17 = vld [vmem:[%s992_s2] ss:$0 sm:$0xff] }
   0xd   : > { %766 = vmatpush.bf16.msra.mxu2 %v764_v0  ;;  %767 = vmatpush.bf16.msra.mxu3 %v764_v0  ;;  %s209_s23 = scalar_lea.vmem %s990_s0, %s657_s20  ;;  %s847_s27 = scalar_lea.vmem %s993_s3, %s659_s24 }
   0xe   : > { %v748_v1 = vld [vmem:[%s209_s23] sm:$0xff]  ;;  %v749_v5 = vld [vmem:[%s209_s23 + $0x8] sm:$0xff]  ;;  %v750_v9 = vld [vmem:[%s209_s23 + $0x10] sm:$0xff]  ;;  %s861_s6 = scalar_lea.vmem %s994_s4, %s659_s24 }
   0xf   : > { %v752_v2 = vld [vmem:[%s209_s23 + $0x20] sm:$0xff]  ;;  %730 = vmatmul.msk.bf16.vlgmr.msra.gmra.mxu0 %vm348_vm0, %v748_v1  ;;  %v753_v6 = vld [vmem:[%s209_s23 + $0x28] sm:$0xff]  ;;  %v754_v10 = vld [vmem:[%s209_s23 + $0x30] sm:$0xff] }
  0x10   : > { %v756_v3 = vld [vmem:[%s209_s23 + $0x40] sm:$0xff]  ;;  %734 = vmatmul.msk.bf16.vlgmr.msra.gmra.mxu1 %vm348_vm0, %v752_v2  ;;  %v757_v7 = vld [vmem:[%s209_s23 + $0x48] sm:$0xff]  ;;  %v758_v11 = vld [vmem:[%s209_s23 + $0x50] sm:$0xff] }
  0x11   : > { %v760_v4 = vld [vmem:[%s209_s23 + $0x60] sm:$0xff]  ;;  %738 = vmatmul.msk.bf16.vlgmr.msra.gmra.mxu2 %vm348_vm0, %v756_v3  ;;  %v761_v8 = vld [vmem:[%s209_s23 + $0x68] sm:$0xff]  ;;  %v762_v12 = vld [vmem:[%s209_s23 + $0x70] sm:$0xff] }
  0x12   : > { %742 = vmatmul.msk.bf16.vlgmr.msra.gmra.mxu3 %vm348_vm0, %v760_v4  ;;  %v751_v13 = vld [vmem:[%s209_s23 + $0x18] sm:$0xff]  ;;  %v486_v19 = vld [vmem:[%s847_s27] sm:$0xff]  ;;  %v487_v33 = vld [vmem:[%s847_s27 + $0x8] sm:$0xff] }
  0x13   : > { %v755_v14 = vld [vmem:[%s209_s23 + $0x38] sm:$0xff]  ;;  %v494_v21 = vld [vmem:[%s847_s27 + $0x40] sm:$0xff]  ;;  %v495_v35 = vld [vmem:[%s847_s27 + $0x48] sm:$0xff] }
  0x14   : > { %v759_v15 = vld [vmem:[%s209_s23 + $0x58] sm:$0xff]  ;;  %v502_v27 = vld [vmem:[%s847_s27 + $0x80] sm:$0xff]  ;;  %v503_v43 = vld [vmem:[%s847_s27 + $0x88] sm:$0xff] }
  0x15   : > { %v763_v16 = vld [vmem:[%s209_s23 + $0x78] sm:$0xff]  ;;  %v510_v29 = vld [vmem:[%s847_s27 + $0xc0] sm:$0xff]  ;;  %v511_v45 = vld [vmem:[%s847_s27 + $0xc8] sm:$0xff] }
  0x16   : > { %v488_v49 = vld [vmem:[%s847_s27 + $0x10] sm:$0xff]  ;;  %v489_v1 = vld [vmem:[%s847_s27 + $0x18] sm:$0xff] }
  0x17   : > { %v496_v51 = vld [vmem:[%s847_s27 + $0x50] sm:$0xff]  ;;  %v497_v3 = vld [vmem:[%s847_s27 + $0x58] sm:$0xff] }
  0x18   : > { %v504_v59 = vld [vmem:[%s847_s27 + $0x90] sm:$0xff] }
  0x19   : > { %v512_v61 = vld [vmem:[%s847_s27 + $0xd0] sm:$0xff] }
  0x1f   : > { %731 = vmatmul.msk.bf16.gmra.mxu0 %vm348_vm0, %v749_v5 }
  0x20   : > { %735 = vmatmul.msk.bf16.gmra.mxu1 %vm348_vm0, %v753_v6 }
  0x21   : > { %739 = vmatmul.msk.bf16.gmra.mxu2 %vm348_vm0, %v757_v7 }
  0x22   : > { %743 = vmatmul.msk.bf16.gmra.mxu3 %vm348_vm0, %v761_v8 }
  0x2f   : > { %732 = vmatmul.msk.bf16.gmra.mxu0 %vm348_vm0, %v750_v9 }
  0x30   : > { %736 = vmatmul.msk.bf16.gmra.mxu1 %vm348_vm0, %v754_v10 }
  0x31   : > { %740 = vmatmul.msk.bf16.gmra.mxu2 %vm348_vm0, %v758_v11  ;;  %v505_v11 = vld [vmem:[%s847_s27 + $0x98] sm:$0xff] }
  0x32   : > { %744 = vmatmul.msk.bf16.gmra.mxu3 %vm348_vm0, %v762_v12 }
  0x3f   : > { %733 = vmatmul.msk.bf16.gmra.mxu0 %vm348_vm0, %v751_v13  ;;  %v513_v13 = vld [vmem:[%s847_s27 + $0xd8] sm:$0xff] }
  0x40   : > { %737 = vmatmul.msk.bf16.gmra.mxu1 %vm348_vm0, %v755_v14 }
  0x41   : > { %741 = vmatmul.msk.bf16.gmra.mxu2 %vm348_vm0, %v759_v15 }
  0x42   : > { %745 = vmatmul.msk.bf16.gmra.mxu3 %vm348_vm0, %v763_v16 }
  0x8c   : > { %v406_v18 = vpop.f32.mrf.mxu0 }
  0x8d   : > { %v426_v20 = vpop.f32.mrf.mxu1  ;;  %v407_v22 = vadd.f32 %v852_v17, %v406_v18  ;;  %v490_v18 = vld [vmem:[%s847_s27 + $0x20] sm:$0xff] }
  0x8e   : > { %v427_v23 = vadd.f32 %v852_v17, %v426_v20  ;;  %v498_v20 = vld [vmem:[%s847_s27 + $0x60] sm:$0xff] }
  0x8f   : > { %v518_v24 = vadd.f32 %v486_v19, %v407_v22 }
  0x90   : > { %v526_v25 = vadd.f32 %v494_v21, %v427_v23 }
  0x91   : > { %551 = vst.msk [vmem:[%s861_s6] sm:$0xff] %vm550_vm1, %v518_v24 }
  0x92   : > { %559 = vst.msk [vmem:[%s861_s6 + $0x40] sm:$0xff] %vm550_vm1, %v526_v25 }
  0x94   : > { %v446_v26 = vpop.f32.mrf.mxu2  ;;  %v408_v32 = vpop.f32.mrf.mxu0 }
  0x95   : > { %v466_v28 = vpop.f32.mrf.mxu3  ;;  %v447_v30 = vadd.f32 %v852_v17, %v446_v26  ;;  %v428_v34 = vpop.f32.mrf.mxu1  ;;  %v409_v36 = vadd.f32 %v852_v17, %v408_v32 }
  0x96   : > { %v467_v31 = vadd.f32 %v852_v17, %v466_v28  ;;  %v429_v37 = vadd.f32 %v852_v17, %v428_v34  ;;  %v506_v28 = vld [vmem:[%s847_s27 + $0xa0] sm:$0xff]  ;;  %v491_v34 = vld [vmem:[%s847_s27 + $0x28] sm:$0xff] }
  0x97   : > { %v534_v38 = vadd.f32 %v502_v27, %v447_v30  ;;  %v519_v40 = vadd.f32 %v487_v33, %v409_v36  ;;  %v514_v30 = vld [vmem:[%s847_s27 + $0xe0] sm:$0xff]  ;;  %v499_v36 = vld [vmem:[%s847_s27 + $0x68] sm:$0xff] }
  0x98   : > { %v542_v39 = vadd.f32 %v510_v29, %v467_v31  ;;  %v527_v41 = vadd.f32 %v495_v35, %v429_v37 }
  0x99   : > { %567 = vst.msk [vmem:[%s861_s6 + $0x80] sm:$0xff] %vm550_vm1, %v534_v38 }
  0x9a   : > { %575 = vst.msk [vmem:[%s861_s6 + $0xc0] sm:$0xff] %vm550_vm1, %v542_v39 }
  0x9b   : > { %552 = vst.msk [vmem:[%s861_s6 + $0x8] sm:$0xff] %vm550_vm1, %v519_v40 }
  0x9c   : > { %560 = vst.msk [vmem:[%s861_s6 + $0x48] sm:$0xff] %vm550_vm1, %v527_v41  ;;  %v448_v42 = vpop.f32.mrf.mxu2  ;;  %v411_v48 = vpop.f32.mrf.mxu0 }
  0x9d   : > { %v468_v44 = vpop.f32.mrf.mxu3  ;;  %v449_v46 = vadd.f32 %v852_v17, %v448_v42  ;;  %v431_v50 = vpop.f32.mrf.mxu1  ;;  %v412_v52 = vadd.f32 %v852_v17, %v411_v48 }
  0x9e   : > { %v469_v47 = vadd.f32 %v852_v17, %v468_v44  ;;  %v432_v53 = vadd.f32 %v852_v17, %v431_v50  ;;  %v507_v44 = vld [vmem:[%s847_s27 + $0xa8] sm:$0xff]  ;;  %v492_v50 = vld [vmem:[%s847_s27 + $0x30] sm:$0xff] }
  0x9f   : > { %v535_v54 = vadd.f32 %v503_v43, %v449_v46  ;;  %v520_v56 = vadd.f32 %v488_v49, %v412_v52  ;;  %v515_v46 = vld [vmem:[%s847_s27 + $0xe8] sm:$0xff]  ;;  %v500_v52 = vld [vmem:[%s847_s27 + $0x70] sm:$0xff] }
  0xa0   : > { %v543_v55 = vadd.f32 %v511_v45, %v469_v47  ;;  %v528_v57 = vadd.f32 %v496_v51, %v432_v53 }
  0xa1   : > { %568 = vst.msk [vmem:[%s861_s6 + $0x88] sm:$0xff] %vm550_vm1, %v535_v54 }
  0xa2   : > { %576 = vst.msk [vmem:[%s861_s6 + $0xc8] sm:$0xff] %vm550_vm1, %v543_v55 }
  0xa3   : > { %553 = vst.msk [vmem:[%s861_s6 + $0x10] sm:$0xff] %vm550_vm1, %v520_v56 }
  0xa4   : > { %561 = vst.msk [vmem:[%s861_s6 + $0x50] sm:$0xff] %vm550_vm1, %v528_v57  ;;  %v451_v58 = vpop.f32.mrf.mxu2  ;;  %v413_v0 = vpop.f32.mrf.mxu0 }
  0xa5   : > { %v471_v60 = vpop.f32.mrf.mxu3  ;;  %v452_v62 = vadd.f32 %v852_v17, %v451_v58  ;;  %v433_v2 = vpop.f32.mrf.mxu1  ;;  %v414_v4 = vadd.f32 %v852_v17, %v413_v0 }
  0xa6   : > { %v472_v63 = vadd.f32 %v852_v17, %v471_v60  ;;  %v434_v5 = vadd.f32 %v852_v17, %v433_v2  ;;  %v508_v60 = vld [vmem:[%s847_s27 + $0xb0] sm:$0xff]  ;;  %v493_v2 = vld [vmem:[%s847_s27 + $0x38] sm:$0xff] }
  0xa7   : > { %v536_v6 = vadd.f32 %v504_v59, %v452_v62  ;;  %v521_v8 = vadd.f32 %v489_v1, %v414_v4  ;;  %v516_v62 = vld [vmem:[%s847_s27 + $0xf0] sm:$0xff]  ;;  %v501_v4 = vld [vmem:[%s847_s27 + $0x78] sm:$0xff] }
  0xa8   : > { %v544_v7 = vadd.f32 %v512_v61, %v472_v63  ;;  %v529_v9 = vadd.f32 %v497_v3, %v434_v5 }
  0xa9   : > { %569 = vst.msk [vmem:[%s861_s6 + $0x90] sm:$0xff] %vm550_vm1, %v536_v6 }
  0xaa   : > { %577 = vst.msk [vmem:[%s861_s6 + $0xd0] sm:$0xff] %vm550_vm1, %v544_v7 }
  0xab   : > { %554 = vst.msk [vmem:[%s861_s6 + $0x18] sm:$0xff] %vm550_vm1, %v521_v8 }
  0xac   : > { %562 = vst.msk [vmem:[%s861_s6 + $0x58] sm:$0xff] %vm550_vm1, %v529_v9  ;;  %v453_v10 = vpop.f32.mrf.mxu2  ;;  %v416_v16 = vpop.f32.mrf.mxu0 }
  0xad   : > { %v473_v12 = vpop.f32.mrf.mxu3  ;;  %v454_v14 = vadd.f32 %v852_v17, %v453_v10  ;;  %v436_v19 = vpop.f32.mrf.mxu1  ;;  %v417_v21 = vadd.f32 %v852_v17, %v416_v16 }
  0xae   : > { %v474_v15 = vadd.f32 %v852_v17, %v473_v12  ;;  %v437_v22 = vadd.f32 %v852_v17, %v436_v19  ;;  %v509_v12 = vld [vmem:[%s847_s27 + $0xb8] sm:$0xff] }
  0xaf   : > { %v537_v23 = vadd.f32 %v505_v11, %v454_v14  ;;  %v522_v25 = vadd.f32 %v490_v18, %v417_v21  ;;  %v517_v14 = vld [vmem:[%s847_s27 + $0xf8] sm:$0xff] }
  0xb0   : > { %v545_v24 = vadd.f32 %v513_v13, %v474_v15  ;;  %v530_v26 = vadd.f32 %v498_v20, %v437_v22 }
  0xb1   : > { %570 = vst.msk [vmem:[%s861_s6 + $0x98] sm:$0xff] %vm550_vm1, %v537_v23 }
  0xb2   : > { %578 = vst.msk [vmem:[%s861_s6 + $0xd8] sm:$0xff] %vm550_vm1, %v545_v24 }
  0xb3   : > { %555 = vst.msk [vmem:[%s861_s6 + $0x20] sm:$0xff] %vm550_vm1, %v522_v25 }
  0xb4   : > { %563 = vst.msk [vmem:[%s861_s6 + $0x60] sm:$0xff] %vm550_vm1, %v530_v26  ;;  %v456_v27 = vpop.f32.mrf.mxu2  ;;  %v418_v33 = vpop.f32.mrf.mxu0 }
  0xb5   : > { %v476_v29 = vpop.f32.mrf.mxu3  ;;  %v457_v31 = vadd.f32 %v852_v17, %v456_v27  ;;  %v438_v35 = vpop.f32.mrf.mxu1  ;;  %v419_v37 = vadd.f32 %v852_v17, %v418_v33 }
  0xb6   : > { %v477_v32 = vadd.f32 %v852_v17, %v476_v29  ;;  %v439_v38 = vadd.f32 %v852_v17, %v438_v35 }
  0xb7   : > { %v538_v39 = vadd.f32 %v506_v28, %v457_v31  ;;  %v523_v41 = vadd.f32 %v491_v34, %v419_v37 }
  0xb8   : > { %v546_v40 = vadd.f32 %v514_v30, %v477_v32  ;;  %v531_v42 = vadd.f32 %v499_v36, %v439_v38 }
  0xb9   : > { %571 = vst.msk [vmem:[%s861_s6 + $0xa0] sm:$0xff] %vm550_vm1, %v538_v39 }
  0xba   : > { %579 = vst.msk [vmem:[%s861_s6 + $0xe0] sm:$0xff] %vm550_vm1, %v546_v40 }
  0xbb   : > { %556 = vst.msk [vmem:[%s861_s6 + $0x28] sm:$0xff] %vm550_vm1, %v523_v41 }
  0xbc   : > { %564 = vst.msk [vmem:[%s861_s6 + $0x68] sm:$0xff] %vm550_vm1, %v531_v42  ;;  %v458_v43 = vpop.f32.mrf.mxu2  ;;  %v421_v49 = vpop.f32.mrf.mxu0 }
  0xbd   : > { %v478_v45 = vpop.f32.mrf.mxu3  ;;  %v459_v47 = vadd.f32 %v852_v17, %v458_v43  ;;  %v441_v51 = vpop.f32.mrf.mxu1  ;;  %v422_v53 = vadd.f32 %v852_v17, %v421_v49 }
  0xbe   : > { %v479_v48 = vadd.f32 %v852_v17, %v478_v45  ;;  %v442_v54 = vadd.f32 %v852_v17, %v441_v51 }
  0xbf   : > { %v539_v55 = vadd.f32 %v507_v44, %v459_v47  ;;  %v524_v57 = vadd.f32 %v492_v50, %v422_v53 }
  0xc0   : > { %v547_v56 = vadd.f32 %v515_v46, %v479_v48  ;;  %v532_v58 = vadd.f32 %v500_v52, %v442_v54 }
  0xc1   : > { %572 = vst.msk [vmem:[%s861_s6 + $0xa8] sm:$0xff] %vm550_vm1, %v539_v55 }
  0xc2   : > { %580 = vst.msk [vmem:[%s861_s6 + $0xe8] sm:$0xff] %vm550_vm1, %v547_v56 }
  0xc3   : > { %557 = vst.msk [vmem:[%s861_s6 + $0x30] sm:$0xff] %vm550_vm1, %v524_v57 }
  0xc4   : > { %565 = vst.msk [vmem:[%s861_s6 + $0x70] sm:$0xff] %vm550_vm1, %v532_v58  ;;  %v461_v59 = vpop.f32.mrf.mxu2  ;;  %v423_v1 = vpop.f32.mrf.mxu0 }
  0xc5   : > { %v481_v61 = vpop.f32.mrf.mxu3  ;;  %v462_v63 = vadd.f32 %v852_v17, %v461_v59  ;;  %v443_v3 = vpop.f32.mrf.mxu1  ;;  %v424_v5 = vadd.f32 %v852_v17, %v423_v1 }
  0xc6   : > { %v482_v0 = vadd.f32 %v852_v17, %v481_v61  ;;  %v444_v6 = vadd.f32 %v852_v17, %v443_v3 }
  0xc7   : > { %v540_v7 = vadd.f32 %v508_v60, %v462_v63  ;;  %v525_v9 = vadd.f32 %v493_v2, %v424_v5 }
  0xc8   : > { %v548_v8 = vadd.f32 %v516_v62, %v482_v0  ;;  %v533_v10 = vadd.f32 %v501_v4, %v444_v6 }
  0xc9   : > { %573 = vst.msk [vmem:[%s861_s6 + $0xb0] sm:$0xff] %vm550_vm1, %v540_v7 }
  0xca   : > { %581 = vst.msk [vmem:[%s861_s6 + $0xf0] sm:$0xff] %vm550_vm1, %v548_v8 }
  0xcb   : > { %558 = vst.msk [vmem:[%s861_s6 + $0x38] sm:$0xff] %vm550_vm1, %v525_v9 }
  0xcc   : > { %566 = vst.msk [vmem:[%s861_s6 + $0x78] sm:$0xff] %vm550_vm1, %v533_v10  ;;  %v463_v11 = vpop.f32.mrf.mxu2 }
  0xcd   : > { %v483_v13 = vpop.f32.mrf.mxu3  ;;  %v464_v15 = vadd.f32 %v852_v17, %v463_v11 }
  0xce   : > { %v484_v16 = vadd.f32 %v852_v17, %v483_v13 }
  0xcf   : > { %v541_v18 = vadd.f32 %v509_v12, %v464_v15 }
  0xd0   : > { %v549_v19 = vadd.f32 %v517_v14, %v484_v16 }
  0xd1   : > { %574 = vst.msk [vmem:[%s861_s6 + $0xb8] sm:$0xff] %vm550_vm1, %v541_v18 }
  0xd2   : > { %582 = vst.msk [vmem:[%s861_s6 + $0xf8] sm:$0xff] %vm550_vm1, %v549_v19 }
  0xd3 PF: > { %s14_s15 = sadd.s32 1, %s783_s15  }
  0xd4   : > { %p11_p4 = scmp.ge.s32.totalorder %s14_s15, 4  }
  0xd6   :  { %13 = sbr.rel (!%p11_p4) target bundleno = 1 (0x1), region = 69 }

</bundles_post_ra>
